<compile_context>
chip_gen: v6e
topology: v6e:2x2x1
jax: 0.10.0
libtpu: 0.0.40
codegen_flags: <defaults>
</compile_context>

<pallas_src>
import numpy as np

import jax
import jax.numpy as jnp
from jax.experimental import pallas as pl
from jax.experimental.pallas import tpu as pltpu


def _full_spec(arr):
    """BlockSpec covering the full array (no grid)."""
    nd = arr.ndim
    return pl.BlockSpec(arr.shape, lambda *_: (0,) * nd)


# ---------------------------------------------------------------------------
# Fully fused forward kernel.
# ---------------------------------------------------------------------------
def fused_forward_kernel(x_ref, w1f_ref, c1b_ref, w2f_ref, c2b_ref,
                         s_ref, wih1_8_ref, bias8_ref, wbd_ref,
                         fc1b_ref, fc2a_ref, fc2b_ref, fc2bias_ref,
                         wfc1_hbm_ref,
                         o_ref,
                         pool_scr, wfc1_vmem, fc1_sem):
    f32 = jnp.float32
    bf16 = jnp.bfloat16

    B, L, _ = x_ref.shape          # batch, input length, in-channels (static)
    H = wbd_ref.shape[0] // 2      # LSTM hidden = 32
    BT = s_ref.shape[0]            # B * T
    T = BT // B                    # LSTM steps = seq_len // 4
    P1 = L // 2                    # pooled length after layer 1
    Lc1 = P1 * 2                   # conv-1 positions actually consumed by pool1

    # Kick off the fc1-weight DMA immediately; it overlaps the whole conv/LSTM
    # path and is waited on only right before the fc1 matmul.
    fc1_copy = pltpu.make_async_copy(wfc1_hbm_ref, wfc1_vmem, fc1_sem)
    fc1_copy.start()

    def conv_taps(x_lc, npos):
        # x_lc: (len, C) bf16, position-major.  Tap stack for positions
        # 0..npos-1 with zero padding=1, columns ordered [k=0 | k=1 | k=2].
        c = x_lc.shape[1]
        zrow = jnp.zeros((1, c), bf16)
        up = jnp.concatenate([zrow, x_lc[:npos - 1, :]], axis=0)     # x[p-1]
        mid = x_lc[:npos, :]                                          # x[p]
        if npos + 1 <= x_lc.shape[0]:
            down = x_lc[1:npos + 1, :]                                # x[p+1]
        else:
            down = jnp.concatenate([x_lc[1:npos, :], zrow], axis=0)
        return jnp.concatenate([up, mid, down], axis=1)              # (npos, 3C)

    def relu_pool(acc, rows):
        # acc: (rows, 64) f32 conv output (rows even, per-sample contiguous).
        # ReLU then MaxPool1d(2,2) via scratch + stride-2 sublane reads.
        acc = jnp.maximum(acc, 0.0)
        pool_scr[pl.ds(0, rows), :] = acc
        half = rows // 2
        return jnp.maximum(pool_scr[pl.ds(0, half, 2), :],
                           pool_scr[pl.ds(1, half, 2), :])           # (rows//2, 64)

    # ---- conv1 + pool1 (batch-stacked single matmul) ------------------------
    taps1 = jnp.concatenate([conv_taps(x_ref[b], Lc1) for b in range(B)], axis=0)
    acc1 = jnp.dot(taps1, w1f_ref[...], preferred_element_type=f32) + c1b_ref[...]
    pooled1 = relu_pool(acc1, B * Lc1)                               # (B*P1, 64) f32

    # ---- conv2 + pool2 (batch-stacked single matmul) ------------------------
    p1b = pooled1.astype(bf16)
    taps2 = jnp.concatenate(
        [conv_taps(p1b[b * P1:(b + 1) * P1, :], P1) for b in range(B)], axis=0)
    acc2 = jnp.dot(taps2, w2f_ref[...], preferred_element_type=f32) + c2b_ref[...]
    pooled2 = relu_pool(acc2, B * P1)                # (B*T, 64) f32, sample-major

    # ---- one-shot relayout to time-major via a 0/1 permutation matmul -------
    # x_tm row t*B + b  ==  pooled2 row b*T + t
    x_tm = jnp.dot(s_ref[...], pooled2.astype(bf16), preferred_element_type=f32)
    x_tm_b = x_tm.astype(bf16)                                       # (B*T, 64)

    # ---- LSTM layer-1 input projection for ALL steps (8H-wide fused layout) -
    # columns: [i1 f1 o1 | i2 f2 o2 | g1 | g2]; layer-2 cols carry only b2.
    proj8 = (jnp.dot(x_tm_b, wih1_8_ref[...], preferred_element_type=f32)
             + bias8_ref[...])                                       # (B*T, 8H)

    # ---- fc1 flatten: (B, T*64) with column index t*64 + c ------------------
    x_flat = jnp.concatenate([x_tm_b[t * B:(t + 1) * B, :] for t in range(T)],
                             axis=1)                                 # (B, T*64) bf16

    # ---- wavefront-skewed 2-layer LSTM (gate order i,f,o,g per layer) -------
    wbd = wbd_ref[...]                                               # (2H, 8H) bf16
    bias8 = bias8_ref[...]                                           # (1, 8H)  f32
    # prologue: layer-1 cell at t = 0 (h1_{-1} = c1_{-1} = 0)
    pre0 = proj8[0:B, :]
    sig0 = jax.nn.sigmoid(pre0[:, 0:3 * H])
    c1 = sig0[:, 0:H] * jnp.tanh(pre0[:, 6 * H:7 * H])
    h1 = sig0[:, 2 * H:3 * H] * jnp.tanh(c1)
    h2 = jnp.zeros((B, H), f32)
    c2 = jnp.zeros((B, H), f32)
    # fused steps: iteration t emits (h2_t, c2_t) and (h1_{t+1}, c1_{t+1})
    for t in range(T):
        addend = proj8[(t + 1) * B:(t + 2) * B, :] if t < T - 1 else bias8
        pre = jnp.dot(jnp.concatenate([h1, h2], axis=1).astype(bf16), wbd,
                      preferred_element_type=f32) + addend           # (B, 8H)
        sig = jax.nn.sigmoid(pre[:, 0:6 * H])     # one EUP pass over both cells
        th = jnp.tanh(pre[:, 6 * H:8 * H])
        # layer-2 cell, step t
        c2 = sig[:, 4 * H:5 * H] * c2 + sig[:, 3 * H:4 * H] * th[:, H:2 * H]
        h2 = sig[:, 5 * H:6 * H] * jnp.tanh(c2)
        if t < T - 1:
            # layer-1 cell, step t+1
            c1 = sig[:, H:2 * H] * c1 + sig[:, 0:H] * th[:, 0:H]
            h1 = sig[:, 2 * H:3 * H] * jnp.tanh(c1)
    # h2 == rnn_out[:, -1, :]

    # ---- fc1 (single matmul; weight DMA has long since landed) --------------
    fc1_copy.wait()
    cnn = jnp.maximum(
        jnp.dot(x_flat, wfc1_vmem[...], preferred_element_type=f32) + fc1b_ref[...],
        0.0)                                                         # (B, 128)

    # ---- fc2 on [cnn | rnn] without materializing the concat ----------------
    o_ref[...] = (jnp.dot(cnn.astype(bf16), fc2a_ref[...], preferred_element_type=f32)
                  + jnp.dot(h2.astype(bf16), fc2b_ref[...], preferred_element_type=f32)
                  + fc2bias_ref[...])


# ---------------------------------------------------------------------------
# Parameters (deterministic synthetic init, PyTorch-like uniform bounds).
# Raw params use exact PyTorch layouts; prepare_params() does every transpose,
# gate permutation, tap folding, wavefront fusion and bf16 cast ONCE.
# ---------------------------------------------------------------------------
def init_params(key, num_classes, seq_len=129):
    H = 32

    def u(k, shape, fan_in):
        bound = float(fan_in) ** -0.5
        return jax.random.uniform(k, shape, jnp.float32, -bound, bound)

    ks = jax.random.split(key, 16)
    return {
        "conv1_w": u(ks[0], (64, 8, 3), 8 * 3),
        "conv1_b": u(ks[1], (64,), 8 * 3),
        "conv2_w": u(ks[2], (64, 64, 3), 64 * 3),
        "conv2_b": u(ks[3], (64,), 64 * 3),
        "fc1_w": u(ks[4], (128, 64 * (seq_len // 4)), 64 * (seq_len // 4)),
        "fc1_b": u(ks[5], (128,), 64 * (seq_len // 4)),
        "w_ih_l0": u(ks[6], (4 * H, 64), H),
        "w_hh_l0": u(ks[7], (4 * H, H), H),
        "b_ih_l0": u(ks[8], (4 * H,), H),
        "b_hh_l0": u(ks[9], (4 * H,), H),
        "w_ih_l1": u(ks[10], (4 * H, H), H),
        "w_hh_l1": u(ks[11], (4 * H, H), H),
        "b_ih_l1": u(ks[12], (4 * H,), H),
        "b_hh_l1": u(ks[13], (4 * H,), H),
        "fc2_w": u(ks[14], (num_classes, 128 + H), 128 + H),
        "fc2_b": u(ks[15], (num_classes,), 128 + H),
    }


def prepare_params(p, seq_len=129):
    """One-time weight re-layout so the steady-state forward has zero glue ops."""
    H = 32
    T = seq_len // 4
    bf16 = jnp.bfloat16
    # torch gate order (i, f, g, o) -> kernel order (i, f, o, g)
    gate_perm = np.concatenate([np.arange(0, 2 * H),
                                np.arange(3 * H, 4 * H),
                                np.arange(2 * H, 3 * H)])

    def perm_w(w):                       # (4H, in) torch -> (in, 4H) permuted
        return w.T[:, gate_perm]

    wih1_p = perm_w(p["w_ih_l0"])        # (64, 4H)
    whh1_p = perm_w(p["w_hh_l0"])        # (H, 4H)
    wih2_p = perm_w(p["w_ih_l1"])        # (H, 4H)
    whh2_p = perm_w(p["w_hh_l1"])        # (H, 4H)
    b1_p = (p["b_ih_l0"] + p["b_hh_l0"])[gate_perm].reshape(1, 4 * H)
    b2_p = (p["b_ih_l1"] + p["b_hh_l1"])[gate_perm].reshape(1, 4 * H)

    def fuse_cols(l1, l2):
        # 8H-wide fused gate layout: [i1 f1 o1 | i2 f2 o2 | g1 | g2]
        return jnp.concatenate([l1[:, :3 * H], l2[:, :3 * H],
                                l1[:, 3 * H:], l2[:, 3 * H:]], axis=1)

    zH = jnp.zeros((H, 4 * H), jnp.float32)
    # layer-1 input projection weight, scattered into the 8H layout
    wih1_8 = fuse_cols(wih1_p, jnp.zeros((64, 4 * H), jnp.float32))
    # fused biases: layer-1 cols get b1, layer-2 cols get b2
    bias8 = fuse_cols(b1_p, b2_p)
    # wavefront block weight: rows = [h1 ; h2], layer-1 cols = [whh1; 0],
    # layer-2 cols = [wih2; whh2]
    wbd = fuse_cols(jnp.concatenate([whh1_p, zH], axis=0),
                    jnp.concatenate([wih2_p, whh2_p], axis=0))

    return {
        # conv taps folded into one matmul: wflat[k*C_in + cin, o] = w[o, cin, k]
        "w1f": p["conv1_w"].transpose(2, 1, 0).reshape(3 * 8, 64).astype(bf16),
        "c1b": p["conv1_b"].reshape(1, 64),
        "w2f": p["conv2_w"].transpose(2, 1, 0).reshape(3 * 64, 64).astype(bf16),
        "c2b": p["conv2_b"].reshape(1, 64),
        # fc1 weight with row index t*64 + c  (matches the time-major flatten);
        # torch column index is c*T + t
        "wfc1_flat": p["fc1_w"].reshape(128, 64, T).transpose(2, 1, 0)
                                .reshape(T * 64, 128).astype(bf16),
        "fc1_b": p["fc1_b"].reshape(1, 128),
        "wih1_8": wih1_8.astype(bf16),
        "bias8": bias8,
        "wbd": wbd.astype(bf16),
        "fc2a_t": p["fc2_w"][:, :128].T.astype(bf16),   # (128, nc)
        "fc2b_t": p["fc2_w"][:, 128:].T.astype(bf16),   # (H, nc)
        "fc2_b": p["fc2_b"].reshape(1, -1),
    }


# ---------------------------------------------------------------------------
# Forward pass: a single fused pallas_call (no grid).
# ---------------------------------------------------------------------------
def forward(prepped, x):
    # x: (B, 8, seq_len) float32, NCL layout (same as PyTorch Conv1d).
    B, _, L = x.shape
    P1 = L // 2
    assert P1 % 2 == 0, "layer-2 pooled length must be even for the stacked pool"
    T = P1 // 2
    Lc1 = P1 * 2
    nc = prepped["fc2_b"].shape[1]

    x_pm = jnp.transpose(x, (0, 2, 1)).astype(jnp.bfloat16)   # (B, L, 8)

    # 0/1 permutation matrix: time-major row t*B + b <- sample-major row b*T + t
    r = np.arange(B * T)
    s_np = np.zeros((B * T, B * T), np.float32)
    s_np[r, (r % B) * T + (r // B)] = 1.0
    s_mat = jnp.asarray(s_np, jnp.bfloat16)

    args = (x_pm,
            prepped["w1f"], prepped["c1b"], prepped["w2f"], prepped["c2b"],
            s_mat, prepped["wih1_8"], prepped["bias8"], prepped["wbd"],
            prepped["fc1_b"], prepped["fc2a_t"], prepped["fc2b_t"],
            prepped["fc2_b"],
            prepped["wfc1_flat"])
    in_specs = ([_full_spec(a) for a in args[:-1]]
                + [pl.BlockSpec(memory_space=pl.ANY)])        # fc1 weight: manual DMA

    return pl.pallas_call(
        fused_forward_kernel,
        out_shape=jax.ShapeDtypeStruct((B, nc), jnp.float32),
        in_specs=in_specs,
        out_specs=pl.BlockSpec((B, nc), lambda *_: (0, 0)),
        scratch_shapes=[pltpu.VMEM((B * Lc1, 64), jnp.float32),     # max-pool staging
                        pltpu.VMEM((64 * T, 128), jnp.bfloat16),    # fc1 weight buffer
                        pltpu.SemaphoreType.DMA],                   # fc1 weight DMA sem
    )(*args)


if __name__ == "__main__":
    num_classes = 10
    seq_len = 129
    batch = 2

    key = jax.random.PRNGKey(0)
    pkey, xkey = jax.random.split(key)
    raw = init_params(pkey, num_classes, seq_len)
    params = prepare_params(raw, seq_len)           # one-time re-layout
    x = jax.random.normal(xkey, (batch, 8, seq_len), jnp.float32)

    out = jax.jit(forward)(params, x)
    out = jax.block_until_ready(out)
    assert out.shape == (batch, num_classes), out.shape
    assert out.dtype == jnp.float32
    print("KERNEL_OK")
</pallas_src>

<mosaic_0001>
module attributes {stable_mosaic.version = 11 : i64} {
  func.func @fused_forward_kernel(%arg0: memref<2x129x8xbf16, #tpu.memory_space<vmem>>, %arg1: memref<24x64xbf16, #tpu.memory_space<vmem>>, %arg2: memref<1x64xf32, #tpu.memory_space<vmem>>, %arg3: memref<192x64xbf16, #tpu.memory_space<vmem>>, %arg4: memref<1x64xf32, #tpu.memory_space<vmem>>, %arg5: memref<64x64xbf16, #tpu.memory_space<vmem>>, %arg6: memref<64x256xbf16, #tpu.memory_space<vmem>>, %arg7: memref<1x256xf32, #tpu.memory_space<vmem>>, %arg8: memref<64x256xbf16, #tpu.memory_space<vmem>>, %arg9: memref<1x128xf32, #tpu.memory_space<vmem>>, %arg10: memref<128x10xbf16, #tpu.memory_space<vmem>>, %arg11: memref<32x10xbf16, #tpu.memory_space<vmem>>, %arg12: memref<1x10xf32, #tpu.memory_space<vmem>>, %arg13: memref<2048x128xbf16, #tpu.memory_space<any>>, %arg14: memref<2x10xf32, #tpu.memory_space<vmem>>, %arg15: memref<256x64xf32, #tpu.memory_space<vmem>>, %arg16: memref<2048x128xbf16, #tpu.memory_space<vmem>>, %arg17: memref<!tpu.dma_semaphore, #tpu.memory_space<semaphore_mem>>) attributes {dimension_semantics = [], scalar_prefetch = 0 : i64, scratch_operands = 3 : i64, tpu.core_type = #tpu.core_type<tc>} {
    tpu.enqueue_dma source(%arg13 : memref<2048x128xbf16, #tpu.memory_space<any>>) target(%arg16 : memref<2048x128xbf16, #tpu.memory_space<vmem>>) target_semaphore(%arg17 : memref<!tpu.dma_semaphore, #tpu.memory_space<semaphore_mem>>)
    %c0 = arith.constant 0 : index
    %c0_0 = arith.constant 0 : index
    %c0_1 = arith.constant 0 : index
    %0 = vector.load %arg0[%c0, %c0_0, %c0_1] : memref<2x129x8xbf16, #tpu.memory_space<vmem>>, vector<1x129x8xbf16>
    %1 = vector.shape_cast %0 : vector<1x129x8xbf16> to vector<129x8xbf16>
    %cst = arith.constant 0.000000e+00 : bf16
    %2 = vector.broadcast %cst : bf16 to vector<1x8xbf16>
    %3 = vector.extract_strided_slice %1 {offsets = [0, 0], sizes = [127, 8], strides = [1, 1]} : vector<129x8xbf16> to vector<127x8xbf16>
    %4 = tpu.concatenate %2, %3 in 0 : vector<1x8xbf16>, vector<127x8xbf16> -> vector<128x8xbf16>
    %5 = vector.extract_strided_slice %1 {offsets = [0, 0], sizes = [128, 8], strides = [1, 1]} : vector<129x8xbf16> to vector<128x8xbf16>
    %6 = vector.extract_strided_slice %1 {offsets = [1, 0], sizes = [128, 8], strides = [1, 1]} : vector<129x8xbf16> to vector<128x8xbf16>
    %7 = tpu.concatenate %4, %5, %6 in 1 : vector<128x8xbf16>, vector<128x8xbf16>, vector<128x8xbf16> -> vector<128x24xbf16>
    %c1 = arith.constant 1 : index
    %c0_2 = arith.constant 0 : index
    %c0_3 = arith.constant 0 : index
    %8 = vector.load %arg0[%c1, %c0_2, %c0_3] : memref<2x129x8xbf16, #tpu.memory_space<vmem>>, vector<1x129x8xbf16>
    %9 = vector.shape_cast %8 : vector<1x129x8xbf16> to vector<129x8xbf16>
    %cst_4 = arith.constant 0.000000e+00 : bf16
    %10 = vector.broadcast %cst_4 : bf16 to vector<1x8xbf16>
    %11 = vector.extract_strided_slice %9 {offsets = [0, 0], sizes = [127, 8], strides = [1, 1]} : vector<129x8xbf16> to vector<127x8xbf16>
    %12 = tpu.concatenate %10, %11 in 0 : vector<1x8xbf16>, vector<127x8xbf16> -> vector<128x8xbf16>
    %13 = vector.extract_strided_slice %9 {offsets = [0, 0], sizes = [128, 8], strides = [1, 1]} : vector<129x8xbf16> to vector<128x8xbf16>
    %14 = vector.extract_strided_slice %9 {offsets = [1, 0], sizes = [128, 8], strides = [1, 1]} : vector<129x8xbf16> to vector<128x8xbf16>
    %15 = tpu.concatenate %12, %13, %14 in 1 : vector<128x8xbf16>, vector<128x8xbf16>, vector<128x8xbf16> -> vector<128x24xbf16>
    %16 = tpu.concatenate %7, %15 in 0 : vector<128x24xbf16>, vector<128x24xbf16> -> vector<256x24xbf16>
    %c0_5 = arith.constant 0 : index
    %c0_6 = arith.constant 0 : index
    %17 = vector.load %arg1[%c0_5, %c0_6] : memref<24x64xbf16, #tpu.memory_space<vmem>>, vector<24x64xbf16>
    %cst_7 = arith.constant dense<0.000000e+00> : vector<256x64xf32>
    %18 = tpu.matmul %16, %17, %cst_7 {dimension_numbers = #tpu.dot_dimension_numbers<[1], [0], [0], [1], [0, 0, 1, 1], [], []>} : vector<256x24xbf16>, vector<24x64xbf16>, vector<256x64xf32> -> vector<256x64xf32>
    %c0_8 = arith.constant 0 : index
    %c0_9 = arith.constant 0 : index
    %19 = vector.load %arg2[%c0_8, %c0_9] : memref<1x64xf32, #tpu.memory_space<vmem>>, vector<1x64xf32>
    %20 = vector.broadcast %19 : vector<1x64xf32> to vector<256x64xf32>
    %21 = arith.addf %18, %20 : vector<256x64xf32>
    %cst_10 = arith.constant 0.000000e+00 : f32
    %22 = vector.broadcast %cst_10 : f32 to vector<256x64xf32>
    %23 = arith.maximumf %21, %22 : vector<256x64xf32>
    %c0_11 = arith.constant 0 : index
    %c0_12 = arith.constant 0 : index
    %24 = vector.load %arg15[%c0_11, %c0_12] : memref<256x64xf32, #tpu.memory_space<vmem>>, vector<256x64xf32>
    tpu.vector_store %arg15[%c0_11, %c0_12], %23 {strides = array<i32>} : memref<256x64xf32, #tpu.memory_space<vmem>>, vector<256x64xf32>,
    %c0_13 = arith.constant 0 : index
    %c0_14 = arith.constant 0 : index
    %25 = tpu.strided_load %arg15[%c0_13, %c0_14] {strides = array<i32: 2, 1>} : memref<256x64xf32, #tpu.memory_space<vmem>>, vector<128x64xf32>
    %c1_15 = arith.constant 1 : index
    %c0_16 = arith.constant 0 : index
    %26 = tpu.strided_load %arg15[%c1_15, %c0_16] {strides = array<i32: 2, 1>} : memref<256x64xf32, #tpu.memory_space<vmem>>, vector<128x64xf32>
    %27 = arith.maximumf %25, %26 : vector<128x64xf32>
    %28 = arith.truncf %27 : vector<128x64xf32> to vector<128x64xbf16>
    %29 = vector.extract_strided_slice %28 {offsets = [0, 0], sizes = [64, 64], strides = [1, 1]} : vector<128x64xbf16> to vector<64x64xbf16>
    %cst_17 = arith.constant 0.000000e+00 : bf16
    %30 = vector.broadcast %cst_17 : bf16 to vector<1x64xbf16>
    %31 = vector.extract_strided_slice %29 {offsets = [0, 0], sizes = [63, 64], strides = [1, 1]} : vector<64x64xbf16> to vector<63x64xbf16>
    %32 = tpu.concatenate %30, %31 in 0 : vector<1x64xbf16>, vector<63x64xbf16> -> vector<64x64xbf16>
    %33 = vector.extract_strided_slice %29 {offsets = [1, 0], sizes = [63, 64], strides = [1, 1]} : vector<64x64xbf16> to vector<63x64xbf16>
    %34 = tpu.concatenate %33, %30 in 0 : vector<63x64xbf16>, vector<1x64xbf16> -> vector<64x64xbf16>
    %35 = tpu.concatenate %32, %29, %34 in 1 : vector<64x64xbf16>, vector<64x64xbf16>, vector<64x64xbf16> -> vector<64x192xbf16>
    %36 = vector.extract_strided_slice %28 {offsets = [64, 0], sizes = [64, 64], strides = [1, 1]} : vector<128x64xbf16> to vector<64x64xbf16>
    %cst_18 = arith.constant 0.000000e+00 : bf16
    %37 = vector.broadcast %cst_18 : bf16 to vector<1x64xbf16>
    %38 = vector.extract_strided_slice %36 {offsets = [0, 0], sizes = [63, 64], strides = [1, 1]} : vector<64x64xbf16> to vector<63x64xbf16>
    %39 = tpu.concatenate %37, %38 in 0 : vector<1x64xbf16>, vector<63x64xbf16> -> vector<64x64xbf16>
    %40 = vector.extract_strided_slice %36 {offsets = [1, 0], sizes = [63, 64], strides = [1, 1]} : vector<64x64xbf16> to vector<63x64xbf16>
    %41 = tpu.concatenate %40, %37 in 0 : vector<63x64xbf16>, vector<1x64xbf16> -> vector<64x64xbf16>
    %42 = tpu.concatenate %39, %36, %41 in 1 : vector<64x64xbf16>, vector<64x64xbf16>, vector<64x64xbf16> -> vector<64x192xbf16>
    %43 = tpu.concatenate %35, %42 in 0 : vector<64x192xbf16>, vector<64x192xbf16> -> vector<128x192xbf16>
    %c0_19 = arith.constant 0 : index
    %c0_20 = arith.constant 0 : index
    %44 = vector.load %arg3[%c0_19, %c0_20] : memref<192x64xbf16, #tpu.memory_space<vmem>>, vector<192x64xbf16>
    %cst_21 = arith.constant dense<0.000000e+00> : vector<128x64xf32>
    %45 = tpu.matmul %43, %44, %cst_21 {dimension_numbers = #tpu.dot_dimension_numbers<[1], [0], [0], [1], [0, 0, 1, 1], [], []>} : vector<128x192xbf16>, vector<192x64xbf16>, vector<128x64xf32> -> vector<128x64xf32>
    %c0_22 = arith.constant 0 : index
    %c0_23 = arith.constant 0 : index
    %46 = vector.load %arg4[%c0_22, %c0_23] : memref<1x64xf32, #tpu.memory_space<vmem>>, vector<1x64xf32>
    %47 = vector.broadcast %46 : vector<1x64xf32> to vector<128x64xf32>
    %48 = arith.addf %45, %47 : vector<128x64xf32>
    %cst_24 = arith.constant 0.000000e+00 : f32
    %49 = vector.broadcast %cst_24 : f32 to vector<128x64xf32>
    %50 = arith.maximumf %48, %49 : vector<128x64xf32>
    %c0_25 = arith.constant 0 : index
    %c0_26 = arith.constant 0 : index
    %51 = vector.load %arg15[%c0_25, %c0_26] : memref<256x64xf32, #tpu.memory_space<vmem>>, vector<128x64xf32>
    tpu.vector_store %arg15[%c0_25, %c0_26], %50 {strides = array<i32>} : memref<256x64xf32, #tpu.memory_space<vmem>>, vector<128x64xf32>,
    %c0_27 = arith.constant 0 : index
    %c0_28 = arith.constant 0 : index
    %52 = tpu.strided_load %arg15[%c0_27, %c0_28] {strides = array<i32: 2, 1>} : memref<256x64xf32, #tpu.memory_space<vmem>>, vector<64x64xf32>
    %c1_29 = arith.constant 1 : index
    %c0_30 = arith.constant 0 : index
    %53 = tpu.strided_load %arg15[%c1_29, %c0_30] {strides = array<i32: 2, 1>} : memref<256x64xf32, #tpu.memory_space<vmem>>, vector<64x64xf32>
    %54 = arith.maximumf %52, %53 : vector<64x64xf32>
    %c0_31 = arith.constant 0 : index
    %c0_32 = arith.constant 0 : index
    %55 = vector.load %arg5[%c0_31, %c0_32] : memref<64x64xbf16, #tpu.memory_space<vmem>>, vector<64x64xbf16>
    %56 = arith.truncf %54 : vector<64x64xf32> to vector<64x64xbf16>
    %cst_33 = arith.constant dense<0.000000e+00> : vector<64x64xf32>
    %57 = tpu.matmul %55, %56, %cst_33 {dimension_numbers = #tpu.dot_dimension_numbers<[1], [0], [0], [1], [0, 0, 1, 1], [], []>} : vector<64x64xbf16>, vector<64x64xbf16>, vector<64x64xf32> -> vector<64x64xf32>
    %58 = arith.truncf %57 : vector<64x64xf32> to vector<64x64xbf16>
    %c0_34 = arith.constant 0 : index
    %c0_35 = arith.constant 0 : index
    %59 = vector.load %arg6[%c0_34, %c0_35] : memref<64x256xbf16, #tpu.memory_space<vmem>>, vector<64x256xbf16>
    %cst_36 = arith.constant dense<0.000000e+00> : vector<64x256xf32>
    %60 = tpu.matmul %58, %59, %cst_36 {dimension_numbers = #tpu.dot_dimension_numbers<[1], [0], [0], [1], [0, 0, 1, 1], [], []>} : vector<64x64xbf16>, vector<64x256xbf16>, vector<64x256xf32> -> vector<64x256xf32>
    %c0_37 = arith.constant 0 : index
    %c0_38 = arith.constant 0 : index
    %61 = vector.load %arg7[%c0_37, %c0_38] : memref<1x256xf32, #tpu.memory_space<vmem>>, vector<1x256xf32>
    %62 = vector.broadcast %61 : vector<1x256xf32> to vector<64x256xf32>
    %63 = arith.addf %60, %62 : vector<64x256xf32>
    %64 = vector.extract_strided_slice %58 {offsets = [0, 0], sizes = [2, 64], strides = [1, 1]} : vector<64x64xbf16> to vector<2x64xbf16>
    %65 = vector.extract_strided_slice %58 {offsets = [2, 0], sizes = [2, 64], strides = [1, 1]} : vector<64x64xbf16> to vector<2x64xbf16>
    %66 = vector.extract_strided_slice %58 {offsets = [4, 0], sizes = [2, 64], strides = [1, 1]} : vector<64x64xbf16> to vector<2x64xbf16>
    %67 = vector.extract_strided_slice %58 {offsets = [6, 0], sizes = [2, 64], strides = [1, 1]} : vector<64x64xbf16> to vector<2x64xbf16>
    %68 = vector.extract_strided_slice %58 {offsets = [8, 0], sizes = [2, 64], strides = [1, 1]} : vector<64x64xbf16> to vector<2x64xbf16>
    %69 = vector.extract_strided_slice %58 {offsets = [10, 0], sizes = [2, 64], strides = [1, 1]} : vector<64x64xbf16> to vector<2x64xbf16>
    %70 = vector.extract_strided_slice %58 {offsets = [12, 0], sizes = [2, 64], strides = [1, 1]} : vector<64x64xbf16> to vector<2x64xbf16>
    %71 = vector.extract_strided_slice %58 {offsets = [14, 0], sizes = [2, 64], strides = [1, 1]} : vector<64x64xbf16> to vector<2x64xbf16>
    %72 = vector.extract_strided_slice %58 {offsets = [16, 0], sizes = [2, 64], strides = [1, 1]} : vector<64x64xbf16> to vector<2x64xbf16>
    %73 = vector.extract_strided_slice %58 {offsets = [18, 0], sizes = [2, 64], strides = [1, 1]} : vector<64x64xbf16> to vector<2x64xbf16>
    %74 = vector.extract_strided_slice %58 {offsets = [20, 0], sizes = [2, 64], strides = [1, 1]} : vector<64x64xbf16> to vector<2x64xbf16>
    %75 = vector.extract_strided_slice %58 {offsets = [22, 0], sizes = [2, 64], strides = [1, 1]} : vector<64x64xbf16> to vector<2x64xbf16>
    %76 = vector.extract_strided_slice %58 {offsets = [24, 0], sizes = [2, 64], strides = [1, 1]} : vector<64x64xbf16> to vector<2x64xbf16>
    %77 = vector.extract_strided_slice %58 {offsets = [26, 0], sizes = [2, 64], strides = [1, 1]} : vector<64x64xbf16> to vector<2x64xbf16>
    %78 = vector.extract_strided_slice %58 {offsets = [28, 0], sizes = [2, 64], strides = [1, 1]} : vector<64x64xbf16> to vector<2x64xbf16>
    %79 = vector.extract_strided_slice %58 {offsets = [30, 0], sizes = [2, 64], strides = [1, 1]} : vector<64x64xbf16> to vector<2x64xbf16>
    %80 = vector.extract_strided_slice %58 {offsets = [32, 0], sizes = [2, 64], strides = [1, 1]} : vector<64x64xbf16> to vector<2x64xbf16>
    %81 = vector.extract_strided_slice %58 {offsets = [34, 0], sizes = [2, 64], strides = [1, 1]} : vector<64x64xbf16> to vector<2x64xbf16>
    %82 = vector.extract_strided_slice %58 {offsets = [36, 0], sizes = [2, 64], strides = [1, 1]} : vector<64x64xbf16> to vector<2x64xbf16>
    %83 = vector.extract_strided_slice %58 {offsets = [38, 0], sizes = [2, 64], strides = [1, 1]} : vector<64x64xbf16> to vector<2x64xbf16>
    %84 = vector.extract_strided_slice %58 {offsets = [40, 0], sizes = [2, 64], strides = [1, 1]} : vector<64x64xbf16> to vector<2x64xbf16>
    %85 = vector.extract_strided_slice %58 {offsets = [42, 0], sizes = [2, 64], strides = [1, 1]} : vector<64x64xbf16> to vector<2x64xbf16>
    %86 = vector.extract_strided_slice %58 {offsets = [44, 0], sizes = [2, 64], strides = [1, 1]} : vector<64x64xbf16> to vector<2x64xbf16>
    %87 = vector.extract_strided_slice %58 {offsets = [46, 0], sizes = [2, 64], strides = [1, 1]} : vector<64x64xbf16> to vector<2x64xbf16>
    %88 = vector.extract_strided_slice %58 {offsets = [48, 0], sizes = [2, 64], strides = [1, 1]} : vector<64x64xbf16> to vector<2x64xbf16>
    %89 = vector.extract_strided_slice %58 {offsets = [50, 0], sizes = [2, 64], strides = [1, 1]} : vector<64x64xbf16> to vector<2x64xbf16>
    %90 = vector.extract_strided_slice %58 {offsets = [52, 0], sizes = [2, 64], strides = [1, 1]} : vector<64x64xbf16> to vector<2x64xbf16>
    %91 = vector.extract_strided_slice %58 {offsets = [54, 0], sizes = [2, 64], strides = [1, 1]} : vector<64x64xbf16> to vector<2x64xbf16>
    %92 = vector.extract_strided_slice %58 {offsets = [56, 0], sizes = [2, 64], strides = [1, 1]} : vector<64x64xbf16> to vector<2x64xbf16>
    %93 = vector.extract_strided_slice %58 {offsets = [58, 0], sizes = [2, 64], strides = [1, 1]} : vector<64x64xbf16> to vector<2x64xbf16>
    %94 = vector.extract_strided_slice %58 {offsets = [60, 0], sizes = [2, 64], strides = [1, 1]} : vector<64x64xbf16> to vector<2x64xbf16>
    %95 = vector.extract_strided_slice %58 {offsets = [62, 0], sizes = [2, 64], strides = [1, 1]} : vector<64x64xbf16> to vector<2x64xbf16>
    %96 = tpu.concatenate %64, %65, %66, %67, %68, %69, %70, %71, %72, %73, %74, %75, %76, %77, %78, %79 in 1 : vector<2x64xbf16>, vector<2x64xbf16>, vector<2x64xbf16>, vector<2x64xbf16>, vector<2x64xbf16>, vector<2x64xbf16>, vector<2x64xbf16>, vector<2x64xbf16>, vector<2x64xbf16>, vector<2x64xbf16>, vector<2x64xbf16>, vector<2x64xbf16>, vector<2x64xbf16>, vector<2x64xbf16>, vector<2x64xbf16>, vector<2x64xbf16> -> vector<2x1024xbf16>
    %97 = tpu.concatenate %80, %81, %82, %83, %84, %85, %86, %87, %88, %89, %90, %91, %92, %93, %94, %95 in 1 : vector<2x64xbf16>, vector<2x64xbf16>, vector<2x64xbf16>, vector<2x64xbf16>, vector<2x64xbf16>, vector<2x64xbf16>, vector<2x64xbf16>, vector<2x64xbf16>, vector<2x64xbf16>, vector<2x64xbf16>, vector<2x64xbf16>, vector<2x64xbf16>, vector<2x64xbf16>, vector<2x64xbf16>, vector<2x64xbf16>, vector<2x64xbf16> -> vector<2x1024xbf16>
    %98 = tpu.concatenate %96, %97 in 1 : vector<2x1024xbf16>, vector<2x1024xbf16> -> vector<2x2048xbf16>
    %c0_39 = arith.constant 0 : index
    %c0_40 = arith.constant 0 : index
    %99 = vector.load %arg8[%c0_39, %c0_40] : memref<64x256xbf16, #tpu.memory_space<vmem>>, vector<64x256xbf16>
    %c0_41 = arith.constant 0 : index
    %c0_42 = arith.constant 0 : index
    %100 = vector.load %arg7[%c0_41, %c0_42] : memref<1x256xf32, #tpu.memory_space<vmem>>, vector<1x256xf32>
    %101 = vector.extract_strided_slice %63 {offsets = [0, 0], sizes = [2, 256], strides = [1, 1]} : vector<64x256xf32> to vector<2x256xf32>
    %102 = vector.extract_strided_slice %101 {offsets = [0, 0], sizes = [2, 96], strides = [1, 1]} : vector<2x256xf32> to vector<2x96xf32>
    %103 = arith.negf %102 : vector<2x96xf32>
    %104 = math.exp %103 : vector<2x96xf32>
    %cst_43 = arith.constant 1.000000e+00 : f32
    %105 = vector.broadcast %cst_43 : f32 to vector<2x96xf32>
    %106 = arith.addf %105, %104 : vector<2x96xf32>
    %107 = arith.divf %105, %106 : vector<2x96xf32>
    %108 = vector.extract_strided_slice %107 {offsets = [0, 0], sizes = [2, 32], strides = [1, 1]} : vector<2x96xf32> to vector<2x32xf32>
    %109 = vector.extract_strided_slice %101 {offsets = [0, 192], sizes = [2, 32], strides = [1, 1]} : vector<2x256xf32> to vector<2x32xf32>
    %110 = math.tanh %109 : vector<2x32xf32>
    %111 = arith.mulf %108, %110 : vector<2x32xf32>
    %112 = vector.extract_strided_slice %107 {offsets = [0, 64], sizes = [2, 32], strides = [1, 1]} : vector<2x96xf32> to vector<2x32xf32>
    %113 = math.tanh %111 : vector<2x32xf32>
    %114 = arith.mulf %112, %113 : vector<2x32xf32>
    %cst_44 = arith.constant 0.000000e+00 : f32
    %115 = vector.broadcast %cst_44 : f32 to vector<2x32xf32>
    %cst_45 = arith.constant 0.000000e+00 : f32
    %116 = vector.broadcast %cst_45 : f32 to vector<2x32xf32>
    %117 = vector.extract_strided_slice %63 {offsets = [2, 0], sizes = [2, 256], strides = [1, 1]} : vector<64x256xf32> to vector<2x256xf32>
    %118 = tpu.concatenate %114, %115 in 1 : vector<2x32xf32>, vector<2x32xf32> -> vector<2x64xf32>
    %119 = arith.truncf %118 : vector<2x64xf32> to vector<2x64xbf16>
    %cst_46 = arith.constant dense<0.000000e+00> : vector<2x256xf32>
    %120 = tpu.matmul %119, %99, %cst_46 {dimension_numbers = #tpu.dot_dimension_numbers<[1], [0], [0], [1], [0, 0, 1, 1], [], []>} : vector<2x64xbf16>, vector<64x256xbf16>, vector<2x256xf32> -> vector<2x256xf32>
    %121 = arith.addf %120, %117 : vector<2x256xf32>
    %122 = vector.extract_strided_slice %121 {offsets = [0, 0], sizes = [2, 192], strides = [1, 1]} : vector<2x256xf32> to vector<2x192xf32>
    %123 = arith.negf %122 : vector<2x192xf32>
    %124 = math.exp %123 : vector<2x192xf32>
    %cst_47 = arith.constant 1.000000e+00 : f32
    %125 = vector.broadcast %cst_47 : f32 to vector<2x192xf32>
    %126 = arith.addf %125, %124 : vector<2x192xf32>
    %127 = arith.divf %125, %126 : vector<2x192xf32>
    %128 = vector.extract_strided_slice %121 {offsets = [0, 192], sizes = [2, 64], strides = [1, 1]} : vector<2x256xf32> to vector<2x64xf32>
    %129 = math.tanh %128 : vector<2x64xf32>
    %130 = vector.extract_strided_slice %127 {offsets = [0, 128], sizes = [2, 32], strides = [1, 1]} : vector<2x192xf32> to vector<2x32xf32>
    %131 = arith.mulf %130, %116 : vector<2x32xf32>
    %132 = vector.extract_strided_slice %127 {offsets = [0, 96], sizes = [2, 32], strides = [1, 1]} : vector<2x192xf32> to vector<2x32xf32>
    %133 = vector.extract_strided_slice %129 {offsets = [0, 32], sizes = [2, 32], strides = [1, 1]} : vector<2x64xf32> to vector<2x32xf32>
    %134 = arith.mulf %132, %133 : vector<2x32xf32>
    %135 = arith.addf %131, %134 : vector<2x32xf32>
    %136 = vector.extract_strided_slice %127 {offsets = [0, 160], sizes = [2, 32], strides = [1, 1]} : vector<2x192xf32> to vector<2x32xf32>
    %137 = math.tanh %135 : vector<2x32xf32>
    %138 = arith.mulf %136, %137 : vector<2x32xf32>
    %139 = vector.extract_strided_slice %127 {offsets = [0, 32], sizes = [2, 32], strides = [1, 1]} : vector<2x192xf32> to vector<2x32xf32>
    %140 = arith.mulf %139, %111 : vector<2x32xf32>
    %141 = vector.extract_strided_slice %127 {offsets = [0, 0], sizes = [2, 32], strides = [1, 1]} : vector<2x192xf32> to vector<2x32xf32>
    %142 = vector.extract_strided_slice %129 {offsets = [0, 0], sizes = [2, 32], strides = [1, 1]} : vector<2x64xf32> to vector<2x32xf32>
    %143 = arith.mulf %141, %142 : vector<2x32xf32>
    %144 = arith.addf %140, %143 : vector<2x32xf32>
    %145 = vector.extract_strided_slice %127 {offsets = [0, 64], sizes = [2, 32], strides = [1, 1]} : vector<2x192xf32> to vector<2x32xf32>
    %146 = math.tanh %144 : vector<2x32xf32>
    %147 = arith.mulf %145, %146 : vector<2x32xf32>
    %148 = vector.extract_strided_slice %63 {offsets = [4, 0], sizes = [2, 256], strides = [1, 1]} : vector<64x256xf32> to vector<2x256xf32>
    %149 = tpu.concatenate %147, %138 in 1 : vector<2x32xf32>, vector<2x32xf32> -> vector<2x64xf32>
    %150 = arith.truncf %149 : vector<2x64xf32> to vector<2x64xbf16>
    %cst_48 = arith.constant dense<0.000000e+00> : vector<2x256xf32>
    %151 = tpu.matmul %150, %99, %cst_48 {dimension_numbers = #tpu.dot_dimension_numbers<[1], [0], [0], [1], [0, 0, 1, 1], [], []>} : vector<2x64xbf16>, vector<64x256xbf16>, vector<2x256xf32> -> vector<2x256xf32>
    %152 = arith.addf %151, %148 : vector<2x256xf32>
    %153 = vector.extract_strided_slice %152 {offsets = [0, 0], sizes = [2, 192], strides = [1, 1]} : vector<2x256xf32> to vector<2x192xf32>
    %154 = arith.negf %153 : vector<2x192xf32>
    %155 = math.exp %154 : vector<2x192xf32>
    %cst_49 = arith.constant 1.000000e+00 : f32
    %156 = vector.broadcast %cst_49 : f32 to vector<2x192xf32>
    %157 = arith.addf %156, %155 : vector<2x192xf32>
    %158 = arith.divf %156, %157 : vector<2x192xf32>
    %159 = vector.extract_strided_slice %152 {offsets = [0, 192], sizes = [2, 64], strides = [1, 1]} : vector<2x256xf32> to vector<2x64xf32>
    %160 = math.tanh %159 : vector<2x64xf32>
    %161 = vector.extract_strided_slice %158 {offsets = [0, 128], sizes = [2, 32], strides = [1, 1]} : vector<2x192xf32> to vector<2x32xf32>
    %162 = arith.mulf %161, %135 : vector<2x32xf32>
    %163 = vector.extract_strided_slice %158 {offsets = [0, 96], sizes = [2, 32], strides = [1, 1]} : vector<2x192xf32> to vector<2x32xf32>
    %164 = vector.extract_strided_slice %160 {offsets = [0, 32], sizes = [2, 32], strides = [1, 1]} : vector<2x64xf32> to vector<2x32xf32>
    %165 = arith.mulf %163, %164 : vector<2x32xf32>
    %166 = arith.addf %162, %165 : vector<2x32xf32>
    %167 = vector.extract_strided_slice %158 {offsets = [0, 160], sizes = [2, 32], strides = [1, 1]} : vector<2x192xf32> to vector<2x32xf32>
    %168 = math.tanh %166 : vector<2x32xf32>
    %169 = arith.mulf %167, %168 : vector<2x32xf32>
    %170 = vector.extract_strided_slice %158 {offsets = [0, 32], sizes = [2, 32], strides = [1, 1]} : vector<2x192xf32> to vector<2x32xf32>
    %171 = arith.mulf %170, %144 : vector<2x32xf32>
    %172 = vector.extract_strided_slice %158 {offsets = [0, 0], sizes = [2, 32], strides = [1, 1]} : vector<2x192xf32> to vector<2x32xf32>
    %173 = vector.extract_strided_slice %160 {offsets = [0, 0], sizes = [2, 32], strides = [1, 1]} : vector<2x64xf32> to vector<2x32xf32>
    %174 = arith.mulf %172, %173 : vector<2x32xf32>
    %175 = arith.addf %171, %174 : vector<2x32xf32>
    %176 = vector.extract_strided_slice %158 {offsets = [0, 64], sizes = [2, 32], strides = [1, 1]} : vector<2x192xf32> to vector<2x32xf32>
    %177 = math.tanh %175 : vector<2x32xf32>
    %178 = arith.mulf %176, %177 : vector<2x32xf32>
    %179 = vector.extract_strided_slice %63 {offsets = [6, 0], sizes = [2, 256], strides = [1, 1]} : vector<64x256xf32> to vector<2x256xf32>
    %180 = tpu.concatenate %178, %169 in 1 : vector<2x32xf32>, vector<2x32xf32> -> vector<2x64xf32>
    %181 = arith.truncf %180 : vector<2x64xf32> to vector<2x64xbf16>
    %cst_50 = arith.constant dense<0.000000e+00> : vector<2x256xf32>
    %182 = tpu.matmul %181, %99, %cst_50 {dimension_numbers = #tpu.dot_dimension_numbers<[1], [0], [0], [1], [0, 0, 1, 1], [], []>} : vector<2x64xbf16>, vector<64x256xbf16>, vector<2x256xf32> -> vector<2x256xf32>
    %183 = arith.addf %182, %179 : vector<2x256xf32>
    %184 = vector.extract_strided_slice %183 {offsets = [0, 0], sizes = [2, 192], strides = [1, 1]} : vector<2x256xf32> to vector<2x192xf32>
    %185 = arith.negf %184 : vector<2x192xf32>
    %186 = math.exp %185 : vector<2x192xf32>
    %cst_51 = arith.constant 1.000000e+00 : f32
    %187 = vector.broadcast %cst_51 : f32 to vector<2x192xf32>
    %188 = arith.addf %187, %186 : vector<2x192xf32>
    %189 = arith.divf %187, %188 : vector<2x192xf32>
    %190 = vector.extract_strided_slice %183 {offsets = [0, 192], sizes = [2, 64], strides = [1, 1]} : vector<2x256xf32> to vector<2x64xf32>
    %191 = math.tanh %190 : vector<2x64xf32>
    %192 = vector.extract_strided_slice %189 {offsets = [0, 128], sizes = [2, 32], strides = [1, 1]} : vector<2x192xf32> to vector<2x32xf32>
    %193 = arith.mulf %192, %166 : vector<2x32xf32>
    %194 = vector.extract_strided_slice %189 {offsets = [0, 96], sizes = [2, 32], strides = [1, 1]} : vector<2x192xf32> to vector<2x32xf32>
    %195 = vector.extract_strided_slice %191 {offsets = [0, 32], sizes = [2, 32], strides = [1, 1]} : vector<2x64xf32> to vector<2x32xf32>
    %196 = arith.mulf %194, %195 : vector<2x32xf32>
    %197 = arith.addf %193, %196 : vector<2x32xf32>
    %198 = vector.extract_strided_slice %189 {offsets = [0, 160], sizes = [2, 32], strides = [1, 1]} : vector<2x192xf32> to vector<2x32xf32>
    %199 = math.tanh %197 : vector<2x32xf32>
    %200 = arith.mulf %198, %199 : vector<2x32xf32>
    %201 = vector.extract_strided_slice %189 {offsets = [0, 32], sizes = [2, 32], strides = [1, 1]} : vector<2x192xf32> to vector<2x32xf32>
    %202 = arith.mulf %201, %175 : vector<2x32xf32>
    %203 = vector.extract_strided_slice %189 {offsets = [0, 0], sizes = [2, 32], strides = [1, 1]} : vector<2x192xf32> to vector<2x32xf32>
    %204 = vector.extract_strided_slice %191 {offsets = [0, 0], sizes = [2, 32], strides = [1, 1]} : vector<2x64xf32> to vector<2x32xf32>
    %205 = arith.mulf %203, %204 : vector<2x32xf32>
    %206 = arith.addf %202, %205 : vector<2x32xf32>
    %207 = vector.extract_strided_slice %189 {offsets = [0, 64], sizes = [2, 32], strides = [1, 1]} : vector<2x192xf32> to vector<2x32xf32>
    %208 = math.tanh %206 : vector<2x32xf32>
    %209 = arith.mulf %207, %208 : vector<2x32xf32>
    %210 = vector.extract_strided_slice %63 {offsets = [8, 0], sizes = [2, 256], strides = [1, 1]} : vector<64x256xf32> to vector<2x256xf32>
    %211 = tpu.concatenate %209, %200 in 1 : vector<2x32xf32>, vector<2x32xf32> -> vector<2x64xf32>
    %212 = arith.truncf %211 : vector<2x64xf32> to vector<2x64xbf16>
    %cst_52 = arith.constant dense<0.000000e+00> : vector<2x256xf32>
    %213 = tpu.matmul %212, %99, %cst_52 {dimension_numbers = #tpu.dot_dimension_numbers<[1], [0], [0], [1], [0, 0, 1, 1], [], []>} : vector<2x64xbf16>, vector<64x256xbf16>, vector<2x256xf32> -> vector<2x256xf32>
    %214 = arith.addf %213, %210 : vector<2x256xf32>
    %215 = vector.extract_strided_slice %214 {offsets = [0, 0], sizes = [2, 192], strides = [1, 1]} : vector<2x256xf32> to vector<2x192xf32>
    %216 = arith.negf %215 : vector<2x192xf32>
    %217 = math.exp %216 : vector<2x192xf32>
    %cst_53 = arith.constant 1.000000e+00 : f32
    %218 = vector.broadcast %cst_53 : f32 to vector<2x192xf32>
    %219 = arith.addf %218, %217 : vector<2x192xf32>
    %220 = arith.divf %218, %219 : vector<2x192xf32>
    %221 = vector.extract_strided_slice %214 {offsets = [0, 192], sizes = [2, 64], strides = [1, 1]} : vector<2x256xf32> to vector<2x64xf32>
    %222 = math.tanh %221 : vector<2x64xf32>
    %223 = vector.extract_strided_slice %220 {offsets = [0, 128], sizes = [2, 32], strides = [1, 1]} : vector<2x192xf32> to vector<2x32xf32>
    %224 = arith.mulf %223, %197 : vector<2x32xf32>
    %225 = vector.extract_strided_slice %220 {offsets = [0, 96], sizes = [2, 32], strides = [1, 1]} : vector<2x192xf32> to vector<2x32xf32>
    %226 = vector.extract_strided_slice %222 {offsets = [0, 32], sizes = [2, 32], strides = [1, 1]} : vector<2x64xf32> to vector<2x32xf32>
    %227 = arith.mulf %225, %226 : vector<2x32xf32>
    %228 = arith.addf %224, %227 : vector<2x32xf32>
    %229 = vector.extract_strided_slice %220 {offsets = [0, 160], sizes = [2, 32], strides = [1, 1]} : vector<2x192xf32> to vector<2x32xf32>
    %230 = math.tanh %228 : vector<2x32xf32>
    %231 = arith.mulf %229, %230 : vector<2x32xf32>
    %232 = vector.extract_strided_slice %220 {offsets = [0, 32], sizes = [2, 32], strides = [1, 1]} : vector<2x192xf32> to vector<2x32xf32>
    %233 = arith.mulf %232, %206 : vector<2x32xf32>
    %234 = vector.extract_strided_slice %220 {offsets = [0, 0], sizes = [2, 32], strides = [1, 1]} : vector<2x192xf32> to vector<2x32xf32>
    %235 = vector.extract_strided_slice %222 {offsets = [0, 0], sizes = [2, 32], strides = [1, 1]} : vector<2x64xf32> to vector<2x32xf32>
    %236 = arith.mulf %234, %235 : vector<2x32xf32>
    %237 = arith.addf %233, %236 : vector<2x32xf32>
    %238 = vector.extract_strided_slice %220 {offsets = [0, 64], sizes = [2, 32], strides = [1, 1]} : vector<2x192xf32> to vector<2x32xf32>
    %239 = math.tanh %237 : vector<2x32xf32>
    %240 = arith.mulf %238, %239 : vector<2x32xf32>
    %241 = vector.extract_strided_slice %63 {offsets = [10, 0], sizes = [2, 256], strides = [1, 1]} : vector<64x256xf32> to vector<2x256xf32>
    %242 = tpu.concatenate %240, %231 in 1 : vector<2x32xf32>, vector<2x32xf32> -> vector<2x64xf32>
    %243 = arith.truncf %242 : vector<2x64xf32> to vector<2x64xbf16>
    %cst_54 = arith.constant dense<0.000000e+00> : vector<2x256xf32>
    %244 = tpu.matmul %243, %99, %cst_54 {dimension_numbers = #tpu.dot_dimension_numbers<[1], [0], [0], [1], [0, 0, 1, 1], [], []>} : vector<2x64xbf16>, vector<64x256xbf16>, vector<2x256xf32> -> vector<2x256xf32>
    %245 = arith.addf %244, %241 : vector<2x256xf32>
    %246 = vector.extract_strided_slice %245 {offsets = [0, 0], sizes = [2, 192], strides = [1, 1]} : vector<2x256xf32> to vector<2x192xf32>
    %247 = arith.negf %246 : vector<2x192xf32>
    %248 = math.exp %247 : vector<2x192xf32>
    %cst_55 = arith.constant 1.000000e+00 : f32
    %249 = vector.broadcast %cst_55 : f32 to vector<2x192xf32>
    %250 = arith.addf %249, %248 : vector<2x192xf32>
    %251 = arith.divf %249, %250 : vector<2x192xf32>
    %252 = vector.extract_strided_slice %245 {offsets = [0, 192], sizes = [2, 64], strides = [1, 1]} : vector<2x256xf32> to vector<2x64xf32>
    %253 = math.tanh %252 : vector<2x64xf32>
    %254 = vector.extract_strided_slice %251 {offsets = [0, 128], sizes = [2, 32], strides = [1, 1]} : vector<2x192xf32> to vector<2x32xf32>
    %255 = arith.mulf %254, %228 : vector<2x32xf32>
    %256 = vector.extract_strided_slice %251 {offsets = [0, 96], sizes = [2, 32], strides = [1, 1]} : vector<2x192xf32> to vector<2x32xf32>
    %257 = vector.extract_strided_slice %253 {offsets = [0, 32], sizes = [2, 32], strides = [1, 1]} : vector<2x64xf32> to vector<2x32xf32>
    %258 = arith.mulf %256, %257 : vector<2x32xf32>
    %259 = arith.addf %255, %258 : vector<2x32xf32>
    %260 = vector.extract_strided_slice %251 {offsets = [0, 160], sizes = [2, 32], strides = [1, 1]} : vector<2x192xf32> to vector<2x32xf32>
    %261 = math.tanh %259 : vector<2x32xf32>
    %262 = arith.mulf %260, %261 : vector<2x32xf32>
    %263 = vector.extract_strided_slice %251 {offsets = [0, 32], sizes = [2, 32], strides = [1, 1]} : vector<2x192xf32> to vector<2x32xf32>
    %264 = arith.mulf %263, %237 : vector<2x32xf32>
    %265 = vector.extract_strided_slice %251 {offsets = [0, 0], sizes = [2, 32], strides = [1, 1]} : vector<2x192xf32> to vector<2x32xf32>
    %266 = vector.extract_strided_slice %253 {offsets = [0, 0], sizes = [2, 32], strides = [1, 1]} : vector<2x64xf32> to vector<2x32xf32>
    %267 = arith.mulf %265, %266 : vector<2x32xf32>
    %268 = arith.addf %264, %267 : vector<2x32xf32>
    %269 = vector.extract_strided_slice %251 {offsets = [0, 64], sizes = [2, 32], strides = [1, 1]} : vector<2x192xf32> to vector<2x32xf32>
    %270 = math.tanh %268 : vector<2x32xf32>
    %271 = arith.mulf %269, %270 : vector<2x32xf32>
    %272 = vector.extract_strided_slice %63 {offsets = [12, 0], sizes = [2, 256], strides = [1, 1]} : vector<64x256xf32> to vector<2x256xf32>
    %273 = tpu.concatenate %271, %262 in 1 : vector<2x32xf32>, vector<2x32xf32> -> vector<2x64xf32>
    %274 = arith.truncf %273 : vector<2x64xf32> to vector<2x64xbf16>
    %cst_56 = arith.constant dense<0.000000e+00> : vector<2x256xf32>
    %275 = tpu.matmul %274, %99, %cst_56 {dimension_numbers = #tpu.dot_dimension_numbers<[1], [0], [0], [1], [0, 0, 1, 1], [], []>} : vector<2x64xbf16>, vector<64x256xbf16>, vector<2x256xf32> -> vector<2x256xf32>
    %276 = arith.addf %275, %272 : vector<2x256xf32>
    %277 = vector.extract_strided_slice %276 {offsets = [0, 0], sizes = [2, 192], strides = [1, 1]} : vector<2x256xf32> to vector<2x192xf32>
    %278 = arith.negf %277 : vector<2x192xf32>
    %279 = math.exp %278 : vector<2x192xf32>
    %cst_57 = arith.constant 1.000000e+00 : f32
    %280 = vector.broadcast %cst_57 : f32 to vector<2x192xf32>
    %281 = arith.addf %280, %279 : vector<2x192xf32>
    %282 = arith.divf %280, %281 : vector<2x192xf32>
    %283 = vector.extract_strided_slice %276 {offsets = [0, 192], sizes = [2, 64], strides = [1, 1]} : vector<2x256xf32> to vector<2x64xf32>
    %284 = math.tanh %283 : vector<2x64xf32>
    %285 = vector.extract_strided_slice %282 {offsets = [0, 128], sizes = [2, 32], strides = [1, 1]} : vector<2x192xf32> to vector<2x32xf32>
    %286 = arith.mulf %285, %259 : vector<2x32xf32>
    %287 = vector.extract_strided_slice %282 {offsets = [0, 96], sizes = [2, 32], strides = [1, 1]} : vector<2x192xf32> to vector<2x32xf32>
    %288 = vector.extract_strided_slice %284 {offsets = [0, 32], sizes = [2, 32], strides = [1, 1]} : vector<2x64xf32> to vector<2x32xf32>
    %289 = arith.mulf %287, %288 : vector<2x32xf32>
    %290 = arith.addf %286, %289 : vector<2x32xf32>
    %291 = vector.extract_strided_slice %282 {offsets = [0, 160], sizes = [2, 32], strides = [1, 1]} : vector<2x192xf32> to vector<2x32xf32>
    %292 = math.tanh %290 : vector<2x32xf32>
    %293 = arith.mulf %291, %292 : vector<2x32xf32>
    %294 = vector.extract_strided_slice %282 {offsets = [0, 32], sizes = [2, 32], strides = [1, 1]} : vector<2x192xf32> to vector<2x32xf32>
    %295 = arith.mulf %294, %268 : vector<2x32xf32>
    %296 = vector.extract_strided_slice %282 {offsets = [0, 0], sizes = [2, 32], strides = [1, 1]} : vector<2x192xf32> to vector<2x32xf32>
    %297 = vector.extract_strided_slice %284 {offsets = [0, 0], sizes = [2, 32], strides = [1, 1]} : vector<2x64xf32> to vector<2x32xf32>
    %298 = arith.mulf %296, %297 : vector<2x32xf32>
    %299 = arith.addf %295, %298 : vector<2x32xf32>
    %300 = vector.extract_strided_slice %282 {offsets = [0, 64], sizes = [2, 32], strides = [1, 1]} : vector<2x192xf32> to vector<2x32xf32>
    %301 = math.tanh %299 : vector<2x32xf32>
    %302 = arith.mulf %300, %301 : vector<2x32xf32>
    %303 = vector.extract_strided_slice %63 {offsets = [14, 0], sizes = [2, 256], strides = [1, 1]} : vector<64x256xf32> to vector<2x256xf32>
    %304 = tpu.concatenate %302, %293 in 1 : vector<2x32xf32>, vector<2x32xf32> -> vector<2x64xf32>
    %305 = arith.truncf %304 : vector<2x64xf32> to vector<2x64xbf16>
    %cst_58 = arith.constant dense<0.000000e+00> : vector<2x256xf32>
    %306 = tpu.matmul %305, %99, %cst_58 {dimension_numbers = #tpu.dot_dimension_numbers<[1], [0], [0], [1], [0, 0, 1, 1], [], []>} : vector<2x64xbf16>, vector<64x256xbf16>, vector<2x256xf32> -> vector<2x256xf32>
    %307 = arith.addf %306, %303 : vector<2x256xf32>
    %308 = vector.extract_strided_slice %307 {offsets = [0, 0], sizes = [2, 192], strides = [1, 1]} : vector<2x256xf32> to vector<2x192xf32>
    %309 = arith.negf %308 : vector<2x192xf32>
    %310 = math.exp %309 : vector<2x192xf32>
    %cst_59 = arith.constant 1.000000e+00 : f32
    %311 = vector.broadcast %cst_59 : f32 to vector<2x192xf32>
    %312 = arith.addf %311, %310 : vector<2x192xf32>
    %313 = arith.divf %311, %312 : vector<2x192xf32>
    %314 = vector.extract_strided_slice %307 {offsets = [0, 192], sizes = [2, 64], strides = [1, 1]} : vector<2x256xf32> to vector<2x64xf32>
    %315 = math.tanh %314 : vector<2x64xf32>
    %316 = vector.extract_strided_slice %313 {offsets = [0, 128], sizes = [2, 32], strides = [1, 1]} : vector<2x192xf32> to vector<2x32xf32>
    %317 = arith.mulf %316, %290 : vector<2x32xf32>
    %318 = vector.extract_strided_slice %313 {offsets = [0, 96], sizes = [2, 32], strides = [1, 1]} : vector<2x192xf32> to vector<2x32xf32>
    %319 = vector.extract_strided_slice %315 {offsets = [0, 32], sizes = [2, 32], strides = [1, 1]} : vector<2x64xf32> to vector<2x32xf32>
    %320 = arith.mulf %318, %319 : vector<2x32xf32>
    %321 = arith.addf %317, %320 : vector<2x32xf32>
    %322 = vector.extract_strided_slice %313 {offsets = [0, 160], sizes = [2, 32], strides = [1, 1]} : vector<2x192xf32> to vector<2x32xf32>
    %323 = math.tanh %321 : vector<2x32xf32>
    %324 = arith.mulf %322, %323 : vector<2x32xf32>
    %325 = vector.extract_strided_slice %313 {offsets = [0, 32], sizes = [2, 32], strides = [1, 1]} : vector<2x192xf32> to vector<2x32xf32>
    %326 = arith.mulf %325, %299 : vector<2x32xf32>
    %327 = vector.extract_strided_slice %313 {offsets = [0, 0], sizes = [2, 32], strides = [1, 1]} : vector<2x192xf32> to vector<2x32xf32>
    %328 = vector.extract_strided_slice %315 {offsets = [0, 0], sizes = [2, 32], strides = [1, 1]} : vector<2x64xf32> to vector<2x32xf32>
    %329 = arith.mulf %327, %328 : vector<2x32xf32>
    %330 = arith.addf %326, %329 : vector<2x32xf32>
    %331 = vector.extract_strided_slice %313 {offsets = [0, 64], sizes = [2, 32], strides = [1, 1]} : vector<2x192xf32> to vector<2x32xf32>
    %332 = math.tanh %330 : vector<2x32xf32>
    %333 = arith.mulf %331, %332 : vector<2x32xf32>
    %334 = vector.extract_strided_slice %63 {offsets = [16, 0], sizes = [2, 256], strides = [1, 1]} : vector<64x256xf32> to vector<2x256xf32>
    %335 = tpu.concatenate %333, %324 in 1 : vector<2x32xf32>, vector<2x32xf32> -> vector<2x64xf32>
    %336 = arith.truncf %335 : vector<2x64xf32> to vector<2x64xbf16>
    %cst_60 = arith.constant dense<0.000000e+00> : vector<2x256xf32>
    %337 = tpu.matmul %336, %99, %cst_60 {dimension_numbers = #tpu.dot_dimension_numbers<[1], [0], [0], [1], [0, 0, 1, 1], [], []>} : vector<2x64xbf16>, vector<64x256xbf16>, vector<2x256xf32> -> vector<2x256xf32>
    %338 = arith.addf %337, %334 : vector<2x256xf32>
    %339 = vector.extract_strided_slice %338 {offsets = [0, 0], sizes = [2, 192], strides = [1, 1]} : vector<2x256xf32> to vector<2x192xf32>
    %340 = arith.negf %339 : vector<2x192xf32>
    %341 = math.exp %340 : vector<2x192xf32>
    %cst_61 = arith.constant 1.000000e+00 : f32
    %342 = vector.broadcast %cst_61 : f32 to vector<2x192xf32>
    %343 = arith.addf %342, %341 : vector<2x192xf32>
    %344 = arith.divf %342, %343 : vector<2x192xf32>
    %345 = vector.extract_strided_slice %338 {offsets = [0, 192], sizes = [2, 64], strides = [1, 1]} : vector<2x256xf32> to vector<2x64xf32>
    %346 = math.tanh %345 : vector<2x64xf32>
    %347 = vector.extract_strided_slice %344 {offsets = [0, 128], sizes = [2, 32], strides = [1, 1]} : vector<2x192xf32> to vector<2x32xf32>
    %348 = arith.mulf %347, %321 : vector<2x32xf32>
    %349 = vector.extract_strided_slice %344 {offsets = [0, 96], sizes = [2, 32], strides = [1, 1]} : vector<2x192xf32> to vector<2x32xf32>
    %350 = vector.extract_strided_slice %346 {offsets = [0, 32], sizes = [2, 32], strides = [1, 1]} : vector<2x64xf32> to vector<2x32xf32>
    %351 = arith.mulf %349, %350 : vector<2x32xf32>
    %352 = arith.addf %348, %351 : vector<2x32xf32>
    %353 = vector.extract_strided_slice %344 {offsets = [0, 160], sizes = [2, 32], strides = [1, 1]} : vector<2x192xf32> to vector<2x32xf32>
    %354 = math.tanh %352 : vector<2x32xf32>
    %355 = arith.mulf %353, %354 : vector<2x32xf32>
    %356 = vector.extract_strided_slice %344 {offsets = [0, 32], sizes = [2, 32], strides = [1, 1]} : vector<2x192xf32> to vector<2x32xf32>
    %357 = arith.mulf %356, %330 : vector<2x32xf32>
    %358 = vector.extract_strided_slice %344 {offsets = [0, 0], sizes = [2, 32], strides = [1, 1]} : vector<2x192xf32> to vector<2x32xf32>
    %359 = vector.extract_strided_slice %346 {offsets = [0, 0], sizes = [2, 32], strides = [1, 1]} : vector<2x64xf32> to vector<2x32xf32>
    %360 = arith.mulf %358, %359 : vector<2x32xf32>
    %361 = arith.addf %357, %360 : vector<2x32xf32>
    %362 = vector.extract_strided_slice %344 {offsets = [0, 64], sizes = [2, 32], strides = [1, 1]} : vector<2x192xf32> to vector<2x32xf32>
    %363 = math.tanh %361 : vector<2x32xf32>
    %364 = arith.mulf %362, %363 : vector<2x32xf32>
    %365 = vector.extract_strided_slice %63 {offsets = [18, 0], sizes = [2, 256], strides = [1, 1]} : vector<64x256xf32> to vector<2x256xf32>
    %366 = tpu.concatenate %364, %355 in 1 : vector<2x32xf32>, vector<2x32xf32> -> vector<2x64xf32>
    %367 = arith.truncf %366 : vector<2x64xf32> to vector<2x64xbf16>
    %cst_62 = arith.constant dense<0.000000e+00> : vector<2x256xf32>
    %368 = tpu.matmul %367, %99, %cst_62 {dimension_numbers = #tpu.dot_dimension_numbers<[1], [0], [0], [1], [0, 0, 1, 1], [], []>} : vector<2x64xbf16>, vector<64x256xbf16>, vector<2x256xf32> -> vector<2x256xf32>
    %369 = arith.addf %368, %365 : vector<2x256xf32>
    %370 = vector.extract_strided_slice %369 {offsets = [0, 0], sizes = [2, 192], strides = [1, 1]} : vector<2x256xf32> to vector<2x192xf32>
    %371 = arith.negf %370 : vector<2x192xf32>
    %372 = math.exp %371 : vector<2x192xf32>
    %cst_63 = arith.constant 1.000000e+00 : f32
    %373 = vector.broadcast %cst_63 : f32 to vector<2x192xf32>
    %374 = arith.addf %373, %372 : vector<2x192xf32>
    %375 = arith.divf %373, %374 : vector<2x192xf32>
    %376 = vector.extract_strided_slice %369 {offsets = [0, 192], sizes = [2, 64], strides = [1, 1]} : vector<2x256xf32> to vector<2x64xf32>
    %377 = math.tanh %376 : vector<2x64xf32>
    %378 = vector.extract_strided_slice %375 {offsets = [0, 128], sizes = [2, 32], strides = [1, 1]} : vector<2x192xf32> to vector<2x32xf32>
    %379 = arith.mulf %378, %352 : vector<2x32xf32>
    %380 = vector.extract_strided_slice %375 {offsets = [0, 96], sizes = [2, 32], strides = [1, 1]} : vector<2x192xf32> to vector<2x32xf32>
    %381 = vector.extract_strided_slice %377 {offsets = [0, 32], sizes = [2, 32], strides = [1, 1]} : vector<2x64xf32> to vector<2x32xf32>
    %382 = arith.mulf %380, %381 : vector<2x32xf32>
    %383 = arith.addf %379, %382 : vector<2x32xf32>
    %384 = vector.extract_strided_slice %375 {offsets = [0, 160], sizes = [2, 32], strides = [1, 1]} : vector<2x192xf32> to vector<2x32xf32>
    %385 = math.tanh %383 : vector<2x32xf32>
    %386 = arith.mulf %384, %385 : vector<2x32xf32>
    %387 = vector.extract_strided_slice %375 {offsets = [0, 32], sizes = [2, 32], strides = [1, 1]} : vector<2x192xf32> to vector<2x32xf32>
    %388 = arith.mulf %387, %361 : vector<2x32xf32>
    %389 = vector.extract_strided_slice %375 {offsets = [0, 0], sizes = [2, 32], strides = [1, 1]} : vector<2x192xf32> to vector<2x32xf32>
    %390 = vector.extract_strided_slice %377 {offsets = [0, 0], sizes = [2, 32], strides = [1, 1]} : vector<2x64xf32> to vector<2x32xf32>
    %391 = arith.mulf %389, %390 : vector<2x32xf32>
    %392 = arith.addf %388, %391 : vector<2x32xf32>
    %393 = vector.extract_strided_slice %375 {offsets = [0, 64], sizes = [2, 32], strides = [1, 1]} : vector<2x192xf32> to vector<2x32xf32>
    %394 = math.tanh %392 : vector<2x32xf32>
    %395 = arith.mulf %393, %394 : vector<2x32xf32>
    %396 = vector.extract_strided_slice %63 {offsets = [20, 0], sizes = [2, 256], strides = [1, 1]} : vector<64x256xf32> to vector<2x256xf32>
    %397 = tpu.concatenate %395, %386 in 1 : vector<2x32xf32>, vector<2x32xf32> -> vector<2x64xf32>
    %398 = arith.truncf %397 : vector<2x64xf32> to vector<2x64xbf16>
    %cst_64 = arith.constant dense<0.000000e+00> : vector<2x256xf32>
    %399 = tpu.matmul %398, %99, %cst_64 {dimension_numbers = #tpu.dot_dimension_numbers<[1], [0], [0], [1], [0, 0, 1, 1], [], []>} : vector<2x64xbf16>, vector<64x256xbf16>, vector<2x256xf32> -> vector<2x256xf32>
    %400 = arith.addf %399, %396 : vector<2x256xf32>
    %401 = vector.extract_strided_slice %400 {offsets = [0, 0], sizes = [2, 192], strides = [1, 1]} : vector<2x256xf32> to vector<2x192xf32>
    %402 = arith.negf %401 : vector<2x192xf32>
    %403 = math.exp %402 : vector<2x192xf32>
    %cst_65 = arith.constant 1.000000e+00 : f32
    %404 = vector.broadcast %cst_65 : f32 to vector<2x192xf32>
    %405 = arith.addf %404, %403 : vector<2x192xf32>
    %406 = arith.divf %404, %405 : vector<2x192xf32>
    %407 = vector.extract_strided_slice %400 {offsets = [0, 192], sizes = [2, 64], strides = [1, 1]} : vector<2x256xf32> to vector<2x64xf32>
    %408 = math.tanh %407 : vector<2x64xf32>
    %409 = vector.extract_strided_slice %406 {offsets = [0, 128], sizes = [2, 32], strides = [1, 1]} : vector<2x192xf32> to vector<2x32xf32>
    %410 = arith.mulf %409, %383 : vector<2x32xf32>
    %411 = vector.extract_strided_slice %406 {offsets = [0, 96], sizes = [2, 32], strides = [1, 1]} : vector<2x192xf32> to vector<2x32xf32>
    %412 = vector.extract_strided_slice %408 {offsets = [0, 32], sizes = [2, 32], strides = [1, 1]} : vector<2x64xf32> to vector<2x32xf32>
    %413 = arith.mulf %411, %412 : vector<2x32xf32>
    %414 = arith.addf %410, %413 : vector<2x32xf32>
    %415 = vector.extract_strided_slice %406 {offsets = [0, 160], sizes = [2, 32], strides = [1, 1]} : vector<2x192xf32> to vector<2x32xf32>
    %416 = math.tanh %414 : vector<2x32xf32>
    %417 = arith.mulf %415, %416 : vector<2x32xf32>
    %418 = vector.extract_strided_slice %406 {offsets = [0, 32], sizes = [2, 32], strides = [1, 1]} : vector<2x192xf32> to vector<2x32xf32>
    %419 = arith.mulf %418, %392 : vector<2x32xf32>
    %420 = vector.extract_strided_slice %406 {offsets = [0, 0], sizes = [2, 32], strides = [1, 1]} : vector<2x192xf32> to vector<2x32xf32>
    %421 = vector.extract_strided_slice %408 {offsets = [0, 0], sizes = [2, 32], strides = [1, 1]} : vector<2x64xf32> to vector<2x32xf32>
    %422 = arith.mulf %420, %421 : vector<2x32xf32>
    %423 = arith.addf %419, %422 : vector<2x32xf32>
    %424 = vector.extract_strided_slice %406 {offsets = [0, 64], sizes = [2, 32], strides = [1, 1]} : vector<2x192xf32> to vector<2x32xf32>
    %425 = math.tanh %423 : vector<2x32xf32>
    %426 = arith.mulf %424, %425 : vector<2x32xf32>
    %427 = vector.extract_strided_slice %63 {offsets = [22, 0], sizes = [2, 256], strides = [1, 1]} : vector<64x256xf32> to vector<2x256xf32>
    %428 = tpu.concatenate %426, %417 in 1 : vector<2x32xf32>, vector<2x32xf32> -> vector<2x64xf32>
    %429 = arith.truncf %428 : vector<2x64xf32> to vector<2x64xbf16>
    %cst_66 = arith.constant dense<0.000000e+00> : vector<2x256xf32>
    %430 = tpu.matmul %429, %99, %cst_66 {dimension_numbers = #tpu.dot_dimension_numbers<[1], [0], [0], [1], [0, 0, 1, 1], [], []>} : vector<2x64xbf16>, vector<64x256xbf16>, vector<2x256xf32> -> vector<2x256xf32>
    %431 = arith.addf %430, %427 : vector<2x256xf32>
    %432 = vector.extract_strided_slice %431 {offsets = [0, 0], sizes = [2, 192], strides = [1, 1]} : vector<2x256xf32> to vector<2x192xf32>
    %433 = arith.negf %432 : vector<2x192xf32>
    %434 = math.exp %433 : vector<2x192xf32>
    %cst_67 = arith.constant 1.000000e+00 : f32
    %435 = vector.broadcast %cst_67 : f32 to vector<2x192xf32>
    %436 = arith.addf %435, %434 : vector<2x192xf32>
    %437 = arith.divf %435, %436 : vector<2x192xf32>
    %438 = vector.extract_strided_slice %431 {offsets = [0, 192], sizes = [2, 64], strides = [1, 1]} : vector<2x256xf32> to vector<2x64xf32>
    %439 = math.tanh %438 : vector<2x64xf32>
    %440 = vector.extract_strided_slice %437 {offsets = [0, 128], sizes = [2, 32], strides = [1, 1]} : vector<2x192xf32> to vector<2x32xf32>
    %441 = arith.mulf %440, %414 : vector<2x32xf32>
    %442 = vector.extract_strided_slice %437 {offsets = [0, 96], sizes = [2, 32], strides = [1, 1]} : vector<2x192xf32> to vector<2x32xf32>
    %443 = vector.extract_strided_slice %439 {offsets = [0, 32], sizes = [2, 32], strides = [1, 1]} : vector<2x64xf32> to vector<2x32xf32>
    %444 = arith.mulf %442, %443 : vector<2x32xf32>
    %445 = arith.addf %441, %444 : vector<2x32xf32>
    %446 = vector.extract_strided_slice %437 {offsets = [0, 160], sizes = [2, 32], strides = [1, 1]} : vector<2x192xf32> to vector<2x32xf32>
    %447 = math.tanh %445 : vector<2x32xf32>
    %448 = arith.mulf %446, %447 : vector<2x32xf32>
    %449 = vector.extract_strided_slice %437 {offsets = [0, 32], sizes = [2, 32], strides = [1, 1]} : vector<2x192xf32> to vector<2x32xf32>
    %450 = arith.mulf %449, %423 : vector<2x32xf32>
    %451 = vector.extract_strided_slice %437 {offsets = [0, 0], sizes = [2, 32], strides = [1, 1]} : vector<2x192xf32> to vector<2x32xf32>
    %452 = vector.extract_strided_slice %439 {offsets = [0, 0], sizes = [2, 32], strides = [1, 1]} : vector<2x64xf32> to vector<2x32xf32>
    %453 = arith.mulf %451, %452 : vector<2x32xf32>
    %454 = arith.addf %450, %453 : vector<2x32xf32>
    %455 = vector.extract_strided_slice %437 {offsets = [0, 64], sizes = [2, 32], strides = [1, 1]} : vector<2x192xf32> to vector<2x32xf32>
    %456 = math.tanh %454 : vector<2x32xf32>
    %457 = arith.mulf %455, %456 : vector<2x32xf32>
    %458 = vector.extract_strided_slice %63 {offsets = [24, 0], sizes = [2, 256], strides = [1, 1]} : vector<64x256xf32> to vector<2x256xf32>
    %459 = tpu.concatenate %457, %448 in 1 : vector<2x32xf32>, vector<2x32xf32> -> vector<2x64xf32>
    %460 = arith.truncf %459 : vector<2x64xf32> to vector<2x64xbf16>
    %cst_68 = arith.constant dense<0.000000e+00> : vector<2x256xf32>
    %461 = tpu.matmul %460, %99, %cst_68 {dimension_numbers = #tpu.dot_dimension_numbers<[1], [0], [0], [1], [0, 0, 1, 1], [], []>} : vector<2x64xbf16>, vector<64x256xbf16>, vector<2x256xf32> -> vector<2x256xf32>
    %462 = arith.addf %461, %458 : vector<2x256xf32>
    %463 = vector.extract_strided_slice %462 {offsets = [0, 0], sizes = [2, 192], strides = [1, 1]} : vector<2x256xf32> to vector<2x192xf32>
    %464 = arith.negf %463 : vector<2x192xf32>
    %465 = math.exp %464 : vector<2x192xf32>
    %cst_69 = arith.constant 1.000000e+00 : f32
    %466 = vector.broadcast %cst_69 : f32 to vector<2x192xf32>
    %467 = arith.addf %466, %465 : vector<2x192xf32>
    %468 = arith.divf %466, %467 : vector<2x192xf32>
    %469 = vector.extract_strided_slice %462 {offsets = [0, 192], sizes = [2, 64], strides = [1, 1]} : vector<2x256xf32> to vector<2x64xf32>
    %470 = math.tanh %469 : vector<2x64xf32>
    %471 = vector.extract_strided_slice %468 {offsets = [0, 128], sizes = [2, 32], strides = [1, 1]} : vector<2x192xf32> to vector<2x32xf32>
    %472 = arith.mulf %471, %445 : vector<2x32xf32>
    %473 = vector.extract_strided_slice %468 {offsets = [0, 96], sizes = [2, 32], strides = [1, 1]} : vector<2x192xf32> to vector<2x32xf32>
    %474 = vector.extract_strided_slice %470 {offsets = [0, 32], sizes = [2, 32], strides = [1, 1]} : vector<2x64xf32> to vector<2x32xf32>
    %475 = arith.mulf %473, %474 : vector<2x32xf32>
    %476 = arith.addf %472, %475 : vector<2x32xf32>
    %477 = vector.extract_strided_slice %468 {offsets = [0, 160], sizes = [2, 32], strides = [1, 1]} : vector<2x192xf32> to vector<2x32xf32>
    %478 = math.tanh %476 : vector<2x32xf32>
    %479 = arith.mulf %477, %478 : vector<2x32xf32>
    %480 = vector.extract_strided_slice %468 {offsets = [0, 32], sizes = [2, 32], strides = [1, 1]} : vector<2x192xf32> to vector<2x32xf32>
    %481 = arith.mulf %480, %454 : vector<2x32xf32>
    %482 = vector.extract_strided_slice %468 {offsets = [0, 0], sizes = [2, 32], strides = [1, 1]} : vector<2x192xf32> to vector<2x32xf32>
    %483 = vector.extract_strided_slice %470 {offsets = [0, 0], sizes = [2, 32], strides = [1, 1]} : vector<2x64xf32> to vector<2x32xf32>
    %484 = arith.mulf %482, %483 : vector<2x32xf32>
    %485 = arith.addf %481, %484 : vector<2x32xf32>
    %486 = vector.extract_strided_slice %468 {offsets = [0, 64], sizes = [2, 32], strides = [1, 1]} : vector<2x192xf32> to vector<2x32xf32>
    %487 = math.tanh %485 : vector<2x32xf32>
    %488 = arith.mulf %486, %487 : vector<2x32xf32>
    %489 = vector.extract_strided_slice %63 {offsets = [26, 0], sizes = [2, 256], strides = [1, 1]} : vector<64x256xf32> to vector<2x256xf32>
    %490 = tpu.concatenate %488, %479 in 1 : vector<2x32xf32>, vector<2x32xf32> -> vector<2x64xf32>
    %491 = arith.truncf %490 : vector<2x64xf32> to vector<2x64xbf16>
    %cst_70 = arith.constant dense<0.000000e+00> : vector<2x256xf32>
    %492 = tpu.matmul %491, %99, %cst_70 {dimension_numbers = #tpu.dot_dimension_numbers<[1], [0], [0], [1], [0, 0, 1, 1], [], []>} : vector<2x64xbf16>, vector<64x256xbf16>, vector<2x256xf32> -> vector<2x256xf32>
    %493 = arith.addf %492, %489 : vector<2x256xf32>
    %494 = vector.extract_strided_slice %493 {offsets = [0, 0], sizes = [2, 192], strides = [1, 1]} : vector<2x256xf32> to vector<2x192xf32>
    %495 = arith.negf %494 : vector<2x192xf32>
    %496 = math.exp %495 : vector<2x192xf32>
    %cst_71 = arith.constant 1.000000e+00 : f32
    %497 = vector.broadcast %cst_71 : f32 to vector<2x192xf32>
    %498 = arith.addf %497, %496 : vector<2x192xf32>
    %499 = arith.divf %497, %498 : vector<2x192xf32>
    %500 = vector.extract_strided_slice %493 {offsets = [0, 192], sizes = [2, 64], strides = [1, 1]} : vector<2x256xf32> to vector<2x64xf32>
    %501 = math.tanh %500 : vector<2x64xf32>
    %502 = vector.extract_strided_slice %499 {offsets = [0, 128], sizes = [2, 32], strides = [1, 1]} : vector<2x192xf32> to vector<2x32xf32>
    %503 = arith.mulf %502, %476 : vector<2x32xf32>
    %504 = vector.extract_strided_slice %499 {offsets = [0, 96], sizes = [2, 32], strides = [1, 1]} : vector<2x192xf32> to vector<2x32xf32>
    %505 = vector.extract_strided_slice %501 {offsets = [0, 32], sizes = [2, 32], strides = [1, 1]} : vector<2x64xf32> to vector<2x32xf32>
    %506 = arith.mulf %504, %505 : vector<2x32xf32>
    %507 = arith.addf %503, %506 : vector<2x32xf32>
    %508 = vector.extract_strided_slice %499 {offsets = [0, 160], sizes = [2, 32], strides = [1, 1]} : vector<2x192xf32> to vector<2x32xf32>
    %509 = math.tanh %507 : vector<2x32xf32>
    %510 = arith.mulf %508, %509 : vector<2x32xf32>
    %511 = vector.extract_strided_slice %499 {offsets = [0, 32], sizes = [2, 32], strides = [1, 1]} : vector<2x192xf32> to vector<2x32xf32>
    %512 = arith.mulf %511, %485 : vector<2x32xf32>
    %513 = vector.extract_strided_slice %499 {offsets = [0, 0], sizes = [2, 32], strides = [1, 1]} : vector<2x192xf32> to vector<2x32xf32>
    %514 = vector.extract_strided_slice %501 {offsets = [0, 0], sizes = [2, 32], strides = [1, 1]} : vector<2x64xf32> to vector<2x32xf32>
    %515 = arith.mulf %513, %514 : vector<2x32xf32>
    %516 = arith.addf %512, %515 : vector<2x32xf32>
    %517 = vector.extract_strided_slice %499 {offsets = [0, 64], sizes = [2, 32], strides = [1, 1]} : vector<2x192xf32> to vector<2x32xf32>
    %518 = math.tanh %516 : vector<2x32xf32>
    %519 = arith.mulf %517, %518 : vector<2x32xf32>
    %520 = vector.extract_strided_slice %63 {offsets = [28, 0], sizes = [2, 256], strides = [1, 1]} : vector<64x256xf32> to vector<2x256xf32>
    %521 = tpu.concatenate %519, %510 in 1 : vector<2x32xf32>, vector<2x32xf32> -> vector<2x64xf32>
    %522 = arith.truncf %521 : vector<2x64xf32> to vector<2x64xbf16>
    %cst_72 = arith.constant dense<0.000000e+00> : vector<2x256xf32>
    %523 = tpu.matmul %522, %99, %cst_72 {dimension_numbers = #tpu.dot_dimension_numbers<[1], [0], [0], [1], [0, 0, 1, 1], [], []>} : vector<2x64xbf16>, vector<64x256xbf16>, vector<2x256xf32> -> vector<2x256xf32>
    %524 = arith.addf %523, %520 : vector<2x256xf32>
    %525 = vector.extract_strided_slice %524 {offsets = [0, 0], sizes = [2, 192], strides = [1, 1]} : vector<2x256xf32> to vector<2x192xf32>
    %526 = arith.negf %525 : vector<2x192xf32>
    %527 = math.exp %526 : vector<2x192xf32>
    %cst_73 = arith.constant 1.000000e+00 : f32
    %528 = vector.broadcast %cst_73 : f32 to vector<2x192xf32>
    %529 = arith.addf %528, %527 : vector<2x192xf32>
    %530 = arith.divf %528, %529 : vector<2x192xf32>
    %531 = vector.extract_strided_slice %524 {offsets = [0, 192], sizes = [2, 64], strides = [1, 1]} : vector<2x256xf32> to vector<2x64xf32>
    %532 = math.tanh %531 : vector<2x64xf32>
    %533 = vector.extract_strided_slice %530 {offsets = [0, 128], sizes = [2, 32], strides = [1, 1]} : vector<2x192xf32> to vector<2x32xf32>
    %534 = arith.mulf %533, %507 : vector<2x32xf32>
    %535 = vector.extract_strided_slice %530 {offsets = [0, 96], sizes = [2, 32], strides = [1, 1]} : vector<2x192xf32> to vector<2x32xf32>
    %536 = vector.extract_strided_slice %532 {offsets = [0, 32], sizes = [2, 32], strides = [1, 1]} : vector<2x64xf32> to vector<2x32xf32>
    %537 = arith.mulf %535, %536 : vector<2x32xf32>
    %538 = arith.addf %534, %537 : vector<2x32xf32>
    %539 = vector.extract_strided_slice %530 {offsets = [0, 160], sizes = [2, 32], strides = [1, 1]} : vector<2x192xf32> to vector<2x32xf32>
    %540 = math.tanh %538 : vector<2x32xf32>
    %541 = arith.mulf %539, %540 : vector<2x32xf32>
    %542 = vector.extract_strided_slice %530 {offsets = [0, 32], sizes = [2, 32], strides = [1, 1]} : vector<2x192xf32> to vector<2x32xf32>
    %543 = arith.mulf %542, %516 : vector<2x32xf32>
    %544 = vector.extract_strided_slice %530 {offsets = [0, 0], sizes = [2, 32], strides = [1, 1]} : vector<2x192xf32> to vector<2x32xf32>
    %545 = vector.extract_strided_slice %532 {offsets = [0, 0], sizes = [2, 32], strides = [1, 1]} : vector<2x64xf32> to vector<2x32xf32>
    %546 = arith.mulf %544, %545 : vector<2x32xf32>
    %547 = arith.addf %543, %546 : vector<2x32xf32>
    %548 = vector.extract_strided_slice %530 {offsets = [0, 64], sizes = [2, 32], strides = [1, 1]} : vector<2x192xf32> to vector<2x32xf32>
    %549 = math.tanh %547 : vector<2x32xf32>
    %550 = arith.mulf %548, %549 : vector<2x32xf32>
    %551 = vector.extract_strided_slice %63 {offsets = [30, 0], sizes = [2, 256], strides = [1, 1]} : vector<64x256xf32> to vector<2x256xf32>
    %552 = tpu.concatenate %550, %541 in 1 : vector<2x32xf32>, vector<2x32xf32> -> vector<2x64xf32>
    %553 = arith.truncf %552 : vector<2x64xf32> to vector<2x64xbf16>
    %cst_74 = arith.constant dense<0.000000e+00> : vector<2x256xf32>
    %554 = tpu.matmul %553, %99, %cst_74 {dimension_numbers = #tpu.dot_dimension_numbers<[1], [0], [0], [1], [0, 0, 1, 1], [], []>} : vector<2x64xbf16>, vector<64x256xbf16>, vector<2x256xf32> -> vector<2x256xf32>
    %555 = arith.addf %554, %551 : vector<2x256xf32>
    %556 = vector.extract_strided_slice %555 {offsets = [0, 0], sizes = [2, 192], strides = [1, 1]} : vector<2x256xf32> to vector<2x192xf32>
    %557 = arith.negf %556 : vector<2x192xf32>
    %558 = math.exp %557 : vector<2x192xf32>
    %cst_75 = arith.constant 1.000000e+00 : f32
    %559 = vector.broadcast %cst_75 : f32 to vector<2x192xf32>
    %560 = arith.addf %559, %558 : vector<2x192xf32>
    %561 = arith.divf %559, %560 : vector<2x192xf32>
    %562 = vector.extract_strided_slice %555 {offsets = [0, 192], sizes = [2, 64], strides = [1, 1]} : vector<2x256xf32> to vector<2x64xf32>
    %563 = math.tanh %562 : vector<2x64xf32>
    %564 = vector.extract_strided_slice %561 {offsets = [0, 128], sizes = [2, 32], strides = [1, 1]} : vector<2x192xf32> to vector<2x32xf32>
    %565 = arith.mulf %564, %538 : vector<2x32xf32>
    %566 = vector.extract_strided_slice %561 {offsets = [0, 96], sizes = [2, 32], strides = [1, 1]} : vector<2x192xf32> to vector<2x32xf32>
    %567 = vector.extract_strided_slice %563 {offsets = [0, 32], sizes = [2, 32], strides = [1, 1]} : vector<2x64xf32> to vector<2x32xf32>
    %568 = arith.mulf %566, %567 : vector<2x32xf32>
    %569 = arith.addf %565, %568 : vector<2x32xf32>
    %570 = vector.extract_strided_slice %561 {offsets = [0, 160], sizes = [2, 32], strides = [1, 1]} : vector<2x192xf32> to vector<2x32xf32>
    %571 = math.tanh %569 : vector<2x32xf32>
    %572 = arith.mulf %570, %571 : vector<2x32xf32>
    %573 = vector.extract_strided_slice %561 {offsets = [0, 32], sizes = [2, 32], strides = [1, 1]} : vector<2x192xf32> to vector<2x32xf32>
    %574 = arith.mulf %573, %547 : vector<2x32xf32>
    %575 = vector.extract_strided_slice %561 {offsets = [0, 0], sizes = [2, 32], strides = [1, 1]} : vector<2x192xf32> to vector<2x32xf32>
    %576 = vector.extract_strided_slice %563 {offsets = [0, 0], sizes = [2, 32], strides = [1, 1]} : vector<2x64xf32> to vector<2x32xf32>
    %577 = arith.mulf %575, %576 : vector<2x32xf32>
    %578 = arith.addf %574, %577 : vector<2x32xf32>
    %579 = vector.extract_strided_slice %561 {offsets = [0, 64], sizes = [2, 32], strides = [1, 1]} : vector<2x192xf32> to vector<2x32xf32>
    %580 = math.tanh %578 : vector<2x32xf32>
    %581 = arith.mulf %579, %580 : vector<2x32xf32>
    %582 = vector.extract_strided_slice %63 {offsets = [32, 0], sizes = [2, 256], strides = [1, 1]} : vector<64x256xf32> to vector<2x256xf32>
    %583 = tpu.concatenate %581, %572 in 1 : vector<2x32xf32>, vector<2x32xf32> -> vector<2x64xf32>
    %584 = arith.truncf %583 : vector<2x64xf32> to vector<2x64xbf16>
    %cst_76 = arith.constant dense<0.000000e+00> : vector<2x256xf32>
    %585 = tpu.matmul %584, %99, %cst_76 {dimension_numbers = #tpu.dot_dimension_numbers<[1], [0], [0], [1], [0, 0, 1, 1], [], []>} : vector<2x64xbf16>, vector<64x256xbf16>, vector<2x256xf32> -> vector<2x256xf32>
    %586 = arith.addf %585, %582 : vector<2x256xf32>
    %587 = vector.extract_strided_slice %586 {offsets = [0, 0], sizes = [2, 192], strides = [1, 1]} : vector<2x256xf32> to vector<2x192xf32>
    %588 = arith.negf %587 : vector<2x192xf32>
    %589 = math.exp %588 : vector<2x192xf32>
    %cst_77 = arith.constant 1.000000e+00 : f32
    %590 = vector.broadcast %cst_77 : f32 to vector<2x192xf32>
    %591 = arith.addf %590, %589 : vector<2x192xf32>
    %592 = arith.divf %590, %591 : vector<2x192xf32>
    %593 = vector.extract_strided_slice %586 {offsets = [0, 192], sizes = [2, 64], strides = [1, 1]} : vector<2x256xf32> to vector<2x64xf32>
    %594 = math.tanh %593 : vector<2x64xf32>
    %595 = vector.extract_strided_slice %592 {offsets = [0, 128], sizes = [2, 32], strides = [1, 1]} : vector<2x192xf32> to vector<2x32xf32>
    %596 = arith.mulf %595, %569 : vector<2x32xf32>
    %597 = vector.extract_strided_slice %592 {offsets = [0, 96], sizes = [2, 32], strides = [1, 1]} : vector<2x192xf32> to vector<2x32xf32>
    %598 = vector.extract_strided_slice %594 {offsets = [0, 32], sizes = [2, 32], strides = [1, 1]} : vector<2x64xf32> to vector<2x32xf32>
    %599 = arith.mulf %597, %598 : vector<2x32xf32>
    %600 = arith.addf %596, %599 : vector<2x32xf32>
    %601 = vector.extract_strided_slice %592 {offsets = [0, 160], sizes = [2, 32], strides = [1, 1]} : vector<2x192xf32> to vector<2x32xf32>
    %602 = math.tanh %600 : vector<2x32xf32>
    %603 = arith.mulf %601, %602 : vector<2x32xf32>
    %604 = vector.extract_strided_slice %592 {offsets = [0, 32], sizes = [2, 32], strides = [1, 1]} : vector<2x192xf32> to vector<2x32xf32>
    %605 = arith.mulf %604, %578 : vector<2x32xf32>
    %606 = vector.extract_strided_slice %592 {offsets = [0, 0], sizes = [2, 32], strides = [1, 1]} : vector<2x192xf32> to vector<2x32xf32>
    %607 = vector.extract_strided_slice %594 {offsets = [0, 0], sizes = [2, 32], strides = [1, 1]} : vector<2x64xf32> to vector<2x32xf32>
    %608 = arith.mulf %606, %607 : vector<2x32xf32>
    %609 = arith.addf %605, %608 : vector<2x32xf32>
    %610 = vector.extract_strided_slice %592 {offsets = [0, 64], sizes = [2, 32], strides = [1, 1]} : vector<2x192xf32> to vector<2x32xf32>
    %611 = math.tanh %609 : vector<2x32xf32>
    %612 = arith.mulf %610, %611 : vector<2x32xf32>
    %613 = vector.extract_strided_slice %63 {offsets = [34, 0], sizes = [2, 256], strides = [1, 1]} : vector<64x256xf32> to vector<2x256xf32>
    %614 = tpu.concatenate %612, %603 in 1 : vector<2x32xf32>, vector<2x32xf32> -> vector<2x64xf32>
    %615 = arith.truncf %614 : vector<2x64xf32> to vector<2x64xbf16>
    %cst_78 = arith.constant dense<0.000000e+00> : vector<2x256xf32>
    %616 = tpu.matmul %615, %99, %cst_78 {dimension_numbers = #tpu.dot_dimension_numbers<[1], [0], [0], [1], [0, 0, 1, 1], [], []>} : vector<2x64xbf16>, vector<64x256xbf16>, vector<2x256xf32> -> vector<2x256xf32>
    %617 = arith.addf %616, %613 : vector<2x256xf32>
    %618 = vector.extract_strided_slice %617 {offsets = [0, 0], sizes = [2, 192], strides = [1, 1]} : vector<2x256xf32> to vector<2x192xf32>
    %619 = arith.negf %618 : vector<2x192xf32>
    %620 = math.exp %619 : vector<2x192xf32>
    %cst_79 = arith.constant 1.000000e+00 : f32
    %621 = vector.broadcast %cst_79 : f32 to vector<2x192xf32>
    %622 = arith.addf %621, %620 : vector<2x192xf32>
    %623 = arith.divf %621, %622 : vector<2x192xf32>
    %624 = vector.extract_strided_slice %617 {offsets = [0, 192], sizes = [2, 64], strides = [1, 1]} : vector<2x256xf32> to vector<2x64xf32>
    %625 = math.tanh %624 : vector<2x64xf32>
    %626 = vector.extract_strided_slice %623 {offsets = [0, 128], sizes = [2, 32], strides = [1, 1]} : vector<2x192xf32> to vector<2x32xf32>
    %627 = arith.mulf %626, %600 : vector<2x32xf32>
    %628 = vector.extract_strided_slice %623 {offsets = [0, 96], sizes = [2, 32], strides = [1, 1]} : vector<2x192xf32> to vector<2x32xf32>
    %629 = vector.extract_strided_slice %625 {offsets = [0, 32], sizes = [2, 32], strides = [1, 1]} : vector<2x64xf32> to vector<2x32xf32>
    %630 = arith.mulf %628, %629 : vector<2x32xf32>
    %631 = arith.addf %627, %630 : vector<2x32xf32>
    %632 = vector.extract_strided_slice %623 {offsets = [0, 160], sizes = [2, 32], strides = [1, 1]} : vector<2x192xf32> to vector<2x32xf32>
    %633 = math.tanh %631 : vector<2x32xf32>
    %634 = arith.mulf %632, %633 : vector<2x32xf32>
    %635 = vector.extract_strided_slice %623 {offsets = [0, 32], sizes = [2, 32], strides = [1, 1]} : vector<2x192xf32> to vector<2x32xf32>
    %636 = arith.mulf %635, %609 : vector<2x32xf32>
    %637 = vector.extract_strided_slice %623 {offsets = [0, 0], sizes = [2, 32], strides = [1, 1]} : vector<2x192xf32> to vector<2x32xf32>
    %638 = vector.extract_strided_slice %625 {offsets = [0, 0], sizes = [2, 32], strides = [1, 1]} : vector<2x64xf32> to vector<2x32xf32>
    %639 = arith.mulf %637, %638 : vector<2x32xf32>
    %640 = arith.addf %636, %639 : vector<2x32xf32>
    %641 = vector.extract_strided_slice %623 {offsets = [0, 64], sizes = [2, 32], strides = [1, 1]} : vector<2x192xf32> to vector<2x32xf32>
    %642 = math.tanh %640 : vector<2x32xf32>
    %643 = arith.mulf %641, %642 : vector<2x32xf32>
    %644 = vector.extract_strided_slice %63 {offsets = [36, 0], sizes = [2, 256], strides = [1, 1]} : vector<64x256xf32> to vector<2x256xf32>
    %645 = tpu.concatenate %643, %634 in 1 : vector<2x32xf32>, vector<2x32xf32> -> vector<2x64xf32>
    %646 = arith.truncf %645 : vector<2x64xf32> to vector<2x64xbf16>
    %cst_80 = arith.constant dense<0.000000e+00> : vector<2x256xf32>
    %647 = tpu.matmul %646, %99, %cst_80 {dimension_numbers = #tpu.dot_dimension_numbers<[1], [0], [0], [1], [0, 0, 1, 1], [], []>} : vector<2x64xbf16>, vector<64x256xbf16>, vector<2x256xf32> -> vector<2x256xf32>
    %648 = arith.addf %647, %644 : vector<2x256xf32>
    %649 = vector.extract_strided_slice %648 {offsets = [0, 0], sizes = [2, 192], strides = [1, 1]} : vector<2x256xf32> to vector<2x192xf32>
    %650 = arith.negf %649 : vector<2x192xf32>
    %651 = math.exp %650 : vector<2x192xf32>
    %cst_81 = arith.constant 1.000000e+00 : f32
    %652 = vector.broadcast %cst_81 : f32 to vector<2x192xf32>
    %653 = arith.addf %652, %651 : vector<2x192xf32>
    %654 = arith.divf %652, %653 : vector<2x192xf32>
    %655 = vector.extract_strided_slice %648 {offsets = [0, 192], sizes = [2, 64], strides = [1, 1]} : vector<2x256xf32> to vector<2x64xf32>
    %656 = math.tanh %655 : vector<2x64xf32>
    %657 = vector.extract_strided_slice %654 {offsets = [0, 128], sizes = [2, 32], strides = [1, 1]} : vector<2x192xf32> to vector<2x32xf32>
    %658 = arith.mulf %657, %631 : vector<2x32xf32>
    %659 = vector.extract_strided_slice %654 {offsets = [0, 96], sizes = [2, 32], strides = [1, 1]} : vector<2x192xf32> to vector<2x32xf32>
    %660 = vector.extract_strided_slice %656 {offsets = [0, 32], sizes = [2, 32], strides = [1, 1]} : vector<2x64xf32> to vector<2x32xf32>
    %661 = arith.mulf %659, %660 : vector<2x32xf32>
    %662 = arith.addf %658, %661 : vector<2x32xf32>
    %663 = vector.extract_strided_slice %654 {offsets = [0, 160], sizes = [2, 32], strides = [1, 1]} : vector<2x192xf32> to vector<2x32xf32>
    %664 = math.tanh %662 : vector<2x32xf32>
    %665 = arith.mulf %663, %664 : vector<2x32xf32>
    %666 = vector.extract_strided_slice %654 {offsets = [0, 32], sizes = [2, 32], strides = [1, 1]} : vector<2x192xf32> to vector<2x32xf32>
    %667 = arith.mulf %666, %640 : vector<2x32xf32>
    %668 = vector.extract_strided_slice %654 {offsets = [0, 0], sizes = [2, 32], strides = [1, 1]} : vector<2x192xf32> to vector<2x32xf32>
    %669 = vector.extract_strided_slice %656 {offsets = [0, 0], sizes = [2, 32], strides = [1, 1]} : vector<2x64xf32> to vector<2x32xf32>
    %670 = arith.mulf %668, %669 : vector<2x32xf32>
    %671 = arith.addf %667, %670 : vector<2x32xf32>
    %672 = vector.extract_strided_slice %654 {offsets = [0, 64], sizes = [2, 32], strides = [1, 1]} : vector<2x192xf32> to vector<2x32xf32>
    %673 = math.tanh %671 : vector<2x32xf32>
    %674 = arith.mulf %672, %673 : vector<2x32xf32>
    %675 = vector.extract_strided_slice %63 {offsets = [38, 0], sizes = [2, 256], strides = [1, 1]} : vector<64x256xf32> to vector<2x256xf32>
    %676 = tpu.concatenate %674, %665 in 1 : vector<2x32xf32>, vector<2x32xf32> -> vector<2x64xf32>
    %677 = arith.truncf %676 : vector<2x64xf32> to vector<2x64xbf16>
    %cst_82 = arith.constant dense<0.000000e+00> : vector<2x256xf32>
    %678 = tpu.matmul %677, %99, %cst_82 {dimension_numbers = #tpu.dot_dimension_numbers<[1], [0], [0], [1], [0, 0, 1, 1], [], []>} : vector<2x64xbf16>, vector<64x256xbf16>, vector<2x256xf32> -> vector<2x256xf32>
    %679 = arith.addf %678, %675 : vector<2x256xf32>
    %680 = vector.extract_strided_slice %679 {offsets = [0, 0], sizes = [2, 192], strides = [1, 1]} : vector<2x256xf32> to vector<2x192xf32>
    %681 = arith.negf %680 : vector<2x192xf32>
    %682 = math.exp %681 : vector<2x192xf32>
    %cst_83 = arith.constant 1.000000e+00 : f32
    %683 = vector.broadcast %cst_83 : f32 to vector<2x192xf32>
    %684 = arith.addf %683, %682 : vector<2x192xf32>
    %685 = arith.divf %683, %684 : vector<2x192xf32>
    %686 = vector.extract_strided_slice %679 {offsets = [0, 192], sizes = [2, 64], strides = [1, 1]} : vector<2x256xf32> to vector<2x64xf32>
    %687 = math.tanh %686 : vector<2x64xf32>
    %688 = vector.extract_strided_slice %685 {offsets = [0, 128], sizes = [2, 32], strides = [1, 1]} : vector<2x192xf32> to vector<2x32xf32>
    %689 = arith.mulf %688, %662 : vector<2x32xf32>
    %690 = vector.extract_strided_slice %685 {offsets = [0, 96], sizes = [2, 32], strides = [1, 1]} : vector<2x192xf32> to vector<2x32xf32>
    %691 = vector.extract_strided_slice %687 {offsets = [0, 32], sizes = [2, 32], strides = [1, 1]} : vector<2x64xf32> to vector<2x32xf32>
    %692 = arith.mulf %690, %691 : vector<2x32xf32>
    %693 = arith.addf %689, %692 : vector<2x32xf32>
    %694 = vector.extract_strided_slice %685 {offsets = [0, 160], sizes = [2, 32], strides = [1, 1]} : vector<2x192xf32> to vector<2x32xf32>
    %695 = math.tanh %693 : vector<2x32xf32>
    %696 = arith.mulf %694, %695 : vector<2x32xf32>
    %697 = vector.extract_strided_slice %685 {offsets = [0, 32], sizes = [2, 32], strides = [1, 1]} : vector<2x192xf32> to vector<2x32xf32>
    %698 = arith.mulf %697, %671 : vector<2x32xf32>
    %699 = vector.extract_strided_slice %685 {offsets = [0, 0], sizes = [2, 32], strides = [1, 1]} : vector<2x192xf32> to vector<2x32xf32>
    %700 = vector.extract_strided_slice %687 {offsets = [0, 0], sizes = [2, 32], strides = [1, 1]} : vector<2x64xf32> to vector<2x32xf32>
    %701 = arith.mulf %699, %700 : vector<2x32xf32>
    %702 = arith.addf %698, %701 : vector<2x32xf32>
    %703 = vector.extract_strided_slice %685 {offsets = [0, 64], sizes = [2, 32], strides = [1, 1]} : vector<2x192xf32> to vector<2x32xf32>
    %704 = math.tanh %702 : vector<2x32xf32>
    %705 = arith.mulf %703, %704 : vector<2x32xf32>
    %706 = vector.extract_strided_slice %63 {offsets = [40, 0], sizes = [2, 256], strides = [1, 1]} : vector<64x256xf32> to vector<2x256xf32>
    %707 = tpu.concatenate %705, %696 in 1 : vector<2x32xf32>, vector<2x32xf32> -> vector<2x64xf32>
    %708 = arith.truncf %707 : vector<2x64xf32> to vector<2x64xbf16>
    %cst_84 = arith.constant dense<0.000000e+00> : vector<2x256xf32>
    %709 = tpu.matmul %708, %99, %cst_84 {dimension_numbers = #tpu.dot_dimension_numbers<[1], [0], [0], [1], [0, 0, 1, 1], [], []>} : vector<2x64xbf16>, vector<64x256xbf16>, vector<2x256xf32> -> vector<2x256xf32>
    %710 = arith.addf %709, %706 : vector<2x256xf32>
    %711 = vector.extract_strided_slice %710 {offsets = [0, 0], sizes = [2, 192], strides = [1, 1]} : vector<2x256xf32> to vector<2x192xf32>
    %712 = arith.negf %711 : vector<2x192xf32>
    %713 = math.exp %712 : vector<2x192xf32>
    %cst_85 = arith.constant 1.000000e+00 : f32
    %714 = vector.broadcast %cst_85 : f32 to vector<2x192xf32>
    %715 = arith.addf %714, %713 : vector<2x192xf32>
    %716 = arith.divf %714, %715 : vector<2x192xf32>
    %717 = vector.extract_strided_slice %710 {offsets = [0, 192], sizes = [2, 64], strides = [1, 1]} : vector<2x256xf32> to vector<2x64xf32>
    %718 = math.tanh %717 : vector<2x64xf32>
    %719 = vector.extract_strided_slice %716 {offsets = [0, 128], sizes = [2, 32], strides = [1, 1]} : vector<2x192xf32> to vector<2x32xf32>
    %720 = arith.mulf %719, %693 : vector<2x32xf32>
    %721 = vector.extract_strided_slice %716 {offsets = [0, 96], sizes = [2, 32], strides = [1, 1]} : vector<2x192xf32> to vector<2x32xf32>
    %722 = vector.extract_strided_slice %718 {offsets = [0, 32], sizes = [2, 32], strides = [1, 1]} : vector<2x64xf32> to vector<2x32xf32>
    %723 = arith.mulf %721, %722 : vector<2x32xf32>
    %724 = arith.addf %720, %723 : vector<2x32xf32>
    %725 = vector.extract_strided_slice %716 {offsets = [0, 160], sizes = [2, 32], strides = [1, 1]} : vector<2x192xf32> to vector<2x32xf32>
    %726 = math.tanh %724 : vector<2x32xf32>
    %727 = arith.mulf %725, %726 : vector<2x32xf32>
    %728 = vector.extract_strided_slice %716 {offsets = [0, 32], sizes = [2, 32], strides = [1, 1]} : vector<2x192xf32> to vector<2x32xf32>
    %729 = arith.mulf %728, %702 : vector<2x32xf32>
    %730 = vector.extract_strided_slice %716 {offsets = [0, 0], sizes = [2, 32], strides = [1, 1]} : vector<2x192xf32> to vector<2x32xf32>
    %731 = vector.extract_strided_slice %718 {offsets = [0, 0], sizes = [2, 32], strides = [1, 1]} : vector<2x64xf32> to vector<2x32xf32>
    %732 = arith.mulf %730, %731 : vector<2x32xf32>
    %733 = arith.addf %729, %732 : vector<2x32xf32>
    %734 = vector.extract_strided_slice %716 {offsets = [0, 64], sizes = [2, 32], strides = [1, 1]} : vector<2x192xf32> to vector<2x32xf32>
    %735 = math.tanh %733 : vector<2x32xf32>
    %736 = arith.mulf %734, %735 : vector<2x32xf32>
    %737 = vector.extract_strided_slice %63 {offsets = [42, 0], sizes = [2, 256], strides = [1, 1]} : vector<64x256xf32> to vector<2x256xf32>
    %738 = tpu.concatenate %736, %727 in 1 : vector<2x32xf32>, vector<2x32xf32> -> vector<2x64xf32>
    %739 = arith.truncf %738 : vector<2x64xf32> to vector<2x64xbf16>
    %cst_86 = arith.constant dense<0.000000e+00> : vector<2x256xf32>
    %740 = tpu.matmul %739, %99, %cst_86 {dimension_numbers = #tpu.dot_dimension_numbers<[1], [0], [0], [1], [0, 0, 1, 1], [], []>} : vector<2x64xbf16>, vector<64x256xbf16>, vector<2x256xf32> -> vector<2x256xf32>
    %741 = arith.addf %740, %737 : vector<2x256xf32>
    %742 = vector.extract_strided_slice %741 {offsets = [0, 0], sizes = [2, 192], strides = [1, 1]} : vector<2x256xf32> to vector<2x192xf32>
    %743 = arith.negf %742 : vector<2x192xf32>
    %744 = math.exp %743 : vector<2x192xf32>
    %cst_87 = arith.constant 1.000000e+00 : f32
    %745 = vector.broadcast %cst_87 : f32 to vector<2x192xf32>
    %746 = arith.addf %745, %744 : vector<2x192xf32>
    %747 = arith.divf %745, %746 : vector<2x192xf32>
    %748 = vector.extract_strided_slice %741 {offsets = [0, 192], sizes = [2, 64], strides = [1, 1]} : vector<2x256xf32> to vector<2x64xf32>
    %749 = math.tanh %748 : vector<2x64xf32>
    %750 = vector.extract_strided_slice %747 {offsets = [0, 128], sizes = [2, 32], strides = [1, 1]} : vector<2x192xf32> to vector<2x32xf32>
    %751 = arith.mulf %750, %724 : vector<2x32xf32>
    %752 = vector.extract_strided_slice %747 {offsets = [0, 96], sizes = [2, 32], strides = [1, 1]} : vector<2x192xf32> to vector<2x32xf32>
    %753 = vector.extract_strided_slice %749 {offsets = [0, 32], sizes = [2, 32], strides = [1, 1]} : vector<2x64xf32> to vector<2x32xf32>
    %754 = arith.mulf %752, %753 : vector<2x32xf32>
    %755 = arith.addf %751, %754 : vector<2x32xf32>
    %756 = vector.extract_strided_slice %747 {offsets = [0, 160], sizes = [2, 32], strides = [1, 1]} : vector<2x192xf32> to vector<2x32xf32>
    %757 = math.tanh %755 : vector<2x32xf32>
    %758 = arith.mulf %756, %757 : vector<2x32xf32>
    %759 = vector.extract_strided_slice %747 {offsets = [0, 32], sizes = [2, 32], strides = [1, 1]} : vector<2x192xf32> to vector<2x32xf32>
    %760 = arith.mulf %759, %733 : vector<2x32xf32>
    %761 = vector.extract_strided_slice %747 {offsets = [0, 0], sizes = [2, 32], strides = [1, 1]} : vector<2x192xf32> to vector<2x32xf32>
    %762 = vector.extract_strided_slice %749 {offsets = [0, 0], sizes = [2, 32], strides = [1, 1]} : vector<2x64xf32> to vector<2x32xf32>
    %763 = arith.mulf %761, %762 : vector<2x32xf32>
    %764 = arith.addf %760, %763 : vector<2x32xf32>
    %765 = vector.extract_strided_slice %747 {offsets = [0, 64], sizes = [2, 32], strides = [1, 1]} : vector<2x192xf32> to vector<2x32xf32>
    %766 = math.tanh %764 : vector<2x32xf32>
    %767 = arith.mulf %765, %766 : vector<2x32xf32>
    %768 = vector.extract_strided_slice %63 {offsets = [44, 0], sizes = [2, 256], strides = [1, 1]} : vector<64x256xf32> to vector<2x256xf32>
    %769 = tpu.concatenate %767, %758 in 1 : vector<2x32xf32>, vector<2x32xf32> -> vector<2x64xf32>
    %770 = arith.truncf %769 : vector<2x64xf32> to vector<2x64xbf16>
    %cst_88 = arith.constant dense<0.000000e+00> : vector<2x256xf32>
    %771 = tpu.matmul %770, %99, %cst_88 {dimension_numbers = #tpu.dot_dimension_numbers<[1], [0], [0], [1], [0, 0, 1, 1], [], []>} : vector<2x64xbf16>, vector<64x256xbf16>, vector<2x256xf32> -> vector<2x256xf32>
    %772 = arith.addf %771, %768 : vector<2x256xf32>
    %773 = vector.extract_strided_slice %772 {offsets = [0, 0], sizes = [2, 192], strides = [1, 1]} : vector<2x256xf32> to vector<2x192xf32>
    %774 = arith.negf %773 : vector<2x192xf32>
    %775 = math.exp %774 : vector<2x192xf32>
    %cst_89 = arith.constant 1.000000e+00 : f32
    %776 = vector.broadcast %cst_89 : f32 to vector<2x192xf32>
    %777 = arith.addf %776, %775 : vector<2x192xf32>
    %778 = arith.divf %776, %777 : vector<2x192xf32>
    %779 = vector.extract_strided_slice %772 {offsets = [0, 192], sizes = [2, 64], strides = [1, 1]} : vector<2x256xf32> to vector<2x64xf32>
    %780 = math.tanh %779 : vector<2x64xf32>
    %781 = vector.extract_strided_slice %778 {offsets = [0, 128], sizes = [2, 32], strides = [1, 1]} : vector<2x192xf32> to vector<2x32xf32>
    %782 = arith.mulf %781, %755 : vector<2x32xf32>
    %783 = vector.extract_strided_slice %778 {offsets = [0, 96], sizes = [2, 32], strides = [1, 1]} : vector<2x192xf32> to vector<2x32xf32>
    %784 = vector.extract_strided_slice %780 {offsets = [0, 32], sizes = [2, 32], strides = [1, 1]} : vector<2x64xf32> to vector<2x32xf32>
    %785 = arith.mulf %783, %784 : vector<2x32xf32>
    %786 = arith.addf %782, %785 : vector<2x32xf32>
    %787 = vector.extract_strided_slice %778 {offsets = [0, 160], sizes = [2, 32], strides = [1, 1]} : vector<2x192xf32> to vector<2x32xf32>
    %788 = math.tanh %786 : vector<2x32xf32>
    %789 = arith.mulf %787, %788 : vector<2x32xf32>
    %790 = vector.extract_strided_slice %778 {offsets = [0, 32], sizes = [2, 32], strides = [1, 1]} : vector<2x192xf32> to vector<2x32xf32>
    %791 = arith.mulf %790, %764 : vector<2x32xf32>
    %792 = vector.extract_strided_slice %778 {offsets = [0, 0], sizes = [2, 32], strides = [1, 1]} : vector<2x192xf32> to vector<2x32xf32>
    %793 = vector.extract_strided_slice %780 {offsets = [0, 0], sizes = [2, 32], strides = [1, 1]} : vector<2x64xf32> to vector<2x32xf32>
    %794 = arith.mulf %792, %793 : vector<2x32xf32>
    %795 = arith.addf %791, %794 : vector<2x32xf32>
    %796 = vector.extract_strided_slice %778 {offsets = [0, 64], sizes = [2, 32], strides = [1, 1]} : vector<2x192xf32> to vector<2x32xf32>
    %797 = math.tanh %795 : vector<2x32xf32>
    %798 = arith.mulf %796, %797 : vector<2x32xf32>
    %799 = vector.extract_strided_slice %63 {offsets = [46, 0], sizes = [2, 256], strides = [1, 1]} : vector<64x256xf32> to vector<2x256xf32>
    %800 = tpu.concatenate %798, %789 in 1 : vector<2x32xf32>, vector<2x32xf32> -> vector<2x64xf32>
    %801 = arith.truncf %800 : vector<2x64xf32> to vector<2x64xbf16>
    %cst_90 = arith.constant dense<0.000000e+00> : vector<2x256xf32>
    %802 = tpu.matmul %801, %99, %cst_90 {dimension_numbers = #tpu.dot_dimension_numbers<[1], [0], [0], [1], [0, 0, 1, 1], [], []>} : vector<2x64xbf16>, vector<64x256xbf16>, vector<2x256xf32> -> vector<2x256xf32>
    %803 = arith.addf %802, %799 : vector<2x256xf32>
    %804 = vector.extract_strided_slice %803 {offsets = [0, 0], sizes = [2, 192], strides = [1, 1]} : vector<2x256xf32> to vector<2x192xf32>
    %805 = arith.negf %804 : vector<2x192xf32>
    %806 = math.exp %805 : vector<2x192xf32>
    %cst_91 = arith.constant 1.000000e+00 : f32
    %807 = vector.broadcast %cst_91 : f32 to vector<2x192xf32>
    %808 = arith.addf %807, %806 : vector<2x192xf32>
    %809 = arith.divf %807, %808 : vector<2x192xf32>
    %810 = vector.extract_strided_slice %803 {offsets = [0, 192], sizes = [2, 64], strides = [1, 1]} : vector<2x256xf32> to vector<2x64xf32>
    %811 = math.tanh %810 : vector<2x64xf32>
    %812 = vector.extract_strided_slice %809 {offsets = [0, 128], sizes = [2, 32], strides = [1, 1]} : vector<2x192xf32> to vector<2x32xf32>
    %813 = arith.mulf %812, %786 : vector<2x32xf32>
    %814 = vector.extract_strided_slice %809 {offsets = [0, 96], sizes = [2, 32], strides = [1, 1]} : vector<2x192xf32> to vector<2x32xf32>
    %815 = vector.extract_strided_slice %811 {offsets = [0, 32], sizes = [2, 32], strides = [1, 1]} : vector<2x64xf32> to vector<2x32xf32>
    %816 = arith.mulf %814, %815 : vector<2x32xf32>
    %817 = arith.addf %813, %816 : vector<2x32xf32>
    %818 = vector.extract_strided_slice %809 {offsets = [0, 160], sizes = [2, 32], strides = [1, 1]} : vector<2x192xf32> to vector<2x32xf32>
    %819 = math.tanh %817 : vector<2x32xf32>
    %820 = arith.mulf %818, %819 : vector<2x32xf32>
    %821 = vector.extract_strided_slice %809 {offsets = [0, 32], sizes = [2, 32], strides = [1, 1]} : vector<2x192xf32> to vector<2x32xf32>
    %822 = arith.mulf %821, %795 : vector<2x32xf32>
    %823 = vector.extract_strided_slice %809 {offsets = [0, 0], sizes = [2, 32], strides = [1, 1]} : vector<2x192xf32> to vector<2x32xf32>
    %824 = vector.extract_strided_slice %811 {offsets = [0, 0], sizes = [2, 32], strides = [1, 1]} : vector<2x64xf32> to vector<2x32xf32>
    %825 = arith.mulf %823, %824 : vector<2x32xf32>
    %826 = arith.addf %822, %825 : vector<2x32xf32>
    %827 = vector.extract_strided_slice %809 {offsets = [0, 64], sizes = [2, 32], strides = [1, 1]} : vector<2x192xf32> to vector<2x32xf32>
    %828 = math.tanh %826 : vector<2x32xf32>
    %829 = arith.mulf %827, %828 : vector<2x32xf32>
    %830 = vector.extract_strided_slice %63 {offsets = [48, 0], sizes = [2, 256], strides = [1, 1]} : vector<64x256xf32> to vector<2x256xf32>
    %831 = tpu.concatenate %829, %820 in 1 : vector<2x32xf32>, vector<2x32xf32> -> vector<2x64xf32>
    %832 = arith.truncf %831 : vector<2x64xf32> to vector<2x64xbf16>
    %cst_92 = arith.constant dense<0.000000e+00> : vector<2x256xf32>
    %833 = tpu.matmul %832, %99, %cst_92 {dimension_numbers = #tpu.dot_dimension_numbers<[1], [0], [0], [1], [0, 0, 1, 1], [], []>} : vector<2x64xbf16>, vector<64x256xbf16>, vector<2x256xf32> -> vector<2x256xf32>
    %834 = arith.addf %833, %830 : vector<2x256xf32>
    %835 = vector.extract_strided_slice %834 {offsets = [0, 0], sizes = [2, 192], strides = [1, 1]} : vector<2x256xf32> to vector<2x192xf32>
    %836 = arith.negf %835 : vector<2x192xf32>
    %837 = math.exp %836 : vector<2x192xf32>
    %cst_93 = arith.constant 1.000000e+00 : f32
    %838 = vector.broadcast %cst_93 : f32 to vector<2x192xf32>
    %839 = arith.addf %838, %837 : vector<2x192xf32>
    %840 = arith.divf %838, %839 : vector<2x192xf32>
    %841 = vector.extract_strided_slice %834 {offsets = [0, 192], sizes = [2, 64], strides = [1, 1]} : vector<2x256xf32> to vector<2x64xf32>
    %842 = math.tanh %841 : vector<2x64xf32>
    %843 = vector.extract_strided_slice %840 {offsets = [0, 128], sizes = [2, 32], strides = [1, 1]} : vector<2x192xf32> to vector<2x32xf32>
    %844 = arith.mulf %843, %817 : vector<2x32xf32>
    %845 = vector.extract_strided_slice %840 {offsets = [0, 96], sizes = [2, 32], strides = [1, 1]} : vector<2x192xf32> to vector<2x32xf32>
    %846 = vector.extract_strided_slice %842 {offsets = [0, 32], sizes = [2, 32], strides = [1, 1]} : vector<2x64xf32> to vector<2x32xf32>
    %847 = arith.mulf %845, %846 : vector<2x32xf32>
    %848 = arith.addf %844, %847 : vector<2x32xf32>
    %849 = vector.extract_strided_slice %840 {offsets = [0, 160], sizes = [2, 32], strides = [1, 1]} : vector<2x192xf32> to vector<2x32xf32>
    %850 = math.tanh %848 : vector<2x32xf32>
    %851 = arith.mulf %849, %850 : vector<2x32xf32>
    %852 = vector.extract_strided_slice %840 {offsets = [0, 32], sizes = [2, 32], strides = [1, 1]} : vector<2x192xf32> to vector<2x32xf32>
    %853 = arith.mulf %852, %826 : vector<2x32xf32>
    %854 = vector.extract_strided_slice %840 {offsets = [0, 0], sizes = [2, 32], strides = [1, 1]} : vector<2x192xf32> to vector<2x32xf32>
    %855 = vector.extract_strided_slice %842 {offsets = [0, 0], sizes = [2, 32], strides = [1, 1]} : vector<2x64xf32> to vector<2x32xf32>
    %856 = arith.mulf %854, %855 : vector<2x32xf32>
    %857 = arith.addf %853, %856 : vector<2x32xf32>
    %858 = vector.extract_strided_slice %840 {offsets = [0, 64], sizes = [2, 32], strides = [1, 1]} : vector<2x192xf32> to vector<2x32xf32>
    %859 = math.tanh %857 : vector<2x32xf32>
    %860 = arith.mulf %858, %859 : vector<2x32xf32>
    %861 = vector.extract_strided_slice %63 {offsets = [50, 0], sizes = [2, 256], strides = [1, 1]} : vector<64x256xf32> to vector<2x256xf32>
    %862 = tpu.concatenate %860, %851 in 1 : vector<2x32xf32>, vector<2x32xf32> -> vector<2x64xf32>
    %863 = arith.truncf %862 : vector<2x64xf32> to vector<2x64xbf16>
    %cst_94 = arith.constant dense<0.000000e+00> : vector<2x256xf32>
    %864 = tpu.matmul %863, %99, %cst_94 {dimension_numbers = #tpu.dot_dimension_numbers<[1], [0], [0], [1], [0, 0, 1, 1], [], []>} : vector<2x64xbf16>, vector<64x256xbf16>, vector<2x256xf32> -> vector<2x256xf32>
    %865 = arith.addf %864, %861 : vector<2x256xf32>
    %866 = vector.extract_strided_slice %865 {offsets = [0, 0], sizes = [2, 192], strides = [1, 1]} : vector<2x256xf32> to vector<2x192xf32>
    %867 = arith.negf %866 : vector<2x192xf32>
    %868 = math.exp %867 : vector<2x192xf32>
    %cst_95 = arith.constant 1.000000e+00 : f32
    %869 = vector.broadcast %cst_95 : f32 to vector<2x192xf32>
    %870 = arith.addf %869, %868 : vector<2x192xf32>
    %871 = arith.divf %869, %870 : vector<2x192xf32>
    %872 = vector.extract_strided_slice %865 {offsets = [0, 192], sizes = [2, 64], strides = [1, 1]} : vector<2x256xf32> to vector<2x64xf32>
    %873 = math.tanh %872 : vector<2x64xf32>
    %874 = vector.extract_strided_slice %871 {offsets = [0, 128], sizes = [2, 32], strides = [1, 1]} : vector<2x192xf32> to vector<2x32xf32>
    %875 = arith.mulf %874, %848 : vector<2x32xf32>
    %876 = vector.extract_strided_slice %871 {offsets = [0, 96], sizes = [2, 32], strides = [1, 1]} : vector<2x192xf32> to vector<2x32xf32>
    %877 = vector.extract_strided_slice %873 {offsets = [0, 32], sizes = [2, 32], strides = [1, 1]} : vector<2x64xf32> to vector<2x32xf32>
    %878 = arith.mulf %876, %877 : vector<2x32xf32>
    %879 = arith.addf %875, %878 : vector<2x32xf32>
    %880 = vector.extract_strided_slice %871 {offsets = [0, 160], sizes = [2, 32], strides = [1, 1]} : vector<2x192xf32> to vector<2x32xf32>
    %881 = math.tanh %879 : vector<2x32xf32>
    %882 = arith.mulf %880, %881 : vector<2x32xf32>
    %883 = vector.extract_strided_slice %871 {offsets = [0, 32], sizes = [2, 32], strides = [1, 1]} : vector<2x192xf32> to vector<2x32xf32>
    %884 = arith.mulf %883, %857 : vector<2x32xf32>
    %885 = vector.extract_strided_slice %871 {offsets = [0, 0], sizes = [2, 32], strides = [1, 1]} : vector<2x192xf32> to vector<2x32xf32>
    %886 = vector.extract_strided_slice %873 {offsets = [0, 0], sizes = [2, 32], strides = [1, 1]} : vector<2x64xf32> to vector<2x32xf32>
    %887 = arith.mulf %885, %886 : vector<2x32xf32>
    %888 = arith.addf %884, %887 : vector<2x32xf32>
    %889 = vector.extract_strided_slice %871 {offsets = [0, 64], sizes = [2, 32], strides = [1, 1]} : vector<2x192xf32> to vector<2x32xf32>
    %890 = math.tanh %888 : vector<2x32xf32>
    %891 = arith.mulf %889, %890 : vector<2x32xf32>
    %892 = vector.extract_strided_slice %63 {offsets = [52, 0], sizes = [2, 256], strides = [1, 1]} : vector<64x256xf32> to vector<2x256xf32>
    %893 = tpu.concatenate %891, %882 in 1 : vector<2x32xf32>, vector<2x32xf32> -> vector<2x64xf32>
    %894 = arith.truncf %893 : vector<2x64xf32> to vector<2x64xbf16>
    %cst_96 = arith.constant dense<0.000000e+00> : vector<2x256xf32>
    %895 = tpu.matmul %894, %99, %cst_96 {dimension_numbers = #tpu.dot_dimension_numbers<[1], [0], [0], [1], [0, 0, 1, 1], [], []>} : vector<2x64xbf16>, vector<64x256xbf16>, vector<2x256xf32> -> vector<2x256xf32>
    %896 = arith.addf %895, %892 : vector<2x256xf32>
    %897 = vector.extract_strided_slice %896 {offsets = [0, 0], sizes = [2, 192], strides = [1, 1]} : vector<2x256xf32> to vector<2x192xf32>
    %898 = arith.negf %897 : vector<2x192xf32>
    %899 = math.exp %898 : vector<2x192xf32>
    %cst_97 = arith.constant 1.000000e+00 : f32
    %900 = vector.broadcast %cst_97 : f32 to vector<2x192xf32>
    %901 = arith.addf %900, %899 : vector<2x192xf32>
    %902 = arith.divf %900, %901 : vector<2x192xf32>
    %903 = vector.extract_strided_slice %896 {offsets = [0, 192], sizes = [2, 64], strides = [1, 1]} : vector<2x256xf32> to vector<2x64xf32>
    %904 = math.tanh %903 : vector<2x64xf32>
    %905 = vector.extract_strided_slice %902 {offsets = [0, 128], sizes = [2, 32], strides = [1, 1]} : vector<2x192xf32> to vector<2x32xf32>
    %906 = arith.mulf %905, %879 : vector<2x32xf32>
    %907 = vector.extract_strided_slice %902 {offsets = [0, 96], sizes = [2, 32], strides = [1, 1]} : vector<2x192xf32> to vector<2x32xf32>
    %908 = vector.extract_strided_slice %904 {offsets = [0, 32], sizes = [2, 32], strides = [1, 1]} : vector<2x64xf32> to vector<2x32xf32>
    %909 = arith.mulf %907, %908 : vector<2x32xf32>
    %910 = arith.addf %906, %909 : vector<2x32xf32>
    %911 = vector.extract_strided_slice %902 {offsets = [0, 160], sizes = [2, 32], strides = [1, 1]} : vector<2x192xf32> to vector<2x32xf32>
    %912 = math.tanh %910 : vector<2x32xf32>
    %913 = arith.mulf %911, %912 : vector<2x32xf32>
    %914 = vector.extract_strided_slice %902 {offsets = [0, 32], sizes = [2, 32], strides = [1, 1]} : vector<2x192xf32> to vector<2x32xf32>
    %915 = arith.mulf %914, %888 : vector<2x32xf32>
    %916 = vector.extract_strided_slice %902 {offsets = [0, 0], sizes = [2, 32], strides = [1, 1]} : vector<2x192xf32> to vector<2x32xf32>
    %917 = vector.extract_strided_slice %904 {offsets = [0, 0], sizes = [2, 32], strides = [1, 1]} : vector<2x64xf32> to vector<2x32xf32>
    %918 = arith.mulf %916, %917 : vector<2x32xf32>
    %919 = arith.addf %915, %918 : vector<2x32xf32>
    %920 = vector.extract_strided_slice %902 {offsets = [0, 64], sizes = [2, 32], strides = [1, 1]} : vector<2x192xf32> to vector<2x32xf32>
    %921 = math.tanh %919 : vector<2x32xf32>
    %922 = arith.mulf %920, %921 : vector<2x32xf32>
    %923 = vector.extract_strided_slice %63 {offsets = [54, 0], sizes = [2, 256], strides = [1, 1]} : vector<64x256xf32> to vector<2x256xf32>
    %924 = tpu.concatenate %922, %913 in 1 : vector<2x32xf32>, vector<2x32xf32> -> vector<2x64xf32>
    %925 = arith.truncf %924 : vector<2x64xf32> to vector<2x64xbf16>
    %cst_98 = arith.constant dense<0.000000e+00> : vector<2x256xf32>
    %926 = tpu.matmul %925, %99, %cst_98 {dimension_numbers = #tpu.dot_dimension_numbers<[1], [0], [0], [1], [0, 0, 1, 1], [], []>} : vector<2x64xbf16>, vector<64x256xbf16>, vector<2x256xf32> -> vector<2x256xf32>
    %927 = arith.addf %926, %923 : vector<2x256xf32>
    %928 = vector.extract_strided_slice %927 {offsets = [0, 0], sizes = [2, 192], strides = [1, 1]} : vector<2x256xf32> to vector<2x192xf32>
    %929 = arith.negf %928 : vector<2x192xf32>
    %930 = math.exp %929 : vector<2x192xf32>
    %cst_99 = arith.constant 1.000000e+00 : f32
    %931 = vector.broadcast %cst_99 : f32 to vector<2x192xf32>
    %932 = arith.addf %931, %930 : vector<2x192xf32>
    %933 = arith.divf %931, %932 : vector<2x192xf32>
    %934 = vector.extract_strided_slice %927 {offsets = [0, 192], sizes = [2, 64], strides = [1, 1]} : vector<2x256xf32> to vector<2x64xf32>
    %935 = math.tanh %934 : vector<2x64xf32>
    %936 = vector.extract_strided_slice %933 {offsets = [0, 128], sizes = [2, 32], strides = [1, 1]} : vector<2x192xf32> to vector<2x32xf32>
    %937 = arith.mulf %936, %910 : vector<2x32xf32>
    %938 = vector.extract_strided_slice %933 {offsets = [0, 96], sizes = [2, 32], strides = [1, 1]} : vector<2x192xf32> to vector<2x32xf32>
    %939 = vector.extract_strided_slice %935 {offsets = [0, 32], sizes = [2, 32], strides = [1, 1]} : vector<2x64xf32> to vector<2x32xf32>
    %940 = arith.mulf %938, %939 : vector<2x32xf32>
    %941 = arith.addf %937, %940 : vector<2x32xf32>
    %942 = vector.extract_strided_slice %933 {offsets = [0, 160], sizes = [2, 32], strides = [1, 1]} : vector<2x192xf32> to vector<2x32xf32>
    %943 = math.tanh %941 : vector<2x32xf32>
    %944 = arith.mulf %942, %943 : vector<2x32xf32>
    %945 = vector.extract_strided_slice %933 {offsets = [0, 32], sizes = [2, 32], strides = [1, 1]} : vector<2x192xf32> to vector<2x32xf32>
    %946 = arith.mulf %945, %919 : vector<2x32xf32>
    %947 = vector.extract_strided_slice %933 {offsets = [0, 0], sizes = [2, 32], strides = [1, 1]} : vector<2x192xf32> to vector<2x32xf32>
    %948 = vector.extract_strided_slice %935 {offsets = [0, 0], sizes = [2, 32], strides = [1, 1]} : vector<2x64xf32> to vector<2x32xf32>
    %949 = arith.mulf %947, %948 : vector<2x32xf32>
    %950 = arith.addf %946, %949 : vector<2x32xf32>
    %951 = vector.extract_strided_slice %933 {offsets = [0, 64], sizes = [2, 32], strides = [1, 1]} : vector<2x192xf32> to vector<2x32xf32>
    %952 = math.tanh %950 : vector<2x32xf32>
    %953 = arith.mulf %951, %952 : vector<2x32xf32>
    %954 = vector.extract_strided_slice %63 {offsets = [56, 0], sizes = [2, 256], strides = [1, 1]} : vector<64x256xf32> to vector<2x256xf32>
    %955 = tpu.concatenate %953, %944 in 1 : vector<2x32xf32>, vector<2x32xf32> -> vector<2x64xf32>
    %956 = arith.truncf %955 : vector<2x64xf32> to vector<2x64xbf16>
    %cst_100 = arith.constant dense<0.000000e+00> : vector<2x256xf32>
    %957 = tpu.matmul %956, %99, %cst_100 {dimension_numbers = #tpu.dot_dimension_numbers<[1], [0], [0], [1], [0, 0, 1, 1], [], []>} : vector<2x64xbf16>, vector<64x256xbf16>, vector<2x256xf32> -> vector<2x256xf32>
    %958 = arith.addf %957, %954 : vector<2x256xf32>
    %959 = vector.extract_strided_slice %958 {offsets = [0, 0], sizes = [2, 192], strides = [1, 1]} : vector<2x256xf32> to vector<2x192xf32>
    %960 = arith.negf %959 : vector<2x192xf32>
    %961 = math.exp %960 : vector<2x192xf32>
    %cst_101 = arith.constant 1.000000e+00 : f32
    %962 = vector.broadcast %cst_101 : f32 to vector<2x192xf32>
    %963 = arith.addf %962, %961 : vector<2x192xf32>
    %964 = arith.divf %962, %963 : vector<2x192xf32>
    %965 = vector.extract_strided_slice %958 {offsets = [0, 192], sizes = [2, 64], strides = [1, 1]} : vector<2x256xf32> to vector<2x64xf32>
    %966 = math.tanh %965 : vector<2x64xf32>
    %967 = vector.extract_strided_slice %964 {offsets = [0, 128], sizes = [2, 32], strides = [1, 1]} : vector<2x192xf32> to vector<2x32xf32>
    %968 = arith.mulf %967, %941 : vector<2x32xf32>
    %969 = vector.extract_strided_slice %964 {offsets = [0, 96], sizes = [2, 32], strides = [1, 1]} : vector<2x192xf32> to vector<2x32xf32>
    %970 = vector.extract_strided_slice %966 {offsets = [0, 32], sizes = [2, 32], strides = [1, 1]} : vector<2x64xf32> to vector<2x32xf32>
    %971 = arith.mulf %969, %970 : vector<2x32xf32>
    %972 = arith.addf %968, %971 : vector<2x32xf32>
    %973 = vector.extract_strided_slice %964 {offsets = [0, 160], sizes = [2, 32], strides = [1, 1]} : vector<2x192xf32> to vector<2x32xf32>
    %974 = math.tanh %972 : vector<2x32xf32>
    %975 = arith.mulf %973, %974 : vector<2x32xf32>
    %976 = vector.extract_strided_slice %964 {offsets = [0, 32], sizes = [2, 32], strides = [1, 1]} : vector<2x192xf32> to vector<2x32xf32>
    %977 = arith.mulf %976, %950 : vector<2x32xf32>
    %978 = vector.extract_strided_slice %964 {offsets = [0, 0], sizes = [2, 32], strides = [1, 1]} : vector<2x192xf32> to vector<2x32xf32>
    %979 = vector.extract_strided_slice %966 {offsets = [0, 0], sizes = [2, 32], strides = [1, 1]} : vector<2x64xf32> to vector<2x32xf32>
    %980 = arith.mulf %978, %979 : vector<2x32xf32>
    %981 = arith.addf %977, %980 : vector<2x32xf32>
    %982 = vector.extract_strided_slice %964 {offsets = [0, 64], sizes = [2, 32], strides = [1, 1]} : vector<2x192xf32> to vector<2x32xf32>
    %983 = math.tanh %981 : vector<2x32xf32>
    %984 = arith.mulf %982, %983 : vector<2x32xf32>
    %985 = vector.extract_strided_slice %63 {offsets = [58, 0], sizes = [2, 256], strides = [1, 1]} : vector<64x256xf32> to vector<2x256xf32>
    %986 = tpu.concatenate %984, %975 in 1 : vector<2x32xf32>, vector<2x32xf32> -> vector<2x64xf32>
    %987 = arith.truncf %986 : vector<2x64xf32> to vector<2x64xbf16>
    %cst_102 = arith.constant dense<0.000000e+00> : vector<2x256xf32>
    %988 = tpu.matmul %987, %99, %cst_102 {dimension_numbers = #tpu.dot_dimension_numbers<[1], [0], [0], [1], [0, 0, 1, 1], [], []>} : vector<2x64xbf16>, vector<64x256xbf16>, vector<2x256xf32> -> vector<2x256xf32>
    %989 = arith.addf %988, %985 : vector<2x256xf32>
    %990 = vector.extract_strided_slice %989 {offsets = [0, 0], sizes = [2, 192], strides = [1, 1]} : vector<2x256xf32> to vector<2x192xf32>
    %991 = arith.negf %990 : vector<2x192xf32>
    %992 = math.exp %991 : vector<2x192xf32>
    %cst_103 = arith.constant 1.000000e+00 : f32
    %993 = vector.broadcast %cst_103 : f32 to vector<2x192xf32>
    %994 = arith.addf %993, %992 : vector<2x192xf32>
    %995 = arith.divf %993, %994 : vector<2x192xf32>
    %996 = vector.extract_strided_slice %989 {offsets = [0, 192], sizes = [2, 64], strides = [1, 1]} : vector<2x256xf32> to vector<2x64xf32>
    %997 = math.tanh %996 : vector<2x64xf32>
    %998 = vector.extract_strided_slice %995 {offsets = [0, 128], sizes = [2, 32], strides = [1, 1]} : vector<2x192xf32> to vector<2x32xf32>
    %999 = arith.mulf %998, %972 : vector<2x32xf32>
    %1000 = vector.extract_strided_slice %995 {offsets = [0, 96], sizes = [2, 32], strides = [1, 1]} : vector<2x192xf32> to vector<2x32xf32>
    %1001 = vector.extract_strided_slice %997 {offsets = [0, 32], sizes = [2, 32], strides = [1, 1]} : vector<2x64xf32> to vector<2x32xf32>
    %1002 = arith.mulf %1000, %1001 : vector<2x32xf32>
    %1003 = arith.addf %999, %1002 : vector<2x32xf32>
    %1004 = vector.extract_strided_slice %995 {offsets = [0, 160], sizes = [2, 32], strides = [1, 1]} : vector<2x192xf32> to vector<2x32xf32>
    %1005 = math.tanh %1003 : vector<2x32xf32>
    %1006 = arith.mulf %1004, %1005 : vector<2x32xf32>
    %1007 = vector.extract_strided_slice %995 {offsets = [0, 32], sizes = [2, 32], strides = [1, 1]} : vector<2x192xf32> to vector<2x32xf32>
    %1008 = arith.mulf %1007, %981 : vector<2x32xf32>
    %1009 = vector.extract_strided_slice %995 {offsets = [0, 0], sizes = [2, 32], strides = [1, 1]} : vector<2x192xf32> to vector<2x32xf32>
    %1010 = vector.extract_strided_slice %997 {offsets = [0, 0], sizes = [2, 32], strides = [1, 1]} : vector<2x64xf32> to vector<2x32xf32>
    %1011 = arith.mulf %1009, %1010 : vector<2x32xf32>
    %1012 = arith.addf %1008, %1011 : vector<2x32xf32>
    %1013 = vector.extract_strided_slice %995 {offsets = [0, 64], sizes = [2, 32], strides = [1, 1]} : vector<2x192xf32> to vector<2x32xf32>
    %1014 = math.tanh %1012 : vector<2x32xf32>
    %1015 = arith.mulf %1013, %1014 : vector<2x32xf32>
    %1016 = vector.extract_strided_slice %63 {offsets = [60, 0], sizes = [2, 256], strides = [1, 1]} : vector<64x256xf32> to vector<2x256xf32>
    %1017 = tpu.concatenate %1015, %1006 in 1 : vector<2x32xf32>, vector<2x32xf32> -> vector<2x64xf32>
    %1018 = arith.truncf %1017 : vector<2x64xf32> to vector<2x64xbf16>
    %cst_104 = arith.constant dense<0.000000e+00> : vector<2x256xf32>
    %1019 = tpu.matmul %1018, %99, %cst_104 {dimension_numbers = #tpu.dot_dimension_numbers<[1], [0], [0], [1], [0, 0, 1, 1], [], []>} : vector<2x64xbf16>, vector<64x256xbf16>, vector<2x256xf32> -> vector<2x256xf32>
    %1020 = arith.addf %1019, %1016 : vector<2x256xf32>
    %1021 = vector.extract_strided_slice %1020 {offsets = [0, 0], sizes = [2, 192], strides = [1, 1]} : vector<2x256xf32> to vector<2x192xf32>
    %1022 = arith.negf %1021 : vector<2x192xf32>
    %1023 = math.exp %1022 : vector<2x192xf32>
    %cst_105 = arith.constant 1.000000e+00 : f32
    %1024 = vector.broadcast %cst_105 : f32 to vector<2x192xf32>
    %1025 = arith.addf %1024, %1023 : vector<2x192xf32>
    %1026 = arith.divf %1024, %1025 : vector<2x192xf32>
    %1027 = vector.extract_strided_slice %1020 {offsets = [0, 192], sizes = [2, 64], strides = [1, 1]} : vector<2x256xf32> to vector<2x64xf32>
    %1028 = math.tanh %1027 : vector<2x64xf32>
    %1029 = vector.extract_strided_slice %1026 {offsets = [0, 128], sizes = [2, 32], strides = [1, 1]} : vector<2x192xf32> to vector<2x32xf32>
    %1030 = arith.mulf %1029, %1003 : vector<2x32xf32>
    %1031 = vector.extract_strided_slice %1026 {offsets = [0, 96], sizes = [2, 32], strides = [1, 1]} : vector<2x192xf32> to vector<2x32xf32>
    %1032 = vector.extract_strided_slice %1028 {offsets = [0, 32], sizes = [2, 32], strides = [1, 1]} : vector<2x64xf32> to vector<2x32xf32>
    %1033 = arith.mulf %1031, %1032 : vector<2x32xf32>
    %1034 = arith.addf %1030, %1033 : vector<2x32xf32>
    %1035 = vector.extract_strided_slice %1026 {offsets = [0, 160], sizes = [2, 32], strides = [1, 1]} : vector<2x192xf32> to vector<2x32xf32>
    %1036 = math.tanh %1034 : vector<2x32xf32>
    %1037 = arith.mulf %1035, %1036 : vector<2x32xf32>
    %1038 = vector.extract_strided_slice %1026 {offsets = [0, 32], sizes = [2, 32], strides = [1, 1]} : vector<2x192xf32> to vector<2x32xf32>
    %1039 = arith.mulf %1038, %1012 : vector<2x32xf32>
    %1040 = vector.extract_strided_slice %1026 {offsets = [0, 0], sizes = [2, 32], strides = [1, 1]} : vector<2x192xf32> to vector<2x32xf32>
    %1041 = vector.extract_strided_slice %1028 {offsets = [0, 0], sizes = [2, 32], strides = [1, 1]} : vector<2x64xf32> to vector<2x32xf32>
    %1042 = arith.mulf %1040, %1041 : vector<2x32xf32>
    %1043 = arith.addf %1039, %1042 : vector<2x32xf32>
    %1044 = vector.extract_strided_slice %1026 {offsets = [0, 64], sizes = [2, 32], strides = [1, 1]} : vector<2x192xf32> to vector<2x32xf32>
    %1045 = math.tanh %1043 : vector<2x32xf32>
    %1046 = arith.mulf %1044, %1045 : vector<2x32xf32>
    %1047 = vector.extract_strided_slice %63 {offsets = [62, 0], sizes = [2, 256], strides = [1, 1]} : vector<64x256xf32> to vector<2x256xf32>
    %1048 = tpu.concatenate %1046, %1037 in 1 : vector<2x32xf32>, vector<2x32xf32> -> vector<2x64xf32>
    %1049 = arith.truncf %1048 : vector<2x64xf32> to vector<2x64xbf16>
    %cst_106 = arith.constant dense<0.000000e+00> : vector<2x256xf32>
    %1050 = tpu.matmul %1049, %99, %cst_106 {dimension_numbers = #tpu.dot_dimension_numbers<[1], [0], [0], [1], [0, 0, 1, 1], [], []>} : vector<2x64xbf16>, vector<64x256xbf16>, vector<2x256xf32> -> vector<2x256xf32>
    %1051 = arith.addf %1050, %1047 : vector<2x256xf32>
    %1052 = vector.extract_strided_slice %1051 {offsets = [0, 0], sizes = [2, 192], strides = [1, 1]} : vector<2x256xf32> to vector<2x192xf32>
    %1053 = arith.negf %1052 : vector<2x192xf32>
    %1054 = math.exp %1053 : vector<2x192xf32>
    %cst_107 = arith.constant 1.000000e+00 : f32
    %1055 = vector.broadcast %cst_107 : f32 to vector<2x192xf32>
    %1056 = arith.addf %1055, %1054 : vector<2x192xf32>
    %1057 = arith.divf %1055, %1056 : vector<2x192xf32>
    %1058 = vector.extract_strided_slice %1051 {offsets = [0, 192], sizes = [2, 64], strides = [1, 1]} : vector<2x256xf32> to vector<2x64xf32>
    %1059 = math.tanh %1058 : vector<2x64xf32>
    %1060 = vector.extract_strided_slice %1057 {offsets = [0, 128], sizes = [2, 32], strides = [1, 1]} : vector<2x192xf32> to vector<2x32xf32>
    %1061 = arith.mulf %1060, %1034 : vector<2x32xf32>
    %1062 = vector.extract_strided_slice %1057 {offsets = [0, 96], sizes = [2, 32], strides = [1, 1]} : vector<2x192xf32> to vector<2x32xf32>
    %1063 = vector.extract_strided_slice %1059 {offsets = [0, 32], sizes = [2, 32], strides = [1, 1]} : vector<2x64xf32> to vector<2x32xf32>
    %1064 = arith.mulf %1062, %1063 : vector<2x32xf32>
    %1065 = arith.addf %1061, %1064 : vector<2x32xf32>
    %1066 = vector.extract_strided_slice %1057 {offsets = [0, 160], sizes = [2, 32], strides = [1, 1]} : vector<2x192xf32> to vector<2x32xf32>
    %1067 = math.tanh %1065 : vector<2x32xf32>
    %1068 = arith.mulf %1066, %1067 : vector<2x32xf32>
    %1069 = vector.extract_strided_slice %1057 {offsets = [0, 32], sizes = [2, 32], strides = [1, 1]} : vector<2x192xf32> to vector<2x32xf32>
    %1070 = arith.mulf %1069, %1043 : vector<2x32xf32>
    %1071 = vector.extract_strided_slice %1057 {offsets = [0, 0], sizes = [2, 32], strides = [1, 1]} : vector<2x192xf32> to vector<2x32xf32>
    %1072 = vector.extract_strided_slice %1059 {offsets = [0, 0], sizes = [2, 32], strides = [1, 1]} : vector<2x64xf32> to vector<2x32xf32>
    %1073 = arith.mulf %1071, %1072 : vector<2x32xf32>
    %1074 = arith.addf %1070, %1073 : vector<2x32xf32>
    %1075 = vector.extract_strided_slice %1057 {offsets = [0, 64], sizes = [2, 32], strides = [1, 1]} : vector<2x192xf32> to vector<2x32xf32>
    %1076 = math.tanh %1074 : vector<2x32xf32>
    %1077 = arith.mulf %1075, %1076 : vector<2x32xf32>
    %1078 = tpu.concatenate %1077, %1068 in 1 : vector<2x32xf32>, vector<2x32xf32> -> vector<2x64xf32>
    %1079 = arith.truncf %1078 : vector<2x64xf32> to vector<2x64xbf16>
    %cst_108 = arith.constant dense<0.000000e+00> : vector<2x256xf32>
    %1080 = tpu.matmul %1079, %99, %cst_108 {dimension_numbers = #tpu.dot_dimension_numbers<[1], [0], [0], [1], [0, 0, 1, 1], [], []>} : vector<2x64xbf16>, vector<64x256xbf16>, vector<2x256xf32> -> vector<2x256xf32>
    %1081 = vector.broadcast %100 : vector<1x256xf32> to vector<2x256xf32>
    %1082 = arith.addf %1080, %1081 : vector<2x256xf32>
    %1083 = vector.extract_strided_slice %1082 {offsets = [0, 0], sizes = [2, 192], strides = [1, 1]} : vector<2x256xf32> to vector<2x192xf32>
    %1084 = arith.negf %1083 : vector<2x192xf32>
    %1085 = math.exp %1084 : vector<2x192xf32>
    %cst_109 = arith.constant 1.000000e+00 : f32
    %1086 = vector.broadcast %cst_109 : f32 to vector<2x192xf32>
    %1087 = arith.addf %1086, %1085 : vector<2x192xf32>
    %1088 = arith.divf %1086, %1087 : vector<2x192xf32>
    %1089 = vector.extract_strided_slice %1082 {offsets = [0, 192], sizes = [2, 64], strides = [1, 1]} : vector<2x256xf32> to vector<2x64xf32>
    %1090 = math.tanh %1089 : vector<2x64xf32>
    %1091 = vector.extract_strided_slice %1088 {offsets = [0, 128], sizes = [2, 32], strides = [1, 1]} : vector<2x192xf32> to vector<2x32xf32>
    %1092 = arith.mulf %1091, %1065 : vector<2x32xf32>
    %1093 = vector.extract_strided_slice %1088 {offsets = [0, 96], sizes = [2, 32], strides = [1, 1]} : vector<2x192xf32> to vector<2x32xf32>
    %1094 = vector.extract_strided_slice %1090 {offsets = [0, 32], sizes = [2, 32], strides = [1, 1]} : vector<2x64xf32> to vector<2x32xf32>
    %1095 = arith.mulf %1093, %1094 : vector<2x32xf32>
    %1096 = arith.addf %1092, %1095 : vector<2x32xf32>
    %1097 = vector.extract_strided_slice %1088 {offsets = [0, 160], sizes = [2, 32], strides = [1, 1]} : vector<2x192xf32> to vector<2x32xf32>
    %1098 = math.tanh %1096 : vector<2x32xf32>
    %1099 = arith.mulf %1097, %1098 : vector<2x32xf32>
    tpu.wait_dma2 semaphore(%arg17 : memref<!tpu.dma_semaphore, #tpu.memory_space<semaphore_mem>>) src(%arg13 : memref<2048x128xbf16, #tpu.memory_space<any>>) dst(%arg16 : memref<2048x128xbf16, #tpu.memory_space<vmem>>)
    %c0_110 = arith.constant 0 : index
    %c0_111 = arith.constant 0 : index
    %1100 = vector.load %arg16[%c0_110, %c0_111] : memref<2048x128xbf16, #tpu.memory_space<vmem>>, vector<2048x128xbf16>
    %cst_112 = arith.constant dense<0.000000e+00> : vector<2x128xf32>
    %1101 = tpu.matmul %98, %1100, %cst_112 {dimension_numbers = #tpu.dot_dimension_numbers<[1], [0], [0], [1], [0, 0, 1, 1], [], []>} : vector<2x2048xbf16>, vector<2048x128xbf16>, vector<2x128xf32> -> vector<2x128xf32>
    %c0_113 = arith.constant 0 : index
    %c0_114 = arith.constant 0 : index
    %1102 = vector.load %arg9[%c0_113, %c0_114] : memref<1x128xf32, #tpu.memory_space<vmem>>, vector<1x128xf32>
    %1103 = vector.broadcast %1102 : vector<1x128xf32> to vector<2x128xf32>
    %1104 = arith.addf %1101, %1103 : vector<2x128xf32>
    %cst_115 = arith.constant 0.000000e+00 : f32
    %1105 = vector.broadcast %cst_115 : f32 to vector<2x128xf32>
    %1106 = arith.maximumf %1104, %1105 : vector<2x128xf32>
    %1107 = arith.truncf %1106 : vector<2x128xf32> to vector<2x128xbf16>
    %c0_116 = arith.constant 0 : index
    %c0_117 = arith.constant 0 : index
    %1108 = vector.load %arg10[%c0_116, %c0_117] : memref<128x10xbf16, #tpu.memory_space<vmem>>, vector<128x10xbf16>
    %cst_118 = arith.constant dense<0.000000e+00> : vector<2x10xf32>
    %1109 = tpu.matmul %1107, %1108, %cst_118 {dimension_numbers = #tpu.dot_dimension_numbers<[1], [0], [0], [1], [0, 0, 1, 1], [], []>} : vector<2x128xbf16>, vector<128x10xbf16>, vector<2x10xf32> -> vector<2x10xf32>
    %1110 = arith.truncf %1099 : vector<2x32xf32> to vector<2x32xbf16>
    %c0_119 = arith.constant 0 : index
    %c0_120 = arith.constant 0 : index
    %1111 = vector.load %arg11[%c0_119, %c0_120] : memref<32x10xbf16, #tpu.memory_space<vmem>>, vector<32x10xbf16>
    %cst_121 = arith.constant dense<0.000000e+00> : vector<2x10xf32>
    %1112 = tpu.matmul %1110, %1111, %cst_121 {dimension_numbers = #tpu.dot_dimension_numbers<[1], [0], [0], [1], [0, 0, 1, 1], [], []>} : vector<2x32xbf16>, vector<32x10xbf16>, vector<2x10xf32> -> vector<2x10xf32>
    %1113 = arith.addf %1109, %1112 : vector<2x10xf32>
    %c0_122 = arith.constant 0 : index
    %c0_123 = arith.constant 0 : index
    %1114 = vector.load %arg12[%c0_122, %c0_123] : memref<1x10xf32, #tpu.memory_space<vmem>>, vector<1x10xf32>
    %1115 = vector.broadcast %1114 : vector<1x10xf32> to vector<2x10xf32>
    %1116 = arith.addf %1113, %1115 : vector<2x10xf32>
    %c0_124 = arith.constant 0 : index
    %c0_125 = arith.constant 0 : index
    %1117 = vector.load %arg14[%c0_124, %c0_125] : memref<2x10xf32, #tpu.memory_space<vmem>>, vector<2x10xf32>
    tpu.vector_store %arg14[%c0_124, %c0_125], %1116 {strides = array<i32>} : memref<2x10xf32, #tpu.memory_space<vmem>>, vector<2x10xf32>,
    return
  }
}

</mosaic_0001>

<bundles_post_ra>
// kernel: forward.1
= control target key start
LH: loop header
LB: loop body
LE: loop exit
PB: predicated region body
PF: predicated region fallthrough
CT: control target
= control target key end

     0   :  { %s7764_s17 = smov 8   ;;  %vm202_vm0 = vsmask.f32 7424  ;;  %s7765_s26 = smov 16   ;;  %vm115_vm1 = vsmask.f32 256  ;;  %s9552_s0 = inlined_call_operand.vmem [shape: bf16[2,129,8], index: 0, kind: input, shape index: {}]   ;;  %s9553_s1 = inlined_call_operand.vmem [shape: bf16[24,64], index: 1, kind: input, shape index: {}]   ;;  %s9554_s2 = inlined_call_operand.vmem [shape: f32[1,64], index: 2, kind: input, shape index: {}]   ;;  %s9555_s3 = inlined_call_operand.vmem [shape: bf16[192,64], index: 3, kind: input, shape index: {}]   ;;  %s9556_s4 = inlined_call_operand.vmem [shape: f32[1,64], index: 4, kind: input, shape index: {}]   ;;  %s9557_s5 = inlined_call_operand.vmem [shape: bf16[64,64], index: 5, kind: input, shape index: {}]   ;;  %s9558_s6 = inlined_call_operand.vmem [shape: bf16[64,256], index: 6, kind: input, shape index: {}]   ;;  %s9559_s7 = inlined_call_operand.vmem [shape: f32[1,256], index: 7, kind: input, shape index: {}]   ;;  %s9560_s8 = inlined_call_operand.vmem [shape: bf16[64,256], index: 8, kind: input, shape index: {}]   ;;  %s9561_s9 = inlined_call_operand.vmem [shape: f32[1,128], index: 9, kind: input, shape index: {}]   ;;  %s9562_s10 = inlined_call_operand.vmem [shape: bf16[128,10], index: 10, kind: input, shape index: {}]   ;;  %s9563_s11 = inlined_call_operand.vmem [shape: bf16[32,10], index: 11, kind: input, shape index: {}]   ;;  %s9564_s12 = inlined_call_operand.vmem [shape: f32[1,10], index: 12, kind: input, shape index: {}]   ;;  %s9565_s13 = inlined_call_operand.hbm [shape: bf16[2048,128], index: 13, kind: input, shape index: {}]   ;;  %s9566_s14 = inlined_call_operand.hbm [shape: f32[2,10], index: 14, kind: output, shape index: {}]  }
   0x1   :  { %v7852_v0 = vld [vmem:[%s9552_s0] sm:$0xff]   ;;  %v7045_v1 = vld [vmem:[%s9552_s0 + $0x8] sm:$0xff]   ;;  %v7046_v5 = vld [vmem:[%s9552_s0 + $0x10] sm:$0xff]   ;;  %vm567_vm2 = vcmask 1043456  }
   0x2   :  { %183 = vrot.lane.b32.xlu0 %v7852_v0, %s7764_s17  ;;  %v120_v2 = vshll.u32 %v7852_v0, 16  ;;  %v117_v3 = vshrl.u32 %v7852_v0, 16  ;;  %v127_v4 = vshll.u32 %v7045_v1, 16  ;;  %v124_v6 = vshrl.u32 %v7045_v1, 16  ;;  %v7047_v7 = vld [vmem:[%s9552_s0 + $0x18] sm:$0xff]   ;;  %v7872_v9 = vld [vmem:[%s9552_s0 + $0x20] sm:$0xff]  }
   0x3   :  { %v135_v12 = vshll.u32 %v7046_v5, 16  ;;  %v132_v13 = vshrl.u32 %v7046_v5, 16  ;;  %v143_v15 = vshll.u32 %v7047_v7, 16  ;;  %v7882_v18 = vld [vmem:[%s9552_s0 + $0x28] sm:$0xff]   ;;  %v151_v23 = vshll.u32 %v7872_v9, 16  ;;  %v7897_v27 = vld [vmem:[%s9552_s0 + $0x30] sm:$0xff]  }
   0x4   :  { %v203_v8 = vrot.slane %v120_v2, 1  ;;  %v205_v10 = vrot.slane %v127_v4, 1  ;;  %v7874_v11 = vrot.slane %v124_v6, 7  ;;  %v140_v26 = vshrl.u32 %v7047_v7, 16  ;;  %v7910_v33 = vld [vmem:[%s9552_s0 + $0x38] sm:$0xff]   ;;  %v7917_v36 = vld [vmem:[%s9552_s0 + $0x44] sm:$0xff]  }
   0x5   :  { %v208_v17 = vrot.slane %v135_v12, 1  ;;  %v211_v21 = vrot.slane %v143_v15, 1  ;;  %v7892_v25 = vrot.slane %v132_v13, 7  ;;  %v148_v29 = vshrl.u32 %v7872_v9, 16  ;;  %v7932_v43 = vld [vmem:[%s9552_s0 + $0x4c] sm:$0xff]   ;;  %v7942_v46 = vld [vmem:[%s9552_s0 + $0x54] sm:$0xff]  }
   0x6   :  { %185 = vrot.lane.b32.xlu0 %v7045_v1, %s7764_s17  ;;  %v204_v14 = vor.u32 %v203_v8, %v117_v3  ;;  %v207_v16 = vor.u32 %v205_v10, %v124_v6  ;;  %v7885_v19 = vor.u32 %v127_v4, %v7874_v11  ;;  %v159_v30 = vshll.u32 %v7882_v18, 16  ;;  %v7053_v42 = vld [vmem:[%s9552_s0 + $0x40] ss:$0 sps:$4 sm:$0x11]   ;;  %v7977_v4 = vld [vmem:[%s9552_s0 + $0x64] sm:$0xff]  }
   0x7   :  { %v210_v22 = vor.u32 %v208_v17, %v132_v13  ;;  %v7902_v31 = vrot.slane %v140_v26, 7  ;;  %v214_v32 = vrot.slane %v151_v23, 1  ;;  %v213_v34 = vor.u32 %v211_v21, %v140_v26  ;;  %v7953_v50 = vld [vmem:[%s9552_s0 + $0x5c] sm:$0xff]  }
   0x8   :  { %v206_v20 = vsel %vm202_vm0, %v204_v14, %v205_v10  ;;  %v209_v24 = vsel %vm202_vm0, %v207_v16, %v208_v17  ;;  %v156_v35 = vshrl.u32 %v7882_v18, 16  ;;  %v7920_v37 = vor.u32 %v135_v12, %v7892_v25 }
   0x9   :  { %231 = vrot.lane.b32.xlu1 %v206_v20, %s7765_s26  ;;  %v212_v28 = vsel %vm202_vm0, %v210_v22, %v211_v21  ;;  %v216_v38 = vor.u32 %v214_v32, %v148_v29  ;;  %v217_v39 = vrot.slane %v159_v30, 1  ;;  %v167_v40 = vshll.u32 %v7897_v27, 16 }
   0xa   :  { %187 = vrot.lane.b32.xlu0 %v7046_v5, %s7764_s17  ;;  %v164_v41 = vshrl.u32 %v7897_v27, 16  ;;  %v7935_v44 = vor.u32 %v143_v15, %v7902_v31  ;;  %v175_v45 = vshll.u32 %v7910_v33, 16  ;;  %v215_v47 = vsel %vm202_vm0, %v213_v34, %v214_v32  ;;  %v7062_v34 = vld [vmem:[%s9553_s1 + $0x8] ss:$0 sps:$4 sm:$0xff]  }
   0xb   :  { %v7947_v48 = vrot.slane %v148_v29, 7  ;;  %v351_v49 = vshll.u32 %v7917_v36, 16  ;;  %v218_v51 = vsel %vm202_vm0, %v216_v38, %v217_v39  ;;  %v7956_v52 = vrot.slane %v156_v35, 7  ;;  %v8014_v38 = vld [vmem:[%s9552_s0 + $0x74] sm:$0xff]   ;;  %7032 = vmatprep.subr.msk.bf16.mxu0 %vm567_vm2, %v7062_v34  ;;  %7033 = vmatprep.subr.msk.bf16.mxu1 %vm567_vm2, %v7062_v34 }
   0xc   :  { %v220_v53 = vrot.slane %v167_v40, 1  ;;  %v7960_v54 = vrot.slane %v164_v41, 7  ;;  %v172_v55 = vshrl.u32 %v7910_v33, 16  ;;  %v227_v56 = vshll.u32 %v7053_v42, 16 }
   0xd   :  { %233 = vrot.lane.b32.xlu1 %v209_v24, %s7765_s26  ;;  %v223_v57 = vrot.slane %v175_v45, 1  ;;  %v348_v58 = vshrl.u32 %v7917_v36, 16  ;;  %v358_v59 = vshll.u32 %v7932_v43, 16  ;;  %v366_v60 = vshll.u32 %v7942_v46, 16 }
   0xe   :  { %235 = vrot.lane.b32.xlu0 %v212_v28, %s7765_s26  ;;  %v219_v61 = vor.u32 %v217_v39, %v156_v35  ;;  %v431_v62 = vrot.slane %v351_v49, 1  ;;  %v355_v63 = vshrl.u32 %v7932_v43, 16  ;;  %v374_v1 = vshll.u32 %v7953_v50, 16  ;;  %v7063_v35 = vld [vmem:[%s9553_s1] sm:$0xff]  }
   0xf   :  { %v222_v5 = vor.u32 %v220_v53, %v164_v41  ;;  %v363_v6 = vshrl.u32 %v7942_v46, 16  ;;  %v174_v8 = vrot.slane %v172_v55, 7  ;;  %v225_v10 = vor.u32 %v223_v57, %v172_v55 }
  0x10   :  { %v229_v12 = vrot.slane %v227_v56, 1  ;;  %v371_v13 = vshrl.u32 %v7953_v50, 16  ;;  %v433_v14 = vrot.slane %v358_v59, 1  ;;  %v357_v15 = vrot.slane %v355_v63, 7 }
  0x11   :  { %189 = vrot.lane.b32.xlu1 %v7047_v7, %s7764_s17  ;;  %v7983_v7 = vld [vmem:[%s9552_s0 + $0x6c] sm:$0xff]   ;;  %v7990_v16 = vrot.slane %v366_v60, 1  ;;  %v365_v17 = vrot.slane %v363_v6, 7  ;;  %v221_v20 = vsel %vm202_vm0, %v219_v61, %v220_v53  ;;  %v7997_v21 = vrot.slane %v374_v1, 1 }
  0x12   :  { %191 = vrot.lane.b32.xlu0 %v7872_v9, %s7764_s17  ;;  %v373_v22 = vrot.slane %v371_v13, 7  ;;  %v382_v24 = vshll.u32 %v7977_v4, 16  ;;  %v224_v26 = vsel %vm202_vm0, %v222_v5, %v223_v57  ;;  %v432_v28 = vor.u32 %v431_v62, %v348_v58 }
  0x13   :  { %v379_v29 = vshrl.u32 %v7977_v4, 16  ;;  %v390_v32 = vshll.u32 %v7983_v7, 16  ;;  %v119_v39 = vrot.slane %v117_v3, 7  ;;  %v230_v41 = vsel %vm202_vm0, %v225_v10, %v229_v12 }
  0x14   :  { %v387_v42 = vshrl.u32 %v7983_v7, 16  ;;  %v569_v53 = vsel %vm567_vm2, %v7062_v34, 0  ;;  %v434_v55 = vsel %vm202_vm0, %v432_v28, %v433_v14  ;;  %v8038_v57 = vsel %vm115_vm1, %v7874_v11, %v7920_v37 }
  0x15   :  { %237 = vrot.lane.b32.xlu1 %v215_v47, %s7765_s26  ;;  %v381_v47 = vrot.slane %v379_v29, 7  ;;  %v8030_v3 = vsel %vm115_vm1, %v119_v39, %v7885_v19  ;;  %6949 = vmatpush3.bf16.msra.mxu0 %v569_v53  ;;  %v8043_v0 = vsel %vm115_vm1, %v7892_v25, %v7935_v44  ;;  %v153_v19 = vor.u32 %v151_v23, %v7947_v48 }
  0x16   :  { %239 = vrot.lane.b32.xlu0 %v218_v51, %s7765_s26  ;;  %v8026_v51 = vor.u32 %v120_v2, %v119_v39  ;;  %v389_v56 = vrot.slane %v387_v42, 7  ;;  %v395_v2 = vshrl.u32 %v8014_v38, 16  ;;  %6950 = vmatprep.subr.bf16.mxu0 %v7063_v35  ;;  %v161_v61 = vor.u32 %v159_v30, %v7956_v52 }
  0x17   :  { %7030 = vmatpush3.bf16.msra.mxu1 %v569_v53  ;;  %v169_v11 = vor.u32 %v167_v40, %v7960_v54  ;;  %v177_v25 = vor.u32 %v175_v45, %v174_v8  ;;  %v350_v37 = vrot.slane %v348_v58, 7  ;;  %v360_v44 = vor.u32 %v358_v59, %v357_v15  ;;  %v7060_v59 = vld [vmem:[%s9552_s0 + $0x7c] sm:$0xff]  }
  0x18   :  { %7029 = vmatprep.subr.bf16.mxu1 %v7063_v35  ;;  %v368_v9 = vor.u32 %v366_v60, %v365_v17  ;;  %v8067_v23 = vsel %vm115_vm1, %v7947_v48, %v161_v61  ;;  %v376_v30 = vor.u32 %v374_v1, %v373_v22  ;;  %v438_v58 = vor.u32 %v7990_v16, %v363_v6 }
  0x19   :  { %193 = vrot.lane.b32.xlu1 %v7882_v18, %s7764_s17  ;;  %v8063_v18 = vsel %vm115_vm1, %v7902_v31, %v153_v19  ;;  %6951 = vmatpush3.bf16.msra.mxu0 %v7063_v35  ;;  %v8079_v40 = vor.u32 %v351_v49, %v350_v37  ;;  %v8082_v31 = vsel %vm115_vm1, %v350_v37, %v360_v44  ;;  %v403_v5 = vshrl.u32 %v7060_v59, 16 }
  0x1a   :  { %195 = vrot.lane.b32.xlu0 %v7897_v27, %s7764_s17  ;;  %v8071_v27 = vsel %vm115_vm1, %v7956_v52, %v169_v11  ;;  %v8085_v45 = vsel %vm115_vm1, %v357_v15, %v368_v9  ;;  %v8088_v48 = vsel %vm115_vm1, %v365_v17, %v376_v30  ;;  %v384_v52 = vor.u32 %v382_v24, %v381_v47 }
  0x1b   :  { %7031 = vmatpush3.bf16.msra.mxu1 %v7063_v35  ;;  %v392_v60 = vor.u32 %v390_v32, %v389_v56  ;;  %v440_v1 = vsel %vm202_vm0, %v438_v58, %v7997_v21  ;;  %v405_v10 = vrot.slane %v403_v5, 7 }
  0x1c   :  { %v8097_v49 = vsel %vm115_vm1, %v373_v22, %v384_v52 }
  0x1d   :  { %241 = vrot.lane.b32.xlu1 %v221_v20, %s7765_s26  ;;  %v8117_v6 = vsel %vm115_vm1, %v381_v47, %v392_v60 }
  0x1e   :  { %243 = vrot.lane.b32.xlu0 %v224_v26, %s7765_s26 }
  0x21   :  { %197 = vrot.lane.b32.xlu1 %v7910_v33, %s7764_s17  ;;  %v8075_v33 = vsel %vm115_vm1, %v7960_v54, %v177_v25  ;;  %v397_v54 = vrot.slane %v395_v2, 7 }
  0x22   :  { %412 = vrot.lane.b32.xlu0 %v7917_v36, %s7764_s17  ;;  %v435_v36 = vor.u32 %v433_v14, %v355_v63  ;;  %v398_v63 = vshll.u32 %v8014_v38, 16 }
  0x24   :  { %v437_v62 = vsel %vm202_vm0, %v435_v36, %v7990_v16  ;;  %v400_v8 = vor.u32 %v398_v63, %v397_v54 }
  0x25   :  { %245 = vrot.lane.b32.xlu1 %v230_v41, %s7765_s26 }
  0x26   :  { %459 = vrot.lane.b32.xlu0 %v434_v55, %s7765_s26 }
  0x29   :  { %414 = vrot.lane.b32.xlu1 %v7932_v43, %s7764_s17  ;;  %v442_v43 = vrot.slane %v382_v24, 1 }
  0x2a   :  { %416 = vrot.lane.b32.xlu0 %v7942_v46, %s7764_s17 }
  0x2d   :  { %461 = vrot.lane.b32.xlu1 %v437_v62, %s7765_s26 }
  0x2e   :  { %19 = vsyncpa [#allocation6], 0  ;;  %463 = vrot.lane.b32.xlu0 %v440_v1, %s7765_s26  ;;  %v441_v46 = vor.u32 %v7997_v21, %v371_v13  ;;  %v8127_v12 = vsel %vm115_vm1, %v389_v56, %v400_v8  ;;  %v444_v14 = vor.u32 %v442_v43, %v379_v29  ;;  %v445_v15 = vrot.slane %v390_v32, 1  ;;  %s7768_s15 = smov 32  }
  0x2f   :  { %v406_v16 = vshll.u32 %v7060_v59, 16  ;;  %v448_v22 = vrot.slane %v398_v63, 1  ;;  %vm180_vm3 = vcmask 1040384   ;;  %vm247_vm5 = vcmask 64512  }
  0x30   :  { %v443_v20 = vsel %vm202_vm0, %v441_v46, %v442_v43  ;;  %v446_v13 = vsel %vm202_vm0, %v444_v14, %v445_v15  ;;  %v447_v24 = vor.u32 %v445_v15, %v387_v42  ;;  %vm8161_vm4 = vmand %vm180_vm3, %vm115_vm1  ;;  %vm272_vm6 = vcmask 130048  }
  0x31   :  { %418 = vrot.lane.b32.xlu1 %v7953_v50, %s7764_s17  ;;  %v408_v17 = vor.u32 %v406_v16, %v405_v10  ;;  %v7061_v50 = vld [vmem:[%s9552_s0 + $0x84] ss:$0 sps:$4 sm:$0x11]   ;;  %v451_v26 = vrot.slane %v406_v16, 1  ;;  %v182_v41 = vsel %vm8161_vm4, 0, %v8026_v51  ;;  %vm534_vm7 = vcmask 195584  }
  0x32   :  { %420 = vrot.lane.b32.xlu0 %v7977_v4, %s7764_s17  ;;  %v450_v4 = vor.u32 %v448_v22, %v395_v2  ;;  %v449_v28 = vsel %vm202_vm0, %v447_v24, %v448_v22  ;;  %v455_v29 = vshll.u32 %v7061_v50, 16  ;;  %vm764_vm8 = vcmask 523264  }
  0x33   :  { %v8140_v21 = vsel %vm115_vm1, %v397_v54, %v408_v17  ;;  %v453_v34 = vor.u32 %v451_v26, %v403_v5  ;;  %v411_v5 = vsel %vm8161_vm4, 0, %v8079_v40  ;;  %vm929_vm9 = vcmask 1047552  }
  0x34   :  { %v452_v32 = vsel %vm202_vm0, %v450_v4, %v451_v26  ;;  %v457_v35 = vrot.slane %v455_v29, 1  ;;  %vm8414_vm10 = vmand %vm929_vm9, %vm202_vm0  ;;  %vm1726_vm11 = vcmask 261120  }
  0x35   :  { %465 = vrot.lane.b32.xlu1 %v443_v20, %s7765_s26 }
  0x36   :  { %467 = vrot.lane.b32.xlu0 %v446_v13, %s7765_s26  ;;  %v458_v39 = vsel %vm202_vm0, %v453_v34, %v457_v35 }
  0x39   :  { %422 = vrot.lane.b32.xlu1 %v7983_v7, %s7764_s17 }
  0x3a   :  { %424 = vrot.lane.b32.xlu0 %v8014_v38, %s7764_s17 }
  0x3d   :  { %469 = vrot.lane.b32.xlu1 %v449_v28, %s7765_s26 }
  0x3e   :  { %471 = vrot.lane.b32.xlu0 %v452_v32, %s7765_s26 }
  0x41   :  { %426 = vrot.lane.b32.xlu1 %v7060_v59, %s7764_s17 }
  0x45   :  { %473 = vrot.lane.b32.xlu1 %v458_v39, %s7765_s26 }
  0x74   :  { %v184_v38 = vpop.permute.xlu0 %183 }
  0x75   :  { %v250_v47 = vsel %vm247_vm5, %v182_v41, %v184_v38 }
  0x78   :  { %v186_v42 = vpop.permute.xlu0 %185 }
  0x79   :  { %v253_v2 = vsel %vm247_vm5, %v8030_v3, %v186_v42 }
  0x7b   :  { %v232_v53 = vpop.permute.xlu1 %231 }
  0x7c   :  { %v274_v55 = vsel %vm272_vm6, %v250_v47, %v232_v53  ;;  %v188_v56 = vpop.permute.xlu0 %187 }
  0x7d   :  { %6952 = vmatprep.mubr.msk.bf16.mxu0 %vm534_vm7, %v274_v55  ;;  %v256_v19 = vsel %vm247_vm5, %v8038_v57, %v188_v56  ;;  %v7766_v55 = vmov 0   ;;  %v7065_v56 = vld [vmem:[%s9555_s3 + $0x30] sm:$0xff]  }
  0x7e   :  { %1161 = vmatprep.subr.bf16.mxu1 %v7766_v55 }
  0x7f   :  { %v234_v61 = vpop.permute.xlu1 %233 }
  0x80   :  { %v276_v51 = vsel %vm272_vm6, %v253_v2, %v234_v61  ;;  %v236_v11 = vpop.permute.xlu0 %235  ;;  %v7067_v2 = vld [vmem:[%s9555_s3 + $0x20] sm:$0xff]   ;;  %v7069_v61 = vld [vmem:[%s9555_s3 + $0x10] sm:$0xff]  }
  0x81   :  { %6953 = vmatmul.mubr.msk.bf16.vlgmr.msra.gmra.mxu0 %vm534_vm7, %v276_v51  ;;  %v278_v25 = vsel %vm272_vm6, %v256_v19, %v236_v11  ;;  %v7068_v19 = vld [vmem:[%s9555_s3 + $0x18] sm:$0xff]   ;;  %v7070_v51 = vld [vmem:[%s9555_s3 + $0x8] sm:$0xff]   ;;  %v7071_v11 = vld [vmem:[%s9555_s3] sm:$0xff]  }
  0x82   :  { %6956 = vmatprep.mubr.msk.bf16.mxu0 %vm534_vm7, %v278_v25  ;;  %v7072_v25 = vld [vmem:[%s9555_s3 + $0x58] sm:$0xff]  }
  0x83   :  { %v190_v37 = vpop.permute.xlu1 %189 }
  0x84   :  { %v192_v44 = vpop.permute.xlu0 %191  ;;  %v259_v9 = vsel %vm247_vm5, %v8043_v0, %v190_v37  ;;  %v7073_v37 = vld [vmem:[%s9555_s3 + $0x50] sm:$0xff]  }
  0x85   :  { %v262_v3 = vsel %vm247_vm5, %v8063_v18, %v192_v44  ;;  %v7074_v44 = vld [vmem:[%s9555_s3 + $0x48] sm:$0xff]  }
  0x87   :  { %v238_v30 = vpop.permute.xlu1 %237 }
  0x88   :  { %v280_v57 = vsel %vm272_vm6, %v259_v9, %v238_v30  ;;  %v240_v52 = vpop.permute.xlu0 %239  ;;  %v8284_v9 = vld [vmem:[%s9554_s2] ss:$0 sm:$0xff]  ;;  %s7767_s2 = smov 64  }
  0x89   :  { %6957 = vmatmul.mubr.msk.bf16.gmra.mxu0 %vm534_vm7, %v280_v57  ;;  %v282_v54 = vsel %vm272_vm6, %v262_v3, %v240_v52  ;;  %v7075_v3 = vld [vmem:[%s9555_s3 + $0x40] sm:$0xff]  }
  0x8a   :  { %6960 = vmatprep.mubr.msk.bf16.mxu1 %vm534_vm7, %v282_v54 }
  0x8b   :  { %v194_v36 = vpop.permute.xlu1 %193 }
  0x8c   :  { %v196_v58 = vpop.permute.xlu0 %195  ;;  %v265_v18 = vsel %vm247_vm5, %v8067_v23, %v194_v36 }
  0x8d   :  { %v268_v59 = vsel %vm247_vm5, %v8071_v27, %v196_v58 }
  0x8f   :  { %v242_v60 = vpop.permute.xlu1 %241 }
  0x90   :  { %v284_v0 = vsel %vm272_vm6, %v265_v18, %v242_v60  ;;  %v244_v62 = vpop.permute.xlu0 %243 }
  0x91   :  { %6961 = vmatmul.mubr.msk.bf16.vlgmr.msra.gmra.mxu1 %vm534_vm7, %v284_v0  ;;  %v286_v63 = vsel %vm272_vm6, %v268_v59, %v244_v62 }
  0x92   :  { %6964 = vmatprep.mubr.msk.bf16.mxu1 %vm534_vm7, %v286_v63 }
  0x93   :  { %v198_v1 = vpop.permute.xlu1 %197 }
  0x94   :  { %v413_v8 = vpop.permute.xlu0 %412  ;;  %v271_v23 = vsel %vm247_vm5, %v8075_v33, %v198_v1 }
  0x95   :  { %v477_v27 = vsel %vm247_vm5, %v411_v5, %v413_v8 }
  0x97   :  { %v246_v43 = vpop.permute.xlu1 %245 }
  0x98   :  { %v288_v10 = vsel %vm272_vm6, %v271_v23, %v246_v43  ;;  %v460_v46 = vpop.permute.xlu0 %459 }
  0x99   :  { %6965 = vmatmul.mubr.msk.bf16.gmra.mxu1 %vm534_vm7, %v288_v10  ;;  %v500_v14 = vsel %vm272_vm6, %v477_v27, %v460_v46 }
  0x9a   :  { %6968 = vmatprep.mubr.msk.bf16.mxu1 %vm534_vm7, %v500_v14 }
  0x9b   :  { %v415_v15 = vpop.permute.xlu1 %414 }
  0x9c   :  { %v417_v16 = vpop.permute.xlu0 %416  ;;  %v480_v17 = vsel %vm247_vm5, %v8082_v31, %v415_v15 }
  0x9d   :  { %v483_v40 = vsel %vm247_vm5, %v8085_v45, %v417_v16 }
  0x9f   :  { %v462_v20 = vpop.permute.xlu1 %461 }
  0xa0   :  { %v502_v33 = vsel %vm272_vm6, %v480_v17, %v462_v20  ;;  %v464_v13 = vpop.permute.xlu0 %463 }
  0xa1   :  { %6969 = vmatmul.mubr.msk.bf16.gmra.mxu1 %vm534_vm7, %v502_v33  ;;  %v504_v22 = vsel %vm272_vm6, %v483_v40, %v464_v13 }
  0xa2   :  { %6972 = vmatprep.mubr.msk.bf16.mxu1 %vm534_vm7, %v504_v22 }
  0xa3   :  { %v419_v24 = vpop.permute.xlu1 %418 }
  0xa4   :  { %v421_v50 = vpop.permute.xlu0 %420  ;;  %v486_v45 = vsel %vm247_vm5, %v8088_v48, %v419_v24 }
  0xa5   :  { %v489_v4 = vsel %vm247_vm5, %v8097_v49, %v421_v50 }
  0xa7   :  { %v466_v26 = vpop.permute.xlu1 %465 }
  0xa8   :  { %v506_v31 = vsel %vm272_vm6, %v486_v45, %v466_v26  ;;  %v468_v28 = vpop.permute.xlu0 %467 }
  0xa9   :  { %6973 = vmatmul.mubr.msk.bf16.gmra.mxu1 %vm534_vm7, %v506_v31  ;;  %v508_v29 = vsel %vm272_vm6, %v489_v4, %v468_v28 }
  0xaa   :  { %6976 = vmatprep.mubr.msk.bf16.mxu1 %vm534_vm7, %v508_v29 }
  0xab   :  { %v423_v32 = vpop.permute.xlu1 %422 }
  0xac   :  { %v425_v34 = vpop.permute.xlu0 %424  ;;  %v492_v49 = vsel %vm247_vm5, %v8117_v6, %v423_v32  ;;  %v7064_v6 = vld [vmem:[%s9555_s3 + $0x38] sm:$0xff]  }
  0xad   :  { %v495_v35 = vsel %vm247_vm5, %v8127_v12, %v425_v34  ;;  %1162 = vmatpush1.bf16.msra.mxu1 %v7064_v6 }
  0xae   :  { %1163 = vmatprep.subr.bf16.mxu1 %v7766_v55 }
  0xaf   :  { %v470_v39 = vpop.permute.xlu1 %469 }
  0xb0   :  { %v510_v48 = vsel %vm272_vm6, %v492_v49, %v470_v39  ;;  %v472_v38 = vpop.permute.xlu0 %471 }
  0xb1   :  { %6977 = vmatmul.mubr.msk.bf16.gmra.mxu1 %vm534_vm7, %v510_v48  ;;  %v512_v41 = vsel %vm272_vm6, %v495_v35, %v472_v38 }
  0xb2   :  { %6980 = vmatprep.mubr.msk.bf16.mxu1 %vm534_vm7, %v512_v41  ;;  %1164 = vmatpush1.bf16.msra.mxu1 %v7065_v56 }
  0xb3   :  { %v427_v42 = vpop.permute.xlu1 %426  ;;  %1165 = vmatprep.subr.bf16.mxu1 %v7766_v55 }
  0xb4   :  { %v498_v47 = vsel %vm247_vm5, %v8140_v21, %v427_v42  ;;  %v7066_v21 = vld [vmem:[%s9555_s3 + $0x28] sm:$0xff]  }
  0xb6   :  { %1166 = vmatpush1.bf16.msra.mxu1 %v7066_v21 }
  0xb7   :  { %v474_v53 = vpop.permute.xlu1 %473  ;;  %1167 = vmatprep.subr.bf16.mxu1 %v7766_v55 }
  0xb8   :  { %v514_v12 = vsel %vm272_vm6, %v498_v47, %v474_v53 }
  0xb9   :  { %6981 = vmatmul.mubr.msk.bf16.gmra.mxu1 %vm534_vm7, %v514_v12 }
  0xba   :  { %1168 = vmatpush1.bf16.msra.mxu1 %v7067_v2 }
  0xbb   :  { %1169 = vmatprep.subr.bf16.mxu1 %v7766_v55 }
  0xbe   :  { %1170 = vmatpush1.bf16.msra.mxu1 %v7068_v19 }
  0xbf   :  { %1171 = vmatprep.subr.bf16.mxu1 %v7766_v55 }
  0xc2   :  { %1172 = vmatpush1.bf16.msra.mxu1 %v7069_v61 }
  0xc3   :  { %1173 = vmatprep.subr.bf16.mxu1 %v7766_v55 }
  0xc6   :  { %1174 = vmatpush1.bf16.msra.mxu1 %v7070_v51 }
  0xc7   :  { %1175 = vmatprep.subr.bf16.mxu1 %v7766_v55 }
  0xca   :  { %1176 = vmatpush1.bf16.msra.mxu1 %v7071_v11 }
  0xcb   :  { %1185 = vmatprep.subr.bf16.mxu1 %v7766_v55 }
  0xce   :  { %1186 = vmatpush2.bf16.msra.mxu1 %v7072_v25 }
  0xcf   :  { %1187 = vmatprep.subr.bf16.mxu1 %v7766_v55 }
  0xd2   :  { %1188 = vmatpush2.bf16.msra.mxu1 %v7073_v37 }
  0xd3   :  { %1189 = vmatprep.subr.bf16.mxu1 %v7766_v55 }
  0xd6   :  { %1190 = vmatpush2.bf16.msra.mxu1 %v7074_v44 }
  0xd7   :  { %1191 = vmatprep.subr.bf16.mxu1 %v7766_v55 }
  0xda   :  { %1192 = vmatpush2.bf16.msra.mxu1 %v7075_v3 }
 0x141   :  { %v6954_v30 = vpop.f32.mrf.mxu0 }
 0x142   :  { %v614_v57 = vadd.f32 %v6954_v30, %v8284_v9 }
 0x143   :  { %v605_v52 = vpop.f32.mrf.mxu0 }
 0x144   :  { %v734_v54 = vmax.f32 %v614_v57, 0.0  ;;  %v606_v36 = vadd.f32 %v8284_v9, %v605_v52 }
 0x145   :  { %v6955_v58 = vpop.f32.mrf.mxu0 }
 0x146   :  { %767 = vst.msk [vmem:[#allocation2 + $0x10] sm:$0xff] %vm764_vm8, %v734_v54  ;;  %v732_v59 = vmax.f32 %v606_v36, 0.0  ;;  %v617_v18 = vadd.f32 %v6955_v58, %v8284_v9 }
 0x147   :  { %v608_v60 = vpop.f32.mrf.mxu0 }
 0x148   :  { %765 = vst.msk [vmem:[#allocation2] sm:$0xff] %vm764_vm8, %v732_v59  ;;  %v735_v0 = vmax.f32 %v617_v18, 0.0  ;;  %v609_v62 = vadd.f32 %v8284_v9, %v608_v60 }
 0x149   :  { %v6958_v63 = vpop.f32.mrf.mxu0 }
 0x14a   :  { %768 = vst.msk [vmem:[#allocation2 + $0x18] sm:$0xff] %vm764_vm8, %v735_v0  ;;  %v733_v1 = vmax.f32 %v609_v62, 0.0  ;;  %v630_v5 = vadd.f32 %v6958_v63, %v8284_v9 }
 0x14b   :  { %v621_v8 = vpop.f32.mrf.mxu0 }
 0x14c   :  { %766 = vst.msk [vmem:[#allocation2 + $0x8] sm:$0xff] %vm764_vm8, %v733_v1  ;;  %v738_v27 = vmax.f32 %v630_v5, 0.0  ;;  %v622_v23 = vadd.f32 %v8284_v9, %v621_v8 }
 0x14d   :  { %v6959_v43 = vpop.f32.mrf.mxu0 }
 0x14e   :  { %771 = vst.msk [vmem:[#allocation2 + $0x30] sm:$0xff] %vm764_vm8, %v738_v27  ;;  %v736_v10 = vmax.f32 %v622_v23, 0.0  ;;  %v633_v46 = vadd.f32 %v6959_v43, %v8284_v9 }
 0x14f   :  { %v624_v14 = vpop.f32.mrf.mxu0 }
 0x150   :  { %769 = vst.msk [vmem:[#allocation2 + $0x20] sm:$0xff] %vm764_vm8, %v736_v10  ;;  %v739_v15 = vmax.f32 %v633_v46, 0.0  ;;  %v625_v16 = vadd.f32 %v8284_v9, %v624_v14 }
 0x151   :  { %v6962_v40 = vpop.f32.mrf.mxu1  ;;  %v799_v17 = vld [vmem:[#allocation2 + $0x10] ss:$2 sm:$0xff]  ;;  %v831_v20 = vld [vmem:[#allocation2 + $0x11] ss:$2 sm:$0xff] }
 0x152   :  { %772 = vst.msk [vmem:[#allocation2 + $0x38] sm:$0xff] %vm764_vm8, %v739_v15  ;;  %v737_v33 = vmax.f32 %v625_v16, 0.0  ;;  %v646_v13 = vadd.f32 %v6962_v40, %v8284_v9  ;;  %v861_v31 = vmax.f32 %v799_v17, %v831_v20 }
 0x153   :  { %v637_v22 = vpop.f32.mrf.mxu1  ;;  %v797_v24 = vld [vmem:[#allocation2] ss:$2 sm:$0xff]  ;;  %v829_v50 = vld [vmem:[#allocation2 + $0x1] ss:$2 sm:$0xff] }
 0x154   :  { %770 = vst.msk [vmem:[#allocation2 + $0x28] sm:$0xff] %vm764_vm8, %v737_v33  ;;  %v742_v4 = vmax.f32 %v646_v13, 0.0  ;;  %v638_v45 = vadd.f32 %v8284_v9, %v637_v22  ;;  %v860_v26 = vmax.f32 %v797_v24, %v829_v50 }
 0x155   :  { %v6963_v28 = vpop.f32.mrf.mxu1 }
 0x156   :  { %775 = vst.msk [vmem:[#allocation2 + $0x50] sm:$0xff] %vm764_vm8, %v742_v4  ;;  %v740_v29 = vmax.f32 %v638_v45, 0.0  ;;  %v649_v32 = vadd.f32 %v6963_v28, %v8284_v9  ;;  %v876_v34 = vpack.c.bf16 %v861_v31, %v860_v26 }
 0x157   :  { %v640_v35 = vpop.f32.mrf.mxu1 }
 0x158   :  { %773 = vst.msk [vmem:[#allocation2 + $0x40] sm:$0xff] %vm764_vm8, %v740_v29  ;;  %v743_v49 = vmax.f32 %v649_v32, 0.0  ;;  %v641_v39 = vadd.f32 %v8284_v9, %v640_v35  ;;  %936 = vrot.lane.b32.xlu0 %v876_v34, %s7767_s2  ;;  %v885_v48 = vshrl.u32 %v876_v34, 16  ;;  %v888_v53 = vshll.u32 %v876_v34, 16 }
 0x159   :  { %v6966_v38 = vpop.f32.mrf.mxu1  ;;  %v803_v41 = vld [vmem:[#allocation2 + $0x30] ss:$2 sm:$0xff]  ;;  %v835_v42 = vld [vmem:[#allocation2 + $0x31] ss:$2 sm:$0xff] }
 0x15a   :  { %776 = vst.msk [vmem:[#allocation2 + $0x58] sm:$0xff] %vm764_vm8, %v743_v49  ;;  %v741_v47 = vmax.f32 %v641_v39, 0.0  ;;  %v662_v12 = vadd.f32 %v6966_v38, %v8284_v9  ;;  %v887_v2 = vrot.slane %v885_v48, 7  ;;  %v863_v11 = vmax.f32 %v803_v41, %v835_v42 }
 0x15b   :  { %v653_v6 = vpop.f32.mrf.mxu1  ;;  %v801_v56 = vld [vmem:[#allocation2 + $0x20] ss:$2 sm:$0xff]  ;;  %v833_v21 = vld [vmem:[#allocation2 + $0x21] ss:$2 sm:$0xff]  ;;  %v917_v57 = vrot.slane %v888_v53, 1 }
 0x15c   :  { %774 = vst.msk [vmem:[#allocation2 + $0x48] sm:$0xff] %vm764_vm8, %v741_v47  ;;  %v746_v19 = vmax.f32 %v662_v12, 0.0  ;;  %v654_v61 = vadd.f32 %v8284_v9, %v653_v6  ;;  %v862_v51 = vmax.f32 %v801_v56, %v833_v21  ;;  %v8313_v37 = vor.u32 %v888_v53, %v887_v2 }
 0x15d   :  { %v6967_v25 = vpop.f32.mrf.mxu1  ;;  %v918_v1 = vor.u32 %v917_v57, %v885_v48 }
 0x15e   :  { %779 = vst.msk [vmem:[#allocation2 + $0x70] sm:$0xff] %vm764_vm8, %v746_v19  ;;  %v744_v44 = vmax.f32 %v654_v61, 0.0  ;;  %v665_v3 = vadd.f32 %v6967_v25, %v8284_v9  ;;  %v877_v30 = vpack.c.bf16 %v863_v11, %v862_v51 }
 0x15f   :  { %v656_v52 = vpop.f32.mrf.mxu1 }
 0x160   :  { %777 = vst.msk [vmem:[#allocation2 + $0x60] sm:$0xff] %vm764_vm8, %v744_v44  ;;  %v747_v54 = vmax.f32 %v665_v3, 0.0  ;;  %v657_v36 = vadd.f32 %v8284_v9, %v656_v52  ;;  %938 = vrot.lane.b32.xlu1 %v877_v30, %s7767_s2  ;;  %v892_v58 = vshrl.u32 %v877_v30, 16  ;;  %v895_v59 = vshll.u32 %v877_v30, 16 }
 0x161   :  { %v6970_v18 = vpop.f32.mrf.mxu1  ;;  %v807_v60 = vld [vmem:[#allocation2 + $0x50] ss:$2 sm:$0xff]  ;;  %v839_v0 = vld [vmem:[#allocation2 + $0x51] ss:$2 sm:$0xff] }
 0x162   :  { %780 = vst.msk [vmem:[#allocation2 + $0x78] sm:$0xff] %vm764_vm8, %v747_v54  ;;  %v745_v62 = vmax.f32 %v657_v36, 0.0  ;;  %v678_v63 = vadd.f32 %v6970_v18, %v8284_v9  ;;  %v919_v5 = vrot.slane %v895_v59, 1  ;;  %v865_v43 = vmax.f32 %v807_v60, %v839_v0 }
 0x163   :  { %v669_v8 = vpop.f32.mrf.mxu1  ;;  %v805_v27 = vld [vmem:[#allocation2 + $0x40] ss:$2 sm:$0xff]  ;;  %v837_v23 = vld [vmem:[#allocation2 + $0x41] ss:$2 sm:$0xff]  ;;  %v894_v10 = vrot.slane %v892_v58, 7 }
 0x164   :  { %778 = vst.msk [vmem:[#allocation2 + $0x68] sm:$0xff] %vm764_vm8, %v745_v62  ;;  %v750_v46 = vmax.f32 %v678_v63, 0.0  ;;  %v670_v14 = vadd.f32 %v8284_v9, %v669_v8  ;;  %v920_v15 = vsel %vm202_vm0, %v918_v1, %v919_v5  ;;  %v864_v16 = vmax.f32 %v805_v27, %v837_v23 }
 0x165   :  { %v6971_v40 = vpop.f32.mrf.mxu1  ;;  %6459 = vmatprep.mubr.msk.bf16.mxu1 %vm764_vm8, %v920_v15  ;;  %v921_v17 = vor.u32 %v919_v5, %v892_v58  ;;  %v897_v20 = vor.u32 %v895_v59, %v894_v10 }
 0x166   :  { %783 = vst.msk [vmem:[#allocation2 + $0x90] sm:$0xff] %vm764_vm8, %v750_v46  ;;  %v748_v33 = vmax.f32 %v670_v14, 0.0  ;;  %v681_v13 = vadd.f32 %v6971_v40, %v8284_v9  ;;  %v878_v22 = vpack.c.bf16 %v865_v43, %v864_v16 }
 0x167   :  { %v672_v24 = vpop.f32.mrf.mxu1  ;;  %v8329_v50 = vsel %vm115_vm1, %v887_v2, %v897_v20 }
 0x168   :  { %781 = vst.msk [vmem:[#allocation2 + $0x80] sm:$0xff] %vm764_vm8, %v748_v33  ;;  %v751_v4 = vmax.f32 %v681_v13, 0.0  ;;  %v673_v45 = vadd.f32 %v8284_v9, %v672_v24  ;;  %v900_v26 = vshrl.u32 %v878_v22, 16  ;;  %v903_v31 = vshll.u32 %v878_v22, 16  ;;  %940 = vrot.lane.b32.xlu0 %v878_v22, %s7767_s2 }
 0x169   :  { %v6974_v28 = vpop.f32.mrf.mxu1  ;;  %v811_v29 = vld [vmem:[#allocation2 + $0x70] ss:$2 sm:$0xff]  ;;  %v843_v32 = vld [vmem:[#allocation2 + $0x71] ss:$2 sm:$0xff] }
 0x16a   :  { %784 = vst.msk [vmem:[#allocation2 + $0x98] sm:$0xff] %vm764_vm8, %v751_v4  ;;  %v749_v34 = vmax.f32 %v673_v45, 0.0  ;;  %v694_v35 = vadd.f32 %v6974_v28, %v8284_v9  ;;  %v922_v49 = vrot.slane %v903_v31, 1  ;;  %v867_v41 = vmax.f32 %v811_v29, %v843_v32 }
 0x16b   :  { %v685_v39 = vpop.f32.mrf.mxu1  ;;  %v809_v48 = vld [vmem:[#allocation2 + $0x60] ss:$2 sm:$0xff]  ;;  %v841_v38 = vld [vmem:[#allocation2 + $0x61] ss:$2 sm:$0xff]  ;;  %v902_v42 = vrot.slane %v900_v26, 7 }
 0x16c   :  { %782 = vst.msk [vmem:[#allocation2 + $0x88] sm:$0xff] %vm764_vm8, %v749_v34  ;;  %v754_v47 = vmax.f32 %v694_v35, 0.0  ;;  %v686_v53 = vadd.f32 %v8284_v9, %v685_v39  ;;  %v866_v12 = vmax.f32 %v809_v48, %v841_v38  ;;  %v8339_v6 = vsel %vm202_vm0, %v921_v17, %v922_v49 }
 0x16d   :  { %v6975_v56 = vpop.f32.mrf.mxu1  ;;  %v905_v21 = vor.u32 %v903_v31, %v902_v42  ;;  %v924_v59 = vor.u32 %v922_v49, %v900_v26 }
 0x16e   :  { %787 = vst.msk [vmem:[#allocation2 + $0xb0] sm:$0xff] %vm764_vm8, %v754_v47  ;;  %v752_v2 = vmax.f32 %v686_v53, 0.0  ;;  %v697_v19 = vadd.f32 %v6975_v56, %v8284_v9  ;;  %v8343_v61 = vpack.c.bf16 %v867_v41, %v866_v12 }
 0x16f   :  { %v688_v51 = vpop.f32.mrf.mxu1  ;;  %v8346_v11 = vsel %vm115_vm1, %v894_v10, %v905_v21 }
 0x170   :  { %785 = vst.msk [vmem:[#allocation2 + $0xa0] sm:$0xff] %vm764_vm8, %v752_v2  ;;  %v755_v25 = vmax.f32 %v697_v19, 0.0  ;;  %v689_v44 = vadd.f32 %v8284_v9, %v688_v51  ;;  %v911_v3 = vshll.u32 %v8343_v61, 16  ;;  %942 = vrot.lane.b32.xlu1 %v8343_v61, %s7767_s2  ;;  %v908_v30 = vshrl.u32 %v8343_v61, 16 }
 0x171   :  { %v6978_v57 = vpop.f32.mrf.mxu1  ;;  %v815_v52 = vld [vmem:[#allocation2 + $0x90] ss:$2 sm:$0xff]  ;;  %v847_v54 = vld [vmem:[#allocation2 + $0x91] ss:$2 sm:$0xff] }
 0x172   :  { %788 = vst.msk [vmem:[#allocation2 + $0xb8] sm:$0xff] %vm764_vm8, %v755_v25  ;;  %v753_v36 = vmax.f32 %v689_v44, 0.0  ;;  %v710_v58 = vadd.f32 %v6978_v57, %v8284_v9  ;;  %v8356_v18 = vrot.slane %v911_v3, 1  ;;  %v869_v63 = vmax.f32 %v815_v52, %v847_v54 }
 0x173   :  { %v701_v60 = vpop.f32.mrf.mxu1  ;;  %v813_v0 = vld [vmem:[#allocation2 + $0x80] ss:$2 sm:$0xff]  ;;  %v845_v62 = vld [vmem:[#allocation2 + $0x81] ss:$2 sm:$0xff]  ;;  %v910_v1 = vrot.slane %v908_v30, 7 }
 0x174   :  { %786 = vst.msk [vmem:[#allocation2 + $0xa8] sm:$0xff] %vm764_vm8, %v753_v36  ;;  %v758_v5 = vmax.f32 %v710_v58, 0.0  ;;  %v702_v8 = vadd.f32 %v8284_v9, %v701_v60  ;;  %v868_v27 = vmax.f32 %v813_v0, %v845_v62  ;;  %v8364_v23 = vsel %vm202_vm0, %v924_v59, %v8356_v18 }
 0x175   :  { %v6979_v43 = vpop.f32.mrf.mxu1  ;;  %v913_v10 = vor.u32 %v911_v3, %v910_v1 }
 0x176   :  { %791 = vst.msk [vmem:[#allocation2 + $0xd0] sm:$0xff] %vm764_vm8, %v758_v5  ;;  %v756_v46 = vmax.f32 %v702_v8, 0.0  ;;  %v713_v14 = vadd.f32 %v6979_v43, %v8284_v9  ;;  %v8368_v15 = vpack.c.bf16 %v869_v63, %v868_v27 }
 0x177   :  { %v704_v16 = vpop.f32.mrf.mxu1  ;;  %v8371_v40 = vsel %vm115_vm1, %v902_v42, %v913_v10 }
 0x178   :  { %789 = vst.msk [vmem:[#allocation2 + $0xc0] sm:$0xff] %vm764_vm8, %v756_v46  ;;  %v759_v17 = vmax.f32 %v713_v14, 0.0  ;;  %v705_v20 = vadd.f32 %v8284_v9, %v704_v16  ;;  %1010 = vrot.lane.b32.xlu0 %v8368_v15, %s7767_s2  ;;  %v964_v4 = vshll.u32 %v8368_v15, 16  ;;  %v961_v42 = vshrl.u32 %v8368_v15, 16 }
 0x179   :  { %v6982_v33 = vpop.f32.mrf.mxu1  ;;  %v819_v13 = vld [vmem:[#allocation2 + $0xb0] ss:$2 sm:$0xff]  ;;  %v851_v22 = vld [vmem:[#allocation2 + $0xb1] ss:$2 sm:$0xff] }
 0x17a   :  { %792 = vst.msk [vmem:[#allocation2 + $0xd8] sm:$0xff] %vm764_vm8, %v759_v17  ;;  %v757_v24 = vmax.f32 %v705_v20, 0.0  ;;  %v726_v45 = vadd.f32 %v6982_v33, %v8284_v9  ;;  %v871_v35 = vmax.f32 %v819_v13, %v851_v22  ;;  %v993_v41 = vrot.slane %v964_v4, 1 }
 0x17b   :  { %v717_v26 = vpop.f32.mrf.mxu1  ;;  %v817_v31 = vld [vmem:[#allocation2 + $0xa0] ss:$2 sm:$0xff]  ;;  %v849_v28 = vld [vmem:[#allocation2 + $0xa1] ss:$2 sm:$0xff]  ;;  %v963_v54 = vrot.slane %v961_v42, 7 }
 0x17c   :  { %790 = vst.msk [vmem:[#allocation2 + $0xc8] sm:$0xff] %vm764_vm8, %v757_v24  ;;  %v762_v29 = vmax.f32 %v726_v45, 0.0  ;;  %v718_v32 = vadd.f32 %v8284_v9, %v717_v26  ;;  %v870_v34 = vmax.f32 %v817_v31, %v849_v28  ;;  %v994_v25 = vor.u32 %v993_v41, %v961_v42 }
 0x17d   :  { %v6983_v49 = vpop.f32.mrf.mxu1 }
 0x17e   :  { %795 = vst.msk [vmem:[#allocation2 + $0xf0] sm:$0xff] %vm764_vm8, %v762_v29  ;;  %v760_v39 = vmax.f32 %v718_v32, 0.0  ;;  %v729_v48 = vadd.f32 %v6983_v49, %v8284_v9  ;;  %v881_v38 = vpack.c.bf16 %v871_v35, %v870_v34  ;;  %v916_v35 = vsel %vm8161_vm4, 0, %v8313_v37 }
 0x17f   :  { %v720_v47 = vpop.f32.mrf.mxu1 }
 0x180   :  { %793 = vst.msk [vmem:[#allocation2 + $0xe0] sm:$0xff] %vm764_vm8, %v760_v39  ;;  %v763_v53 = vmax.f32 %v729_v48, 0.0  ;;  %v721_v12 = vadd.f32 %v8284_v9, %v720_v47  ;;  %v968_v56 = vshrl.u32 %v881_v38, 16  ;;  %v971_v21 = vshll.u32 %v881_v38, 16  ;;  %1012 = vrot.lane.b32.xlu1 %v881_v38, %s7767_s2 }
 0x181   :  { %v823_v2 = vld [vmem:[#allocation2 + $0xd0] ss:$2 sm:$0xff]  ;;  %v855_v19 = vld [vmem:[#allocation2 + $0xd1] ss:$2 sm:$0xff]  ;;  %v927_v38 = vor.u32 %v8356_v18, %v908_v30  ;;  %v966_v30 = vor.u32 %v964_v4, %v963_v54 }
 0x182   :  { %796 = vst.msk [vmem:[#allocation2 + $0xf8] sm:$0xff] %vm764_vm8, %v763_v53  ;;  %v761_v51 = vmax.f32 %v721_v12, 0.0  ;;  %v995_v44 = vrot.slane %v971_v21, 1  ;;  %v970_v3 = vrot.slane %v968_v56, 7  ;;  %v873_v58 = vmax.f32 %v823_v2, %v855_v19  ;;  %v8447_v2 = vld [vmem:[%s9556_s4] ss:$0 sm:$0xff] }
 0x183   :  { %v821_v57 = vld [vmem:[#allocation2 + $0xc0] ss:$2 sm:$0xff]  ;;  %v853_v52 = vld [vmem:[#allocation2 + $0xc1] ss:$2 sm:$0xff] }
 0x184   :  { %794 = vst.msk [vmem:[#allocation2 + $0xe8] sm:$0xff] %vm764_vm8, %v761_v51  ;;  %v872_v36 = vmax.f32 %v821_v57, %v853_v52  ;;  %v996_v9 = vsel %vm202_vm0, %v994_v25, %v995_v44  ;;  %v973_v59 = vor.u32 %v971_v21, %v970_v3  ;;  %v997_v8 = vor.u32 %v995_v44, %v968_v56  ;;  %v7076_v21 = vld [vmem:[%s9557_s5] sm:$0xff]  }
 0x185   :  { %6992 = vmatprep.mubr.msk.bf16.mxu0 %vm764_vm8, %v7076_v21 }
 0x186   :  { %v882_v60 = vpack.c.bf16 %v873_v58, %v872_v36  ;;  %v974_v0 = vsel %vm115_vm1, %v963_v54, %v973_v59 }
 0x188   :  { %v976_v62 = vshrl.u32 %v882_v60, 16  ;;  %v979_v63 = vshll.u32 %v882_v60, 16  ;;  %1014 = vrot.lane.b32.xlu0 %v882_v60, %s7767_s2 }
 0x189   :  { %v827_v1 = vld [vmem:[#allocation2 + $0xf0] ss:$2 sm:$0xff]  ;;  %v859_v5 = vld [vmem:[#allocation2 + $0xf1] ss:$2 sm:$0xff] }
 0x18a   :  { %v998_v27 = vrot.slane %v979_v63, 1  ;;  %v978_v43 = vrot.slane %v976_v62, 7  ;;  %v875_v16 = vmax.f32 %v827_v1, %v859_v5 }
 0x18b   :  { %v825_v10 = vld [vmem:[#allocation2 + $0xe0] ss:$2 sm:$0xff]  ;;  %v857_v46 = vld [vmem:[#allocation2 + $0xe1] ss:$2 sm:$0xff] }
 0x18c   :  { %v874_v14 = vmax.f32 %v825_v10, %v857_v46  ;;  %v999_v17 = vsel %vm202_vm0, %v997_v8, %v998_v27  ;;  %v981_v20 = vor.u32 %v979_v63, %v978_v43  ;;  %v1000_v45 = vor.u32 %v998_v27, %v976_v62 }
 0x18e   :  { %v883_v33 = vpack.c.bf16 %v875_v16, %v874_v14  ;;  %v982_v13 = vsel %vm115_vm1, %v970_v3, %v981_v20 }
 0x190   :  { %v987_v22 = vshll.u32 %v883_v33, 16  ;;  %1016 = vrot.lane.b32.xlu1 %v883_v33, %s7767_s2  ;;  %v984_v24 = vshrl.u32 %v883_v33, 16 }
 0x192   :  { %v1001_v26 = vrot.slane %v987_v22, 1  ;;  %v986_v31 = vrot.slane %v984_v24, 7 }
 0x194   :  { %v1002_v28 = vsel %vm202_vm0, %v1000_v45, %v1001_v26  ;;  %v989_v29 = vor.u32 %v987_v22, %v986_v31 }
 0x196   :  { %v990_v32 = vsel %vm115_vm1, %v978_v43, %v989_v29 }
 0x1ca   :  { %v937_v34 = vpop.permute.xlu0 %936 }
 0x1cb   :  { %v946_v49 = vsel %vm764_vm8, %v916_v35, %v937_v34 }
 0x1cc   :  { %1194 = vmatmul.mubr.bf16.vlgmr.msra.gmra.mxu1 %v946_v49 }
 0x1cd   :  { %6460 = vmatprep.mubr.msk.bf16.mxu1 %vm764_vm8, %v8339_v6 }
 0x1d2   :  { %v939_v39 = vpop.permute.xlu1 %938 }
 0x1d3   :  { %v950_v48 = vsel %vm764_vm8, %v8329_v50, %v939_v39  ;;  %v931_v50 = vsel %vm8414_vm10, %v927_v38, 0 }
 0x1d4   :  { %1202 = vmatmul.mubr.bf16.gmra.mxu1 %v950_v48 }
 0x1d5   :  { %6461 = vmatprep.mubr.msk.bf16.mxu1 %vm764_vm8, %v8364_v23 }
 0x1da   :  { %v941_v41 = vpop.permute.xlu0 %940 }
 0x1db   :  { %v954_v6 = vsel %vm764_vm8, %v8346_v11, %v941_v41  ;;  %v992_v11 = vsel %vm8161_vm4, 0, %v966_v30 }
 0x1dc   :  { %1210 = vmatmul.mubr.bf16.gmra.mxu1 %v954_v6 }
 0x1dd   :  { %6462 = vmatprep.mubr.msk.bf16.mxu1 %vm764_vm8, %v931_v50 }
 0x1e2   :  { %v943_v23 = vpop.permute.xlu1 %942 }
 0x1e3   :  { %v958_v61 = vsel %vm764_vm8, %v8371_v40, %v943_v23  ;;  %v1003_v40 = vor.u32 %v1001_v26, %v984_v24 }
 0x1e4   :  { %1218 = vmatmul.mubr.bf16.gmra.mxu1 %v958_v61 }
 0x1e5   :  { %6463 = vmatprep.mubr.msk.bf16.mxu1 %vm764_vm8, %v996_v9  ;;  %v1005_v7 = vsel %vm8414_vm10, %v1003_v40, 0 }
 0x1ea   :  { %v1011_v18 = vpop.permute.xlu0 %1010 }
 0x1eb   :  { %v1020_v42 = vsel %vm764_vm8, %v992_v11, %v1011_v18 }
 0x1ec   :  { %1226 = vmatmul.mubr.bf16.gmra.mxu1 %v1020_v42 }
 0x1ed   :  { %6464 = vmatprep.mubr.msk.bf16.mxu1 %vm764_vm8, %v999_v17 }
 0x1f2   :  { %v1013_v47 = vpop.permute.xlu1 %1012 }
 0x1f3   :  { %v1024_v53 = vsel %vm764_vm8, %v974_v0, %v1013_v47 }
 0x1f4   :  { %1234 = vmatmul.mubr.bf16.gmra.mxu1 %v1024_v53 }
 0x1f5   :  { %6465 = vmatprep.mubr.msk.bf16.mxu1 %vm764_vm8, %v1002_v28 }
 0x1fa   :  { %v1015_v12 = vpop.permute.xlu0 %1014 }
 0x1fb   :  { %v1028_v15 = vsel %vm764_vm8, %v982_v13, %v1015_v12 }
 0x1fc   :  { %1242 = vmatmul.mubr.bf16.gmra.mxu1 %v1028_v15 }
 0x1fd   :  { %6466 = vmatprep.mubr.msk.bf16.mxu1 %vm764_vm8, %v1005_v7 }
 0x202   :  { %v1017_v4 = vpop.permute.xlu1 %1016 }
 0x203   :  { %v1032_v56 = vsel %vm764_vm8, %v990_v32, %v1017_v4 }
 0x204   :  { %1250 = vmatmul.mubr.bf16.gmra.mxu1 %v1032_v56 }
 0x205   :  { %2008 = vmatprep.mubr.bf16.mxu1 %v7766_v55 }
 0x28c   :  { %v1195_v19 = vpop.f32.mrf.mxu1 }
 0x28d   :  { %v1196_v51 = vadd.f32 %v8447_v2, %v1195_v19 }
 0x28e   :  { %v1197_v25 = vpop.f32.mrf.mxu1 }
 0x28f   :  { %v1258_v44 = vmax.f32 %v1196_v51, 0.0 }
 0x290   :  { %v1198_v3 = vpop.f32.mrf.mxu1 }
 0x291   :  { %1274 = vst.msk [vmem:[#allocation2] sm:$0xff] %vm764_vm8, %v1258_v44  ;;  %v1199_v57 = vadd.f32 %v8447_v2, %v1198_v3 }
 0x292   :  { %v1200_v52 = vpop.f32.mrf.mxu1 }
 0x293   :  { %v1259_v54 = vmax.f32 %v1199_v57, 0.0 }
 0x294   :  { %v1203_v36 = vpop.f32.mrf.mxu1 }
 0x295   :  { %1275 = vst.msk [vmem:[#allocation2 + $0x8] sm:$0xff] %vm764_vm8, %v1259_v54  ;;  %v1204_v58 = vadd.f32 %v8447_v2, %v1203_v36 }
 0x296   :  { %v1205_v9 = vpop.f32.mrf.mxu1 }
 0x297   :  { %v1260_v59 = vmax.f32 %v1204_v58, 0.0 }
 0x298   :  { %v1206_v60 = vpop.f32.mrf.mxu1 }
 0x299   :  { %1276 = vst.msk [vmem:[#allocation2 + $0x10] sm:$0xff] %vm764_vm8, %v1260_v59  ;;  %v1207_v0 = vadd.f32 %v8447_v2, %v1206_v60 }
 0x29a   :  { %v1208_v62 = vpop.f32.mrf.mxu1 }
 0x29b   :  { %v1261_v63 = vmax.f32 %v1207_v0, 0.0 }
 0x29c   :  { %v1211_v1 = vpop.f32.mrf.mxu1 }
 0x29d   :  { %1277 = vst.msk [vmem:[#allocation2 + $0x18] sm:$0xff] %vm764_vm8, %v1261_v63  ;;  %v1212_v5 = vadd.f32 %v8447_v2, %v1211_v1 }
 0x29e   :  { %v1213_v8 = vpop.f32.mrf.mxu1 }
 0x29f   :  { %v1262_v27 = vmax.f32 %v1212_v5, 0.0 }
 0x2a0   :  { %v1214_v43 = vpop.f32.mrf.mxu1 }
 0x2a1   :  { %1278 = vst.msk [vmem:[#allocation2 + $0x20] sm:$0xff] %vm764_vm8, %v1262_v27  ;;  %v1215_v10 = vadd.f32 %v8447_v2, %v1214_v43 }
 0x2a2   :  { %v1216_v46 = vpop.f32.mrf.mxu1 }
 0x2a3   :  { %v1263_v14 = vmax.f32 %v1215_v10, 0.0 }
 0x2a4   :  { %v1219_v16 = vpop.f32.mrf.mxu1  ;;  %v1291_v43 = vld [vmem:[#allocation2 + $0x10] ss:$2 sm:$0xff]  ;;  %v1299_v10 = vld [vmem:[#allocation2 + $0x11] ss:$2 sm:$0xff] }
 0x2a5   :  { %1279 = vst.msk [vmem:[#allocation2 + $0x28] sm:$0xff] %vm764_vm8, %v1263_v14  ;;  %v1220_v17 = vadd.f32 %v8447_v2, %v1219_v16  ;;  %v1290_v14 = vld [vmem:[#allocation2] ss:$2 sm:$0xff]  ;;  %v1298_v16 = vld [vmem:[#allocation2 + $0x1] ss:$2 sm:$0xff] }
 0x2a6   :  { %v1221_v20 = vpop.f32.mrf.mxu1 }
 0x2a7   :  { %v1264_v33 = vmax.f32 %v1220_v17, 0.0  ;;  %v1307_v20 = vmax.f32 %v1291_v43, %v1299_v10 }
 0x2a8   :  { %v1222_v13 = vpop.f32.mrf.mxu1 }
 0x2a9   :  { %1280 = vst.msk [vmem:[#allocation2 + $0x30] sm:$0xff] %vm764_vm8, %v1264_v33  ;;  %v1223_v22 = vadd.f32 %v8447_v2, %v1222_v13  ;;  %v1306_v33 = vmax.f32 %v1290_v14, %v1298_v16 }
 0x2aa   :  { %v1224_v24 = vpop.f32.mrf.mxu1 }
 0x2ab   :  { %v1265_v45 = vmax.f32 %v1223_v22, 0.0  ;;  %v1322_v13 = vpack.c.bf16 %v1307_v20, %v1306_v33  ;;  %v7082_v22 = vld [vmem:[%s9558_s6 + $0x34] ss:$8 sps:$4 sm:$0xff]   ;;  %v7077_v24 = vld [vmem:[%s9557_s5 + $0x8] sm:$0xff]  }
 0x2ac   :  { %v1227_v26 = vpop.f32.mrf.mxu1  ;;  %v1300_v5 = vld [vmem:[#allocation2 + $0x21] ss:$2 sm:$0xff] }
 0x2ad   :  { %1281 = vst.msk [vmem:[#allocation2 + $0x38] sm:$0xff] %vm764_vm8, %v1265_v45  ;;  %v1228_v31 = vadd.f32 %v8447_v2, %v1227_v26  ;;  %v7078_v45 = vld [vmem:[%s9557_s5 + $0x10] sm:$0xff]  }
 0x2ae   :  { %v1229_v28 = vpop.f32.mrf.mxu1  ;;  %v7080_v26 = vld [vmem:[%s9558_s6 + $0x30] ss:$8 sps:$4 sm:$0xff]  }
 0x2af   :  { %v1266_v29 = vmax.f32 %v1228_v31, 0.0  ;;  %v7085_v31 = vld [vmem:[%s9558_s6 + $0x24] ss:$8 sps:$4 sm:$0xff]   ;;  %v7083_v28 = vld [vmem:[%s9558_s6 + $0x20] ss:$8 sps:$4 sm:$0xff]  }
 0x2b0   :  { %v1230_v32 = vpop.f32.mrf.mxu1 }
 0x2b1   :  { %1282 = vst.msk [vmem:[#allocation2 + $0x40] sm:$0xff] %vm764_vm8, %v1266_v29  ;;  %v1231_v34 = vadd.f32 %v8447_v2, %v1230_v32  ;;  %v7079_v29 = vld [vmem:[%s9557_s5 + $0x18] sm:$0xff]  }
 0x2b2   :  { %v1232_v35 = vpop.f32.mrf.mxu1  ;;  %v7086_v32 = vld [vmem:[%s9558_s6 + $0x10] ss:$8 sps:$4 sm:$0xff]  }
 0x2b3   :  { %v1267_v49 = vmax.f32 %v1231_v34, 0.0  ;;  %v7088_v34 = vld [vmem:[%s9558_s6 + $0x14] ss:$8 sps:$4 sm:$0xff]   ;;  %v7091_v35 = vld [vmem:[%s9558_s6 + $0x4] ss:$8 sps:$4 sm:$0xff]  }
 0x2b4   :  { %v1235_v39 = vpop.f32.mrf.mxu1  ;;  %v1293_v0 = vld [vmem:[#allocation2 + $0x30] ss:$2 sm:$0xff]  ;;  %v1301_v62 = vld [vmem:[#allocation2 + $0x31] ss:$2 sm:$0xff] }
 0x2b5   :  { %1283 = vst.msk [vmem:[#allocation2 + $0x48] sm:$0xff] %vm764_vm8, %v1267_v49  ;;  %v1236_v48 = vadd.f32 %v8447_v2, %v1235_v39  ;;  %v1309_v27 = vmax.f32 %v1293_v0, %v1301_v62  ;;  %v7089_v49 = vld [vmem:[%s9558_s6] ss:$8 sps:$4 sm:$0xff]   ;;  %v8590_v62 = vld [vmem:[%s9560_s8 + $0x10] ss:$8 sps:$4 sm:$0xff]  }
 0x2b6   :  { %v1237_v38 = vpop.f32.mrf.mxu1 }
 0x2b7   :  { %v1268_v37 = vmax.f32 %v1236_v48, 0.0 }
 0x2b8   :  { %v1238_v41 = vpop.f32.mrf.mxu1 }
 0x2b9   :  { %1284 = vst.msk [vmem:[#allocation2 + $0x50] sm:$0xff] %vm764_vm8, %v1268_v37  ;;  %v1239_v6 = vadd.f32 %v8447_v2, %v1238_v41 }
 0x2ba   :  { %v1240_v50 = vpop.f32.mrf.mxu1 }
 0x2bb   :  { %v1269_v23 = vmax.f32 %v1239_v6, 0.0 }
 0x2bc   :  { %v1243_v61 = vpop.f32.mrf.mxu1  ;;  %v1294_v52 = vld [vmem:[#allocation2 + $0x40] ss:$2 sm:$0xff]  ;;  %v1302_v58 = vld [vmem:[#allocation2 + $0x41] ss:$2 sm:$0xff] }
 0x2bd   :  { %1285 = vst.msk [vmem:[#allocation2 + $0x58] sm:$0xff] %vm764_vm8, %v1269_v23  ;;  %v1244_v30 = vadd.f32 %v8447_v2, %v1243_v61  ;;  %v1310_v1 = vmax.f32 %v1294_v52, %v1302_v58  ;;  %v8562_v58 = vld [vmem:[%s9560_s8 + $0x30] ss:$8 sps:$4 sm:$0xff]  }
 0x2be   :  { %v1245_v18 = vpop.f32.mrf.mxu1 }
 0x2bf   :  { %v1270_v11 = vmax.f32 %v1244_v30, 0.0 }
 0x2c0   :  { %v1246_v42 = vpop.f32.mrf.mxu1 }
 0x2c1   :  { %1286 = vst.msk [vmem:[#allocation2 + $0x60] sm:$0xff] %vm764_vm8, %v1270_v11  ;;  %v1247_v47 = vadd.f32 %v8447_v2, %v1246_v42  ;;  %v1437_v42 = vlaneseq }
 0x2c2   :  { %v1248_v53 = vpop.f32.mrf.mxu1 }
 0x2c3   :  { %v1271_v40 = vmax.f32 %v1247_v47, 0.0  ;;  %v1438_v47 = vshrl.u32 %v1437_v42, 7 }
 0x2c4   :  { %v1251_v12 = vpop.f32.mrf.mxu1  ;;  %v1295_v25 = vld [vmem:[#allocation2 + $0x50] ss:$2 sm:$0xff]  ;;  %v1303_v57 = vld [vmem:[#allocation2 + $0x51] ss:$2 sm:$0xff] }
 0x2c5   :  { %1287 = vst.msk [vmem:[#allocation2 + $0x68] sm:$0xff] %vm764_vm8, %v1271_v40  ;;  %v1252_v15 = vadd.f32 %v8447_v2, %v1251_v12  ;;  %v1311_v60 = vmax.f32 %v1295_v25, %v1303_v57  ;;  %v1443_v53 = vsub.s32 1, %v1438_v47  ;;  %v1435_v40 = vld [vmem:[%s9559_s7] sm:$0x3] }
 0x2c6   :  { %v1253_v7 = vpop.f32.mrf.mxu1 }
 0x2c7   :  { %v1272_v4 = vmax.f32 %v1252_v15, 0.0  ;;  %v1324_v8 = vpack.c.bf16 %v1311_v60, %v1310_v1  ;;  %v8541_v12 = vrot.slane %v1435_v40, %v1443_v53  ;;  %v8582_v60 = vld [vmem:[%s9560_s8 + $0x14] ss:$8 sps:$4 sm:$0xff]   ;;  %v8604_v1 = vld [vmem:[%s9560_s8] ss:$8 sps:$4 sm:$0xff]  }
 0x2c8   :  { %v1254_v56 = vpop.f32.mrf.mxu1 }
 0x2c9   :  { %1288 = vst.msk [vmem:[#allocation2 + $0x70] sm:$0xff] %vm764_vm8, %v1272_v4  ;;  %v1255_v21 = vadd.f32 %v8447_v2, %v1254_v56  ;;  %v1292_v2 = vld [vmem:[#allocation2 + $0x20] ss:$2 sm:$0xff] }
 0x2ca   :  { %v1256_v19 = vpop.f32.mrf.mxu1  ;;  %v1308_v46 = vmax.f32 %v1292_v2, %v1300_v5 }
 0x2cb   :  { %v1273_v51 = vmax.f32 %v1255_v21, 0.0  ;;  %v1439_v21 = vsub.s32 0, %v1438_v47 }
 0x2cc   :  { %v1296_v44 = vld [vmem:[#allocation2 + $0x60] ss:$2 sm:$0xff]  ;;  %v1304_v3 = vld [vmem:[#allocation2 + $0x61] ss:$2 sm:$0xff]  ;;  %v1323_v17 = vpack.c.bf16 %v1309_v27, %v1308_v46 }
 0x2cd   :  { %1289 = vst.msk [vmem:[#allocation2 + $0x78] sm:$0xff] %vm764_vm8, %v1273_v51  ;;  %v1312_v9 = vmax.f32 %v1296_v44, %v1304_v3  ;;  %v8548_v19 = vrot.slane %v1435_v40, %v1439_v21 }
 0x2d4   :  { %v1297_v54 = vld [vmem:[#allocation2 + $0x70] ss:$2 sm:$0xff]  ;;  %v1305_v36 = vld [vmem:[#allocation2 + $0x71] ss:$2 sm:$0xff] }
 0x2d5   :  { %v1313_v59 = vmax.f32 %v1297_v54, %v1305_v36  ;;  %v8557_v36 = vld [vmem:[%s9560_s8 + $0x34] ss:$8 sps:$4 sm:$0xff]  }
 0x2d6   :  { %1984 = vmatprep.subr.bf16.mxu1 %v8557_v36 }
 0x2d7   :  { %v1325_v63 = vpack.c.bf16 %v1313_v59, %v1312_v9  ;;  %v8567_v9 = vld [vmem:[%s9560_s8 + $0x24] ss:$8 sps:$4 sm:$0xff]   ;;  %v8575_v59 = vld [vmem:[%s9560_s8 + $0x20] ss:$8 sps:$4 sm:$0xff]   ;;  %1985 = vmatpush1.bf16.msra.mxu1 %v8562_v58 }
 0x2d8   :  { %1986 = vmatprep.subr.bf16.mxu1 %v8567_v9 }
 0x2d9   :  { %6984 = vmatprep.subr.bf16.mxu0 %v1325_v63 }
 0x2da   :  { %6985 = vmatpush3.bf16.msra.mxu0 %v1325_v63  ;;  %v8596_v63 = vld [vmem:[%s9560_s8 + $0x4] ss:$8 sps:$4 sm:$0xff]  }
 0x2db   :  { %6986 = vmatprep.subr.bf16.mxu0 %v1324_v8  ;;  %1987 = vmatpush1.bf16.msra.mxu1 %v8575_v59 }
 0x2dc   :  { %1988 = vmatprep.subr.bf16.mxu1 %v8582_v60 }
 0x2de   :  { %6987 = vmatpush3.bf16.msra.mxu0 %v1324_v8 }
 0x2df   :  { %6988 = vmatprep.subr.bf16.mxu0 %v1323_v17  ;;  %1989 = vmatpush1.bf16.msra.mxu1 %v8590_v62 }
 0x2e0   :  { %1990 = vmatprep.subr.bf16.mxu1 %v8596_v63 }
 0x2e2   :  { %6989 = vmatpush3.bf16.msra.mxu0 %v1323_v17 }
 0x2e3   :  { %6990 = vmatprep.subr.bf16.mxu0 %v1322_v13  ;;  %1991 = vmatpush1.bf16.msra.mxu1 %v8604_v1 }
 0x2e4   :  { %2176 = vmatprep.subr.bf16.mxu1 %v8557_v36 }
 0x2e6   :  { %6991 = vmatpush3.bf16.msra.mxu0 %v1322_v13 }
 0x2e7   :  { %1507 = vmatprep.subr.bf16.mxu0 %v7082_v22 }
 0x2e9   :  { %6993 = vmatmul.mubr.msk.bf16.vlgmr.msra.gmra.mxu0 %vm764_vm8, %v7077_v24 }
 0x2ea   :  { %6996 = vmatprep.mubr.msk.bf16.mxu0 %vm764_vm8, %v7078_v45  ;;  %1508 = vmatpush1.bf16.msra.mxu0 %v7080_v26 }
 0x2eb   :  { %1509 = vmatprep.subr.bf16.mxu0 %v7085_v31 }
 0x2ee   :  { %1510 = vmatpush1.bf16.msra.mxu0 %v7083_v28 }
 0x2ef   :  { %1511 = vmatprep.subr.bf16.mxu0 %v7088_v34 }
 0x2f1   :  { %6997 = vmatmul.mubr.msk.bf16.gmra.mxu0 %vm764_vm8, %v7079_v29 }
 0x2f2   :  { %1531 = vmatprep.mubr.bf16.mxu0 %v7766_v55  ;;  %1512 = vmatpush1.bf16.msra.mxu0 %v7086_v32 }
 0x2f3   :  { %1513 = vmatprep.subr.bf16.mxu0 %v7091_v35 }
 0x2f6   :  { %1514 = vmatpush1.bf16.msra.mxu0 %v7089_v49 }
 0x2f7   :  { %1786 = vmatprep.subr.bf16.mxu0 %v8557_v36 }
 0x3a9   :  { %v6994_v39 = vpop.f32.mrf.mxu0 }
 0x3ab   :  { %v1392_v48 = vpop.f32.mrf.mxu0 }
 0x3ad   :  { %v6995_v38 = vpop.f32.mrf.mxu0 }
 0x3ae   :  { %v8523_v61 = vpack.c.bf16 %v6995_v38, %v6994_v39 }
 0x3af   :  { %v1395_v37 = vpop.f32.mrf.mxu0 }
 0x3b0   :  { %v8518_v41 = vpack.c.bf16 %v1395_v37, %v1392_v48 }
 0x3b1   :  { %v6998_v6 = vpop.f32.mrf.mxu0 }
 0x3b2   :  { %6483 = vmatmul.mubr.msk.bf16.vlgmr.msra.gmra.mxu0 %vm764_vm8, %v8518_v41 }
 0x3b3   :  { %1541 = vmatprep.mubr.bf16.mxu0 %v7766_v55  ;;  %v1408_v50 = vpop.f32.mrf.mxu0  ;;  %1787 = vmatpush1.bf16.msra.mxu0 %v8562_v58 }
 0x3b4   :  { %1788 = vmatprep.subr.bf16.mxu0 %v8567_v9 }
 0x3b5   :  { %v6999_v23 = vpop.f32.mrf.mxu0 }
 0x3b6   :  { %v8533_v11 = vpack.c.bf16 %v6999_v23, %v6998_v6 }
 0x3b7   :  { %v1411_v30 = vpop.f32.mrf.mxu0  ;;  %1789 = vmatpush1.bf16.msra.mxu0 %v8575_v59 }
 0x3b8   :  { %v8528_v18 = vpack.c.bf16 %v1411_v30, %v1408_v50  ;;  %1790 = vmatprep.subr.bf16.mxu0 %v8582_v60 }
 0x3ba   :  { %6484 = vmatmul.mubr.msk.bf16.gmra.mxu0 %vm764_vm8, %v8523_v61 }
 0x3bb   :  { %1551 = vmatprep.mubr.bf16.mxu0 %v7766_v55  ;;  %1791 = vmatpush1.bf16.msra.mxu0 %v8590_v62 }
 0x3bc   :  { %1792 = vmatprep.subr.bf16.mxu0 %v8596_v63 }
 0x3bf   :  { %1793 = vmatpush1.bf16.msra.mxu0 %v8604_v1 }
 0x3c0   :  { %1887 = vmatprep.subr.bf16.mxu0 %v8557_v36 }
 0x3c2   :  { %6485 = vmatmul.mubr.msk.bf16.gmra.mxu0 %vm764_vm8, %v8528_v18 }
 0x3c3   :  { %1561 = vmatprep.mubr.bf16.mxu0 %v7766_v55 }
 0x3ca   :  { %6486 = vmatmul.mubr.msk.bf16.gmra.mxu0 %vm764_vm8, %v8533_v11 }
 0x3cb   :  { %1810 = vmatprep.mubr.bf16.mxu0 %v7766_v55 }
 0x472   :  { %v1533_v15 = vpop.f32.mrf.mxu0 }
 0x473   :  { %v8551_v51 = vadd.f32 %v1533_v15, %v8548_v19 }
 0x474   :  { %v1535_v7 = vpop.f32.mrf.mxu0 }
 0x475   :  { %v8544_v4 = vadd.f32 %v1535_v7, %v8541_v12  ;;  %v6487_v25 = vmul.f32 -1.442695, %v8551_v51  ;;  %v1771_v29 = vrot.slane %v8551_v51, 2 }
 0x476   :  { %v8626_v10 = vpop.f32.mrf.mxu0 }
 0x477   :  { %7104 = vtanh.f32 %v8544_v4  ;;  %v1772_v35 = vrot.slane %v8544_v4, 2 }
 0x478   :  { %7106 = vpow2.f32 %v6487_v25  ;;  %v8628_v46 = vpop.f32.mrf.mxu0 }
 0x47a   :  { %v8630_v14 = vpop.f32.mrf.mxu0 }
 0x47c   :  { %v8632_v16 = vpop.f32.mrf.mxu0 }
 0x47e   :  { %v8634_v17 = vpop.f32.mrf.mxu0 }
 0x480   :  { %v8636_v20 = vpop.f32.mrf.mxu0 }
 0x482   :  { %v8638_v33 = vpop.f32.mrf.mxu0 }
 0x484   :  { %v7105_v56 = vpop.eup %7104  ;;  %v8640_v13 = vpop.f32.mrf.mxu0 }
 0x485   :  { %1712 = vrot.lane.b32.xlu0 %v7105_v56, %s7767_s2  ;;  %v7107_v44 = vpop.eup %7106 }
 0x486   :  { %v1707_v3 = vadd.f32 1.0, %v7107_v44  ;;  %v8642_v22 = vpop.f32.mrf.mxu0 }
 0x488   :  { %7108 = vrcp.f32 %v1707_v3  ;;  %v8644_v24 = vpop.f32.mrf.mxu0 }
 0x48a   :  { %v8646_v45 = vpop.f32.mrf.mxu0 }
 0x48c   :  { %v8648_v26 = vpop.f32.mrf.mxu0 }
 0x48e   :  { %v8650_v31 = vpop.f32.mrf.mxu0 }
 0x490   :  { %v8652_v28 = vpop.f32.mrf.mxu0 }
 0x495   :  { %v7109_v57 = vpop.eup %7108 }
 0x4f7   :  { %v1713_v52 = vpop.permute.xlu0 %1712 }
 0x4f8   :  { %v1715_v54 = vmul.f32 %v7109_v57, %v1713_v52 }
 0x4fa   :  { %7110 = vtanh.f32 %v1715_v54 }
 0x507   :  { %v7111_v0 = vpop.eup %7110 }
 0x508   :  { %1718 = vrot.lane.b32.xlu1 %v7111_v0, %s7767_s2 }
 0x57a   :  { %v1719_v2 = vpop.permute.xlu1 %1718 }
 0x57b   :  { %v1721_v5 = vmul.f32 %v7109_v57, %v1719_v2 }
 0x57d   :  { %1723 = vrot.lane.b32.xlu0 %v1721_v5, %s7767_s2 }
 0x581   :  { %1846 = vrot.lane.b32.xlu0 %v1715_v54, %s7768_s15 }
 0x5ef   :  { %v1724_v8 = vpop.permute.xlu0 %1723 }
 0x5f0   :  { %v1727_v27 = vsel %vm1726_vm11, %v1724_v8, 0.0 }
 0x5f1   :  { %v1728_v43 = vpack.c.bf16 %v1727_v27, %v1727_v27 }
 0x5f3   :  { %6496 = vmatmul.mubr.msk.bf16.vlgmr.msra.gmra.mxu0 %vm764_vm8, %v1728_v43  ;;  %v1847_v21 = vpop.permute.xlu0 %1846 }
 0x5f4   :  { %1888 = vmatpush1.bf16.msra.mxu0 %v8562_v58  ;;  %1911 = vmatprep.mubr.bf16.mxu0 %v7766_v55 }
 0x5f5   :  { %1889 = vmatprep.subr.bf16.mxu0 %v8567_v9 }
 0x5f8   :  { %1890 = vmatpush1.bf16.msra.mxu0 %v8575_v59 }
 0x5f9   :  { %1891 = vmatprep.subr.bf16.mxu0 %v8582_v60 }
 0x5fc   :  { %1892 = vmatpush1.bf16.msra.mxu0 %v8590_v62 }
 0x5fd   :  { %1893 = vmatprep.subr.bf16.mxu0 %v8596_v63 }
 0x600   :  { %1894 = vmatpush1.bf16.msra.mxu0 %v8604_v1 }
 0x601   :  { %2077 = vmatprep.subr.bf16.mxu0 %v8557_v36 }
 0x6b3   :  { %v1812_v32 = vpop.f32.mrf.mxu0 }
 0x6b4   :  { %v1813_v34 = vadd.f32 %v1812_v32, %v1771_v29 }
 0x6b5   :  { %v1814_v49 = vpop.f32.mrf.mxu0 }
 0x6b6   :  { %v6497_v39 = vmul.f32 -1.442695, %v1813_v34  ;;  %v1815_v48 = vadd.f32 %v1814_v49, %v1772_v35  ;;  %v1872_v35 = vrot.slane %v8551_v51, 4 }
 0x6b7   :  { %v1816_v38 = vpop.f32.mrf.mxu0 }
 0x6b8   :  { %7112 = vpow2.f32 %v6497_v39  ;;  %v6498_v47 = vmul.f32 -1.442695, %v1815_v48 }
 0x6b9   :  { %7114 = vtanh.f32 %v1815_v48  ;;  %v1817_v37 = vpop.f32.mrf.mxu0  ;;  %v1873_v48 = vrot.slane %v8544_v4, 4 }
 0x6c5   :  { %v7113_v6 = vpop.eup %7112 }
 0x6c6   :  { %v7115_v50 = vpop.eup %7114  ;;  %v1825_v23 = vadd.f32 1.0, %v7113_v6 }
 0x6c7   :  { %1851 = vrot.lane.b32.xlu1 %v7115_v50, %s7767_s2 }
 0x6c8   :  { %7116 = vrcp.f32 %v1825_v23 }
 0x6c9   :  { %7118 = vpow2.f32 %v6498_v47 }
 0x6d5   :  { %v7117_v30 = vpop.eup %7116 }
 0x6d6   :  { %v1833_v42 = vmul.f32 %v7117_v30, %v7115_v50  ;;  %v7119_v53 = vpop.eup %7118  ;;  %v1849_v52 = vmul.f32 %v7117_v30, %v1847_v21 }
 0x6d7   :  { %v1826_v40 = vadd.f32 1.0, %v7119_v53 }
 0x6d8   :  { %1835 = vrot.lane.b32.xlu0 %v1833_v42, %s7768_s15 }
 0x6d9   :  { %7120 = vrcp.f32 %v1826_v40 }
 0x6e6   :  { %v7121_v56 = vpop.eup %7120 }
 0x6e7   :  { %v1832_v25 = vmul.f32 0.0, %v7121_v56 }
 0x739   :  { %v1852_v15 = vpop.permute.xlu1 %1851 }
 0x73a   :  { %v1854_v7 = vmul.f32 %v7117_v30, %v1852_v15 }
 0x73c   :  { %1856 = vrot.lane.b32.xlu1 %v1854_v7, %s7768_s15 }
 0x74a   :  { %v1836_v44 = vpop.permute.xlu0 %1835 }
 0x74b   :  { %v1838_v3 = vadd.f32 %v1836_v44, %v1832_v25 }
 0x74d   :  { %7122 = vtanh.f32 %v1838_v3 }
 0x75a   :  { %v7123_v57 = vpop.eup %7122 }
 0x75b   :  { %1841 = vrot.lane.b32.xlu0 %v7123_v57, %s7768_s15 }
 0x7ae   :  { %v1857_v54 = vpop.permute.xlu1 %1856 }
 0x7af   :  { %v1859_v0 = vadd.f32 %v1857_v54, %v1849_v52 }
 0x7b1   :  { %7124 = vtanh.f32 %v1859_v0 }
 0x7be   :  { %v7125_v2 = vpop.eup %7124 }
 0x7bf   :  { %1862 = vrot.lane.b32.xlu1 %v7125_v2, %s7768_s15 }
 0x7cd   :  { %v1842_v27 = vpop.permute.xlu0 %1841 }
 0x7ce   :  { %v1844_v43 = vmul.f32 %v7121_v56, %v1842_v27 }
 0x831   :  { %v1863_v5 = vpop.permute.xlu1 %1862 }
 0x832   :  { %v1865_v8 = vmul.f32 %v7117_v30, %v1863_v5 }
 0x834   :  { %1867 = vrot.lane.b32.xlu1 %v1865_v8, %s7767_s2 }
 0x8a6   :  { %v1868_v29 = vpop.permute.xlu1 %1867 }
 0x8a7   :  { %v1870_v32 = vsel %vm1726_vm11, %v1868_v29, %v1844_v43 }
 0x8a8   :  { %v1871_v34 = vpack.c.bf16 %v1870_v32, %v1870_v32 }
 0x8aa   :  { %6499 = vmatmul.mubr.msk.bf16.vlgmr.msra.gmra.mxu0 %vm764_vm8, %v1871_v34 }
 0x8ab   :  { %2078 = vmatpush1.bf16.msra.mxu0 %v8562_v58  ;;  %2101 = vmatprep.mubr.bf16.mxu0 %v7766_v55 }
 0x8ac   :  { %2079 = vmatprep.subr.bf16.mxu0 %v8567_v9 }
 0x8af   :  { %2080 = vmatpush1.bf16.msra.mxu0 %v8575_v59 }
 0x8b0   :  { %2081 = vmatprep.subr.bf16.mxu0 %v8582_v60 }
 0x8b3   :  { %2082 = vmatpush1.bf16.msra.mxu0 %v8590_v62 }
 0x8b4   :  { %2083 = vmatprep.subr.bf16.mxu0 %v8596_v63 }
 0x8b7   :  { %2084 = vmatpush1.bf16.msra.mxu0 %v8604_v1 }
 0x8b8   :  { %2273 = vmatprep.subr.bf16.mxu0 %v8557_v36 }
 0x96a   :  { %v1913_v49 = vpop.f32.mrf.mxu0 }
 0x96b   :  { %v1914_v39 = vadd.f32 %v1913_v49, %v1872_v35 }
 0x96c   :  { %v1915_v38 = vpop.f32.mrf.mxu0 }
 0x96d   :  { %v6500_v37 = vmul.f32 -1.442695, %v1914_v39  ;;  %v1916_v6 = vadd.f32 %v1915_v38, %v1873_v48 }
 0x96e   :  { %v1917_v50 = vpop.f32.mrf.mxu0 }
 0x96f   :  { %7126 = vpow2.f32 %v6500_v37  ;;  %v6501_v15 = vmul.f32 -1.442695, %v1916_v6  ;;  %v1970_v37 = vrot.slane %v8544_v4, 6 }
 0x970   :  { %7128 = vtanh.f32 %v1916_v6  ;;  %v1918_v23 = vpop.f32.mrf.mxu0 }
 0x97c   :  { %v7127_v30 = vpop.eup %7126 }
 0x97d   :  { %v7129_v42 = vpop.eup %7128  ;;  %v1926_v47 = vadd.f32 1.0, %v7127_v30 }
 0x97e   :  { %1948 = vrot.lane.b32.xlu0 %v7129_v42, %s7767_s2 }
 0x97f   :  { %7130 = vrcp.f32 %v1926_v47 }
 0x980   :  { %7132 = vpow2.f32 %v6501_v15 }
 0x98c   :  { %v7131_v53 = vpop.eup %7130 }
 0x98d   :  { %v1934_v40 = vmul.f32 %v7131_v53, %v7129_v42  ;;  %v7133_v7 = vpop.eup %7132  ;;  %v1946_v5 = vmul.f32 %v7131_v53, %v1859_v0  ;;  %v1969_v0 = vrot.slane %v8551_v51, 6 }
 0x98e   :  { %v1927_v56 = vadd.f32 1.0, %v7133_v7 }
 0x98f   :  { %1936 = vrot.lane.b32.xlu0 %v1934_v40, %s7768_s15 }
 0x990   :  { %7134 = vrcp.f32 %v1927_v56 }
 0x99d   :  { %v7135_v44 = vpop.eup %7134 }
 0x99e   :  { %v1933_v57 = vmul.f32 %v7135_v44, %v1838_v3 }
 0x9f0   :  { %v1949_v21 = vpop.permute.xlu0 %1948 }
 0x9f1   :  { %v1951_v25 = vmul.f32 %v7131_v53, %v1949_v21 }
 0x9f3   :  { %1953 = vrot.lane.b32.xlu1 %v1951_v25, %s7768_s15 }
 0xa01   :  { %v1937_v52 = vpop.permute.xlu0 %1936 }
 0xa02   :  { %v1939_v54 = vadd.f32 %v1937_v52, %v1933_v57 }
 0xa04   :  { %7136 = vtanh.f32 %v1939_v54 }
 0xa11   :  { %v7137_v2 = vpop.eup %7136 }
 0xa12   :  { %1942 = vrot.lane.b32.xlu0 %v7137_v2, %s7768_s15 }
 0xa65   :  { %v1954_v8 = vpop.permute.xlu1 %1953 }
 0xa66   :  { %v1956_v27 = vadd.f32 %v1954_v8, %v1946_v5 }
 0xa68   :  { %7138 = vtanh.f32 %v1956_v27 }
 0xa75   :  { %v7139_v43 = vpop.eup %7138 }
 0xa76   :  { %1959 = vrot.lane.b32.xlu1 %v7139_v43, %s7768_s15 }
 0xa84   :  { %v1943_v34 = vpop.permute.xlu0 %1942 }
 0xa85   :  { %v1945_v35 = vmul.f32 %v7135_v44, %v1943_v34 }
 0xae8   :  { %v1960_v29 = vpop.permute.xlu1 %1959 }
 0xae9   :  { %v1962_v32 = vmul.f32 %v7131_v53, %v1960_v29 }
 0xaeb   :  { %1964 = vrot.lane.b32.xlu1 %v1962_v32, %s7767_s2 }
 0xb5d   :  { %v1965_v3 = vpop.permute.xlu1 %1964 }
 0xb5e   :  { %v1967_v49 = vsel %vm1726_vm11, %v1965_v3, %v1945_v35 }
 0xb5f   :  { %v1968_v39 = vpack.c.bf16 %v1967_v49, %v1967_v49 }
 0xb61   :  { %6502 = vmatmul.mubr.msk.bf16.vlgmr.msra.gmra.mxu1 %vm764_vm8, %v1968_v39 }
 0xb62   :  { %2177 = vmatpush1.bf16.msra.mxu1 %v8562_v58  ;;  %2200 = vmatprep.mubr.bf16.mxu1 %v7766_v55 }
 0xb63   :  { %2178 = vmatprep.subr.bf16.mxu1 %v8567_v9 }
 0xb66   :  { %2179 = vmatpush1.bf16.msra.mxu1 %v8575_v59 }
 0xb67   :  { %2180 = vmatprep.subr.bf16.mxu1 %v8582_v60 }
 0xb6a   :  { %2181 = vmatpush1.bf16.msra.mxu1 %v8590_v62 }
 0xb6b   :  { %2182 = vmatprep.subr.bf16.mxu1 %v8596_v63 }
 0xb6e   :  { %2183 = vmatpush1.bf16.msra.mxu1 %v8604_v1 }
 0xb6f   :  { %2370 = vmatprep.subr.bf16.mxu1 %v8557_v36 }
 0xc21   :  { %v2010_v48 = vpop.f32.mrf.mxu1 }
 0xc22   :  { %v2011_v38 = vadd.f32 %v2010_v48, %v1969_v0 }
 0xc23   :  { %v2012_v6 = vpop.f32.mrf.mxu1 }
 0xc24   :  { %v6503_v50 = vmul.f32 -1.442695, %v2011_v38  ;;  %v2013_v23 = vadd.f32 %v2012_v6, %v1970_v37  ;;  %v8717_v38 = vadd.f32 %v8628_v46, %v8541_v12 }
 0xc25   :  { %v2014_v30 = vpop.f32.mrf.mxu1 }
 0xc26   :  { %7140 = vpow2.f32 %v6503_v50  ;;  %v6504_v51 = vmul.f32 -1.442695, %v2013_v23 }
 0xc27   :  { %7142 = vtanh.f32 %v2013_v23  ;;  %v2015_v42 = vpop.f32.mrf.mxu1 }
 0xc33   :  { %v7141_v47 = vpop.eup %7140 }
 0xc34   :  { %v7143_v53 = vpop.eup %7142  ;;  %v2023_v40 = vadd.f32 1.0, %v7141_v47 }
 0xc35   :  { %2045 = vrot.lane.b32.xlu0 %v7143_v53, %s7767_s2 }
 0xc36   :  { %7144 = vrcp.f32 %v2023_v40 }
 0xc37   :  { %7146 = vpow2.f32 %v6504_v51 }
 0xc43   :  { %v7145_v15 = vpop.eup %7144 }
 0xc44   :  { %v2031_v7 = vmul.f32 %v7145_v15, %v7143_v53  ;;  %v7147_v4 = vpop.eup %7146  ;;  %v2043_v8 = vmul.f32 %v7145_v15, %v1956_v27  ;;  %v8713_v27 = vadd.f32 %v8626_v10, %v8548_v19 }
 0xc45   :  { %v2024_v56 = vadd.f32 1.0, %v7147_v4 }
 0xc46   :  { %2033 = vrot.lane.b32.xlu0 %v2031_v7, %s7768_s15 }
 0xc47   :  { %7148 = vrcp.f32 %v2024_v56 }
 0xc54   :  { %v7149_v44 = vpop.eup %7148 }
 0xc55   :  { %v2030_v57 = vmul.f32 %v7149_v44, %v1939_v54 }
 0xca7   :  { %v2046_v21 = vpop.permute.xlu0 %2045 }
 0xca8   :  { %v2048_v25 = vmul.f32 %v7145_v15, %v2046_v21 }
 0xcaa   :  { %2050 = vrot.lane.b32.xlu1 %v2048_v25, %s7768_s15 }
 0xcb8   :  { %v2034_v52 = vpop.permute.xlu0 %2033 }
 0xcb9   :  { %v2036_v2 = vadd.f32 %v2034_v52, %v2030_v57 }
 0xcbb   :  { %7150 = vtanh.f32 %v2036_v2 }
 0xcc8   :  { %v7151_v5 = vpop.eup %7150 }
 0xcc9   :  { %2039 = vrot.lane.b32.xlu0 %v7151_v5, %s7768_s15 }
 0xd1c   :  { %v2051_v43 = vpop.permute.xlu1 %2050 }
 0xd1d   :  { %v2053_v29 = vadd.f32 %v2051_v43, %v2043_v8 }
 0xd1f   :  { %7152 = vtanh.f32 %v2053_v29 }
 0xd2c   :  { %v7153_v32 = vpop.eup %7152 }
 0xd2d   :  { %2056 = vrot.lane.b32.xlu1 %v7153_v32, %s7768_s15 }
 0xd3b   :  { %v2040_v3 = vpop.permute.xlu0 %2039 }
 0xd3c   :  { %v2042_v49 = vmul.f32 %v7149_v44, %v2040_v3 }
 0xd9f   :  { %v2057_v34 = vpop.permute.xlu1 %2056 }
 0xda0   :  { %v2059_v35 = vmul.f32 %v7145_v15, %v2057_v34 }
 0xda2   :  { %2061 = vrot.lane.b32.xlu1 %v2059_v35, %s7767_s2 }
 0xe14   :  { %v2062_v54 = vpop.permute.xlu1 %2061 }
 0xe15   :  { %v2064_v39 = vsel %vm1726_vm11, %v2062_v54, %v2042_v49 }
 0xe16   :  { %v2065_v0 = vpack.c.bf16 %v2064_v39, %v2064_v39 }
 0xe18   :  { %6505 = vmatmul.mubr.msk.bf16.vlgmr.msra.gmra.mxu0 %vm764_vm8, %v2065_v0 }
 0xe19   :  { %2274 = vmatpush1.bf16.msra.mxu0 %v8562_v58  ;;  %2297 = vmatprep.mubr.bf16.mxu0 %v7766_v55 }
 0xe1a   :  { %2275 = vmatprep.subr.bf16.mxu0 %v8567_v9 }
 0xe1d   :  { %2276 = vmatpush1.bf16.msra.mxu0 %v8575_v59 }
 0xe1e   :  { %2277 = vmatprep.subr.bf16.mxu0 %v8582_v60 }
 0xe21   :  { %2278 = vmatpush1.bf16.msra.mxu0 %v8590_v62 }
 0xe22   :  { %2279 = vmatprep.subr.bf16.mxu0 %v8596_v63 }
 0xe25   :  { %2280 = vmatpush1.bf16.msra.mxu0 %v8604_v1 }
 0xe26   :  { %2463 = vmatprep.subr.bf16.mxu0 %v8557_v36 }
 0xed8   :  { %v2103_v48 = vpop.f32.mrf.mxu0 }
 0xed9   :  { %v2104_v37 = vadd.f32 %v2103_v48, %v8713_v27 }
 0xeda   :  { %v2105_v6 = vpop.f32.mrf.mxu0 }
 0xedb   :  { %v6506_v50 = vmul.f32 -1.442695, %v2104_v37  ;;  %v2106_v23 = vadd.f32 %v2105_v6, %v8717_v38  ;;  %v2162_v37 = vrot.slane %v8717_v38, 2 }
 0xedc   :  { %v2107_v30 = vpop.f32.mrf.mxu0 }
 0xedd   :  { %7154 = vpow2.f32 %v6506_v50  ;;  %v6507_v46 = vmul.f32 -1.442695, %v2106_v23 }
 0xede   :  { %7156 = vtanh.f32 %v2106_v23  ;;  %v2108_v42 = vpop.f32.mrf.mxu0 }
 0xeea   :  { %v7155_v47 = vpop.eup %7154 }
 0xeeb   :  { %v7157_v53 = vpop.eup %7156  ;;  %v2116_v40 = vadd.f32 1.0, %v7155_v47 }
 0xeec   :  { %2138 = vrot.lane.b32.xlu0 %v7157_v53, %s7767_s2 }
 0xeed   :  { %7158 = vrcp.f32 %v2116_v40 }
 0xeee   :  { %7160 = vpow2.f32 %v6507_v46 }
 0xefa   :  { %v7159_v10 = vpop.eup %7158 }
 0xefb   :  { %v2124_v15 = vmul.f32 %v7159_v10, %v7157_v53  ;;  %v7161_v7 = vpop.eup %7160  ;;  %v2136_v5 = vmul.f32 %v7159_v10, %v2053_v29  ;;  %v2161_v29 = vrot.slane %v8713_v27, 2 }
 0xefc   :  { %v2117_v51 = vadd.f32 1.0, %v7161_v7 }
 0xefd   :  { %2126 = vrot.lane.b32.xlu0 %v2124_v15, %s7768_s15 }
 0xefe   :  { %7162 = vrcp.f32 %v2117_v51 }
 0xf0b   :  { %v7163_v21 = vpop.eup %7162 }
 0xf0c   :  { %v2123_v25 = vmul.f32 %v7163_v21, %v2036_v2 }
 0xf5e   :  { %v2139_v4 = vpop.permute.xlu0 %2138 }
 0xf5f   :  { %v2141_v56 = vmul.f32 %v7159_v10, %v2139_v4 }
 0xf61   :  { %2143 = vrot.lane.b32.xlu1 %v2141_v56, %s7768_s15 }
 0xf6f   :  { %v2127_v44 = vpop.permute.xlu0 %2126 }
 0xf70   :  { %v2129_v57 = vadd.f32 %v2127_v44, %v2123_v25 }
 0xf72   :  { %7164 = vtanh.f32 %v2129_v57 }
 0xf7f   :  { %v7165_v52 = vpop.eup %7164 }
 0xf80   :  { %2132 = vrot.lane.b32.xlu0 %v7165_v52, %s7768_s15 }
 0xfd3   :  { %v2144_v8 = vpop.permute.xlu1 %2143 }
 0xfd4   :  { %v2146_v43 = vadd.f32 %v2144_v8, %v2136_v5 }
 0xfd6   :  { %7166 = vtanh.f32 %v2146_v43 }
 0xfe3   :  { %v7167_v32 = vpop.eup %7166 }
 0xfe4   :  { %2149 = vrot.lane.b32.xlu1 %v7167_v32, %s7768_s15 }
 0xff2   :  { %v2133_v3 = vpop.permute.xlu0 %2132 }
 0xff3   :  { %v2135_v49 = vmul.f32 %v7163_v21, %v2133_v3 }
0x1056   :  { %v2150_v34 = vpop.permute.xlu1 %2149 }
0x1057   :  { %v2152_v35 = vmul.f32 %v7159_v10, %v2150_v34 }
0x1059   :  { %2154 = vrot.lane.b32.xlu1 %v2152_v35, %s7767_s2 }
0x10cb   :  { %v2155_v2 = vpop.permute.xlu1 %2154 }
0x10cc   :  { %v2157_v54 = vsel %vm1726_vm11, %v2155_v2, %v2135_v49 }
0x10cd   :  { %v2158_v39 = vpack.c.bf16 %v2157_v54, %v2157_v54 }
0x10cf   :  { %6508 = vmatmul.mubr.msk.bf16.vlgmr.msra.gmra.mxu1 %vm764_vm8, %v2158_v39 }
0x10d0   :  { %2371 = vmatpush1.bf16.msra.mxu1 %v8562_v58  ;;  %2394 = vmatprep.mubr.bf16.mxu1 %v7766_v55 }
0x10d1   :  { %2372 = vmatprep.subr.bf16.mxu1 %v8567_v9 }
0x10d4   :  { %2373 = vmatpush1.bf16.msra.mxu1 %v8575_v59 }
0x10d5   :  { %2374 = vmatprep.subr.bf16.mxu1 %v8582_v60 }
0x10d8   :  { %2375 = vmatpush1.bf16.msra.mxu1 %v8590_v62 }
0x10d9   :  { %2376 = vmatprep.subr.bf16.mxu1 %v8596_v63 }
0x10dc   :  { %2377 = vmatpush1.bf16.msra.mxu1 %v8604_v1 }
0x10dd   :  { %2562 = vmatprep.subr.bf16.mxu1 %v8557_v36 }
0x118f   :  { %v2202_v0 = vpop.f32.mrf.mxu1 }
0x1190   :  { %v2203_v48 = vadd.f32 %v2202_v0, %v2161_v29 }
0x1191   :  { %v2204_v6 = vpop.f32.mrf.mxu1 }
0x1192   :  { %v6509_v50 = vmul.f32 -1.442695, %v2203_v48  ;;  %v2205_v23 = vadd.f32 %v2204_v6, %v2162_v37  ;;  %v2259_v37 = vrot.slane %v8717_v38, 4 }
0x1193   :  { %v2206_v30 = vpop.f32.mrf.mxu1 }
0x1194   :  { %7168 = vpow2.f32 %v6509_v50  ;;  %v6510_v46 = vmul.f32 -1.442695, %v2205_v23 }
0x1195   :  { %7170 = vtanh.f32 %v2205_v23  ;;  %v2207_v42 = vpop.f32.mrf.mxu1 }
0x11a1   :  { %v7169_v47 = vpop.eup %7168 }
0x11a2   :  { %v7171_v53 = vpop.eup %7170  ;;  %v2215_v40 = vadd.f32 1.0, %v7169_v47 }
0x11a3   :  { %2237 = vrot.lane.b32.xlu0 %v7171_v53, %s7767_s2 }
0x11a4   :  { %7172 = vrcp.f32 %v2215_v40 }
0x11a5   :  { %7174 = vpow2.f32 %v6510_v46 }
0x11b1   :  { %v7173_v10 = vpop.eup %7172 }
0x11b2   :  { %v2223_v15 = vmul.f32 %v7173_v10, %v7171_v53  ;;  %v7175_v7 = vpop.eup %7174  ;;  %v2235_v8 = vmul.f32 %v7173_v10, %v2146_v43  ;;  %v2258_v43 = vrot.slane %v8713_v27, 4 }
0x11b3   :  { %v2216_v51 = vadd.f32 1.0, %v7175_v7 }
0x11b4   :  { %2225 = vrot.lane.b32.xlu0 %v2223_v15, %s7768_s15 }
0x11b5   :  { %7176 = vrcp.f32 %v2216_v51 }
0x11c2   :  { %v7177_v21 = vpop.eup %7176 }
0x11c3   :  { %v2222_v25 = vmul.f32 %v7177_v21, %v2129_v57 }
0x1215   :  { %v2238_v4 = vpop.permute.xlu0 %2237 }
0x1216   :  { %v2240_v56 = vmul.f32 %v7173_v10, %v2238_v4 }
0x1218   :  { %2242 = vrot.lane.b32.xlu1 %v2240_v56, %s7768_s15 }
0x1226   :  { %v2226_v44 = vpop.permute.xlu0 %2225 }
0x1227   :  { %v2228_v52 = vadd.f32 %v2226_v44, %v2222_v25 }
0x1229   :  { %7178 = vtanh.f32 %v2228_v52 }
0x1236   :  { %v7179_v5 = vpop.eup %7178 }
0x1237   :  { %2231 = vrot.lane.b32.xlu0 %v7179_v5, %s7768_s15 }
0x128a   :  { %v2243_v32 = vpop.permute.xlu1 %2242 }
0x128b   :  { %v2245_v34 = vadd.f32 %v2243_v32, %v2235_v8 }
0x128d   :  { %7180 = vtanh.f32 %v2245_v34 }
0x129a   :  { %v7181_v35 = vpop.eup %7180 }
0x129b   :  { %2248 = vrot.lane.b32.xlu1 %v7181_v35, %s7768_s15 }
0x12a9   :  { %v2232_v2 = vpop.permute.xlu0 %2231 }
0x12aa   :  { %v2234_v54 = vmul.f32 %v7177_v21, %v2232_v2 }
0x130d   :  { %v2249_v3 = vpop.permute.xlu1 %2248 }
0x130e   :  { %v2251_v49 = vmul.f32 %v7173_v10, %v2249_v3 }
0x1310   :  { %2253 = vrot.lane.b32.xlu1 %v2251_v49, %s7767_s2 }
0x1382   :  { %v2254_v57 = vpop.permute.xlu1 %2253 }
0x1383   :  { %v2256_v39 = vsel %vm1726_vm11, %v2254_v57, %v2234_v54 }
0x1384   :  { %v2257_v29 = vpack.c.bf16 %v2256_v39, %v2256_v39 }
0x1386   :  { %6511 = vmatmul.mubr.msk.bf16.vlgmr.msra.gmra.mxu0 %vm764_vm8, %v2257_v29 }
0x1387   :  { %2464 = vmatpush1.bf16.msra.mxu0 %v8562_v58  ;;  %2487 = vmatprep.mubr.bf16.mxu0 %v7766_v55 }
0x1388   :  { %2465 = vmatprep.subr.bf16.mxu0 %v8567_v9 }
0x138b   :  { %2466 = vmatpush1.bf16.msra.mxu0 %v8575_v59 }
0x138c   :  { %2467 = vmatprep.subr.bf16.mxu0 %v8582_v60 }
0x138f   :  { %2468 = vmatpush1.bf16.msra.mxu0 %v8590_v62 }
0x1390   :  { %2469 = vmatprep.subr.bf16.mxu0 %v8596_v63 }
0x1393   :  { %2470 = vmatpush1.bf16.msra.mxu0 %v8604_v1 }
0x1394   :  { %2659 = vmatprep.subr.bf16.mxu0 %v8557_v36 }
0x1446   :  { %v2299_v0 = vpop.f32.mrf.mxu0 }
0x1447   :  { %v2300_v48 = vadd.f32 %v2299_v0, %v2258_v43 }
0x1448   :  { %v2301_v6 = vpop.f32.mrf.mxu0 }
0x1449   :  { %v6512_v50 = vmul.f32 -1.442695, %v2300_v48  ;;  %v2302_v23 = vadd.f32 %v2301_v6, %v2259_v37  ;;  %v2356_v37 = vrot.slane %v8717_v38, 6 }
0x144a   :  { %v2303_v30 = vpop.f32.mrf.mxu0 }
0x144b   :  { %7182 = vpow2.f32 %v6512_v50  ;;  %v6513_v46 = vmul.f32 -1.442695, %v2302_v23 }
0x144c   :  { %7184 = vtanh.f32 %v2302_v23  ;;  %v2304_v42 = vpop.f32.mrf.mxu0 }
0x1458   :  { %v7183_v47 = vpop.eup %7182 }
0x1459   :  { %v7185_v53 = vpop.eup %7184  ;;  %v2312_v40 = vadd.f32 1.0, %v7183_v47 }
0x145a   :  { %2334 = vrot.lane.b32.xlu0 %v7185_v53, %s7767_s2 }
0x145b   :  { %7186 = vrcp.f32 %v2312_v40 }
0x145c   :  { %7188 = vpow2.f32 %v6513_v46 }
0x1468   :  { %v7187_v10 = vpop.eup %7186 }
0x1469   :  { %v2320_v15 = vmul.f32 %v7187_v10, %v7185_v53  ;;  %v7189_v7 = vpop.eup %7188  ;;  %v2332_v32 = vmul.f32 %v7187_v10, %v2245_v34  ;;  %v2355_v34 = vrot.slane %v8713_v27, 6 }
0x146a   :  { %v2313_v51 = vadd.f32 1.0, %v7189_v7 }
0x146b   :  { %2322 = vrot.lane.b32.xlu0 %v2320_v15, %s7768_s15 }
0x146c   :  { %7190 = vrcp.f32 %v2313_v51 }
0x1479   :  { %v7191_v21 = vpop.eup %7190 }
0x147a   :  { %v2319_v25 = vmul.f32 %v7191_v21, %v2228_v52 }
0x14cc   :  { %v2335_v4 = vpop.permute.xlu0 %2334 }
0x14cd   :  { %v2337_v56 = vmul.f32 %v7187_v10, %v2335_v4 }
0x14cf   :  { %2339 = vrot.lane.b32.xlu1 %v2337_v56, %s7768_s15 }
0x14dd   :  { %v2323_v44 = vpop.permute.xlu0 %2322 }
0x14de   :  { %v2325_v5 = vadd.f32 %v2323_v44, %v2319_v25 }
0x14e0   :  { %7192 = vtanh.f32 %v2325_v5 }
0x14ed   :  { %v7193_v8 = vpop.eup %7192 }
0x14ee   :  { %2328 = vrot.lane.b32.xlu0 %v7193_v8, %s7768_s15 }
0x1541   :  { %v2340_v35 = vpop.permute.xlu1 %2339 }
0x1542   :  { %v2342_v3 = vadd.f32 %v2340_v35, %v2332_v32 }
0x1544   :  { %7194 = vtanh.f32 %v2342_v3 }
0x1551   :  { %v7195_v49 = vpop.eup %7194 }
0x1552   :  { %2345 = vrot.lane.b32.xlu1 %v7195_v49, %s7768_s15 }
0x1560   :  { %v2329_v57 = vpop.permute.xlu0 %2328 }
0x1561   :  { %v2331_v39 = vmul.f32 %v7191_v21, %v2329_v57 }
0x15c4   :  { %v2346_v2 = vpop.permute.xlu1 %2345 }
0x15c5   :  { %v2348_v54 = vmul.f32 %v7187_v10, %v2346_v2 }
0x15c7   :  { %2350 = vrot.lane.b32.xlu1 %v2348_v54, %s7767_s2 }
0x1639   :  { %v2351_v52 = vpop.permute.xlu1 %2350 }
0x163a   :  { %v2353_v29 = vsel %vm1726_vm11, %v2351_v52, %v2331_v39 }
0x163b   :  { %v2354_v43 = vpack.c.bf16 %v2353_v29, %v2353_v29 }
0x163d   :  { %6514 = vmatmul.mubr.msk.bf16.vlgmr.msra.gmra.mxu1 %vm764_vm8, %v2354_v43 }
0x163e   :  { %2563 = vmatpush1.bf16.msra.mxu1 %v8562_v58  ;;  %2586 = vmatprep.mubr.bf16.mxu1 %v7766_v55 }
0x163f   :  { %2564 = vmatprep.subr.bf16.mxu1 %v8567_v9 }
0x1642   :  { %2565 = vmatpush1.bf16.msra.mxu1 %v8575_v59 }
0x1643   :  { %2566 = vmatprep.subr.bf16.mxu1 %v8582_v60 }
0x1646   :  { %2567 = vmatpush1.bf16.msra.mxu1 %v8590_v62 }
0x1647   :  { %2568 = vmatprep.subr.bf16.mxu1 %v8596_v63 }
0x164a   :  { %2569 = vmatpush1.bf16.msra.mxu1 %v8604_v1 }
0x164b   :  { %2756 = vmatprep.subr.bf16.mxu1 %v8557_v36 }
0x16fd   :  { %v2396_v0 = vpop.f32.mrf.mxu1 }
0x16fe   :  { %v2397_v48 = vadd.f32 %v2396_v0, %v2355_v34 }
0x16ff   :  { %v2398_v6 = vpop.f32.mrf.mxu1 }
0x1700   :  { %v6515_v50 = vmul.f32 -1.442695, %v2397_v48  ;;  %v2399_v23 = vadd.f32 %v2398_v6, %v2356_v37 }
0x1701   :  { %v2400_v30 = vpop.f32.mrf.mxu1 }
0x1702   :  { %7196 = vpow2.f32 %v6515_v50  ;;  %v6516_v27 = vmul.f32 -1.442695, %v2399_v23 }
0x1703   :  { %7198 = vtanh.f32 %v2399_v23  ;;  %v2401_v42 = vpop.f32.mrf.mxu1 }
0x170f   :  { %v7197_v47 = vpop.eup %7196 }
0x1710   :  { %v7199_v53 = vpop.eup %7198  ;;  %v2409_v40 = vadd.f32 1.0, %v7197_v47 }
0x1711   :  { %2431 = vrot.lane.b32.xlu0 %v7199_v53, %s7767_s2 }
0x1712   :  { %7200 = vrcp.f32 %v2409_v40 }
0x1713   :  { %7202 = vpow2.f32 %v6516_v27 }
0x171f   :  { %v7201_v10 = vpop.eup %7200 }
0x1720   :  { %v2417_v15 = vmul.f32 %v7201_v10, %v7199_v53  ;;  %v7203_v38 = vpop.eup %7202  ;;  %v2429_v8 = vmul.f32 %v7201_v10, %v2342_v3  ;;  %v8797_v3 = vadd.f32 %v8630_v14, %v8548_v19 }
0x1721   :  { %v2410_v46 = vadd.f32 1.0, %v7203_v38 }
0x1722   :  { %2419 = vrot.lane.b32.xlu0 %v2417_v15, %s7768_s15 }
0x1723   :  { %7204 = vrcp.f32 %v2410_v46 }
0x1730   :  { %v7205_v4 = vpop.eup %7204 }
0x1731   :  { %v2416_v56 = vmul.f32 %v7205_v4, %v2325_v5 }
0x1783   :  { %v2432_v7 = vpop.permute.xlu0 %2431 }
0x1784   :  { %v2434_v51 = vmul.f32 %v7201_v10, %v2432_v7 }
0x1786   :  { %2436 = vrot.lane.b32.xlu1 %v2434_v51, %s7768_s15 }
0x1794   :  { %v2420_v21 = vpop.permute.xlu0 %2419 }
0x1795   :  { %v2422_v25 = vadd.f32 %v2420_v21, %v2416_v56 }
0x1797   :  { %7206 = vtanh.f32 %v2422_v25 }
0x17a4   :  { %v7207_v44 = vpop.eup %7206 }
0x17a5   :  { %2425 = vrot.lane.b32.xlu0 %v7207_v44, %s7768_s15 }
0x17f8   :  { %v2437_v32 = vpop.permute.xlu1 %2436 }
0x17f9   :  { %v2439_v35 = vadd.f32 %v2437_v32, %v2429_v8 }
0x17fb   :  { %7208 = vtanh.f32 %v2439_v35 }
0x1808   :  { %v7209_v49 = vpop.eup %7208 }
0x1809   :  { %2442 = vrot.lane.b32.xlu1 %v7209_v49, %s7768_s15  ;;  %v8823_v49 = vld [vmem:[%s9560_s8 + $0x24] ss:$8 sps:$4 sm:$0xff]  }
0x1817   :  { %v2426_v57 = vpop.permute.xlu0 %2425 }
0x1818   :  { %v2428_v39 = vmul.f32 %v7205_v4, %v2426_v57  ;;  %v8844_v57 = vld [vmem:[%s9560_s8 + $0x34] ss:$8 sps:$4 sm:$0xff]  }
0x187b   :  { %v2443_v2 = vpop.permute.xlu1 %2442 }
0x187c   :  { %v2445_v54 = vmul.f32 %v7201_v10, %v2443_v2  ;;  %v8829_v2 = vld [vmem:[%s9560_s8 + $0x20] ss:$8 sps:$4 sm:$0xff]  }
0x187e   :  { %2447 = vrot.lane.b32.xlu1 %v2445_v54, %s7767_s2  ;;  %v8835_v54 = vld [vmem:[%s9560_s8 + $0x14] ss:$8 sps:$4 sm:$0xff]  }
0x18f0   :  { %v2448_v5 = vpop.permute.xlu1 %2447 }
0x18f1   :  { %v2450_v52 = vsel %vm1726_vm11, %v2448_v5, %v2428_v39  ;;  %v2547_v39 = vrot.slane %v8797_v3, 2 }
0x18f2   :  { %v2451_v29 = vpack.c.bf16 %v2450_v52, %v2450_v52 }
0x18f4   :  { %6517 = vmatmul.mubr.msk.bf16.vlgmr.msra.gmra.mxu0 %vm764_vm8, %v2451_v29 }
0x18f5   :  { %2660 = vmatpush1.bf16.msra.mxu0 %v8562_v58  ;;  %2683 = vmatprep.mubr.bf16.mxu0 %v7766_v55 }
0x18f6   :  { %2661 = vmatprep.subr.bf16.mxu0 %v8567_v9  ;;  %v8801_v9 = vadd.f32 %v8632_v16, %v8541_v12 }
0x18f8   :  { %v2548_v29 = vrot.slane %v8801_v9, 2 }
0x18f9   :  { %2662 = vmatpush1.bf16.msra.mxu0 %v8575_v59 }
0x18fa   :  { %2663 = vmatprep.subr.bf16.mxu0 %v8582_v60 }
0x18fd   :  { %2664 = vmatpush1.bf16.msra.mxu0 %v8590_v62 }
0x18fe   :  { %2665 = vmatprep.subr.bf16.mxu0 %v8596_v63 }
0x1901   :  { %2666 = vmatpush1.bf16.msra.mxu0 %v8604_v1 }
0x1902   :  { %2849 = vmatprep.subr.bf16.mxu0 %v8557_v36 }
0x19b4   :  { %v2489_v58 = vpop.f32.mrf.mxu0 }
0x19b5   :  { %v2490_v59 = vadd.f32 %v2489_v58, %v8797_v3 }
0x19b6   :  { %v2491_v60 = vpop.f32.mrf.mxu0 }
0x19b7   :  { %v6518_v43 = vmul.f32 -1.442695, %v2490_v59  ;;  %v2492_v34 = vadd.f32 %v2491_v60, %v8801_v9 }
0x19b8   :  { %v2493_v0 = vpop.f32.mrf.mxu0 }
0x19b9   :  { %7210 = vpow2.f32 %v6518_v43  ;;  %v6519_v16 = vmul.f32 -1.442695, %v2492_v34 }
0x19ba   :  { %7212 = vtanh.f32 %v2492_v34  ;;  %v2494_v48 = vpop.f32.mrf.mxu0 }
0x19c6   :  { %v7211_v36 = vpop.eup %7210 }
0x19c7   :  { %v7213_v37 = vpop.eup %7212  ;;  %v2502_v6 = vadd.f32 1.0, %v7211_v36 }
0x19c8   :  { %2524 = vrot.lane.b32.xlu0 %v7213_v37, %s7767_s2 }
0x19c9   :  { %7214 = vrcp.f32 %v2502_v6 }
0x19ca   :  { %7216 = vpow2.f32 %v6519_v16 }
0x19d6   :  { %v7215_v14 = vpop.eup %7214 }
0x19d7   :  { %v2510_v50 = vmul.f32 %v7215_v14, %v7213_v37  ;;  %v7217_v23 = vpop.eup %7216  ;;  %v2522_v38 = vmul.f32 %v7215_v14, %v2439_v35  ;;  %v8816_v35 = vld [vmem:[%s9560_s8 + $0x30] ss:$8 sps:$4 sm:$0xff]  }
0x19d8   :  { %v2503_v30 = vadd.f32 1.0, %v7217_v23 }
0x19d9   :  { %2512 = vrot.lane.b32.xlu0 %v2510_v50, %s7768_s15 }
0x19da   :  { %7218 = vrcp.f32 %v2503_v30 }
0x19e7   :  { %v7219_v53 = vpop.eup %7218 }
0x19e8   :  { %v2509_v40 = vmul.f32 %v7219_v53, %v2422_v25 }
0x1a3a   :  { %v2525_v42 = vpop.permute.xlu0 %2524 }
0x1a3b   :  { %v2527_v47 = vmul.f32 %v7215_v14, %v2525_v42 }
0x1a3d   :  { %2529 = vrot.lane.b32.xlu1 %v2527_v47, %s7768_s15 }
0x1a4b   :  { %v2513_v10 = vpop.permute.xlu0 %2512 }
0x1a4c   :  { %v2515_v15 = vadd.f32 %v2513_v10, %v2509_v40 }
0x1a4e   :  { %7220 = vtanh.f32 %v2515_v15 }
0x1a5b   :  { %v7221_v27 = vpop.eup %7220 }
0x1a5c   :  { %2518 = vrot.lane.b32.xlu0 %v7221_v27, %s7768_s15 }
0x1aaf   :  { %v2530_v46 = vpop.permute.xlu1 %2529 }
0x1ab0   :  { %v2532_v7 = vadd.f32 %v2530_v46, %v2522_v38 }
0x1ab2   :  { %7222 = vtanh.f32 %v2532_v7 }
0x1abf   :  { %v7223_v51 = vpop.eup %7222 }
0x1ac0   :  { %2535 = vrot.lane.b32.xlu1 %v7223_v51, %s7768_s15 }
0x1ace   :  { %v2519_v21 = vpop.permute.xlu0 %2518 }
0x1acf   :  { %v2521_v44 = vmul.f32 %v7219_v53, %v2519_v21 }
0x1b32   :  { %v2536_v4 = vpop.permute.xlu1 %2535 }
0x1b33   :  { %v2538_v56 = vmul.f32 %v7215_v14, %v2536_v4 }
0x1b35   :  { %2540 = vrot.lane.b32.xlu1 %v2538_v56, %s7767_s2 }
0x1ba7   :  { %v2541_v25 = vpop.permute.xlu1 %2540 }
0x1ba8   :  { %v2543_v8 = vsel %vm1726_vm11, %v2541_v25, %v2521_v44  ;;  %v8871_v44 = vld [vmem:[%s9560_s8 + $0x4] ss:$8 sps:$4 sm:$0xff]   ;;  %v8877_v25 = vld [vmem:[%s9560_s8] ss:$8 sps:$4 sm:$0xff]  }
0x1ba9   :  { %v2544_v32 = vpack.c.bf16 %v2543_v8, %v2543_v8  ;;  %v2644_v8 = vrot.slane %v8797_v3, 4 }
0x1bab   :  { %6520 = vmatmul.mubr.msk.bf16.vlgmr.msra.gmra.mxu1 %vm764_vm8, %v2544_v32 }
0x1bac   :  { %2757 = vmatpush1.bf16.msra.mxu1 %v8816_v35  ;;  %2780 = vmatprep.mubr.bf16.mxu1 %v7766_v55 }
0x1bad   :  { %2758 = vmatprep.subr.bf16.mxu1 %v8823_v49 }
0x1bb0   :  { %2759 = vmatpush1.bf16.msra.mxu1 %v8829_v2 }
0x1bb1   :  { %2760 = vmatprep.subr.bf16.mxu1 %v8835_v54 }
0x1bb4   :  { %2761 = vmatpush1.bf16.msra.mxu1 %v8590_v62 }
0x1bb5   :  { %2762 = vmatprep.subr.bf16.mxu1 %v8596_v63 }
0x1bb8   :  { %2763 = vmatpush1.bf16.msra.mxu1 %v8604_v1 }
0x1bb9   :  { %2948 = vmatprep.subr.bf16.mxu1 %v8844_v57 }
0x1c6b   :  { %v2588_v5 = vpop.f32.mrf.mxu1 }
0x1c6c   :  { %v2589_v52 = vadd.f32 %v2588_v5, %v2547_v39  ;;  %v2645_v5 = vrot.slane %v8801_v9, 4 }
0x1c6d   :  { %v2590_v58 = vpop.f32.mrf.mxu1 }
0x1c6e   :  { %v6521_v59 = vmul.f32 -1.442695, %v2589_v52  ;;  %v2591_v62 = vadd.f32 %v2590_v58, %v2548_v29 }
0x1c6f   :  { %v2592_v60 = vpop.f32.mrf.mxu1 }
0x1c70   :  { %7224 = vpow2.f32 %v6521_v59  ;;  %v6522_v36 = vmul.f32 -1.442695, %v2591_v62 }
0x1c71   :  { %7226 = vtanh.f32 %v2591_v62  ;;  %v2593_v63 = vpop.f32.mrf.mxu1 }
0x1c7d   :  { %v7225_v1 = vpop.eup %7224 }
0x1c7e   :  { %v7227_v43 = vpop.eup %7226  ;;  %v2601_v34 = vadd.f32 1.0, %v7225_v1 }
0x1c7f   :  { %2623 = vrot.lane.b32.xlu0 %v7227_v43, %s7767_s2 }
0x1c80   :  { %7228 = vrcp.f32 %v2601_v34 }
0x1c81   :  { %7230 = vpow2.f32 %v6522_v36 }
0x1c8d   :  { %v7229_v0 = vpop.eup %7228 }
0x1c8e   :  { %v2609_v48 = vmul.f32 %v7229_v0, %v7227_v43  ;;  %v7231_v37 = vpop.eup %7230  ;;  %v2621_v53 = vmul.f32 %v7229_v0, %v2532_v7  ;;  %v8865_v7 = vld [vmem:[%s9560_s8 + $0x10] ss:$8 sps:$4 sm:$0xff]  }
0x1c8f   :  { %v2602_v6 = vadd.f32 1.0, %v7231_v37 }
0x1c90   :  { %2611 = vrot.lane.b32.xlu0 %v2609_v48, %s7768_s15 }
0x1c91   :  { %7232 = vrcp.f32 %v2602_v6 }
0x1c9e   :  { %v7233_v16 = vpop.eup %7232 }
0x1c9f   :  { %v2608_v23 = vmul.f32 %v7233_v16, %v2515_v15 }
0x1cf1   :  { %v2624_v14 = vpop.permute.xlu0 %2623 }
0x1cf2   :  { %v2626_v50 = vmul.f32 %v7229_v0, %v2624_v14 }
0x1cf4   :  { %2628 = vrot.lane.b32.xlu1 %v2626_v50, %s7768_s15 }
0x1d02   :  { %v2612_v30 = vpop.permute.xlu0 %2611 }
0x1d03   :  { %v2614_v42 = vadd.f32 %v2612_v30, %v2608_v23 }
0x1d05   :  { %7234 = vtanh.f32 %v2614_v42 }
0x1d12   :  { %v7235_v47 = vpop.eup %7234 }
0x1d13   :  { %2617 = vrot.lane.b32.xlu0 %v7235_v47, %s7768_s15 }
0x1d66   :  { %v2629_v40 = vpop.permute.xlu1 %2628 }
0x1d67   :  { %v2631_v10 = vadd.f32 %v2629_v40, %v2621_v53 }
0x1d69   :  { %7236 = vtanh.f32 %v2631_v10 }
0x1d76   :  { %v7237_v27 = vpop.eup %7236 }
0x1d77   :  { %2634 = vrot.lane.b32.xlu1 %v7237_v27, %s7768_s15 }
0x1d85   :  { %v2618_v51 = vpop.permute.xlu0 %2617 }
0x1d86   :  { %v2620_v4 = vmul.f32 %v7233_v16, %v2618_v51 }
0x1de9   :  { %v2635_v38 = vpop.permute.xlu1 %2634 }
0x1dea   :  { %v2637_v46 = vmul.f32 %v7229_v0, %v2635_v38 }
0x1dec   :  { %2639 = vrot.lane.b32.xlu1 %v2637_v46, %s7767_s2 }
0x1e5e   :  { %v2640_v15 = vpop.permute.xlu1 %2639 }
0x1e5f   :  { %v2642_v56 = vsel %vm1726_vm11, %v2640_v15, %v2620_v4 }
0x1e60   :  { %v2643_v21 = vpack.c.bf16 %v2642_v56, %v2642_v56 }
0x1e62   :  { %6523 = vmatmul.mubr.msk.bf16.vlgmr.msra.gmra.mxu0 %vm764_vm8, %v2643_v21 }
0x1e63   :  { %2850 = vmatpush1.bf16.msra.mxu0 %v8816_v35  ;;  %2873 = vmatprep.mubr.bf16.mxu0 %v7766_v55 }
0x1e64   :  { %2851 = vmatprep.subr.bf16.mxu0 %v8823_v49 }
0x1e67   :  { %2852 = vmatpush1.bf16.msra.mxu0 %v8829_v2 }
0x1e68   :  { %2853 = vmatprep.subr.bf16.mxu0 %v8835_v54 }
0x1e6b   :  { %2854 = vmatpush1.bf16.msra.mxu0 %v8865_v7 }
0x1e6c   :  { %2855 = vmatprep.subr.bf16.mxu0 %v8871_v44 }
0x1e6f   :  { %2856 = vmatpush1.bf16.msra.mxu0 %v8877_v25 }
0x1e70   :  { %3045 = vmatprep.subr.bf16.mxu0 %v8844_v57 }
0x1f22   :  { %v2685_v32 = vpop.f32.mrf.mxu0 }
0x1f23   :  { %v2686_v39 = vadd.f32 %v2685_v32, %v2644_v8  ;;  %v2742_v32 = vrot.slane %v8801_v9, 6 }
0x1f24   :  { %v2687_v52 = vpop.f32.mrf.mxu0 }
0x1f25   :  { %v6524_v29 = vmul.f32 -1.442695, %v2686_v39  ;;  %v2688_v58 = vadd.f32 %v2687_v52, %v2645_v5 }
0x1f26   :  { %v2689_v59 = vpop.f32.mrf.mxu0 }
0x1f27   :  { %7238 = vpow2.f32 %v6524_v29  ;;  %v6525_v0 = vmul.f32 -1.442695, %v2688_v58 }
0x1f28   :  { %7240 = vtanh.f32 %v2688_v58  ;;  %v2690_v62 = vpop.f32.mrf.mxu0 }
0x1f34   :  { %v7239_v60 = vpop.eup %7238 }
0x1f35   :  { %v7241_v63 = vpop.eup %7240  ;;  %v2698_v1 = vadd.f32 1.0, %v7239_v60 }
0x1f36   :  { %2720 = vrot.lane.b32.xlu0 %v7241_v63, %s7767_s2 }
0x1f37   :  { %7242 = vrcp.f32 %v2698_v1 }
0x1f38   :  { %7244 = vpow2.f32 %v6525_v0 }
0x1f44   :  { %v7243_v43 = vpop.eup %7242 }
0x1f45   :  { %v2706_v34 = vmul.f32 %v7243_v43, %v7241_v63  ;;  %v7245_v48 = vpop.eup %7244  ;;  %v2718_v47 = vmul.f32 %v7243_v43, %v2631_v10  ;;  %v2741_v10 = vrot.slane %v8797_v3, 6 }
0x1f46   :  { %v2699_v36 = vadd.f32 1.0, %v7245_v48 }
0x1f47   :  { %2708 = vrot.lane.b32.xlu0 %v2706_v34, %s7768_s15 }
0x1f48   :  { %7246 = vrcp.f32 %v2699_v36 }
0x1f55   :  { %v7247_v14 = vpop.eup %7246 }
0x1f56   :  { %v2705_v50 = vmul.f32 %v7247_v14, %v2614_v42 }
0x1fa8   :  { %v2721_v37 = vpop.permute.xlu0 %2720 }
0x1fa9   :  { %v2723_v6 = vmul.f32 %v7243_v43, %v2721_v37 }
0x1fab   :  { %2725 = vrot.lane.b32.xlu1 %v2723_v6, %s7768_s15 }
0x1fb9   :  { %v2709_v16 = vpop.permute.xlu0 %2708 }
0x1fba   :  { %v2711_v23 = vadd.f32 %v2709_v16, %v2705_v50 }
0x1fbc   :  { %7248 = vtanh.f32 %v2711_v23 }
0x1fc9   :  { %v7249_v30 = vpop.eup %7248 }
0x1fca   :  { %2714 = vrot.lane.b32.xlu0 %v7249_v30, %s7768_s15 }
0x201d   :  { %v2726_v53 = vpop.permute.xlu1 %2725 }
0x201e   :  { %v2728_v40 = vadd.f32 %v2726_v53, %v2718_v47 }
0x2020   :  { %7250 = vtanh.f32 %v2728_v40 }
0x202d   :  { %v7251_v27 = vpop.eup %7250 }
0x202e   :  { %2731 = vrot.lane.b32.xlu1 %v7251_v27, %s7768_s15 }
0x203c   :  { %v2715_v51 = vpop.permute.xlu0 %2714 }
0x203d   :  { %v2717_v4 = vmul.f32 %v7247_v14, %v2715_v51 }
0x20a0   :  { %v2732_v38 = vpop.permute.xlu1 %2731 }
0x20a1   :  { %v2734_v46 = vmul.f32 %v7243_v43, %v2732_v38 }
0x20a3   :  { %2736 = vrot.lane.b32.xlu1 %v2734_v46, %s7767_s2 }
0x2115   :  { %v2737_v42 = vpop.permute.xlu1 %2736 }
0x2116   :  { %v2739_v15 = vsel %vm1726_vm11, %v2737_v42, %v2717_v4 }
0x2117   :  { %v2740_v56 = vpack.c.bf16 %v2739_v15, %v2739_v15  ;;  %v8925_v15 = vadd.f32 %v8636_v20, %v8541_v12 }
0x2119   :  { %6526 = vmatmul.mubr.msk.bf16.vlgmr.msra.gmra.mxu1 %vm764_vm8, %v2740_v56 }
0x211a   :  { %2949 = vmatpush1.bf16.msra.mxu1 %v8816_v35  ;;  %2972 = vmatprep.mubr.bf16.mxu1 %v7766_v55 }
0x211b   :  { %2950 = vmatprep.subr.bf16.mxu1 %v8823_v49 }
0x211e   :  { %2951 = vmatpush1.bf16.msra.mxu1 %v8829_v2 }
0x211f   :  { %2952 = vmatprep.subr.bf16.mxu1 %v8835_v54 }
0x2122   :  { %2953 = vmatpush1.bf16.msra.mxu1 %v8865_v7 }
0x2123   :  { %2954 = vmatprep.subr.bf16.mxu1 %v8871_v44 }
0x2126   :  { %2955 = vmatpush1.bf16.msra.mxu1 %v8877_v25 }
0x2127   :  { %3142 = vmatprep.subr.bf16.mxu1 %v8844_v57 }
0x21d9   :  { %v2782_v21 = vpop.f32.mrf.mxu1 }
0x21da   :  { %v2783_v8 = vadd.f32 %v2782_v21, %v2741_v10 }
0x21db   :  { %v2784_v39 = vpop.f32.mrf.mxu1 }
0x21dc   :  { %v6527_v5 = vmul.f32 -1.442695, %v2783_v8  ;;  %v2785_v52 = vadd.f32 %v2784_v39, %v2742_v32 }
0x21dd   :  { %v2786_v29 = vpop.f32.mrf.mxu1 }
0x21de   :  { %7252 = vpow2.f32 %v6527_v5  ;;  %v6528_v3 = vmul.f32 -1.442695, %v2785_v52 }
0x21df   :  { %7254 = vtanh.f32 %v2785_v52  ;;  %v2787_v58 = vpop.f32.mrf.mxu1 }
0x21eb   :  { %v7253_v59 = vpop.eup %7252 }
0x21ec   :  { %v7255_v62 = vpop.eup %7254  ;;  %v2795_v60 = vadd.f32 1.0, %v7253_v59 }
0x21ed   :  { %2817 = vrot.lane.b32.xlu0 %v7255_v62, %s7767_s2 }
0x21ee   :  { %7256 = vrcp.f32 %v2795_v60 }
0x21ef   :  { %7258 = vpow2.f32 %v6528_v3 }
0x21fb   :  { %v7257_v63 = vpop.eup %7256 }
0x21fc   :  { %v2803_v1 = vmul.f32 %v7257_v63, %v7255_v62  ;;  %v7259_v9 = vpop.eup %7258  ;;  %v2815_v50 = vmul.f32 %v7257_v63, %v2728_v40  ;;  %v8921_v40 = vadd.f32 %v8634_v17, %v8548_v19 }
0x21fd   :  { %v2796_v43 = vadd.f32 1.0, %v7259_v9 }
0x21fe   :  { %2805 = vrot.lane.b32.xlu0 %v2803_v1, %s7768_s15 }
0x21ff   :  { %7260 = vrcp.f32 %v2796_v43 }
0x220c   :  { %v7261_v48 = vpop.eup %7260 }
0x220d   :  { %v2802_v36 = vmul.f32 %v7261_v48, %v2711_v23 }
0x225f   :  { %v2818_v34 = vpop.permute.xlu0 %2817 }
0x2260   :  { %v2820_v0 = vmul.f32 %v7257_v63, %v2818_v34 }
0x2262   :  { %2822 = vrot.lane.b32.xlu1 %v2820_v0, %s7768_s15 }
0x2270   :  { %v2806_v37 = vpop.permute.xlu0 %2805 }
0x2271   :  { %v2808_v6 = vadd.f32 %v2806_v37, %v2802_v36 }
0x2273   :  { %7262 = vtanh.f32 %v2808_v6 }
0x2280   :  { %v7263_v14 = vpop.eup %7262 }
0x2281   :  { %2811 = vrot.lane.b32.xlu0 %v7263_v14, %s7768_s15 }
0x22d4   :  { %v2823_v16 = vpop.permute.xlu1 %2822 }
0x22d5   :  { %v2825_v30 = vadd.f32 %v2823_v16, %v2815_v50 }
0x22d7   :  { %7264 = vtanh.f32 %v2825_v30 }
0x22e4   :  { %v7265_v47 = vpop.eup %7264 }
0x22e5   :  { %2828 = vrot.lane.b32.xlu1 %v7265_v47, %s7768_s15 }
0x22f3   :  { %v2812_v38 = vpop.permute.xlu0 %2811 }
0x22f4   :  { %v2814_v46 = vmul.f32 %v7261_v48, %v2812_v38 }
0x2357   :  { %v2829_v53 = vpop.permute.xlu1 %2828 }
0x2358   :  { %v2831_v27 = vmul.f32 %v7257_v63, %v2829_v53 }
0x235a   :  { %2833 = vrot.lane.b32.xlu1 %v2831_v27, %s7767_s2 }
0x23cc   :  { %v2834_v23 = vpop.permute.xlu1 %2833 }
0x23cd   :  { %v2836_v51 = vsel %vm1726_vm11, %v2834_v23, %v2814_v46  ;;  %v2934_v23 = vrot.slane %v8925_v15, 2 }
0x23ce   :  { %v2837_v4 = vpack.c.bf16 %v2836_v51, %v2836_v51 }
0x23d0   :  { %6529 = vmatmul.mubr.msk.bf16.vlgmr.msra.gmra.mxu0 %vm764_vm8, %v2837_v4 }
0x23d1   :  { %3046 = vmatpush1.bf16.msra.mxu0 %v8816_v35  ;;  %3069 = vmatprep.mubr.bf16.mxu0 %v7766_v55 }
0x23d2   :  { %3047 = vmatprep.subr.bf16.mxu0 %v8823_v49 }
0x23d5   :  { %3048 = vmatpush1.bf16.msra.mxu0 %v8829_v2 }
0x23d6   :  { %3049 = vmatprep.subr.bf16.mxu0 %v8835_v54 }
0x23d9   :  { %3050 = vmatpush1.bf16.msra.mxu0 %v8865_v7 }
0x23da   :  { %3051 = vmatprep.subr.bf16.mxu0 %v8871_v44 }
0x23dd   :  { %3052 = vmatpush1.bf16.msra.mxu0 %v8877_v25 }
0x23de   :  { %3235 = vmatprep.subr.bf16.mxu0 %v8844_v57 }
0x2490   :  { %v2875_v42 = vpop.f32.mrf.mxu0 }
0x2491   :  { %v2876_v56 = vadd.f32 %v2875_v42, %v8921_v40 }
0x2492   :  { %v2877_v10 = vpop.f32.mrf.mxu0 }
0x2493   :  { %v6530_v21 = vmul.f32 -1.442695, %v2876_v56  ;;  %v2878_v8 = vadd.f32 %v2877_v10, %v8925_v15 }
0x2494   :  { %v2879_v32 = vpop.f32.mrf.mxu0 }
0x2495   :  { %7266 = vpow2.f32 %v6530_v21  ;;  %v6531_v20 = vmul.f32 -1.442695, %v2878_v8 }
0x2496   :  { %7268 = vtanh.f32 %v2878_v8  ;;  %v2880_v39 = vpop.f32.mrf.mxu0 }
0x24a2   :  { %v7267_v5 = vpop.eup %7266 }
0x24a3   :  { %v7269_v52 = vpop.eup %7268  ;;  %v2888_v29 = vadd.f32 1.0, %v7267_v5 }
0x24a4   :  { %2910 = vrot.lane.b32.xlu0 %v7269_v52, %s7767_s2 }
0x24a5   :  { %7270 = vrcp.f32 %v2888_v29 }
0x24a6   :  { %7272 = vpow2.f32 %v6531_v20 }
0x24b2   :  { %v7271_v17 = vpop.eup %7270 }
0x24b3   :  { %v2896_v58 = vmul.f32 %v7271_v17, %v7269_v52  ;;  %v7273_v59 = vpop.eup %7272  ;;  %v2908_v0 = vmul.f32 %v7271_v17, %v2825_v30  ;;  %v2933_v30 = vrot.slane %v8921_v40, 2 }
0x24b4   :  { %v2889_v62 = vadd.f32 1.0, %v7273_v59 }
0x24b5   :  { %2898 = vrot.lane.b32.xlu0 %v2896_v58, %s7768_s15 }
0x24b6   :  { %7274 = vrcp.f32 %v2889_v62 }
0x24c3   :  { %v7275_v1 = vpop.eup %7274 }
0x24c4   :  { %v2895_v3 = vmul.f32 %v7275_v1, %v2808_v6 }
0x2516   :  { %v2911_v60 = vpop.permute.xlu0 %2910 }
0x2517   :  { %v2913_v63 = vmul.f32 %v7271_v17, %v2911_v60 }
0x2519   :  { %2915 = vrot.lane.b32.xlu1 %v2913_v63, %s7768_s15 }
0x2527   :  { %v2899_v9 = vpop.permute.xlu0 %2898 }
0x2528   :  { %v2901_v43 = vadd.f32 %v2899_v9, %v2895_v3 }
0x252a   :  { %7276 = vtanh.f32 %v2901_v43 }
0x2537   :  { %v7277_v34 = vpop.eup %7276 }
0x2538   :  { %2904 = vrot.lane.b32.xlu0 %v7277_v34, %s7768_s15 }
0x258b   :  { %v2916_v48 = vpop.permute.xlu1 %2915 }
0x258c   :  { %v2918_v36 = vadd.f32 %v2916_v48, %v2908_v0 }
0x258e   :  { %7278 = vtanh.f32 %v2918_v36 }
0x259b   :  { %v7279_v37 = vpop.eup %7278 }
0x259c   :  { %2921 = vrot.lane.b32.xlu1 %v7279_v37, %s7768_s15 }
0x25aa   :  { %v2905_v16 = vpop.permute.xlu0 %2904 }
0x25ab   :  { %v2907_v47 = vmul.f32 %v7275_v1, %v2905_v16 }
0x260e   :  { %v2922_v14 = vpop.permute.xlu1 %2921 }
0x260f   :  { %v2924_v50 = vmul.f32 %v7271_v17, %v2922_v14 }
0x2611   :  { %2926 = vrot.lane.b32.xlu1 %v2924_v50, %s7767_s2 }
0x2683   :  { %v2927_v6 = vpop.permute.xlu1 %2926 }
0x2684   :  { %v2929_v53 = vsel %vm1726_vm11, %v2927_v6, %v2907_v47 }
0x2685   :  { %v2930_v27 = vpack.c.bf16 %v2929_v53, %v2929_v53 }
0x2687   :  { %6532 = vmatmul.mubr.msk.bf16.vlgmr.msra.gmra.mxu1 %vm764_vm8, %v2930_v27  ;;  %v3031_v27 = vrot.slane %v8925_v15, 4 }
0x2688   :  { %3143 = vmatpush1.bf16.msra.mxu1 %v8816_v35  ;;  %3166 = vmatprep.mubr.bf16.mxu1 %v7766_v55 }
0x2689   :  { %3144 = vmatprep.subr.bf16.mxu1 %v8823_v49 }
0x268c   :  { %3145 = vmatpush1.bf16.msra.mxu1 %v8829_v2 }
0x268d   :  { %3146 = vmatprep.subr.bf16.mxu1 %v8835_v54 }
0x2690   :  { %3147 = vmatpush1.bf16.msra.mxu1 %v8865_v7 }
0x2691   :  { %3148 = vmatprep.subr.bf16.mxu1 %v8871_v44 }
0x2694   :  { %3149 = vmatpush1.bf16.msra.mxu1 %v8877_v25 }
0x2695   :  { %3334 = vmatprep.subr.bf16.mxu1 %v8844_v57 }
0x2747   :  { %v2974_v38 = vpop.f32.mrf.mxu1 }
0x2748   :  { %v2975_v46 = vadd.f32 %v2974_v38, %v2933_v30 }
0x2749   :  { %v2976_v51 = vpop.f32.mrf.mxu1 }
0x274a   :  { %v6533_v4 = vmul.f32 -1.442695, %v2975_v46  ;;  %v2977_v42 = vadd.f32 %v2976_v51, %v2934_v23 }
0x274b   :  { %v2978_v56 = vpop.f32.mrf.mxu1 }
0x274c   :  { %7280 = vpow2.f32 %v6533_v4  ;;  %v6534_v52 = vmul.f32 -1.442695, %v2977_v42 }
0x274d   :  { %7282 = vtanh.f32 %v2977_v42  ;;  %v2979_v10 = vpop.f32.mrf.mxu1 }
0x2759   :  { %v7281_v21 = vpop.eup %7280 }
0x275a   :  { %v7283_v8 = vpop.eup %7282  ;;  %v2987_v32 = vadd.f32 1.0, %v7281_v21 }
0x275b   :  { %3009 = vrot.lane.b32.xlu0 %v7283_v8, %s7767_s2 }
0x275c   :  { %7284 = vrcp.f32 %v2987_v32 }
0x275d   :  { %7286 = vpow2.f32 %v6534_v52 }
0x2769   :  { %v7285_v39 = vpop.eup %7284 }
0x276a   :  { %v2995_v5 = vmul.f32 %v7285_v39, %v7283_v8  ;;  %v7287_v29 = vpop.eup %7286  ;;  %v3007_v3 = vmul.f32 %v7285_v39, %v2918_v36  ;;  %v3030_v36 = vrot.slane %v8921_v40, 4 }
0x276b   :  { %v2988_v17 = vadd.f32 1.0, %v7287_v29 }
0x276c   :  { %2997 = vrot.lane.b32.xlu0 %v2995_v5, %s7768_s15 }
0x276d   :  { %7288 = vrcp.f32 %v2988_v17 }
0x277a   :  { %v7289_v59 = vpop.eup %7288 }
0x277b   :  { %v2994_v62 = vmul.f32 %v7289_v59, %v2901_v43 }
0x27cd   :  { %v3010_v58 = vpop.permute.xlu0 %3009 }
0x27ce   :  { %v3012_v20 = vmul.f32 %v7285_v39, %v3010_v58 }
0x27d0   :  { %3014 = vrot.lane.b32.xlu1 %v3012_v20, %s7768_s15 }
0x27de   :  { %v2998_v60 = vpop.permute.xlu0 %2997 }
0x27df   :  { %v3000_v63 = vadd.f32 %v2998_v60, %v2994_v62 }
0x27e1   :  { %7290 = vtanh.f32 %v3000_v63 }
0x27ee   :  { %v7291_v1 = vpop.eup %7290 }
0x27ef   :  { %3003 = vrot.lane.b32.xlu0 %v7291_v1, %s7768_s15 }
0x2842   :  { %v3015_v9 = vpop.permute.xlu1 %3014 }
0x2843   :  { %v3017_v34 = vadd.f32 %v3015_v9, %v3007_v3 }
0x2845   :  { %7292 = vtanh.f32 %v3017_v34 }
0x2852   :  { %v7293_v0 = vpop.eup %7292 }
0x2853   :  { %3020 = vrot.lane.b32.xlu1 %v7293_v0, %s7768_s15 }
0x2861   :  { %v3004_v14 = vpop.permute.xlu0 %3003 }
0x2862   :  { %v3006_v50 = vmul.f32 %v7289_v59, %v3004_v14 }
0x28c5   :  { %v3021_v48 = vpop.permute.xlu1 %3020 }
0x28c6   :  { %v3023_v37 = vmul.f32 %v7285_v39, %v3021_v48 }
0x28c8   :  { %3025 = vrot.lane.b32.xlu1 %v3023_v37, %s7767_s2 }
0x293a   :  { %v3026_v43 = vpop.permute.xlu1 %3025 }
0x293b   :  { %v3028_v16 = vsel %vm1726_vm11, %v3026_v43, %v3006_v50 }
0x293c   :  { %v3029_v47 = vpack.c.bf16 %v3028_v16, %v3028_v16 }
0x293e   :  { %6535 = vmatmul.mubr.msk.bf16.vlgmr.msra.gmra.mxu0 %vm764_vm8, %v3029_v47  ;;  %v3128_v47 = vrot.slane %v8925_v15, 6 }
0x293f   :  { %3236 = vmatpush1.bf16.msra.mxu0 %v8816_v35  ;;  %3259 = vmatprep.mubr.bf16.mxu0 %v7766_v55 }
0x2940   :  { %3237 = vmatprep.subr.bf16.mxu0 %v8823_v49 }
0x2943   :  { %3238 = vmatpush1.bf16.msra.mxu0 %v8829_v2 }
0x2944   :  { %3239 = vmatprep.subr.bf16.mxu0 %v8835_v54 }
0x2947   :  { %3240 = vmatpush1.bf16.msra.mxu0 %v8865_v7 }
0x2948   :  { %3241 = vmatprep.subr.bf16.mxu0 %v8871_v44 }
0x294b   :  { %3242 = vmatpush1.bf16.msra.mxu0 %v8877_v25 }
0x294c   :  { %3431 = vmatprep.subr.bf16.mxu0 %v8844_v57 }
0x29fe   :  { %v3071_v6 = vpop.f32.mrf.mxu0 }
0x29ff   :  { %v3072_v53 = vadd.f32 %v3071_v6, %v3030_v36 }
0x2a00   :  { %v3073_v30 = vpop.f32.mrf.mxu0 }
0x2a01   :  { %v6536_v38 = vmul.f32 -1.442695, %v3072_v53  ;;  %v3074_v46 = vadd.f32 %v3073_v30, %v3031_v27 }
0x2a02   :  { %v3075_v23 = vpop.f32.mrf.mxu0 }
0x2a03   :  { %7294 = vpow2.f32 %v6536_v38  ;;  %v6537_v8 = vmul.f32 -1.442695, %v3074_v46 }
0x2a04   :  { %7296 = vtanh.f32 %v3074_v46  ;;  %v3076_v51 = vpop.f32.mrf.mxu0 }
0x2a10   :  { %v7295_v4 = vpop.eup %7294 }
0x2a11   :  { %v7297_v42 = vpop.eup %7296  ;;  %v3084_v56 = vadd.f32 1.0, %v7295_v4 }
0x2a12   :  { %3106 = vrot.lane.b32.xlu0 %v7297_v42, %s7767_s2 }
0x2a13   :  { %7298 = vrcp.f32 %v3084_v56 }
0x2a14   :  { %7300 = vpow2.f32 %v6537_v8 }
0x2a20   :  { %v7299_v10 = vpop.eup %7298 }
0x2a21   :  { %v3092_v21 = vmul.f32 %v7299_v10, %v7297_v42  ;;  %v7301_v32 = vpop.eup %7300  ;;  %v3104_v62 = vmul.f32 %v7299_v10, %v3017_v34  ;;  %v3127_v34 = vrot.slane %v8921_v40, 6 }
0x2a22   :  { %v3085_v39 = vadd.f32 1.0, %v7301_v32 }
0x2a23   :  { %3094 = vrot.lane.b32.xlu0 %v3092_v21, %s7768_s15 }
0x2a24   :  { %7302 = vrcp.f32 %v3085_v39 }
0x2a31   :  { %v7303_v29 = vpop.eup %7302 }
0x2a32   :  { %v3091_v17 = vmul.f32 %v7303_v29, %v3000_v63 }
0x2a84   :  { %v3107_v5 = vpop.permute.xlu0 %3106 }
0x2a85   :  { %v3109_v52 = vmul.f32 %v7299_v10, %v3107_v5 }
0x2a87   :  { %3111 = vrot.lane.b32.xlu1 %v3109_v52, %s7768_s15 }
0x2a95   :  { %v3095_v58 = vpop.permute.xlu0 %3094 }
0x2a96   :  { %v3097_v20 = vadd.f32 %v3095_v58, %v3091_v17 }
0x2a98   :  { %7304 = vtanh.f32 %v3097_v20 }
0x2aa5   :  { %v7305_v59 = vpop.eup %7304 }
0x2aa6   :  { %3100 = vrot.lane.b32.xlu0 %v7305_v59, %s7768_s15 }
0x2af9   :  { %v3112_v60 = vpop.permute.xlu1 %3111 }
0x2afa   :  { %v3114_v1 = vadd.f32 %v3112_v60, %v3104_v62 }
0x2afc   :  { %7306 = vtanh.f32 %v3114_v1 }
0x2b09   :  { %v7307_v3 = vpop.eup %7306 }
0x2b0a   :  { %3117 = vrot.lane.b32.xlu1 %v7307_v3, %s7768_s15 }
0x2b18   :  { %v3101_v48 = vpop.permute.xlu0 %3100 }
0x2b19   :  { %v3103_v37 = vmul.f32 %v7303_v29, %v3101_v48 }
0x2b7c   :  { %v3118_v9 = vpop.permute.xlu1 %3117 }
0x2b7d   :  { %v3120_v0 = vmul.f32 %v7299_v10, %v3118_v9 }
0x2b7f   :  { %3122 = vrot.lane.b32.xlu1 %v3120_v0, %s7767_s2 }
0x2bf1   :  { %v3123_v63 = vpop.permute.xlu1 %3122 }
0x2bf2   :  { %v3125_v14 = vsel %vm1726_vm11, %v3123_v63, %v3103_v37  ;;  %v9009_v37 = vadd.f32 %v8640_v13, %v8541_v12 }
0x2bf3   :  { %v3126_v50 = vpack.c.bf16 %v3125_v14, %v3125_v14 }
0x2bf5   :  { %6538 = vmatmul.mubr.msk.bf16.vlgmr.msra.gmra.mxu1 %vm764_vm8, %v3126_v50 }
0x2bf6   :  { %3335 = vmatpush1.bf16.msra.mxu1 %v8816_v35  ;;  %3358 = vmatprep.mubr.bf16.mxu1 %v7766_v55 }
0x2bf7   :  { %3336 = vmatprep.subr.bf16.mxu1 %v8823_v49 }
0x2bfa   :  { %3337 = vmatpush1.bf16.msra.mxu1 %v8829_v2 }
0x2bfb   :  { %3338 = vmatprep.subr.bf16.mxu1 %v8835_v54 }
0x2bfe   :  { %3339 = vmatpush1.bf16.msra.mxu1 %v8865_v7 }
0x2bff   :  { %3340 = vmatprep.subr.bf16.mxu1 %v8871_v44 }
0x2c02   :  { %3341 = vmatpush1.bf16.msra.mxu1 %v8877_v25 }
0x2c03   :  { %3528 = vmatprep.subr.bf16.mxu1 %v8844_v57 }
0x2cb5   :  { %v3168_v43 = vpop.f32.mrf.mxu1 }
0x2cb6   :  { %v3169_v16 = vadd.f32 %v3168_v43, %v3127_v34 }
0x2cb7   :  { %v3170_v36 = vpop.f32.mrf.mxu1 }
0x2cb8   :  { %v6539_v6 = vmul.f32 -1.442695, %v3169_v16  ;;  %v3171_v53 = vadd.f32 %v3170_v36, %v3128_v47 }
0x2cb9   :  { %v3172_v27 = vpop.f32.mrf.mxu1 }
0x2cba   :  { %7308 = vpow2.f32 %v6539_v6  ;;  %v6540_v40 = vmul.f32 -1.442695, %v3171_v53 }
0x2cbb   :  { %7310 = vtanh.f32 %v3171_v53  ;;  %v3173_v30 = vpop.f32.mrf.mxu1 }
0x2cc7   :  { %v7309_v38 = vpop.eup %7308 }
0x2cc8   :  { %v7311_v46 = vpop.eup %7310  ;;  %v3181_v23 = vadd.f32 1.0, %v7309_v38 }
0x2cc9   :  { %3203 = vrot.lane.b32.xlu0 %v7311_v46, %s7767_s2 }
0x2cca   :  { %7312 = vrcp.f32 %v3181_v23 }
0x2ccb   :  { %7314 = vpow2.f32 %v6540_v40 }
0x2cd7   :  { %v7313_v51 = vpop.eup %7312 }
0x2cd8   :  { %v3189_v4 = vmul.f32 %v7313_v51, %v7311_v46  ;;  %v7315_v15 = vpop.eup %7314  ;;  %v3201_v52 = vmul.f32 %v7313_v51, %v3114_v1  ;;  %v9005_v1 = vadd.f32 %v8638_v33, %v8548_v19 }
0x2cd9   :  { %v3182_v42 = vadd.f32 1.0, %v7315_v15 }
0x2cda   :  { %3191 = vrot.lane.b32.xlu0 %v3189_v4, %s7768_s15 }
0x2cdb   :  { %7316 = vrcp.f32 %v3182_v42 }
0x2ce8   :  { %v7317_v21 = vpop.eup %7316 }
0x2ce9   :  { %v3188_v8 = vmul.f32 %v7317_v21, %v3097_v20 }
0x2d3b   :  { %v3204_v56 = vpop.permute.xlu0 %3203 }
0x2d3c   :  { %v3206_v10 = vmul.f32 %v7313_v51, %v3204_v56 }
0x2d3e   :  { %3208 = vrot.lane.b32.xlu1 %v3206_v10, %s7768_s15 }
0x2d4c   :  { %v3192_v32 = vpop.permute.xlu0 %3191 }
0x2d4d   :  { %v3194_v39 = vadd.f32 %v3192_v32, %v3188_v8 }
0x2d4f   :  { %7318 = vtanh.f32 %v3194_v39 }
0x2d5c   :  { %v7319_v5 = vpop.eup %7318 }
0x2d5d   :  { %3197 = vrot.lane.b32.xlu0 %v7319_v5, %s7768_s15 }
0x2db0   :  { %v3209_v29 = vpop.permute.xlu1 %3208 }
0x2db1   :  { %v3211_v17 = vadd.f32 %v3209_v29, %v3201_v52 }
0x2db3   :  { %7320 = vtanh.f32 %v3211_v17 }
0x2dc0   :  { %v7321_v58 = vpop.eup %7320 }
0x2dc1   :  { %3214 = vrot.lane.b32.xlu1 %v7321_v58, %s7768_s15 }
0x2dcf   :  { %v3198_v60 = vpop.permute.xlu0 %3197 }
0x2dd0   :  { %v3200_v3 = vmul.f32 %v7317_v21, %v3198_v60 }
0x2e33   :  { %v3215_v59 = vpop.permute.xlu1 %3214 }
0x2e34   :  { %v3217_v62 = vmul.f32 %v7313_v51, %v3215_v59 }
0x2e36   :  { %3219 = vrot.lane.b32.xlu1 %v3217_v62, %s7767_s2  ;;  %v3320_v62 = vrot.slane %v9009_v37, 2 }
0x2ea8   :  { %v3220_v20 = vpop.permute.xlu1 %3219 }
0x2ea9   :  { %v3222_v9 = vsel %vm1726_vm11, %v3220_v20, %v3200_v3 }
0x2eaa   :  { %v3223_v0 = vpack.c.bf16 %v3222_v9, %v3222_v9 }
0x2eac   :  { %6541 = vmatmul.mubr.msk.bf16.vlgmr.msra.gmra.mxu0 %vm764_vm8, %v3223_v0 }
0x2ead   :  { %3432 = vmatpush1.bf16.msra.mxu0 %v8816_v35  ;;  %3455 = vmatprep.mubr.bf16.mxu0 %v7766_v55 }
0x2eae   :  { %3433 = vmatprep.subr.bf16.mxu0 %v8823_v49 }
0x2eb1   :  { %3434 = vmatpush1.bf16.msra.mxu0 %v8829_v2 }
0x2eb2   :  { %3435 = vmatprep.subr.bf16.mxu0 %v8835_v54 }
0x2eb5   :  { %3436 = vmatpush1.bf16.msra.mxu0 %v8865_v7 }
0x2eb6   :  { %3437 = vmatprep.subr.bf16.mxu0 %v8871_v44 }
0x2eb9   :  { %3438 = vmatpush1.bf16.msra.mxu0 %v8877_v25 }
0x2eba   :  { %3621 = vmatprep.subr.bf16.mxu0 %v8844_v57 }
0x2f6c   :  { %v3261_v48 = vpop.f32.mrf.mxu0 }
0x2f6d   :  { %v3262_v63 = vadd.f32 %v3261_v48, %v9005_v1 }
0x2f6e   :  { %v3263_v14 = vpop.f32.mrf.mxu0 }
0x2f6f   :  { %v6542_v50 = vmul.f32 -1.442695, %v3262_v63  ;;  %v3264_v34 = vadd.f32 %v3263_v14, %v9009_v37 }
0x2f70   :  { %v3265_v43 = vpop.f32.mrf.mxu0 }
0x2f71   :  { %7322 = vpow2.f32 %v6542_v50  ;;  %v6543_v13 = vmul.f32 -1.442695, %v3264_v34 }
0x2f72   :  { %7324 = vtanh.f32 %v3264_v34  ;;  %v3266_v16 = vpop.f32.mrf.mxu0 }
0x2f7e   :  { %v7323_v47 = vpop.eup %7322 }
0x2f7f   :  { %v7325_v36 = vpop.eup %7324  ;;  %v3274_v6 = vadd.f32 1.0, %v7323_v47 }
0x2f80   :  { %3296 = vrot.lane.b32.xlu0 %v7325_v36, %s7767_s2 }
0x2f81   :  { %7326 = vrcp.f32 %v3274_v6 }
0x2f82   :  { %7328 = vpow2.f32 %v6543_v13 }
0x2f8e   :  { %v7327_v33 = vpop.eup %7326 }
0x2f8f   :  { %v3282_v53 = vmul.f32 %v7327_v33, %v7325_v36  ;;  %v7329_v27 = vpop.eup %7328  ;;  %v3294_v42 = vmul.f32 %v7327_v33, %v3211_v17  ;;  %v3319_v17 = vrot.slane %v9005_v1, 2 }
0x2f90   :  { %v3275_v30 = vadd.f32 1.0, %v7329_v27 }
0x2f91   :  { %3284 = vrot.lane.b32.xlu0 %v3282_v53, %s7768_s15 }
0x2f92   :  { %7330 = vrcp.f32 %v3275_v30 }
0x2f9f   :  { %v7331_v23 = vpop.eup %7330 }
0x2fa0   :  { %v3281_v51 = vmul.f32 %v7331_v23, %v3194_v39 }
0x2ff2   :  { %v3297_v38 = vpop.permute.xlu0 %3296 }
0x2ff3   :  { %v3299_v46 = vmul.f32 %v7327_v33, %v3297_v38 }
0x2ff5   :  { %3301 = vrot.lane.b32.xlu1 %v3299_v46, %s7768_s15 }
0x3003   :  { %v3285_v4 = vpop.permute.xlu0 %3284 }
0x3004   :  { %v3287_v40 = vadd.f32 %v3285_v4, %v3281_v51 }
0x3006   :  { %7332 = vtanh.f32 %v3287_v40 }
0x3013   :  { %v7333_v15 = vpop.eup %7332 }
0x3014   :  { %3290 = vrot.lane.b32.xlu0 %v7333_v15, %s7768_s15 }
0x3067   :  { %v3302_v56 = vpop.permute.xlu1 %3301 }
0x3068   :  { %v3304_v10 = vadd.f32 %v3302_v56, %v3294_v42  ;;  %v9043_v42 = vld [vmem:[%s9560_s8 + $0x30] ss:$8 sps:$4 sm:$0xff]   ;;  %v9050_v56 = vld [vmem:[%s9560_s8 + $0x24] ss:$8 sps:$4 sm:$0xff]  }
0x306a   :  { %7334 = vtanh.f32 %v3304_v10 }
0x3077   :  { %v7335_v21 = vpop.eup %7334 }
0x3078   :  { %3307 = vrot.lane.b32.xlu1 %v7335_v21, %s7768_s15  ;;  %v9062_v21 = vld [vmem:[%s9560_s8 + $0x14] ss:$8 sps:$4 sm:$0xff]  }
0x3086   :  { %v3291_v5 = vpop.permute.xlu0 %3290 }
0x3087   :  { %v3293_v52 = vmul.f32 %v7331_v23, %v3291_v5 }
0x30ea   :  { %v3308_v8 = vpop.permute.xlu1 %3307 }
0x30eb   :  { %v3310_v32 = vmul.f32 %v7327_v33, %v3308_v8  ;;  %v9071_v8 = vld [vmem:[%s9560_s8 + $0x34] ss:$8 sps:$4 sm:$0xff]  }
0x30ed   :  { %3312 = vrot.lane.b32.xlu1 %v3310_v32, %s7767_s2  ;;  %v3416_v32 = vrot.slane %v9005_v1, 4 }
0x315f   :  { %v3313_v39 = vpop.permute.xlu1 %3312 }
0x3160   :  { %v3315_v29 = vsel %vm1726_vm11, %v3313_v39, %v3293_v52  ;;  %v3417_v39 = vrot.slane %v9009_v37, 4 }
0x3161   :  { %v3316_v58 = vpack.c.bf16 %v3315_v29, %v3315_v29 }
0x3163   :  { %6544 = vmatmul.mubr.msk.bf16.vlgmr.msra.gmra.mxu1 %vm764_vm8, %v3316_v58 }
0x3164   :  { %3529 = vmatpush1.bf16.msra.mxu1 %v8816_v35  ;;  %3552 = vmatprep.mubr.bf16.mxu1 %v7766_v55 }
0x3165   :  { %3530 = vmatprep.subr.bf16.mxu1 %v8823_v49 }
0x3168   :  { %3531 = vmatpush1.bf16.msra.mxu1 %v8829_v2 }
0x3169   :  { %3532 = vmatprep.subr.bf16.mxu1 %v8835_v54 }
0x316c   :  { %3533 = vmatpush1.bf16.msra.mxu1 %v8865_v7 }
0x316d   :  { %3534 = vmatprep.subr.bf16.mxu1 %v8871_v44 }
0x3170   :  { %3535 = vmatpush1.bf16.msra.mxu1 %v8877_v25 }
0x3171   :  { %3720 = vmatprep.subr.bf16.mxu1 %v8844_v57 }
0x3223   :  { %v3360_v59 = vpop.f32.mrf.mxu1 }
0x3224   :  { %v3361_v35 = vadd.f32 %v3360_v59, %v3319_v17 }
0x3225   :  { %v3362_v60 = vpop.f32.mrf.mxu1 }
0x3226   :  { %v6545_v49 = vmul.f32 -1.442695, %v3361_v35  ;;  %v3363_v3 = vadd.f32 %v3362_v60, %v3320_v62 }
0x3227   :  { %v3364_v2 = vpop.f32.mrf.mxu1 }
0x3228   :  { %7336 = vpow2.f32 %v6545_v49  ;;  %v6546_v63 = vmul.f32 -1.442695, %v3363_v3 }
0x3229   :  { %7338 = vtanh.f32 %v3363_v3  ;;  %v3365_v54 = vpop.f32.mrf.mxu1 }
0x3235   :  { %v7337_v20 = vpop.eup %7336 }
0x3236   :  { %v7339_v9 = vpop.eup %7338  ;;  %v3373_v0 = vadd.f32 1.0, %v7337_v20 }
0x3237   :  { %3395 = vrot.lane.b32.xlu0 %v7339_v9, %s7767_s2 }
0x3238   :  { %7340 = vrcp.f32 %v3373_v0 }
0x3239   :  { %7342 = vpow2.f32 %v6546_v63 }
0x3245   :  { %v7341_v57 = vpop.eup %7340 }
0x3246   :  { %v3381_v48 = vmul.f32 %v7341_v57, %v7339_v9  ;;  %v7343_v14 = vpop.eup %7342  ;;  %v3393_v53 = vmul.f32 %v7341_v57, %v3304_v10  ;;  %v9056_v10 = vld [vmem:[%s9560_s8 + $0x20] ss:$8 sps:$4 sm:$0xff]  }
0x3247   :  { %v3374_v50 = vadd.f32 1.0, %v7343_v14 }
0x3248   :  { %3383 = vrot.lane.b32.xlu0 %v3381_v48, %s7768_s15 }
0x3249   :  { %7344 = vrcp.f32 %v3374_v50 }
0x3256   :  { %v7345_v16 = vpop.eup %7344 }
0x3257   :  { %v3380_v47 = vmul.f32 %v7345_v16, %v3287_v40 }
0x32a9   :  { %v3396_v34 = vpop.permute.xlu0 %3395 }
0x32aa   :  { %v3398_v43 = vmul.f32 %v7341_v57, %v3396_v34 }
0x32ac   :  { %3400 = vrot.lane.b32.xlu1 %v3398_v43, %s7768_s15 }
0x32ba   :  { %v3384_v36 = vpop.permute.xlu0 %3383 }
0x32bb   :  { %v3386_v6 = vadd.f32 %v3384_v36, %v3380_v47 }
0x32bd   :  { %7346 = vtanh.f32 %v3386_v6 }
0x32ca   :  { %v7347_v33 = vpop.eup %7346 }
0x32cb   :  { %3389 = vrot.lane.b32.xlu0 %v7347_v33, %s7768_s15 }
0x331e   :  { %v3401_v13 = vpop.permute.xlu1 %3400 }
0x331f   :  { %v3403_v27 = vadd.f32 %v3401_v13, %v3393_v53 }
0x3321   :  { %7348 = vtanh.f32 %v3403_v27 }
0x332e   :  { %v7349_v30 = vpop.eup %7348 }
0x332f   :  { %3406 = vrot.lane.b32.xlu1 %v7349_v30, %s7768_s15  ;;  %v9098_v30 = vld [vmem:[%s9560_s8 + $0x4] ss:$8 sps:$4 sm:$0xff]  }
0x333d   :  { %v3390_v23 = vpop.permute.xlu0 %3389 }
0x333e   :  { %v3392_v51 = vmul.f32 %v7345_v16, %v3390_v23 }
0x33a1   :  { %v3407_v38 = vpop.permute.xlu1 %3406 }
0x33a2   :  { %v3409_v46 = vmul.f32 %v7341_v57, %v3407_v38  ;;  %v9104_v38 = vld [vmem:[%s9560_s8] ss:$8 sps:$4 sm:$0xff]  }
0x33a4   :  { %3411 = vrot.lane.b32.xlu1 %v3409_v46, %s7767_s2  ;;  %v3513_v46 = vrot.slane %v9005_v1, 6 }
0x3416   :  { %v3412_v4 = vpop.permute.xlu1 %3411 }
0x3417   :  { %v3414_v40 = vsel %vm1726_vm11, %v3412_v4, %v3392_v51  ;;  %v3514_v4 = vrot.slane %v9009_v37, 6 }
0x3418   :  { %v3415_v15 = vpack.c.bf16 %v3414_v40, %v3414_v40 }
0x341a   :  { %6547 = vmatmul.mubr.msk.bf16.vlgmr.msra.gmra.mxu0 %vm764_vm8, %v3415_v15 }
0x341b   :  { %3622 = vmatpush1.bf16.msra.mxu0 %v9043_v42  ;;  %3645 = vmatprep.mubr.bf16.mxu0 %v7766_v55 }
0x341c   :  { %3623 = vmatprep.subr.bf16.mxu0 %v9050_v56 }
0x341f   :  { %3624 = vmatpush1.bf16.msra.mxu0 %v9056_v10 }
0x3420   :  { %3625 = vmatprep.subr.bf16.mxu0 %v9062_v21 }
0x3423   :  { %3626 = vmatpush1.bf16.msra.mxu0 %v8865_v7 }
0x3424   :  { %3627 = vmatprep.subr.bf16.mxu0 %v8871_v44 }
0x3427   :  { %3628 = vmatpush1.bf16.msra.mxu0 %v8877_v25 }
0x3428   :  { %3817 = vmatprep.subr.bf16.mxu0 %v9071_v8 }
0x34da   :  { %v3457_v5 = vpop.f32.mrf.mxu0 }
0x34db   :  { %v3458_v52 = vadd.f32 %v3457_v5, %v3416_v32 }
0x34dc   :  { %v3459_v29 = vpop.f32.mrf.mxu0 }
0x34dd   :  { %v6548_v58 = vmul.f32 -1.442695, %v3458_v52  ;;  %v3460_v7 = vadd.f32 %v3459_v29, %v3417_v39 }
0x34de   :  { %v3461_v17 = vpop.f32.mrf.mxu0 }
0x34df   :  { %7350 = vpow2.f32 %v6548_v58  ;;  %v6549_v49 = vmul.f32 -1.442695, %v3460_v7 }
0x34e0   :  { %7352 = vtanh.f32 %v3460_v7  ;;  %v3462_v44 = vpop.f32.mrf.mxu0 }
0x34ec   :  { %v7351_v25 = vpop.eup %7350 }
0x34ed   :  { %v7353_v59 = vpop.eup %7352  ;;  %v3470_v35 = vadd.f32 1.0, %v7351_v25 }
0x34ee   :  { %3492 = vrot.lane.b32.xlu0 %v7353_v59, %s7767_s2 }
0x34ef   :  { %7354 = vrcp.f32 %v3470_v35 }
0x34f0   :  { %7356 = vpow2.f32 %v6549_v49 }
0x34fc   :  { %v7355_v62 = vpop.eup %7354 }
0x34fd   :  { %v3478_v60 = vmul.f32 %v7355_v62, %v7353_v59  ;;  %v7357_v3 = vpop.eup %7356  ;;  %v3490_v14 = vmul.f32 %v7355_v62, %v3403_v27  ;;  %v9092_v27 = vld [vmem:[%s9560_s8 + $0x10] ss:$8 sps:$4 sm:$0xff]  }
0x34fe   :  { %v3471_v2 = vadd.f32 1.0, %v7357_v3 }
0x34ff   :  { %3480 = vrot.lane.b32.xlu0 %v3478_v60, %s7768_s15 }
0x3500   :  { %7358 = vrcp.f32 %v3471_v2 }
0x350d   :  { %v7359_v9 = vpop.eup %7358 }
0x350e   :  { %v3477_v0 = vmul.f32 %v7359_v9, %v3386_v6 }
0x3560   :  { %v3493_v54 = vpop.permute.xlu0 %3492 }
0x3561   :  { %v3495_v20 = vmul.f32 %v7355_v62, %v3493_v54 }
0x3563   :  { %3497 = vrot.lane.b32.xlu1 %v3495_v20, %s7768_s15 }
0x3571   :  { %v3481_v57 = vpop.permute.xlu0 %3480 }
0x3572   :  { %v3483_v48 = vadd.f32 %v3481_v57, %v3477_v0 }
0x3574   :  { %7360 = vtanh.f32 %v3483_v48 }
0x3581   :  { %v7361_v63 = vpop.eup %7360 }
0x3582   :  { %3486 = vrot.lane.b32.xlu0 %v7361_v63, %s7768_s15 }
0x35d5   :  { %v3498_v50 = vpop.permute.xlu1 %3497 }
0x35d6   :  { %v3500_v34 = vadd.f32 %v3498_v50, %v3490_v14 }
0x35d8   :  { %7362 = vtanh.f32 %v3500_v34 }
0x35e5   :  { %v7363_v43 = vpop.eup %7362 }
0x35e6   :  { %3503 = vrot.lane.b32.xlu1 %v7363_v43, %s7768_s15 }
0x35f4   :  { %v3487_v36 = vpop.permute.xlu0 %3486 }
0x35f5   :  { %v3489_v33 = vmul.f32 %v7359_v9, %v3487_v36 }
0x3658   :  { %v3504_v16 = vpop.permute.xlu1 %3503 }
0x3659   :  { %v3506_v47 = vmul.f32 %v7355_v62, %v3504_v16 }
0x365b   :  { %3508 = vrot.lane.b32.xlu1 %v3506_v47, %s7767_s2  ;;  %v9133_v47 = vadd.f32 %v8644_v24, %v8541_v12 }
0x36cd   :  { %v3509_v6 = vpop.permute.xlu1 %3508 }
0x36ce   :  { %v3511_v53 = vsel %vm1726_vm11, %v3509_v6, %v3489_v33 }
0x36cf   :  { %v3512_v13 = vpack.c.bf16 %v3511_v53, %v3511_v53 }
0x36d1   :  { %6550 = vmatmul.mubr.msk.bf16.vlgmr.msra.gmra.mxu1 %vm764_vm8, %v3512_v13 }
0x36d2   :  { %3721 = vmatpush1.bf16.msra.mxu1 %v9043_v42  ;;  %3744 = vmatprep.mubr.bf16.mxu1 %v7766_v55 }
0x36d3   :  { %3722 = vmatprep.subr.bf16.mxu1 %v9050_v56 }
0x36d6   :  { %3723 = vmatpush1.bf16.msra.mxu1 %v9056_v10 }
0x36d7   :  { %3724 = vmatprep.subr.bf16.mxu1 %v9062_v21 }
0x36da   :  { %3725 = vmatpush1.bf16.msra.mxu1 %v9092_v27 }
0x36db   :  { %3726 = vmatprep.subr.bf16.mxu1 %v9098_v30 }
0x36de   :  { %3727 = vmatpush1.bf16.msra.mxu1 %v9104_v38 }
0x36df   :  { %3914 = vmatprep.subr.bf16.mxu1 %v9071_v8 }
0x3791   :  { %v3554_v23 = vpop.f32.mrf.mxu1 }
0x3792   :  { %v3555_v51 = vadd.f32 %v3554_v23, %v3513_v46 }
0x3793   :  { %v3556_v40 = vpop.f32.mrf.mxu1 }
0x3794   :  { %v6551_v15 = vmul.f32 -1.442695, %v3555_v51  ;;  %v3557_v32 = vadd.f32 %v3556_v40, %v3514_v4 }
0x3795   :  { %v3558_v5 = vpop.f32.mrf.mxu1 }
0x3796   :  { %7364 = vpow2.f32 %v6551_v15  ;;  %v6552_v1 = vmul.f32 -1.442695, %v3557_v32 }
0x3797   :  { %7366 = vtanh.f32 %v3557_v32  ;;  %v3559_v52 = vpop.f32.mrf.mxu1 }
0x37a3   :  { %v7365_v39 = vpop.eup %7364 }
0x37a4   :  { %v7367_v29 = vpop.eup %7366  ;;  %v3567_v58 = vadd.f32 1.0, %v7365_v39 }
0x37a5   :  { %3589 = vrot.lane.b32.xlu0 %v7367_v29, %s7767_s2 }
0x37a6   :  { %7368 = vrcp.f32 %v3567_v58 }
0x37a7   :  { %7370 = vpow2.f32 %v6552_v1 }
0x37b3   :  { %v7369_v7 = vpop.eup %7368 }
0x37b4   :  { %v3575_v17 = vmul.f32 %v7369_v7, %v7367_v29  ;;  %v7371_v37 = vpop.eup %7370  ;;  %v3587_v2 = vmul.f32 %v7369_v7, %v3500_v34  ;;  %v9129_v34 = vadd.f32 %v8642_v22, %v8548_v19 }
0x37b5   :  { %v3568_v44 = vadd.f32 1.0, %v7371_v37 }
0x37b6   :  { %3577 = vrot.lane.b32.xlu0 %v3575_v17, %s7768_s15 }
0x37b7   :  { %7372 = vrcp.f32 %v3568_v44 }
0x37c4   :  { %v7373_v35 = vpop.eup %7372 }
0x37c5   :  { %v3574_v62 = vmul.f32 %v7373_v35, %v3483_v48 }
0x3817   :  { %v3590_v25 = vpop.permute.xlu0 %3589 }
0x3818   :  { %v3592_v59 = vmul.f32 %v7369_v7, %v3590_v25 }
0x381a   :  { %3594 = vrot.lane.b32.xlu1 %v3592_v59, %s7768_s15 }
0x3828   :  { %v3578_v60 = vpop.permute.xlu0 %3577 }
0x3829   :  { %v3580_v49 = vadd.f32 %v3578_v60, %v3574_v62 }
0x382b   :  { %7374 = vtanh.f32 %v3580_v49 }
0x3838   :  { %v7375_v3 = vpop.eup %7374 }
0x3839   :  { %3583 = vrot.lane.b32.xlu0 %v7375_v3, %s7768_s15 }
0x388c   :  { %v3595_v54 = vpop.permute.xlu1 %3594 }
0x388d   :  { %v3597_v20 = vadd.f32 %v3595_v54, %v3587_v2  ;;  %v3705_v54 = vrot.slane %v9129_v34, 2 }
0x388f   :  { %7376 = vtanh.f32 %v3597_v20 }
0x389c   :  { %v7377_v9 = vpop.eup %7376 }
0x389d   :  { %3600 = vrot.lane.b32.xlu1 %v7377_v9, %s7768_s15 }
0x38ab   :  { %v3584_v63 = vpop.permute.xlu0 %3583 }
0x38ac   :  { %v3586_v14 = vmul.f32 %v7373_v35, %v3584_v63 }
0x390f   :  { %v3601_v0 = vpop.permute.xlu1 %3600 }
0x3910   :  { %v3603_v57 = vmul.f32 %v7369_v7, %v3601_v0  ;;  %v3706_v0 = vrot.slane %v9133_v47, 2 }
0x3912   :  { %3605 = vrot.lane.b32.xlu1 %v3603_v57, %s7767_s2 }
0x3984   :  { %v3606_v48 = vpop.permute.xlu1 %3605 }
0x3985   :  { %v3608_v50 = vsel %vm1726_vm11, %v3606_v48, %v3586_v14 }
0x3986   :  { %v3609_v43 = vpack.c.bf16 %v3608_v50, %v3608_v50 }
0x3988   :  { %6553 = vmatmul.mubr.msk.bf16.vlgmr.msra.gmra.mxu0 %vm764_vm8, %v3609_v43 }
0x3989   :  { %3818 = vmatpush1.bf16.msra.mxu0 %v9043_v42  ;;  %3841 = vmatprep.mubr.bf16.mxu0 %v7766_v55 }
0x398a   :  { %3819 = vmatprep.subr.bf16.mxu0 %v9050_v56 }
0x398d   :  { %3820 = vmatpush1.bf16.msra.mxu0 %v9056_v10 }
0x398e   :  { %3821 = vmatprep.subr.bf16.mxu0 %v9062_v21 }
0x3991   :  { %3822 = vmatpush1.bf16.msra.mxu0 %v9092_v27 }
0x3992   :  { %3823 = vmatprep.subr.bf16.mxu0 %v9098_v30 }
0x3995   :  { %3824 = vmatpush1.bf16.msra.mxu0 %v9104_v38 }
0x3996   :  { %4007 = vmatprep.subr.bf16.mxu0 %v9071_v8 }
0x3a48   :  { %v3647_v16 = vpop.f32.mrf.mxu0 }
0x3a49   :  { %v3648_v36 = vadd.f32 %v3647_v16, %v9129_v34 }
0x3a4a   :  { %v3649_v33 = vpop.f32.mrf.mxu0 }
0x3a4b   :  { %v6554_v6 = vmul.f32 -1.442695, %v3648_v36  ;;  %v3650_v53 = vadd.f32 %v3649_v33, %v9133_v47 }
0x3a4c   :  { %v3651_v13 = vpop.f32.mrf.mxu0 }
0x3a4d   :  { %7378 = vpow2.f32 %v6554_v6  ;;  %v6555_v24 = vmul.f32 -1.442695, %v3650_v53 }
0x3a4e   :  { %7380 = vtanh.f32 %v3650_v53  ;;  %v3652_v46 = vpop.f32.mrf.mxu0 }
0x3a5a   :  { %v7379_v23 = vpop.eup %7378 }
0x3a5b   :  { %v7381_v51 = vpop.eup %7380  ;;  %v3660_v4 = vadd.f32 1.0, %v7379_v23 }
0x3a5c   :  { %3682 = vrot.lane.b32.xlu0 %v7381_v51, %s7767_s2 }
0x3a5d   :  { %7382 = vrcp.f32 %v3660_v4 }
0x3a5e   :  { %7384 = vpow2.f32 %v6555_v24 }
0x3a6a   :  { %v7383_v22 = vpop.eup %7382 }
0x3a6b   :  { %v3668_v40 = vmul.f32 %v7383_v22, %v7381_v51  ;;  %v7385_v15 = vpop.eup %7384  ;;  %v3680_v1 = vmul.f32 %v7383_v22, %v3597_v20 }
0x3a6c   :  { %v3661_v32 = vadd.f32 1.0, %v7385_v15 }
0x3a6d   :  { %3670 = vrot.lane.b32.xlu0 %v3668_v40, %s7768_s15 }
0x3a6e   :  { %7386 = vrcp.f32 %v3661_v32 }
0x3a7b   :  { %v7387_v39 = vpop.eup %7386 }
0x3a7c   :  { %v3667_v29 = vmul.f32 %v7387_v39, %v3580_v49 }
0x3ace   :  { %v3683_v5 = vpop.permute.xlu0 %3682 }
0x3acf   :  { %v3685_v52 = vmul.f32 %v7383_v22, %v3683_v5 }
0x3ad1   :  { %3687 = vrot.lane.b32.xlu1 %v3685_v52, %s7768_s15 }
0x3adf   :  { %v3671_v58 = vpop.permute.xlu0 %3670 }
0x3ae0   :  { %v3673_v7 = vadd.f32 %v3671_v58, %v3667_v29 }
0x3ae2   :  { %7388 = vtanh.f32 %v3673_v7 }
0x3aef   :  { %v7389_v17 = vpop.eup %7388 }
0x3af0   :  { %3676 = vrot.lane.b32.xlu0 %v7389_v17, %s7768_s15 }
0x3b43   :  { %v3688_v37 = vpop.permute.xlu1 %3687 }
0x3b44   :  { %v3690_v44 = vadd.f32 %v3688_v37, %v3680_v1 }
0x3b46   :  { %7390 = vtanh.f32 %v3690_v44 }
0x3b53   :  { %v7391_v25 = vpop.eup %7390 }
0x3b54   :  { %3693 = vrot.lane.b32.xlu1 %v7391_v25, %s7768_s15 }
0x3b62   :  { %v3677_v62 = vpop.permute.xlu0 %3676 }
0x3b63   :  { %v3679_v60 = vmul.f32 %v7387_v39, %v3677_v62  ;;  %v3803_v62 = vrot.slane %v9133_v47, 4 }
0x3bc6   :  { %v3694_v59 = vpop.permute.xlu1 %3693 }
0x3bc7   :  { %v3696_v35 = vmul.f32 %v7383_v22, %v3694_v59 }
0x3bc9   :  { %3698 = vrot.lane.b32.xlu1 %v3696_v35, %s7767_s2 }
0x3c3b   :  { %v3699_v49 = vpop.permute.xlu1 %3698 }
0x3c3c   :  { %v3701_v3 = vsel %vm1726_vm11, %v3699_v49, %v3679_v60 }
0x3c3d   :  { %v3702_v2 = vpack.c.bf16 %v3701_v3, %v3701_v3 }
0x3c3f   :  { %6556 = vmatmul.mubr.msk.bf16.vlgmr.msra.gmra.mxu1 %vm764_vm8, %v3702_v2 }
0x3c40   :  { %3915 = vmatpush1.bf16.msra.mxu1 %v9043_v42  ;;  %3938 = vmatprep.mubr.bf16.mxu1 %v7766_v55 }
0x3c41   :  { %3916 = vmatprep.subr.bf16.mxu1 %v9050_v56 }
0x3c44   :  { %3917 = vmatpush1.bf16.msra.mxu1 %v9056_v10 }
0x3c45   :  { %3918 = vmatprep.subr.bf16.mxu1 %v9062_v21 }
0x3c48   :  { %3919 = vmatpush1.bf16.msra.mxu1 %v9092_v27 }
0x3c49   :  { %3920 = vmatprep.subr.bf16.mxu1 %v9098_v30 }
0x3c4c   :  { %3921 = vmatpush1.bf16.msra.mxu1 %v9104_v38 }
0x3c4d   :  { %4106 = vmatprep.subr.bf16.mxu1 %v9071_v8 }
0x3cff   :  { %v3746_v20 = vpop.f32.mrf.mxu1 }
0x3d00   :  { %v3747_v9 = vadd.f32 %v3746_v20, %v3705_v54 }
0x3d01   :  { %v3748_v57 = vpop.f32.mrf.mxu1 }
0x3d02   :  { %v6557_v63 = vmul.f32 -1.442695, %v3747_v9  ;;  %v3749_v14 = vadd.f32 %v3748_v57, %v3706_v0 }
0x3d03   :  { %v3750_v48 = vpop.f32.mrf.mxu1 }
0x3d04   :  { %7392 = vpow2.f32 %v6557_v63  ;;  %v6558_v53 = vmul.f32 -1.442695, %v3749_v14 }
0x3d05   :  { %7394 = vtanh.f32 %v3749_v14  ;;  %v3751_v50 = vpop.f32.mrf.mxu1 }
0x3d11   :  { %v7393_v43 = vpop.eup %7392 }
0x3d12   :  { %v7395_v16 = vpop.eup %7394  ;;  %v3759_v36 = vadd.f32 1.0, %v7393_v43 }
0x3d13   :  { %3781 = vrot.lane.b32.xlu0 %v7395_v16, %s7767_s2 }
0x3d14   :  { %7396 = vrcp.f32 %v3759_v36 }
0x3d15   :  { %7398 = vpow2.f32 %v6558_v53 }
0x3d21   :  { %v7397_v33 = vpop.eup %7396 }
0x3d22   :  { %v3767_v6 = vmul.f32 %v7397_v33, %v7395_v16  ;;  %v7399_v13 = vpop.eup %7398  ;;  %v3779_v32 = vmul.f32 %v7397_v33, %v3690_v44  ;;  %v3802_v44 = vrot.slane %v9129_v34, 4 }
0x3d23   :  { %v3760_v46 = vadd.f32 1.0, %v7399_v13 }
0x3d24   :  { %3769 = vrot.lane.b32.xlu0 %v3767_v6, %s7768_s15 }
0x3d25   :  { %7400 = vrcp.f32 %v3760_v46 }
0x3d32   :  { %v7401_v4 = vpop.eup %7400 }
0x3d33   :  { %v3766_v22 = vmul.f32 %v7401_v4, %v3673_v7 }
0x3d85   :  { %v3782_v23 = vpop.permute.xlu0 %3781 }
0x3d86   :  { %v3784_v51 = vmul.f32 %v7397_v33, %v3782_v23 }
0x3d88   :  { %3786 = vrot.lane.b32.xlu1 %v3784_v51, %s7768_s15 }
0x3d96   :  { %v3770_v40 = vpop.permute.xlu0 %3769 }
0x3d97   :  { %v3772_v24 = vadd.f32 %v3770_v40, %v3766_v22 }
0x3d99   :  { %7402 = vtanh.f32 %v3772_v24 }
0x3da6   :  { %v7403_v15 = vpop.eup %7402 }
0x3da7   :  { %3775 = vrot.lane.b32.xlu0 %v7403_v15, %s7768_s15 }
0x3dfa   :  { %v3787_v5 = vpop.permute.xlu1 %3786 }
0x3dfb   :  { %v3789_v52 = vadd.f32 %v3787_v5, %v3779_v32 }
0x3dfd   :  { %7404 = vtanh.f32 %v3789_v52 }
0x3e0a   :  { %v7405_v39 = vpop.eup %7404 }
0x3e0b   :  { %3792 = vrot.lane.b32.xlu1 %v7405_v39, %s7768_s15 }
0x3e19   :  { %v3776_v17 = vpop.permute.xlu0 %3775 }
0x3e1a   :  { %v3778_v1 = vmul.f32 %v7401_v4, %v3776_v17  ;;  %v3900_v17 = vrot.slane %v9133_v47, 6 }
0x3e7d   :  { %v3793_v29 = vpop.permute.xlu1 %3792 }
0x3e7e   :  { %v3795_v58 = vmul.f32 %v7397_v33, %v3793_v29 }
0x3e80   :  { %3797 = vrot.lane.b32.xlu1 %v3795_v58, %s7767_s2 }
0x3ef2   :  { %v3798_v7 = vpop.permute.xlu1 %3797 }
0x3ef3   :  { %v3800_v37 = vsel %vm1726_vm11, %v3798_v7, %v3778_v1 }
0x3ef4   :  { %v3801_v25 = vpack.c.bf16 %v3800_v37, %v3800_v37 }
0x3ef6   :  { %6559 = vmatmul.mubr.msk.bf16.vlgmr.msra.gmra.mxu0 %vm764_vm8, %v3801_v25 }
0x3ef7   :  { %4008 = vmatpush1.bf16.msra.mxu0 %v9043_v42  ;;  %4031 = vmatprep.mubr.bf16.mxu0 %v7766_v55 }
0x3ef8   :  { %4009 = vmatprep.subr.bf16.mxu0 %v9050_v56 }
0x3efb   :  { %4010 = vmatpush1.bf16.msra.mxu0 %v9056_v10 }
0x3efc   :  { %4011 = vmatprep.subr.bf16.mxu0 %v9062_v21 }
0x3eff   :  { %4012 = vmatpush1.bf16.msra.mxu0 %v9092_v27 }
0x3f00   :  { %4013 = vmatprep.subr.bf16.mxu0 %v9098_v30 }
0x3f03   :  { %4014 = vmatpush1.bf16.msra.mxu0 %v9104_v38 }
0x3f04   :  { %4203 = vmatprep.subr.bf16.mxu0 %v9071_v8 }
0x3fb6   :  { %v3843_v59 = vpop.f32.mrf.mxu0 }
0x3fb7   :  { %v3844_v35 = vadd.f32 %v3843_v59, %v3802_v44 }
0x3fb8   :  { %v3845_v60 = vpop.f32.mrf.mxu0 }
0x3fb9   :  { %v6560_v49 = vmul.f32 -1.442695, %v3844_v35  ;;  %v3846_v3 = vadd.f32 %v3845_v60, %v3803_v62 }
0x3fba   :  { %v3847_v2 = vpop.f32.mrf.mxu0 }
0x3fbb   :  { %7406 = vpow2.f32 %v6560_v49  ;;  %v6561_v14 = vmul.f32 -1.442695, %v3846_v3 }
0x3fbc   :  { %7408 = vtanh.f32 %v3846_v3  ;;  %v3848_v54 = vpop.f32.mrf.mxu0 }
0x3fc8   :  { %v7407_v20 = vpop.eup %7406 }
0x3fc9   :  { %v7409_v9 = vpop.eup %7408  ;;  %v3856_v0 = vadd.f32 1.0, %v7407_v20 }
0x3fca   :  { %3878 = vrot.lane.b32.xlu0 %v7409_v9, %s7767_s2 }
0x3fcb   :  { %7410 = vrcp.f32 %v3856_v0 }
0x3fcc   :  { %7412 = vpow2.f32 %v6561_v14 }
0x3fd8   :  { %v7411_v57 = vpop.eup %7410 }
0x3fd9   :  { %v3864_v63 = vmul.f32 %v7411_v57, %v7409_v9  ;;  %v7413_v48 = vpop.eup %7412  ;;  %v3876_v46 = vmul.f32 %v7411_v57, %v3789_v52  ;;  %v3899_v52 = vrot.slane %v9129_v34, 6 }
0x3fda   :  { %v3857_v50 = vadd.f32 1.0, %v7413_v48 }
0x3fdb   :  { %3866 = vrot.lane.b32.xlu0 %v3864_v63, %s7768_s15 }
0x3fdc   :  { %7414 = vrcp.f32 %v3857_v50 }
0x3fe9   :  { %v7415_v36 = vpop.eup %7414 }
0x3fea   :  { %v3863_v33 = vmul.f32 %v7415_v36, %v3772_v24 }
0x403c   :  { %v3879_v43 = vpop.permute.xlu0 %3878 }
0x403d   :  { %v3881_v16 = vmul.f32 %v7411_v57, %v3879_v43 }
0x403f   :  { %3883 = vrot.lane.b32.xlu1 %v3881_v16, %s7768_s15 }
0x404d   :  { %v3867_v6 = vpop.permute.xlu0 %3866 }
0x404e   :  { %v3869_v53 = vadd.f32 %v3867_v6, %v3863_v33 }
0x4050   :  { %7416 = vtanh.f32 %v3869_v53 }
0x405d   :  { %v7417_v13 = vpop.eup %7416 }
0x405e   :  { %3872 = vrot.lane.b32.xlu0 %v7417_v13, %s7768_s15 }
0x40b1   :  { %v3884_v23 = vpop.permute.xlu1 %3883 }
0x40b2   :  { %v3886_v51 = vadd.f32 %v3884_v23, %v3876_v46  ;;  %v9213_v23 = vadd.f32 %v8646_v45, %v8548_v19 }
0x40b4   :  { %7418 = vtanh.f32 %v3886_v51 }
0x40c1   :  { %v7419_v4 = vpop.eup %7418 }
0x40c2   :  { %3889 = vrot.lane.b32.xlu1 %v7419_v4, %s7768_s15  ;;  %v9217_v4 = vadd.f32 %v8648_v26, %v8541_v12 }
0x40d0   :  { %v3873_v15 = vpop.permute.xlu0 %3872 }
0x40d1   :  { %v3875_v32 = vmul.f32 %v7415_v36, %v3873_v15 }
0x4134   :  { %v3890_v22 = vpop.permute.xlu1 %3889 }
0x4135   :  { %v3892_v40 = vmul.f32 %v7411_v57, %v3890_v22 }
0x4137   :  { %3894 = vrot.lane.b32.xlu1 %v3892_v40, %s7767_s2 }
0x41a9   :  { %v3895_v24 = vpop.permute.xlu1 %3894 }
0x41aa   :  { %v3897_v5 = vsel %vm1726_vm11, %v3895_v24, %v3875_v32 }
0x41ab   :  { %v3898_v39 = vpack.c.bf16 %v3897_v5, %v3897_v5 }
0x41ad   :  { %6562 = vmatmul.mubr.msk.bf16.vlgmr.msra.gmra.mxu1 %vm764_vm8, %v3898_v39 }
0x41ae   :  { %4107 = vmatpush1.bf16.msra.mxu1 %v9043_v42  ;;  %4130 = vmatprep.mubr.bf16.mxu1 %v7766_v55 }
0x41af   :  { %4108 = vmatprep.subr.bf16.mxu1 %v9050_v56 }
0x41b2   :  { %4109 = vmatpush1.bf16.msra.mxu1 %v9056_v10 }
0x41b3   :  { %4110 = vmatprep.subr.bf16.mxu1 %v9062_v21 }
0x41b6   :  { %4111 = vmatpush1.bf16.msra.mxu1 %v9092_v27 }
0x41b7   :  { %4112 = vmatprep.subr.bf16.mxu1 %v9098_v30 }
0x41ba   :  { %4113 = vmatpush1.bf16.msra.mxu1 %v9104_v38 }
0x41bb   :  { %4300 = vmatprep.subr.bf16.mxu1 %v9071_v8 }
0x426d   :  { %v3940_v29 = vpop.f32.mrf.mxu1 }
0x426e   :  { %v3941_v58 = vadd.f32 %v3940_v29, %v3899_v52 }
0x426f   :  { %v3942_v1 = vpop.f32.mrf.mxu1 }
0x4270   :  { %v6563_v7 = vmul.f32 -1.442695, %v3941_v58  ;;  %v3943_v37 = vadd.f32 %v3942_v1, %v3900_v17 }
0x4271   :  { %v3944_v25 = vpop.f32.mrf.mxu1 }
0x4272   :  { %7420 = vpow2.f32 %v6563_v7  ;;  %v6564_v34 = vmul.f32 -1.442695, %v3943_v37 }
0x4273   :  { %7422 = vtanh.f32 %v3943_v37  ;;  %v3945_v44 = vpop.f32.mrf.mxu1 }
0x427f   :  { %v7421_v59 = vpop.eup %7420 }
0x4280   :  { %v7423_v35 = vpop.eup %7422  ;;  %v3953_v62 = vadd.f32 1.0, %v7421_v59 }
0x4281   :  { %3975 = vrot.lane.b32.xlu0 %v7423_v35, %s7767_s2 }
0x4282   :  { %7424 = vrcp.f32 %v3953_v62 }
0x4283   :  { %7426 = vpow2.f32 %v6564_v34 }
0x428f   :  { %v7425_v60 = vpop.eup %7424 }
0x4290   :  { %v3961_v49 = vmul.f32 %v7425_v60, %v7423_v35  ;;  %v7427_v47 = vpop.eup %7426  ;;  %v3973_v14 = vmul.f32 %v7425_v60, %v3886_v51 }
0x4291   :  { %v3954_v3 = vadd.f32 1.0, %v7427_v47 }
0x4292   :  { %3963 = vrot.lane.b32.xlu0 %v3961_v49, %s7768_s15 }
0x4293   :  { %7428 = vrcp.f32 %v3954_v3 }
0x42a0   :  { %v7429_v20 = vpop.eup %7428 }
0x42a1   :  { %v3960_v9 = vmul.f32 %v7429_v20, %v3869_v53 }
0x42f3   :  { %v3976_v2 = vpop.permute.xlu0 %3975 }
0x42f4   :  { %v3978_v54 = vmul.f32 %v7425_v60, %v3976_v2 }
0x42f6   :  { %3980 = vrot.lane.b32.xlu1 %v3978_v54, %s7768_s15 }
0x4304   :  { %v3964_v0 = vpop.permute.xlu0 %3963 }
0x4305   :  { %v3966_v57 = vadd.f32 %v3964_v0, %v3960_v9 }
0x4307   :  { %7430 = vtanh.f32 %v3966_v57 }
0x4314   :  { %v7431_v63 = vpop.eup %7430 }
0x4315   :  { %3969 = vrot.lane.b32.xlu0 %v7431_v63, %s7768_s15  ;;  %v4091_v63 = vrot.slane %v9213_v23, 2 }
0x4368   :  { %v3981_v48 = vpop.permute.xlu1 %3980 }
0x4369   :  { %v3983_v50 = vadd.f32 %v3981_v48, %v3973_v14 }
0x436b   :  { %7432 = vtanh.f32 %v3983_v50 }
0x4378   :  { %v7433_v43 = vpop.eup %7432 }
0x4379   :  { %3986 = vrot.lane.b32.xlu1 %v7433_v43, %s7768_s15 }
0x4387   :  { %v3970_v33 = vpop.permute.xlu0 %3969 }
0x4388   :  { %v3972_v6 = vmul.f32 %v7429_v20, %v3970_v33 }
0x43eb   :  { %v3987_v16 = vpop.permute.xlu1 %3986 }
0x43ec   :  { %v3989_v36 = vmul.f32 %v7425_v60, %v3987_v16 }
0x43ee   :  { %3991 = vrot.lane.b32.xlu1 %v3989_v36, %s7767_s2 }
0x4460   :  { %v3992_v53 = vpop.permute.xlu1 %3991 }
0x4461   :  { %v3994_v13 = vsel %vm1726_vm11, %v3992_v53, %v3972_v6 }
0x4462   :  { %v3995_v46 = vpack.c.bf16 %v3994_v13, %v3994_v13 }
0x4464   :  { %6565 = vmatmul.mubr.msk.bf16.vlgmr.msra.gmra.mxu0 %vm764_vm8, %v3995_v46 }
0x4465   :  { %4204 = vmatpush1.bf16.msra.mxu0 %v9043_v42  ;;  %4227 = vmatprep.mubr.bf16.mxu0 %v7766_v55 }
0x4466   :  { %4205 = vmatprep.subr.bf16.mxu0 %v9050_v56 }
0x4469   :  { %4206 = vmatpush1.bf16.msra.mxu0 %v9056_v10 }
0x446a   :  { %4207 = vmatprep.subr.bf16.mxu0 %v9062_v21 }
0x446d   :  { %4208 = vmatpush1.bf16.msra.mxu0 %v9092_v27 }
0x446e   :  { %4209 = vmatprep.subr.bf16.mxu0 %v9098_v30 }
0x4471   :  { %4210 = vmatpush1.bf16.msra.mxu0 %v9104_v38 }
0x4472   :  { %4393 = vmatprep.subr.bf16.mxu0 %v9071_v8 }
0x4524   :  { %v4033_v51 = vpop.f32.mrf.mxu0 }
0x4525   :  { %v4034_v22 = vadd.f32 %v4033_v51, %v9213_v23 }
0x4526   :  { %v4035_v40 = vpop.f32.mrf.mxu0 }
0x4527   :  { %v6566_v15 = vmul.f32 -1.442695, %v4034_v22  ;;  %v4036_v32 = vadd.f32 %v4035_v40, %v9217_v4 }
0x4528   :  { %v4037_v24 = vpop.f32.mrf.mxu0 }
0x4529   :  { %7434 = vpow2.f32 %v6566_v15  ;;  %v6567_v26 = vmul.f32 -1.442695, %v4036_v32 }
0x452a   :  { %7436 = vtanh.f32 %v4036_v32  ;;  %v4038_v5 = vpop.f32.mrf.mxu0 }
0x4536   :  { %v7435_v39 = vpop.eup %7434 }
0x4537   :  { %v7437_v52 = vpop.eup %7436  ;;  %v4046_v29 = vadd.f32 1.0, %v7435_v39 }
0x4538   :  { %4068 = vrot.lane.b32.xlu0 %v7437_v52, %s7767_s2 }
0x4539   :  { %7438 = vrcp.f32 %v4046_v29 }
0x453a   :  { %7440 = vpow2.f32 %v6567_v26 }
0x4546   :  { %v7439_v45 = vpop.eup %7438 }
0x4547   :  { %v4054_v58 = vmul.f32 %v7439_v45, %v7437_v52  ;;  %v7441_v17 = vpop.eup %7440  ;;  %v4066_v60 = vmul.f32 %v7439_v45, %v3983_v50  ;;  %v4092_v50 = vrot.slane %v9217_v4, 2 }
0x4548   :  { %v4047_v1 = vadd.f32 1.0, %v7441_v17 }
0x4549   :  { %4056 = vrot.lane.b32.xlu0 %v4054_v58, %s7768_s15 }
0x454a   :  { %7442 = vrcp.f32 %v4047_v1 }
0x4557   :  { %v7443_v25 = vpop.eup %7442 }
0x4558   :  { %v4053_v44 = vmul.f32 %v7443_v25, %v3966_v57 }
0x45aa   :  { %v4069_v7 = vpop.permute.xlu0 %4068 }
0x45ab   :  { %v4071_v37 = vmul.f32 %v7439_v45, %v4069_v7 }
0x45ad   :  { %4073 = vrot.lane.b32.xlu1 %v4071_v37, %s7768_s15 }
0x45bb   :  { %v4057_v59 = vpop.permute.xlu0 %4056 }
0x45bc   :  { %v4059_v35 = vadd.f32 %v4057_v59, %v4053_v44 }
0x45be   :  { %7444 = vtanh.f32 %v4059_v35 }
0x45cb   :  { %v7445_v62 = vpop.eup %7444 }
0x45cc   :  { %4062 = vrot.lane.b32.xlu0 %v7445_v62, %s7768_s15 }
0x461f   :  { %v4074_v49 = vpop.permute.xlu1 %4073 }
0x4620   :  { %v4076_v34 = vadd.f32 %v4074_v49, %v4066_v60  ;;  %v4188_v49 = vrot.slane %v9213_v23, 4 }
0x4622   :  { %7446 = vtanh.f32 %v4076_v34 }
0x462f   :  { %v7447_v47 = vpop.eup %7446 }
0x4630   :  { %4079 = vrot.lane.b32.xlu1 %v7447_v47, %s7768_s15  ;;  %v4189_v47 = vrot.slane %v9217_v4, 4 }
0x463e   :  { %v4063_v54 = vpop.permute.xlu0 %4062 }
0x463f   :  { %v4065_v20 = vmul.f32 %v7443_v25, %v4063_v54 }
0x46a2   :  { %v4080_v3 = vpop.permute.xlu1 %4079 }
0x46a3   :  { %v4082_v2 = vmul.f32 %v7439_v45, %v4080_v3 }
0x46a5   :  { %4084 = vrot.lane.b32.xlu1 %v4082_v2, %s7767_s2 }
0x4717   :  { %v4085_v9 = vpop.permute.xlu1 %4084 }
0x4718   :  { %v4087_v0 = vsel %vm1726_vm11, %v4085_v9, %v4065_v20 }
0x4719   :  { %v4088_v57 = vpack.c.bf16 %v4087_v0, %v4087_v0 }
0x471b   :  { %6568 = vmatmul.mubr.msk.bf16.vlgmr.msra.gmra.mxu1 %vm764_vm8, %v4088_v57 }
0x471c   :  { %4301 = vmatpush1.bf16.msra.mxu1 %v9043_v42  ;;  %4324 = vmatprep.mubr.bf16.mxu1 %v7766_v55 }
0x471d   :  { %4302 = vmatprep.subr.bf16.mxu1 %v9050_v56 }
0x4720   :  { %4303 = vmatpush1.bf16.msra.mxu1 %v9056_v10 }
0x4721   :  { %4304 = vmatprep.subr.bf16.mxu1 %v9062_v21 }
0x4724   :  { %4305 = vmatpush1.bf16.msra.mxu1 %v9092_v27 }
0x4725   :  { %4306 = vmatprep.subr.bf16.mxu1 %v9098_v30 }
0x4728   :  { %4307 = vmatpush1.bf16.msra.mxu1 %v9104_v38 }
0x4729   :  { %4492 = vmatprep.subr.bf16.mxu1 %v9071_v8 }
0x47db   :  { %v4132_v14 = vpop.f32.mrf.mxu1 }
0x47dc   :  { %v4133_v48 = vadd.f32 %v4132_v14, %v4091_v63 }
0x47dd   :  { %v4134_v43 = vpop.f32.mrf.mxu1 }
0x47de   :  { %v6569_v16 = vmul.f32 -1.442695, %v4133_v48  ;;  %v4135_v36 = vadd.f32 %v4134_v43, %v4092_v50 }
0x47df   :  { %v4136_v33 = vpop.f32.mrf.mxu1 }
0x47e0   :  { %7448 = vpow2.f32 %v6569_v16  ;;  %v6570_v40 = vmul.f32 -1.442695, %v4135_v36 }
0x47e1   :  { %7450 = vtanh.f32 %v4135_v36  ;;  %v4137_v6 = vpop.f32.mrf.mxu1 }
0x47ed   :  { %v7449_v53 = vpop.eup %7448 }
0x47ee   :  { %v7451_v13 = vpop.eup %7450  ;;  %v4145_v46 = vadd.f32 1.0, %v7449_v53 }
0x47ef   :  { %4167 = vrot.lane.b32.xlu0 %v7451_v13, %s7767_s2 }
0x47f0   :  { %7452 = vrcp.f32 %v4145_v46 }
0x47f1   :  { %7454 = vpow2.f32 %v6570_v40 }
0x47fd   :  { %v7453_v51 = vpop.eup %7452 }
0x47fe   :  { %v4153_v22 = vmul.f32 %v7453_v51, %v7451_v13  ;;  %v7455_v15 = vpop.eup %7454  ;;  %v4165_v26 = vmul.f32 %v7453_v51, %v4076_v34 }
0x47ff   :  { %v4146_v32 = vadd.f32 1.0, %v7455_v15 }
0x4800   :  { %4155 = vrot.lane.b32.xlu0 %v4153_v22, %s7768_s15 }
0x4801   :  { %7456 = vrcp.f32 %v4146_v32 }
0x480e   :  { %v7457_v39 = vpop.eup %7456 }
0x480f   :  { %v4152_v52 = vmul.f32 %v7457_v39, %v4059_v35 }
0x4861   :  { %v4168_v24 = vpop.permute.xlu0 %4167 }
0x4862   :  { %v4170_v5 = vmul.f32 %v7453_v51, %v4168_v24 }
0x4864   :  { %4172 = vrot.lane.b32.xlu1 %v4170_v5, %s7768_s15 }
0x4872   :  { %v4156_v29 = vpop.permute.xlu0 %4155 }
0x4873   :  { %v4158_v45 = vadd.f32 %v4156_v29, %v4152_v52  ;;  %v9270_v52 = vld [vmem:[%s9560_s8 + $0x30] ss:$8 sps:$4 sm:$0xff]   ;;  %v9277_v29 = vld [vmem:[%s9560_s8 + $0x24] ss:$8 sps:$4 sm:$0xff]  }
0x4875   :  { %7458 = vtanh.f32 %v4158_v45 }
0x4882   :  { %v7459_v58 = vpop.eup %7458 }
0x4883   :  { %4161 = vrot.lane.b32.xlu0 %v7459_v58, %s7768_s15  ;;  %v9289_v58 = vld [vmem:[%s9560_s8 + $0x14] ss:$8 sps:$4 sm:$0xff]  }
0x48d6   :  { %v4173_v17 = vpop.permute.xlu1 %4172 }
0x48d7   :  { %v4175_v1 = vadd.f32 %v4173_v17, %v4165_v26  ;;  %v7578_v26 = vld [vmem:[%s9560_s8 + $0x34] ss:$8 sps:$4 sm:$0xff]   ;;  %v4285_v17 = vrot.slane %v9213_v23, 6 }
0x48d9   :  { %7460 = vtanh.f32 %v4175_v1 }
0x48e6   :  { %v7461_v7 = vpop.eup %7460 }
0x48e7   :  { %4178 = vrot.lane.b32.xlu1 %v7461_v7, %s7768_s15 }
0x48f5   :  { %v4162_v44 = vpop.permute.xlu0 %4161 }
0x48f6   :  { %v4164_v59 = vmul.f32 %v7457_v39, %v4162_v44 }
0x4959   :  { %v4179_v37 = vpop.permute.xlu1 %4178 }
0x495a   :  { %v4181_v25 = vmul.f32 %v7453_v51, %v4179_v37  ;;  %v4286_v37 = vrot.slane %v9217_v4, 6 }
0x495c   :  { %4183 = vrot.lane.b32.xlu1 %v4181_v25, %s7767_s2 }
0x49ce   :  { %v4184_v35 = vpop.permute.xlu1 %4183 }
0x49cf   :  { %v4186_v62 = vsel %vm1726_vm11, %v4184_v35, %v4164_v59 }
0x49d0   :  { %v4187_v60 = vpack.c.bf16 %v4186_v62, %v4186_v62 }
0x49d2   :  { %6571 = vmatmul.mubr.msk.bf16.vlgmr.msra.gmra.mxu0 %vm764_vm8, %v4187_v60 }
0x49d3   :  { %4394 = vmatpush1.bf16.msra.mxu0 %v9043_v42  ;;  %4417 = vmatprep.mubr.bf16.mxu0 %v7766_v55 }
0x49d4   :  { %4395 = vmatprep.subr.bf16.mxu0 %v9050_v56 }
0x49d7   :  { %4396 = vmatpush1.bf16.msra.mxu0 %v9056_v10 }
0x49d8   :  { %4397 = vmatprep.subr.bf16.mxu0 %v9062_v21 }
0x49db   :  { %4398 = vmatpush1.bf16.msra.mxu0 %v9092_v27 }
0x49dc   :  { %4399 = vmatprep.subr.bf16.mxu0 %v9098_v30 }
0x49df   :  { %4400 = vmatpush1.bf16.msra.mxu0 %v9104_v38 }
0x49e0   :  { %4589 = vmatprep.subr.bf16.mxu0 %v9071_v8 }
0x4a92   :  { %v4229_v34 = vpop.f32.mrf.mxu0 }
0x4a93   :  { %v4230_v42 = vadd.f32 %v4229_v34, %v4188_v49 }
0x4a94   :  { %v4231_v3 = vpop.f32.mrf.mxu0 }
0x4a95   :  { %v6572_v56 = vmul.f32 -1.442695, %v4230_v42  ;;  %v4232_v2 = vadd.f32 %v4231_v3, %v4189_v47 }
0x4a96   :  { %v4233_v10 = vpop.f32.mrf.mxu0 }
0x4a97   :  { %7462 = vpow2.f32 %v6572_v56  ;;  %v6573_v57 = vmul.f32 -1.442695, %v4232_v2 }
0x4a98   :  { %7464 = vtanh.f32 %v4232_v2  ;;  %v4234_v21 = vpop.f32.mrf.mxu0 }
0x4aa4   :  { %v7463_v54 = vpop.eup %7462 }
0x4aa5   :  { %v7465_v20 = vpop.eup %7464  ;;  %v4242_v9 = vadd.f32 1.0, %v7463_v54 }
0x4aa6   :  { %4264 = vrot.lane.b32.xlu0 %v7465_v20, %s7767_s2 }
0x4aa7   :  { %7466 = vrcp.f32 %v4242_v9 }
0x4aa8   :  { %7468 = vpow2.f32 %v6573_v57 }
0x4ab4   :  { %v7467_v8 = vpop.eup %7466 }
0x4ab5   :  { %v4250_v0 = vmul.f32 %v7467_v8, %v7465_v20  ;;  %v7469_v63 = vpop.eup %7468  ;;  %v4262_v53 = vmul.f32 %v7467_v8, %v4175_v1 }
0x4ab6   :  { %v4243_v14 = vadd.f32 1.0, %v7469_v63 }
0x4ab7   :  { %4252 = vrot.lane.b32.xlu0 %v4250_v0, %s7768_s15 }
0x4ab8   :  { %7470 = vrcp.f32 %v4243_v14 }
0x4ac5   :  { %v7471_v43 = vpop.eup %7470 }
0x4ac6   :  { %v4249_v16 = vmul.f32 %v7471_v43, %v4158_v45  ;;  %v9283_v45 = vld [vmem:[%s9560_s8 + $0x20] ss:$8 sps:$4 sm:$0xff]  }
0x4b18   :  { %v4265_v48 = vpop.permute.xlu0 %4264 }
0x4b19   :  { %v4267_v50 = vmul.f32 %v7467_v8, %v4265_v48 }
0x4b1b   :  { %4269 = vrot.lane.b32.xlu1 %v4267_v50, %s7768_s15 }
0x4b29   :  { %v4253_v36 = vpop.permute.xlu0 %4252 }
0x4b2a   :  { %v4255_v33 = vadd.f32 %v4253_v36, %v4249_v16  ;;  %v9316_v16 = vld [vmem:[%s9560_s8 + $0x10] ss:$8 sps:$4 sm:$0xff]   ;;  %v9322_v36 = vld [vmem:[%s9560_s8 + $0x4] ss:$8 sps:$4 sm:$0xff]  }
0x4b2c   :  { %7472 = vtanh.f32 %v4255_v33 }
0x4b39   :  { %v7473_v6 = vpop.eup %7472 }
0x4b3a   :  { %4258 = vrot.lane.b32.xlu0 %v7473_v6, %s7768_s15  ;;  %v9333_v6 = vadd.f32 %v8650_v31, %v8548_v19 }
0x4b8d   :  { %v4270_v13 = vpop.permute.xlu1 %4269 }
0x4b8e   :  { %v4272_v46 = vadd.f32 %v4270_v13, %v4262_v53  ;;  %v9337_v13 = vadd.f32 %v8652_v28, %v8541_v12 }
0x4b90   :  { %7474 = vtanh.f32 %v4272_v46 }
0x4b9d   :  { %v7475_v51 = vpop.eup %7474 }
0x4b9e   :  { %4275 = vrot.lane.b32.xlu1 %v7475_v51, %s7768_s15 }
0x4bac   :  { %v4259_v15 = vpop.permute.xlu0 %4258 }
0x4bad   :  { %v4261_v32 = vmul.f32 %v7471_v43, %v4259_v15 }
0x4c10   :  { %v4276_v22 = vpop.permute.xlu1 %4275 }
0x4c11   :  { %v4278_v40 = vmul.f32 %v7467_v8, %v4276_v22 }
0x4c13   :  { %4280 = vrot.lane.b32.xlu1 %v4278_v40, %s7767_s2 }
0x4c85   :  { %v4281_v24 = vpop.permute.xlu1 %4280 }
0x4c86   :  { %v4283_v5 = vsel %vm1726_vm11, %v4281_v24, %v4261_v32 }
0x4c87   :  { %v4284_v39 = vpack.c.bf16 %v4283_v5, %v4283_v5 }
0x4c89   :  { %6574 = vmatmul.mubr.msk.bf16.vlgmr.msra.gmra.mxu1 %vm764_vm8, %v4284_v39 }
0x4c8a   :  { %4493 = vmatpush1.bf16.msra.mxu1 %v9270_v52  ;;  %4516 = vmatprep.mubr.bf16.mxu1 %v7766_v55 }
0x4c8b   :  { %4494 = vmatprep.subr.bf16.mxu1 %v9277_v29 }
0x4c8e   :  { %4495 = vmatpush1.bf16.msra.mxu1 %v9283_v45 }
0x4c8f   :  { %4496 = vmatprep.subr.bf16.mxu1 %v9289_v58 }
0x4c92   :  { %4497 = vmatpush1.bf16.msra.mxu1 %v9092_v27 }
0x4c93   :  { %4498 = vmatprep.subr.bf16.mxu1 %v9098_v30 }
0x4c96   :  { %4499 = vmatpush1.bf16.msra.mxu1 %v9104_v38 }
0x4c97   :  { %4686 = vmatprep.subr.bf16.mxu1 %v7578_v26 }
0x4d49   :  { %v4326_v1 = vpop.f32.mrf.mxu1 }
0x4d4a   :  { %v4327_v7 = vadd.f32 %v4326_v1, %v4285_v17 }
0x4d4b   :  { %v4328_v25 = vpop.f32.mrf.mxu1 }
0x4d4c   :  { %v6575_v44 = vmul.f32 -1.442695, %v4327_v7  ;;  %v4329_v59 = vadd.f32 %v4328_v25, %v4286_v37 }
0x4d4d   :  { %v4330_v35 = vpop.f32.mrf.mxu1 }
0x4d4e   :  { %7476 = vpow2.f32 %v6575_v44  ;;  %v6576_v23 = vmul.f32 -1.442695, %v4329_v59 }
0x4d4f   :  { %7478 = vtanh.f32 %v4329_v59  ;;  %v4331_v27 = vpop.f32.mrf.mxu1 }
0x4d5b   :  { %v7477_v30 = vpop.eup %7476 }
0x4d5c   :  { %v7479_v38 = vpop.eup %7478  ;;  %v4339_v62 = vadd.f32 1.0, %v7477_v30 }
0x4d5d   :  { %4361 = vrot.lane.b32.xlu0 %v7479_v38, %s7767_s2 }
0x4d5e   :  { %7480 = vrcp.f32 %v4339_v62 }
0x4d5f   :  { %7482 = vpow2.f32 %v6576_v23 }
0x4d6b   :  { %v7481_v60 = vpop.eup %7480 }
0x4d6c   :  { %v4347_v49 = vmul.f32 %v7481_v60, %v7479_v38  ;;  %v7483_v4 = vpop.eup %7482  ;;  %v4359_v54 = vmul.f32 %v7481_v60, %v4272_v46 }
0x4d6d   :  { %v4340_v34 = vadd.f32 1.0, %v7483_v4 }
0x4d6e   :  { %4349 = vrot.lane.b32.xlu0 %v4347_v49, %s7768_s15 }
0x4d6f   :  { %7484 = vrcp.f32 %v4340_v34 }
0x4d7c   :  { %v7485_v3 = vpop.eup %7484 }
0x4d7d   :  { %v4346_v56 = vmul.f32 %v7485_v3, %v4255_v33  ;;  %v9328_v33 = vld [vmem:[%s9560_s8] ss:$8 sps:$4 sm:$0xff]   ;;  %s7769_s8 = smov [#allocation3]  }
0x4d7e   :  { %s54_s6 = sshll.u32 %s7769_s8, 4  ;;  %s55_s6 = int_to_ptr.vmem [resolvable:$true] %s54_s6 }
0x4d7f   :  { %p7733_p1 = scmp.lt.s32.totalorder %s55_s6, %s55_s6 }
0x4dcf   :  { %v4362_v42 = vpop.permute.xlu0 %4361 }
0x4dd0   :  { %v4364_v47 = vmul.f32 %v7481_v60, %v4362_v42 }
0x4dd2   :  { %4366 = vrot.lane.b32.xlu1 %v4364_v47, %s7768_s15 }
0x4de0   :  { %v4350_v2 = vpop.permute.xlu0 %4349 }
0x4de1   :  { %v4352_v10 = vadd.f32 %v4350_v2, %v4346_v56  ;;  %v4477_v56 = vrot.slane %v9333_v6, 2 }
0x4de3   :  { %7486 = vtanh.f32 %v4352_v10 }
0x4df0   :  { %v7487_v21 = vpop.eup %7486 }
0x4df1   :  { %4355 = vrot.lane.b32.xlu0 %v7487_v21, %s7768_s15  ;;  %v4478_v21 = vrot.slane %v9337_v13, 2 }
0x4e44   :  { %v4367_v20 = vpop.permute.xlu1 %4366 }
0x4e45   :  { %v4369_v9 = vadd.f32 %v4367_v20, %v4359_v54 }
0x4e47   :  { %7488 = vtanh.f32 %v4369_v9 }
0x4e54   :  { %v7489_v8 = vpop.eup %7488 }
0x4e55   :  { %4372 = vrot.lane.b32.xlu1 %v7489_v8, %s7768_s15 }
0x4e63   :  { %v4356_v63 = vpop.permute.xlu0 %4355 }
0x4e64   :  { %v4358_v14 = vmul.f32 %v7485_v3, %v4356_v63 }
0x4ec7   :  { %v4373_v0 = vpop.permute.xlu1 %4372 }
0x4ec8   :  { %v4375_v57 = vmul.f32 %v7481_v60, %v4373_v0 }
0x4eca   :  { %4377 = vrot.lane.b32.xlu1 %v4375_v57, %s7767_s2 }
0x4f3c   :  { %v4378_v48 = vpop.permute.xlu1 %4377 }
0x4f3d   :  { %v4380_v50 = vsel %vm1726_vm11, %v4378_v48, %v4358_v14 }
0x4f3e   :  { %v4381_v43 = vpack.c.bf16 %v4380_v50, %v4380_v50 }
0x4f40   :  { %6577 = vmatmul.mubr.msk.bf16.vlgmr.msra.gmra.mxu0 %vm764_vm8, %v4381_v43 }
0x4f41   :  { %4590 = vmatpush1.bf16.msra.mxu0 %v9270_v52  ;;  %4613 = vmatprep.mubr.bf16.mxu0 %v7766_v55 }
0x4f42   :  { %4591 = vmatprep.subr.bf16.mxu0 %v9277_v29 }
0x4f45   :  { %4592 = vmatpush1.bf16.msra.mxu0 %v9283_v45 }
0x4f46   :  { %4593 = vmatprep.subr.bf16.mxu0 %v9289_v58 }
0x4f49   :  { %4594 = vmatpush1.bf16.msra.mxu0 %v9316_v16 }
0x4f4a   :  { %4595 = vmatprep.subr.bf16.mxu0 %v9322_v36 }
0x4f4d   :  { %4596 = vmatpush1.bf16.msra.mxu0 %v9328_v33 }
0x4f4e   :  { %4779 = vmatprep.subr.bf16.mxu0 %v7578_v26 }
0x5000   :  { %v4419_v53 = vpop.f32.mrf.mxu0 }
0x5001   :  { %v4420_v46 = vadd.f32 %v4419_v53, %v9333_v6 }
0x5002   :  { %v4421_v51 = vpop.f32.mrf.mxu0 }
0x5003   :  { %v6578_v22 = vmul.f32 -1.442695, %v4420_v46  ;;  %v4422_v40 = vadd.f32 %v4421_v51, %v9337_v13 }
0x5004   :  { %v4423_v15 = vpop.f32.mrf.mxu0 }
0x5005   :  { %7490 = vpow2.f32 %v6578_v22  ;;  %v6579_v28 = vmul.f32 -1.442695, %v4422_v40 }
0x5006   :  { %7492 = vtanh.f32 %v4422_v40  ;;  %v4424_v32 = vpop.f32.mrf.mxu0 }
0x5012   :  { %v7491_v24 = vpop.eup %7490 }
0x5013   :  { %v7493_v5 = vpop.eup %7492  ;;  %v4432_v39 = vadd.f32 1.0, %v7491_v24 }
0x5014   :  { %4454 = vrot.lane.b32.xlu0 %v7493_v5, %s7767_s2 }
0x5015   :  { %7494 = vrcp.f32 %v4432_v39 }
0x5016   :  { %7496 = vpow2.f32 %v6579_v28 }
0x5022   :  { %v7495_v31 = vpop.eup %7494 }
0x5023   :  { %v4440_v26 = vmul.f32 %v7495_v31, %v7493_v5  ;;  %v7497_v17 = vpop.eup %7496  ;;  %v4452_v30 = vmul.f32 %v7495_v31, %v4369_v9 }
0x5024   :  { %v4433_v1 = vadd.f32 1.0, %v7497_v17 }
0x5025   :  { %4442 = vrot.lane.b32.xlu0 %v4440_v26, %s7768_s15 }
0x5026   :  { %7498 = vrcp.f32 %v4433_v1 }
0x5033   :  { %v7499_v25 = vpop.eup %7498 }
0x5034   :  { %v4439_v44 = vmul.f32 %v7499_v25, %v4352_v10 }
0x5086   :  { %v4455_v7 = vpop.permute.xlu0 %4454 }
0x5087   :  { %v4457_v37 = vmul.f32 %v7495_v31, %v4455_v7 }
0x5089   :  { %4459 = vrot.lane.b32.xlu1 %v4457_v37, %s7768_s15 }
0x5097   :  { %v4443_v59 = vpop.permute.xlu0 %4442 }
0x5098   :  { %v4445_v35 = vadd.f32 %v4443_v59, %v4439_v44 }
0x509a   :  { %7500 = vtanh.f32 %v4445_v35 }
0x50a7   :  { %v7501_v27 = vpop.eup %7500 }
0x50a8   :  { %4448 = vrot.lane.b32.xlu0 %v7501_v27, %s7768_s15 }
0x50fb   :  { %v4460_v38 = vpop.permute.xlu1 %4459 }
0x50fc   :  { %v4462_v62 = vadd.f32 %v4460_v38, %v4452_v30 }
0x50fe   :  { %7502 = vtanh.f32 %v4462_v62 }
0x510b   :  { %v7503_v60 = vpop.eup %7502 }
0x510c   :  { %4465 = vrot.lane.b32.xlu1 %v7503_v60, %s7768_s15 }
0x511a   :  { %v4449_v4 = vpop.permute.xlu0 %4448 }
0x511b   :  { %v4451_v34 = vmul.f32 %v7499_v25, %v4449_v4 }
0x517e   :  { %v4466_v49 = vpop.permute.xlu1 %4465 }
0x517f   :  { %v4468_v23 = vmul.f32 %v7495_v31, %v4466_v49 }
0x5181   :  { %4470 = vrot.lane.b32.xlu1 %v4468_v23, %s7767_s2 }
0x51f3   :  { %v4471_v42 = vpop.permute.xlu1 %4470 }
0x51f4   :  { %v4473_v47 = vsel %vm1726_vm11, %v4471_v42, %v4451_v34 }
0x51f5   :  { %v4474_v3 = vpack.c.bf16 %v4473_v47, %v4473_v47 }
0x51f7   :  { %6580 = vmatmul.mubr.msk.bf16.vlgmr.msra.gmra.mxu1 %vm764_vm8, %v4474_v3 }
0x51f8   :  { %4687 = vmatpush1.bf16.msra.mxu1 %v9270_v52  ;;  %4710 = vmatprep.mubr.bf16.mxu1 %v7766_v55 }
0x51f9   :  { %4688 = vmatprep.subr.bf16.mxu1 %v9277_v29 }
0x51fc   :  { %4689 = vmatpush1.bf16.msra.mxu1 %v9283_v45 }
0x51fd   :  { %4690 = vmatprep.subr.bf16.mxu1 %v9289_v58 }
0x5200   :  { %4691 = vmatpush1.bf16.msra.mxu1 %v9316_v16 }
0x5201   :  { %4692 = vmatprep.subr.bf16.mxu1 %v9322_v36 }
0x5204   :  { %4693 = vmatpush1.bf16.msra.mxu1 %v9328_v33 }
0x52b7   :  { %v4518_v2 = vpop.f32.mrf.mxu1 }
0x52b8   :  { %v4519_v10 = vadd.f32 %v4518_v2, %v4477_v56 }
0x52b9   :  { %v4520_v54 = vpop.f32.mrf.mxu1 }
0x52ba   :  { %v6581_v20 = vmul.f32 -1.442695, %v4519_v10  ;;  %v4521_v9 = vadd.f32 %v4520_v54, %v4478_v21 }
0x52bb   :  { %v4522_v8 = vpop.f32.mrf.mxu1 }
0x52bc   :  { %7504 = vpow2.f32 %v6581_v20  ;;  %v6582_v43 = vmul.f32 -1.442695, %v4521_v9 }
0x52bd   :  { %7506 = vtanh.f32 %v4521_v9  ;;  %v4523_v0 = vpop.f32.mrf.mxu1 }
0x52c9   :  { %v7505_v57 = vpop.eup %7504 }
0x52ca   :  { %v7507_v63 = vpop.eup %7506  ;;  %v4531_v14 = vadd.f32 1.0, %v7505_v57 }
0x52cb   :  { %4553 = vrot.lane.b32.xlu0 %v7507_v63, %s7767_s2 }
0x52cc   :  { %7508 = vrcp.f32 %v4531_v14 }
0x52cd   :  { %7510 = vpow2.f32 %v6582_v43  ;;  %v4671_v43 = vrot.slane %v9333_v6, 6 }
0x52d9   :  { %v7509_v48 = vpop.eup %7508 }
0x52da   :  { %v4539_v50 = vmul.f32 %v7509_v48, %v7507_v63  ;;  %v7511_v53 = vpop.eup %7510  ;;  %v4551_v39 = vmul.f32 %v7509_v48, %v4462_v62 }
0x52db   :  { %v4532_v46 = vadd.f32 1.0, %v7511_v53 }
0x52dc   :  { %4541 = vrot.lane.b32.xlu0 %v4539_v50, %s7768_s15 }
0x52dd   :  { %7512 = vrcp.f32 %v4532_v46 }
0x52ea   :  { %v7513_v40 = vpop.eup %7512 }
0x52eb   :  { %v4538_v15 = vmul.f32 %v7513_v40, %v4445_v35  ;;  %v4574_v35 = vrot.slane %v9333_v6, 4 }
0x533d   :  { %v4554_v51 = vpop.permute.xlu0 %4553 }
0x533e   :  { %v4556_v22 = vmul.f32 %v7509_v48, %v4554_v51  ;;  %v4672_v51 = vrot.slane %v9337_v13, 6 }
0x5340   :  { %4558 = vrot.lane.b32.xlu1 %v4556_v22, %s7768_s15 }
0x534e   :  { %v4542_v32 = vpop.permute.xlu0 %4541 }
0x534f   :  { %v4544_v24 = vadd.f32 %v4542_v32, %v4538_v15 }
0x5351   :  { %7514 = vtanh.f32 %v4544_v24 }
0x535e   :  { %v7515_v5 = vpop.eup %7514 }
0x535f   :  { %4547 = vrot.lane.b32.xlu0 %v7515_v5, %s7768_s15 }
0x53b2   :  { %v4559_v31 = vpop.permute.xlu1 %4558 }
0x53b3   :  { %v4561_v26 = vadd.f32 %v4559_v31, %v4551_v39 }
0x53b5   :  { %7516 = vtanh.f32 %v4561_v26 }
0x53c2   :  { %v7517_v28 = vpop.eup %7516 }
0x53c3   :  { %4564 = vrot.lane.b32.xlu1 %v7517_v28, %s7768_s15 }
0x53d1   :  { %v4548_v7 = vpop.permute.xlu0 %4547 }
0x53d2   :  { %v4550_v37 = vmul.f32 %v7513_v40, %v4548_v7 }
0x5435   :  { %v4565_v17 = vpop.permute.xlu1 %4564 }
0x5436   :  { %v4567_v1 = vmul.f32 %v7509_v48, %v4565_v17 }
0x5438   :  { %4569 = vrot.lane.b32.xlu1 %v4567_v1, %s7767_s2 }
0x54aa   :  { %v4570_v25 = vpop.permute.xlu1 %4569 }
0x54ab   :  { %v4572_v44 = vsel %vm1726_vm11, %v4570_v25, %v4550_v37 }
0x54ac   :  { %v4573_v59 = vpack.c.bf16 %v4572_v44, %v4572_v44 }
0x54ae   :  { %6583 = vmatmul.mubr.msk.bf16.vlgmr.msra.gmra.mxu0 %vm764_vm8, %v4573_v59 }
0x54af   :  { %4780 = vmatpush1.bf16.msra.mxu0 %v9270_v52  ;;  %4803 = vmatprep.mubr.bf16.mxu0 %v7766_v55  ;;  %v4575_v52 = vrot.slane %v9337_v13, 4 }
0x54b0   :  { %4781 = vmatprep.subr.bf16.mxu0 %v9277_v29 }
0x54b3   :  { %4782 = vmatpush1.bf16.msra.mxu0 %v9283_v45 }
0x54b4   :  { %4783 = vmatprep.subr.bf16.mxu0 %v9289_v58 }
0x54b7   :  { %4784 = vmatpush1.bf16.msra.mxu0 %v9316_v16 }
0x54b8   :  { %4785 = vmatprep.subr.bf16.mxu0 %v9322_v36 }
0x54bb   :  { %4786 = vmatpush1.bf16.msra.mxu0 %v9328_v33 }
0x556e   :  { %v4615_v27 = vpop.f32.mrf.mxu0 }
0x556f   :  { %v4616_v30 = vadd.f32 %v4615_v27, %v4574_v35 }
0x5570   :  { %v4617_v38 = vpop.f32.mrf.mxu0 }
0x5571   :  { %v6584_v55 = vmul.f32 -1.442695, %v4616_v30  ;;  %v4618_v62 = vadd.f32 %v4617_v38, %v4575_v52 }
0x5572   :  { %v4619_v29 = vpop.f32.mrf.mxu0 }
0x5573   :  { %7518 = vpow2.f32 %v6584_v55  ;;  %v6585_v49 = vmul.f32 -1.442695, %v4618_v62  ;;  %v1573_v29 = vrot.slane %v8518_v41, 1 }
0x5574   :  { %7520 = vtanh.f32 %v4618_v62  ;;  %v4620_v45 = vpop.f32.mrf.mxu0 }
0x5575   :  { %v1581_v45 = vrot.slane %v8518_v41, 5 }
0x5580   :  { %v7519_v58 = vpop.eup %7518 }
0x5581   :  { %v7521_v60 = vpop.eup %7520  ;;  %v4628_v16 = vadd.f32 1.0, %v7519_v58  ;;  %v1589_v58 = vrot.slane %v8523_v61, 1 }
0x5582   :  { %4650 = vrot.lane.b32.xlu0 %v7521_v60, %s7767_s2 }
0x5583   :  { %7522 = vrcp.f32 %v4628_v16  ;;  %v1635_v16 = vrot.slane %v8528_v18, 1 }
0x5584   :  { %7524 = vpow2.f32 %v6585_v49  ;;  %v1659_v49 = vrot.slane %v8533_v11, 5 }
0x5590   :  { %v7523_v36 = vpop.eup %7522 }
0x5591   :  { %v4636_v33 = vmul.f32 %v7523_v36, %v7521_v60  ;;  %v7525_v23 = vpop.eup %7524  ;;  %v4648_v21 = vmul.f32 %v7523_v36, %v4561_v26  ;;  %v1597_v60 = vrot.slane %v8523_v61, 5 }
0x5592   :  { %v4629_v4 = vadd.f32 1.0, %v7525_v23 }
0x5593   :  { %4638 = vrot.lane.b32.xlu0 %v4636_v33, %s7768_s15  ;;  %v1651_v33 = vrot.slane %v8533_v11, 1 }
0x5594   :  { %7526 = vrcp.f32 %v4629_v4 }
0x55a1   :  { %v7527_v47 = vpop.eup %7526 }
0x55a2   :  { %v4635_v3 = vmul.f32 %v7527_v47, %v4544_v24 }
0x55f4   :  { %v4651_v34 = vpop.permute.xlu0 %4650 }
0x55f5   :  { %v4653_v42 = vmul.f32 %v7523_v36, %v4651_v34 }
0x55f7   :  { %4655 = vrot.lane.b32.xlu1 %v4653_v42, %s7768_s15 }
0x5605   :  { %v4639_v56 = vpop.permute.xlu0 %4638 }
0x5606   :  { %v4641_v2 = vadd.f32 %v4639_v56, %v4635_v3 }
0x5608   :  { %7528 = vtanh.f32 %v4641_v2 }
0x5615   :  { %v7529_v10 = vpop.eup %7528 }
0x5616   :  { %4644 = vrot.lane.b32.xlu0 %v7529_v10, %s7768_s15 }
0x5669   :  { %v4656_v54 = vpop.permute.xlu1 %4655 }
0x566a   :  { %v4658_v20 = vadd.f32 %v4656_v54, %v4648_v21 }
0x566c   :  { %7530 = vtanh.f32 %v4658_v20 }
0x5679   :  { %v7531_v9 = vpop.eup %7530 }
0x567a   :  { %4661 = vrot.lane.b32.xlu1 %v7531_v9, %s7768_s15  ;;  %v1596_v9 = vrot.slane %v8523_v61, 4 }
0x5688   :  { %v4645_v57 = vpop.permute.xlu0 %4644 }
0x5689   :  { %v4647_v63 = vmul.f32 %v7527_v47, %v4645_v57 }
0x56ec   :  { %v4662_v8 = vpop.permute.xlu1 %4661 }
0x56ed   :  { %v4664_v0 = vmul.f32 %v7523_v36, %v4662_v8  ;;  %v1643_v36 = vrot.slane %v8528_v18, 5 }
0x56ef   :  { %4666 = vrot.lane.b32.xlu1 %v4664_v0, %s7767_s2 }
0x5761   :  { %v4667_v14 = vpop.permute.xlu1 %4666 }
0x5762   :  { %v4669_v48 = vsel %vm1726_vm11, %v4667_v14, %v4647_v63  ;;  %v1642_v14 = vrot.slane %v8528_v18, 4 }
0x5763   :  { %v4670_v50 = vpack.c.bf16 %v4669_v48, %v4669_v48 }
0x5765   :  { %6586 = vmatmul.mubr.msk.bf16.vlgmr.msra.gmra.mxu1 %vm764_vm8, %v4670_v50 }
0x5825   :  { %v4712_v53 = vpop.f32.mrf.mxu1 }
0x5826   :  { %v4713_v46 = vadd.f32 %v4712_v53, %v4671_v43 }
0x5827   :  { %v4714_v22 = vpop.f32.mrf.mxu1 }
0x5828   :  { %v6587_v40 = vmul.f32 -1.442695, %v4713_v46  ;;  %v4715_v15 = vadd.f32 %v4714_v22, %v4672_v51  ;;  %v1658_v46 = vrot.slane %v8533_v11, 4 }
0x5829   :  { %v4716_v32 = vpop.f32.mrf.mxu1 }
0x582a   :  { %7532 = vpow2.f32 %v6587_v40  ;;  %v6588_v6 = vmul.f32 -1.442695, %v4715_v15 }
0x582b   :  { %7534 = vtanh.f32 %v4715_v15  ;;  %v4717_v24 = vpop.f32.mrf.mxu1 }
0x5837   :  { %v7533_v5 = vpop.eup %7532 }
0x5838   :  { %v7535_v39 = vpop.eup %7534  ;;  %v4725_v31 = vadd.f32 1.0, %v7533_v5 }
0x5839   :  { %4747 = vrot.lane.b32.xlu0 %v7535_v39, %s7767_s2 }
0x583a   :  { %7536 = vrcp.f32 %v4725_v31 }
0x583b   :  { %7538 = vpow2.f32 %v6588_v6 }
0x5847   :  { %v7537_v26 = vpop.eup %7536 }
0x5848   :  { %v4733_v28 = vmul.f32 %v7537_v26, %v7535_v39  ;;  %v7539_v13 = vpop.eup %7538  ;;  %v4745_v27 = vmul.f32 %v7537_v26, %v4658_v20 }
0x5849   :  { %v4726_v17 = vadd.f32 1.0, %v7539_v13 }
0x584a   :  { %4735 = vrot.lane.b32.xlu0 %v4733_v28, %s7768_s15 }
0x584b   :  { %7540 = vrcp.f32 %v4726_v17 }
0x5858   :  { %v7541_v37 = vpop.eup %7540 }
0x5859   :  { %v4732_v25 = vmul.f32 %v7541_v37, %v4641_v2  ;;  %v1580_v2 = vrot.slane %v8518_v41, 4 }
0x58ab   :  { %v4748_v1 = vpop.permute.xlu0 %4747 }
0x58ac   :  { %v4750_v7 = vmul.f32 %v7537_v26, %v4748_v1  ;;  %v1577_v1 = vrot.slane %v8518_v41, 3 }
0x58ae   :  { %4752 = vrot.lane.b32.xlu1 %v4750_v7, %s7768_s15  ;;  %v1593_v7 = vrot.slane %v8523_v61, 3 }
0x58bc   :  { %v4736_v44 = vpop.permute.xlu0 %4735 }
0x58bd   :  { %v9390_v59 = vadd.f32 %v4736_v44, %v4732_v25  ;;  %v1647_v25 = vrot.slane %v8528_v18, 7  ;;  %v1655_v44 = vrot.slane %v8533_v11, 3 }
0x58bf   :  { %7542 = vtanh.f32 %v9390_v59 }
0x58cc   :  { %v7543_v35 = vpop.eup %7542 }
0x58cd   :  { %4741 = vrot.lane.b32.xlu0 %v7543_v35, %s7768_s15  ;;  %v1663_v35 = vrot.slane %v8533_v11, 7 }
0x5920   :  { %v4753_v30 = vpop.permute.xlu1 %4752 }
0x5921   :  { %v4755_v52 = vadd.f32 %v4753_v30, %v4745_v27 }
0x5923   :  { %7544 = vtanh.f32 %v4755_v52 }
0x5930   :  { %v7545_v38 = vpop.eup %7544 }
0x5931   :  { %4758 = vrot.lane.b32.xlu1 %v7545_v38, %s7768_s15 }
0x593f   :  { %v4742_v23 = vpop.permute.xlu0 %4741 }
0x5940   :  { %v4744_v4 = vmul.f32 %v7541_v37, %v4742_v23  ;;  %v1639_v37 = vrot.slane %v8528_v18, 3 }
0x59a3   :  { %v4759_v55 = vpop.permute.xlu1 %4758 }
0x59a4   :  { %v4761_v62 = vmul.f32 %v7537_v26, %v4759_v55 }
0x59a6   :  { %4763 = vrot.lane.b32.xlu1 %v4761_v62, %s7767_s2 }
0x59aa   :  { %1574 = vrot.lane.b32.xlu1 %v1573_v29, %s7767_s2 }
0x59ae   :  { %1582 = vrot.lane.b32.xlu1 %v1581_v45, %s7767_s2  ;;  %v1576_v45 = vrot.slane %v8518_v41, 2 }
0x59b2   :  { %1590 = vrot.lane.b32.xlu1 %v1589_v58, %s7767_s2 }
0x59b6   :  { %1598 = vrot.lane.b32.xlu1 %v1597_v60, %s7767_s2 }
0x59ba   :  { %1636 = vrot.lane.b32.xlu1 %v1635_v16, %s7767_s2 }
0x59be   :  { %1644 = vrot.lane.b32.xlu1 %v1643_v36, %s7767_s2 }
0x59c2   :  { %1652 = vrot.lane.b32.xlu1 %v1651_v33, %s7767_s2 }
0x59c6   :  { %1660 = vrot.lane.b32.xlu1 %v1659_v49, %s7767_s2 }
0x5a18   :  { %v4764_v34 = vpop.permute.xlu1 %4763 }
0x5a19   :  { %v4766_v42 = vsel %vm1726_vm11, %v4764_v34, %v4744_v4 }
0x5a1a   :  { %v4767_v47 = vpack.c.bf16 %v4766_v42, %v4766_v42 }
0x5a1c   :  { %v1575_v3 = vpop.permute.xlu1 %1574  ;;  %6589 = vmatmul.mubr.msk.bf16.vlgmr.msra.gmra.mxu0 %vm764_vm8, %v4767_v47 }
0x5a1d   :  { %v9416_v56 = vsel %vm764_vm8, %v8518_v41, %v1575_v3 }
0x5a20   :  { %v1583_v10 = vpop.permute.xlu1 %1582 }
0x5a21   :  { %v9420_v21 = vsel %vm764_vm8, %v1580_v2, %v1583_v10 }
0x5a24   :  { %v1591_v54 = vpop.permute.xlu1 %1590 }
0x5a25   :  { %v9424_v20 = vsel %vm764_vm8, %v8523_v61, %v1591_v54 }
0x5a28   :  { %v1599_v8 = vpop.permute.xlu1 %1598 }
0x5a29   :  { %v9428_v0 = vsel %vm764_vm8, %v1596_v9, %v1599_v8 }
0x5a2c   :  { %v1637_v57 = vpop.permute.xlu1 %1636 }
0x5a2d   :  { %v9432_v63 = vsel %vm764_vm8, %v8528_v18, %v1637_v57 }
0x5a30   :  { %v1645_v48 = vpop.permute.xlu1 %1644 }
0x5a31   :  { %v9436_v50 = vsel %vm764_vm8, %v1642_v14, %v1645_v48 }
0x5a34   :  { %v1653_v43 = vpop.permute.xlu1 %1652 }
0x5a35   :  { %v9440_v53 = vsel %vm764_vm8, %v8533_v11, %v1653_v43 }
0x5a38   :  { %v1661_v51 = vpop.permute.xlu1 %1660 }
0x5a39   :  { %v9444_v22 = vsel %vm764_vm8, %v1658_v46, %v1661_v51 }
0x5adc   :  { %v4805_v40 = vpop.f32.mrf.mxu0 }
0x5add   :  { %v4806_v15 = vadd.f32 %v4805_v40, %v8548_v19  ;;  %v1585_v19 = vrot.slane %v8518_v41, 7 }
0x5ade   :  { %v4807_v32 = vpop.f32.mrf.mxu0 }
0x5adf   :  { %v6590_v24 = vmul.f32 -1.442695, %v4806_v15  ;;  %v4808_v31 = vadd.f32 %v4807_v32, %v8541_v12  ;;  %v1601_v12 = vrot.slane %v8523_v61, 7 }
0x5ae0   :  { %v4809_v5 = vpop.f32.mrf.mxu0 }
0x5ae1   :  { %7546 = vpow2.f32 %v6590_v24  ;;  %v6591_v27 = vmul.f32 -1.442695, %v4808_v31 }
0x5ae2   :  { %v4810_v39 = vpop.f32.mrf.mxu0  ;;  %7548 = vtanh.f32 %v4808_v31 }
0x5aee   :  { %v7547_v26 = vpop.eup %7546 }
0x5aef   :  { %v4818_v28 = vadd.f32 1.0, %v7547_v26  ;;  %v7549_v6 = vpop.eup %7548 }
0x5af1   :  { %7550 = vrcp.f32 %v4818_v28 }
0x5af2   :  { %7552 = vpow2.f32 %v6591_v27 }
0x5afe   :  { %v7551_v13 = vpop.eup %7550 }
0x5aff   :  { %v4826_v17 = vmul.f32 %v7551_v13, %v7549_v6  ;;  %v7553_v30 = vpop.eup %7552 }
0x5b00   :  { %v4819_v52 = vadd.f32 1.0, %v7553_v30 }
0x5b01   :  { %4828 = vrot.lane.b32.xlu0 %v4826_v17, %s7768_s15 }
0x5b02   :  { %7554 = vrcp.f32 %v4819_v52 }
0x5b05   :  { %1578 = vrot.lane.b32.xlu0 %v1577_v1, %s7767_s2 }
0x5b09   :  { %1586 = vrot.lane.b32.xlu0 %v1585_v19, %s7767_s2 }
0x5b0d   :  { %1594 = vrot.lane.b32.xlu0 %v1593_v7, %s7767_s2 }
0x5b0f   :  { %v7555_v38 = vpop.eup %7554 }
0x5b10   :  { %v4825_v55 = vmul.f32 %v7555_v38, %v9390_v59 }
0x5b11   :  { %1602 = vrot.lane.b32.xlu0 %v1601_v12, %s7767_s2 }
0x5b15   :  { %1640 = vrot.lane.b32.xlu0 %v1639_v37, %s7767_s2 }
0x5b19   :  { %1648 = vrot.lane.b32.xlu0 %v1647_v25, %s7767_s2 }
0x5b1d   :  { %1656 = vrot.lane.b32.xlu0 %v1655_v44, %s7767_s2 }
0x5b21   :  { %1664 = vrot.lane.b32.xlu0 %v1663_v35, %s7767_s2  ;;  %s7728_s2 = scalar_lea.vmem %s55_s6, 16384 }
0x5b22   :  { %p7729_p0 = scmp.ne.s32.totalorder %s55_s6, %s7728_s2  ;;  %p7734_p2 = scmp.lt.s32.totalorder %s7728_s2, %s7728_s2 }
0x5b24   :  { %p7735_p3 = por %p7734_p2, %p7733_p1 }
0x5b26   :  { %p7736_p4 = pnand %p7735_p3, %p7729_p0 }
0x5b73   :  { %v4829_v62 = vpop.permute.xlu0 %4828 }
0x5b74   :  { %v4831_v29 = vadd.f32 %v4829_v62, %v4825_v55 }
0x5b76   :  { %7556 = vtanh.f32 %v4831_v29 }
0x5b77   :  { %v1579_v58 = vpop.permute.xlu0 %1578 }
0x5b78   :  { %v1609_v60 = vsel %vm764_vm8, %v1576_v45, %v1579_v58 }
0x5b79   :  { %7739 = shalt.err (!%p7736_p4)  }
0x5b7a   :  { %57 = dma.hbm_to_vmem [thread:$0]  %s9565_s13, 16384, %s55_s6, [#allocation4]  ;;  %v1584_v59 = vrot.slane %v8518_v41, 6  ;;  %v1592_v33 = vrot.slane %v8523_v61, 2  ;;  %v1600_v4 = vrot.slane %v8523_v61, 6  ;;  %v1638_v41 = vrot.slane %v8528_v18, 2 }
0x5b7b   :  { %v1587_v16 = vpop.permute.xlu0 %1586  ;;  %v1646_v10 = vrot.slane %v8528_v18, 6  ;;  %v1654_v61 = vrot.slane %v8533_v11, 2  ;;  %v1662_v14 = vrot.slane %v8533_v11, 6 }
0x5b7c   :  { %v1617_v36 = vsel %vm764_vm8, %v1584_v59, %v1587_v16 }
0x5b7f   :  { %v1595_v49 = vpop.permute.xlu0 %1594 }
0x5b80   :  { %v9475_v23 = vsel %vm764_vm8, %v1592_v33, %v1595_v49 }
0x5b83   :  { %v7557_v34 = vpop.eup %7556  ;;  %v1603_v42 = vpop.permute.xlu0 %1602 }
0x5b84   :  { %v9479_v47 = vsel %vm764_vm8, %v1600_v4, %v1603_v42  ;;  %4834 = vrot.lane.b32.xlu1 %v7557_v34, %s7768_s15 }
0x5b87   :  { %v1641_v3 = vpop.permute.xlu0 %1640 }
0x5b88   :  { %v9484_v2 = vsel %vm764_vm8, %v1638_v41, %v1641_v3 }
0x5b8b   :  { %v1649_v54 = vpop.permute.xlu0 %1648 }
0x5b8c   :  { %v9488_v9 = vsel %vm764_vm8, %v1646_v10, %v1649_v54 }
0x5b8f   :  { %v1657_v8 = vpop.permute.xlu0 %1656 }
0x5b90   :  { %v9492_v57 = vsel %vm764_vm8, %v1654_v61, %v1657_v8 }
0x5b93   :  { %v1665_v48 = vpop.permute.xlu0 %1664 }
0x5b94   :  { %v9496_v43 = vsel %vm764_vm8, %v1662_v14, %v1665_v48 }
0x5bf6   :  { %v4835_v46 = vpop.permute.xlu1 %4834 }
0x5bf7   :  { %v4837_v51 = vmul.f32 %v7555_v38, %v4835_v46 }
0x5bf8   :  { %7760 = dma.done.wait [#allocation4], 16384 }
0x5bf9   :  { %7761 = vsyncadd [#allocation4], 4294950912  ;;  %5905 = vmatprep.mubr.bf16.mxu1 %v1609_v60  ;;  %5945 = vmatprep.mubr.bf16.mxu0 %v1617_v36  ;;  %v7582_v18 = vld [vmem:[#allocation3 + $0x78] sm:$0xff]   ;;  %v7586_v24 = vld [vmem:[#allocation3 + $0x70] sm:$0xff]   ;;  %v6211_v5 = vpack.c.bf16 %v4837_v51, %v4837_v51  ;;  %s7770_s13 = smov 96   ;;  %vm7772_vm12 = vmmov 0  }
0x5bfa   :  { %v7583_v40 = vld [vmem:[#allocation3 + $0xf8] sm:$0xff]   ;;  %6760 = vmatprep.subr.bf16.mxu1 %v7582_v18  ;;  %v7587_v11 = vld [vmem:[#allocation3 + $0xf0] sm:$0xff]   ;;  %v7590_v26 = vld [vmem:[#allocation3 + $0x68] sm:$0xff]   ;;  %s7773_s6 = smov [#allocation5]   ;;  %vm6370_vm13 = vcmask 74752  }
0x5bfb   :  { %v7584_v15 = vld [vmem:[#allocation3 + $0x38] sm:$0xff]   ;;  %6782 = vmatprep.subr.bf16.mxu0 %v7583_v40  ;;  %v7588_v39 = vld [vmem:[#allocation3 + $0x30] sm:$0xff]   ;;  %6217 = vrot.lane.b32.xlu0 %v6211_v5, %s7770_s13  ;;  %v7591_v28 = vld [vmem:[#allocation3 + $0xe8] sm:$0xff]   ;;  %s6378_s2 = sshll.u32 %s7773_s6, 4  ;;  %s6379_s2 = int_to_ptr.vmem [resolvable:$true] %s6378_s2 }
0x5bfc   :  { %v7585_v32 = vld [vmem:[#allocation3 + $0xb8] sm:$0xff]   ;;  %6761 = vmatpush3.bf16.msra.mxu1 %v7584_v15  ;;  %v7589_v31 = vld [vmem:[#allocation3 + $0xb0] sm:$0xff]   ;;  %v7592_v6 = vld [vmem:[#allocation3 + $0x28] sm:$0xff]   ;;  %s7740_s19 = scalar_lea.vmem %s6379_s2, 32  ;;  %p7745_p6 = scmp.lt.s32.totalorder %s6379_s2, %s6379_s2 }
0x5bfd   :  { %6783 = vmatpush3.bf16.msra.mxu0 %v7585_v32  ;;  %6762 = vmatprep.subr.bf16.mxu1 %v7586_v24  ;;  %v7593_v13 = vld [vmem:[#allocation3 + $0xa8] sm:$0xff]   ;;  %v7594_v17 = vld [vmem:[#allocation3 + $0x60] sm:$0xff]   ;;  %v7598_v12 = vld [vmem:[#allocation3 + $0x58] sm:$0xff]   ;;  %p7741_p5 = scmp.ne.s32.totalorder %s6379_s2, %s7740_s19  ;;  %p7746_p7 = scmp.lt.s32.totalorder %s7740_s19, %s7740_s19 }
0x5bfe   :  { %6784 = vmatprep.subr.bf16.mxu0 %v7587_v11  ;;  %v7595_v1 = vld [vmem:[#allocation3 + $0xe0] sm:$0xff]   ;;  %v7599_v37 = vld [vmem:[#allocation3 + $0xd8] sm:$0xff]   ;;  %v7602_v35 = vld [vmem:[#allocation3 + $0x50] sm:$0xff]  }
0x5bff   :  { %v7596_v19 = vld [vmem:[#allocation3 + $0x20] sm:$0xff]   ;;  %v7600_v25 = vld [vmem:[#allocation3 + $0x18] sm:$0xff]   ;;  %v7603_v27 = vld [vmem:[#allocation3 + $0xd0] sm:$0xff]   ;;  %p7747_p8 = por %p7746_p7, %p7745_p6 }
0x5c00   :  { %6763 = vmatpush3.bf16.msra.mxu1 %v7588_v39  ;;  %v7597_v7 = vld [vmem:[#allocation3 + $0xa0] sm:$0xff]   ;;  %v7601_v44 = vld [vmem:[#allocation3 + $0x98] sm:$0xff]   ;;  %v7604_v30 = vld [vmem:[#allocation3 + $0x10] sm:$0xff]  }
0x5c01   :  { %6785 = vmatpush3.bf16.msra.mxu0 %v7589_v31  ;;  %6764 = vmatprep.subr.bf16.mxu1 %v7590_v26  ;;  %v7605_v52 = vld [vmem:[#allocation3 + $0x90] sm:$0xff]   ;;  %v7606_v38 = vld [vmem:[#allocation3 + $0x48] sm:$0xff]   ;;  %v7610_v45 = vld [vmem:[#allocation3 + $0x40] sm:$0xff]   ;;  %p7748_p9 = pnand %p7747_p8, %p7741_p5 }
0x5c02   :  { %6786 = vmatprep.subr.bf16.mxu0 %v7591_v28  ;;  %v7607_v55 = vld [vmem:[#allocation3 + $0xc8] sm:$0xff]   ;;  %v7611_v58 = vld [vmem:[#allocation3 + $0xc0] sm:$0xff]   ;;  %v7614_v16 = vld [vmem:[#allocation3 + $0x178] sm:$0xff]  }
0x5c03   :  { %v7608_v62 = vld [vmem:[#allocation3 + $0x8] sm:$0xff]   ;;  %v7612_v60 = vld [vmem:[#allocation3] sm:$0xff]   ;;  %v7615_v36 = vld [vmem:[#allocation3 + $0x1f8] sm:$0xff]  }
0x5c04   :  { %6765 = vmatpush3.bf16.msra.mxu1 %v7592_v6  ;;  %v7609_v29 = vld [vmem:[#allocation3 + $0x88] sm:$0xff]   ;;  %v7613_v59 = vld [vmem:[#allocation3 + $0x80] sm:$0xff]   ;;  %v7616_v33 = vld [vmem:[#allocation3 + $0x138] sm:$0xff]  }
0x5c05   :  { %6787 = vmatpush3.bf16.msra.mxu0 %v7593_v13  ;;  %6766 = vmatprep.subr.bf16.mxu1 %v7594_v17  ;;  %v7617_v49 = vld [vmem:[#allocation3 + $0x1b8] sm:$0xff]   ;;  %v7618_v4 = vld [vmem:[#allocation3 + $0x170] sm:$0xff]   ;;  %v7622_v3 = vld [vmem:[#allocation3 + $0x168] sm:$0xff]  }
0x5c06   :  { %6788 = vmatprep.subr.bf16.mxu0 %v7595_v1  ;;  %v7619_v34 = vld [vmem:[#allocation3 + $0x1f0] sm:$0xff]   ;;  %v7624_v10 = vld [vmem:[#allocation3 + $0x128] sm:$0xff]   ;;  %v7626_v54 = vld [vmem:[#allocation3 + $0x160] sm:$0xff]  }
0x5c07   :  { %v7620_v42 = vld [vmem:[#allocation3 + $0x130] sm:$0xff]   ;;  %v7627_v61 = vld [vmem:[#allocation3 + $0x1e0] sm:$0xff]   ;;  %v7631_v14 = vld [vmem:[#allocation3 + $0x1d8] sm:$0xff]  }
0x5c08   :  { %6767 = vmatpush3.bf16.msra.mxu1 %v7596_v19  ;;  %v7621_v41 = vld [vmem:[#allocation3 + $0x1b0] sm:$0xff]   ;;  %v7629_v8 = vld [vmem:[#allocation3 + $0x1a0] sm:$0xff]   ;;  %v7632_v48 = vld [vmem:[#allocation3 + $0x118] sm:$0xff]  }
0x5c09   :  { %6789 = vmatpush3.bf16.msra.mxu0 %v7597_v7  ;;  %6768 = vmatprep.subr.bf16.mxu1 %v7598_v12  ;;  %v7633_v46 = vld [vmem:[#allocation3 + $0x198] sm:$0xff]   ;;  %v7634_v51 = vld [vmem:[#allocation3 + $0x150] sm:$0xff]   ;;  %v7638_v32 = vld [vmem:[#allocation3 + $0x148] sm:$0xff]  }
0x5c0a   :  { %6790 = vmatprep.subr.bf16.mxu0 %v7599_v37  ;;  %v7635_v18 = vld [vmem:[#allocation3 + $0x1d0] sm:$0xff]   ;;  %v7639_v24 = vld [vmem:[#allocation3 + $0x1c8] sm:$0xff]   ;;  %v7642_v39 = vld [vmem:[#allocation3 + $0x140] sm:$0xff]  }
0x5c0b   :  { %v7636_v40 = vld [vmem:[#allocation3 + $0x110] sm:$0xff]   ;;  %v7640_v5 = vld [vmem:[#allocation3 + $0x108] sm:$0xff]   ;;  %v7643_v31 = vld [vmem:[#allocation3 + $0x1c0] sm:$0xff]  }
0x5c0c   :  { %6769 = vmatpush3.bf16.msra.mxu1 %v7600_v25  ;;  %v7637_v15 = vld [vmem:[#allocation3 + $0x190] sm:$0xff]   ;;  %v7641_v11 = vld [vmem:[#allocation3 + $0x188] sm:$0xff]   ;;  %v7644_v26 = vld [vmem:[#allocation3 + $0x100] sm:$0xff]  }
0x5c0d   :  { %6791 = vmatpush3.bf16.msra.mxu0 %v7601_v44  ;;  %6770 = vmatprep.subr.bf16.mxu1 %v7602_v35  ;;  %v7645_v28 = vld [vmem:[#allocation3 + $0x180] sm:$0xff]   ;;  %v7646_v6 = vld [vmem:[#allocation3 + $0x278] sm:$0xff]   ;;  %v7650_v19 = vld [vmem:[#allocation3 + $0x270] sm:$0xff]  }
0x5c0e   :  { %6792 = vmatprep.subr.bf16.mxu0 %v7603_v27  ;;  %v7647_v13 = vld [vmem:[#allocation3 + $0x2f8] sm:$0xff]   ;;  %v7651_v7 = vld [vmem:[#allocation3 + $0x2f0] sm:$0xff]   ;;  %v7654_v25 = vld [vmem:[#allocation3 + $0x268] sm:$0xff]  }
0x5c0f   :  { %v7648_v17 = vld [vmem:[#allocation3 + $0x238] sm:$0xff]   ;;  %v7652_v12 = vld [vmem:[#allocation3 + $0x230] sm:$0xff]   ;;  %v7656_v44 = vld [vmem:[#allocation3 + $0x228] sm:$0xff]  }
0x5c10   :  { %6771 = vmatpush3.bf16.msra.mxu1 %v7604_v30  ;;  %v7649_v1 = vld [vmem:[#allocation3 + $0x2b8] sm:$0xff]   ;;  %v7653_v37 = vld [vmem:[#allocation3 + $0x2b0] sm:$0xff]   ;;  %v7658_v35 = vld [vmem:[#allocation3 + $0x260] sm:$0xff]  }
0x5c11   :  { %6793 = vmatpush3.bf16.msra.mxu0 %v7605_v52  ;;  %6772 = vmatprep.subr.bf16.mxu1 %v7606_v38  ;;  %v7659_v27 = vld [vmem:[#allocation3 + $0x2e0] sm:$0xff]   ;;  %v7663_v52 = vld [vmem:[#allocation3 + $0x2d8] sm:$0xff]  }
0x5c12   :  { %6794 = vmatprep.subr.bf16.mxu0 %v7607_v55  ;;  %v7661_v30 = vld [vmem:[#allocation3 + $0x2a0] sm:$0xff]   ;;  %v7664_v38 = vld [vmem:[#allocation3 + $0x218] sm:$0xff]  }
0x5c13   :  { %v7665_v55 = vld [vmem:[#allocation3 + $0x298] sm:$0xff]  }
0x5c14   :  { %6773 = vmatpush3.bf16.msra.mxu1 %v7608_v62  ;;  %v7666_v62 = vld [vmem:[#allocation3 + $0x250] sm:$0xff]  }
0x5c15   :  { %6795 = vmatpush3.bf16.msra.mxu0 %v7609_v29  ;;  %6774 = vmatprep.subr.bf16.mxu1 %v7610_v45  ;;  %v7667_v29 = vld [vmem:[#allocation3 + $0x2d0] sm:$0xff]  }
0x5c16   :  { %6796 = vmatprep.subr.bf16.mxu0 %v7611_v58  ;;  %v7668_v45 = vld [vmem:[#allocation3 + $0x210] sm:$0xff]  }
0x5c17   :  { %v7669_v58 = vld [vmem:[#allocation3 + $0x290] sm:$0xff]  }
0x5c18   :  { %6775 = vmatpush3.bf16.msra.mxu1 %v7612_v60  ;;  %v7670_v60 = vld [vmem:[#allocation3 + $0x248] sm:$0xff]  }
0x5c19   :  { %6797 = vmatpush3.bf16.msra.mxu0 %v7613_v59  ;;  %6804 = vmatprep.subr.bf16.mxu1 %v7614_v16  ;;  %v7671_v59 = vld [vmem:[#allocation3 + $0x2c8] sm:$0xff]  }
0x5c1a   :  { %6826 = vmatprep.subr.bf16.mxu0 %v7615_v36  ;;  %v7672_v16 = vld [vmem:[#allocation3 + $0x208] sm:$0xff]  }
0x5c1b   :  { %5906 = vmatmul.mubr.bf16.vlgmr.msra.gmra.mxu1 %v9416_v56  ;;  %v7623_v56 = vld [vmem:[#allocation3 + $0x1e8] sm:$0xff]  }
0x5c1c   :  { %5946 = vmatmul.mubr.bf16.vlgmr.msra.gmra.mxu0 %v9420_v21  ;;  %6805 = vmatpush3.bf16.msra.mxu1 %v7616_v33  ;;  %v7625_v21 = vld [vmem:[#allocation3 + $0x1a8] sm:$0xff]   ;;  %v7674_v33 = vld [vmem:[#allocation3 + $0x240] sm:$0xff]  }
0x5c1d   :  { %6827 = vmatpush3.bf16.msra.mxu0 %v7617_v49  ;;  %5985 = vmatprep.mubr.bf16.mxu1 %v9475_v23  ;;  %v7628_v23 = vld [vmem:[#allocation3 + $0x120] sm:$0xff]   ;;  %v7673_v36 = vld [vmem:[#allocation3 + $0x288] sm:$0xff]  }
0x5c1e   :  { %6806 = vmatprep.subr.bf16.mxu1 %v7618_v4  ;;  %6025 = vmatprep.mubr.bf16.mxu0 %v9479_v47  ;;  %v7630_v47 = vld [vmem:[#allocation3 + $0x158] sm:$0xff]   ;;  %v7675_v49 = vld [vmem:[#allocation3 + $0x2c0] sm:$0xff]  }
0x5c1f   :  { %6828 = vmatprep.subr.bf16.mxu0 %v7619_v34  ;;  %v7676_v4 = vld [vmem:[#allocation3 + $0x200] sm:$0xff]  }
0x5c20   :  { %6807 = vmatpush3.bf16.msra.mxu1 %v7620_v42  ;;  %v7677_v34 = vld [vmem:[#allocation3 + $0x280] sm:$0xff]   ;;  %v7678_v42 = vld [vmem:[#allocation3 + $0x378] sm:$0xff]  }
0x5c21   :  { %6829 = vmatpush3.bf16.msra.mxu0 %v7621_v41  ;;  %6808 = vmatprep.subr.bf16.mxu1 %v7622_v3  ;;  %v7679_v41 = vld [vmem:[#allocation3 + $0x3f8] sm:$0xff]  }
0x5c22   :  { %6830 = vmatprep.subr.bf16.mxu0 %v7623_v56  ;;  %v7680_v3 = vld [vmem:[#allocation3 + $0x338] sm:$0xff]  }
0x5c23   :  { %v7681_v56 = vld [vmem:[#allocation3 + $0x3b8] sm:$0xff]  }
0x5c24   :  { %6809 = vmatpush3.bf16.msra.mxu1 %v7624_v10  ;;  %v7682_v10 = vld [vmem:[#allocation3 + $0x370] sm:$0xff]  }
0x5c25   :  { %6831 = vmatpush3.bf16.msra.mxu0 %v7625_v21  ;;  %6810 = vmatprep.subr.bf16.mxu1 %v7626_v54  ;;  %v7683_v21 = vld [vmem:[#allocation3 + $0x3f0] sm:$0xff]  }
0x5c26   :  { %6832 = vmatprep.subr.bf16.mxu0 %v7627_v61  ;;  %v7684_v54 = vld [vmem:[#allocation3 + $0x330] sm:$0xff]  }
0x5c27   :  { %v7685_v61 = vld [vmem:[#allocation3 + $0x3b0] sm:$0xff]  }
0x5c28   :  { %6811 = vmatpush3.bf16.msra.mxu1 %v7628_v23  ;;  %v7686_v23 = vld [vmem:[#allocation3 + $0x368] sm:$0xff]  }
0x5c29   :  { %6833 = vmatpush3.bf16.msra.mxu0 %v7629_v8  ;;  %6812 = vmatprep.subr.bf16.mxu1 %v7630_v47  ;;  %v7688_v8 = vld [vmem:[#allocation3 + $0x328] sm:$0xff]   ;;  %v7690_v47 = vld [vmem:[#allocation3 + $0x360] sm:$0xff]  }
0x5c2a   :  { %6834 = vmatprep.subr.bf16.mxu0 %v7631_v14  ;;  %v7691_v14 = vld [vmem:[#allocation3 + $0x3e0] sm:$0xff]  }
0x5c2c   :  { %6813 = vmatpush3.bf16.msra.mxu1 %v7632_v48  ;;  %v7693_v48 = vld [vmem:[#allocation3 + $0x3a0] sm:$0xff]  }
0x5c2d   :  { %6835 = vmatpush3.bf16.msra.mxu0 %v7633_v46  ;;  %6814 = vmatprep.subr.bf16.mxu1 %v7634_v51  ;;  %v7695_v46 = vld [vmem:[#allocation3 + $0x3d8] sm:$0xff]  }
0x5c2e   :  { %6836 = vmatprep.subr.bf16.mxu0 %v7635_v18  ;;  %v7696_v51 = vld [vmem:[#allocation3 + $0x318] sm:$0xff]  }
0x5c2f   :  { %v7697_v18 = vld [vmem:[#allocation3 + $0x398] sm:$0xff]  }
0x5c30   :  { %6815 = vmatpush3.bf16.msra.mxu1 %v7636_v40  ;;  %v7698_v40 = vld [vmem:[#allocation3 + $0x350] sm:$0xff]  }
0x5c31   :  { %6837 = vmatpush3.bf16.msra.mxu0 %v7637_v15  ;;  %6816 = vmatprep.subr.bf16.mxu1 %v7638_v32  ;;  %v7699_v15 = vld [vmem:[#allocation3 + $0x3d0] sm:$0xff]  }
0x5c32   :  { %6838 = vmatprep.subr.bf16.mxu0 %v7639_v24  ;;  %v7700_v32 = vld [vmem:[#allocation3 + $0x310] sm:$0xff]  }
0x5c33   :  { %v7701_v24 = vld [vmem:[#allocation3 + $0x390] sm:$0xff]  }
0x5c34   :  { %6817 = vmatpush3.bf16.msra.mxu1 %v7640_v5  ;;  %v7702_v5 = vld [vmem:[#allocation3 + $0x348] sm:$0xff]  }
0x5c35   :  { %6839 = vmatpush3.bf16.msra.mxu0 %v7641_v11  ;;  %6818 = vmatprep.subr.bf16.mxu1 %v7642_v39  ;;  %v7703_v11 = vld [vmem:[#allocation3 + $0x3c8] sm:$0xff]  }
0x5c36   :  { %6840 = vmatprep.subr.bf16.mxu0 %v7643_v31  ;;  %v7704_v39 = vld [vmem:[#allocation3 + $0x308] sm:$0xff]  }
0x5c37   :  { %v7705_v31 = vld [vmem:[#allocation3 + $0x388] sm:$0xff]  }
0x5c38   :  { %6819 = vmatpush3.bf16.msra.mxu1 %v7644_v26  ;;  %v7706_v26 = vld [vmem:[#allocation3 + $0x340] sm:$0xff]  }
0x5c39   :  { %6841 = vmatpush3.bf16.msra.mxu0 %v7645_v28  ;;  %6848 = vmatprep.subr.bf16.mxu1 %v7646_v6  ;;  %v7707_v28 = vld [vmem:[#allocation3 + $0x3c0] sm:$0xff]  }
0x5c3a   :  { %6870 = vmatprep.subr.bf16.mxu0 %v7647_v13  ;;  %v7708_v6 = vld [vmem:[#allocation3 + $0x300] sm:$0xff]  }
0x5c3b   :  { %5986 = vmatmul.mubr.bf16.vlgmr.msra.gmra.mxu1 %v9424_v20  ;;  %v7655_v20 = vld [vmem:[#allocation3 + $0x2e8] sm:$0xff]   ;;  %v7709_v13 = vld [vmem:[#allocation3 + $0x380] sm:$0xff]  }
0x5c3c   :  { %6026 = vmatmul.mubr.bf16.vlgmr.msra.gmra.mxu0 %v9428_v0  ;;  %6849 = vmatpush3.bf16.msra.mxu1 %v7648_v17  ;;  %v7657_v0 = vld [vmem:[#allocation3 + $0x2a8] sm:$0xff]   ;;  %v7710_v17 = vld [vmem:[%s9562_s10 + $0x38] sm:$0xff]  }
0x5c3d   :  { %6871 = vmatpush3.bf16.msra.mxu0 %v7649_v1  ;;  %6065 = vmatprep.mubr.bf16.mxu1 %v9484_v2  ;;  %v7660_v2 = vld [vmem:[#allocation3 + $0x220] sm:$0xff]   ;;  %v7771_v1 = vmov 0.0  }
0x5c3e   :  { %6850 = vmatprep.subr.bf16.mxu1 %v7650_v19  ;;  %6105 = vmatprep.mubr.bf16.mxu0 %v9488_v9  ;;  %v7662_v9 = vld [vmem:[#allocation3 + $0x258] sm:$0xff]   ;;  %v7711_v19 = vld [vmem:[%s9562_s10 + $0x30] sm:$0xff]  }
0x5c3f   :  { %6872 = vmatprep.subr.bf16.mxu0 %v7651_v7  ;;  %v7714_v7 = vld [vmem:[%s9562_s10 + $0x18] sm:$0xff]  }
0x5c40   :  { %6851 = vmatpush3.bf16.msra.mxu1 %v7652_v12  ;;  %v7715_v12 = vld [vmem:[%s9563_s11 + $0x8] sm:$0xff]  }
0x5c41   :  { %6873 = vmatpush3.bf16.msra.mxu0 %v7653_v37  ;;  %6852 = vmatprep.subr.bf16.mxu1 %v7654_v25  ;;  %v7716_v37 = vld [vmem:[%s9562_s10 + $0x10] sm:$0xff]   ;;  %v7717_v25 = vld [vmem:[%s9563_s11] sm:$0xff]  }
0x5c42   :  { %6874 = vmatprep.subr.bf16.mxu0 %v7655_v20  ;;  %v7718_v20 = vld [vmem:[%s9562_s10 + $0x8] sm:$0xff]  }
0x5c44   :  { %6853 = vmatpush3.bf16.msra.mxu1 %v7656_v44 }
0x5c45   :  { %6875 = vmatpush3.bf16.msra.mxu0 %v7657_v0  ;;  %6854 = vmatprep.subr.bf16.mxu1 %v7658_v35  ;;  %v7719_v0 = vld [vmem:[%s9562_s10] sm:$0xff]  }
0x5c46   :  { %6876 = vmatprep.subr.bf16.mxu0 %v7659_v27 }
0x5c48   :  { %6855 = vmatpush3.bf16.msra.mxu1 %v7660_v2  ;;  %v6592_v2 = vld [vmem:[%s9561_s9] ss:$0 sm:$0xff] }
0x5c49   :  { %6877 = vmatpush3.bf16.msra.mxu0 %v7661_v30  ;;  %6856 = vmatprep.subr.bf16.mxu1 %v7662_v9 }
0x5c4a   :  { %6878 = vmatprep.subr.bf16.mxu0 %v7663_v52 }
0x5c4c   :  { %6857 = vmatpush3.bf16.msra.mxu1 %v7664_v38 }
0x5c4d   :  { %6879 = vmatpush3.bf16.msra.mxu0 %v7665_v55  ;;  %6858 = vmatprep.subr.bf16.mxu1 %v7666_v62 }
0x5c4e   :  { %6880 = vmatprep.subr.bf16.mxu0 %v7667_v29 }
0x5c50   :  { %6859 = vmatpush3.bf16.msra.mxu1 %v7668_v45 }
0x5c51   :  { %6881 = vmatpush3.bf16.msra.mxu0 %v7669_v58  ;;  %6860 = vmatprep.subr.bf16.mxu1 %v7670_v60 }
0x5c52   :  { %6882 = vmatprep.subr.bf16.mxu0 %v7671_v59 }
0x5c54   :  { %6861 = vmatpush3.bf16.msra.mxu1 %v7672_v16 }
0x5c55   :  { %6883 = vmatpush3.bf16.msra.mxu0 %v7673_v36  ;;  %6862 = vmatprep.subr.bf16.mxu1 %v7674_v33 }
0x5c56   :  { %6884 = vmatprep.subr.bf16.mxu0 %v7675_v49 }
0x5c58   :  { %6863 = vmatpush3.bf16.msra.mxu1 %v7676_v4 }
0x5c59   :  { %6885 = vmatpush3.bf16.msra.mxu0 %v7677_v34  ;;  %6892 = vmatprep.subr.bf16.mxu1 %v7678_v42 }
0x5c5a   :  { %6914 = vmatprep.subr.bf16.mxu0 %v7679_v41 }
0x5c5b   :  { %6066 = vmatmul.mubr.bf16.vlgmr.msra.gmra.mxu1 %v9432_v63  ;;  %v7687_v63 = vld [vmem:[#allocation3 + $0x3e8] sm:$0xff]  }
0x5c5c   :  { %6106 = vmatmul.mubr.bf16.vlgmr.msra.gmra.mxu0 %v9436_v50  ;;  %6893 = vmatpush3.bf16.msra.mxu1 %v7680_v3  ;;  %v7689_v50 = vld [vmem:[#allocation3 + $0x3a8] sm:$0xff]  }
0x5c5d   :  { %6915 = vmatpush3.bf16.msra.mxu0 %v7681_v56  ;;  %6145 = vmatprep.mubr.bf16.mxu1 %v9492_v57  ;;  %v7692_v57 = vld [vmem:[#allocation3 + $0x320] sm:$0xff]  }
0x5c5e   :  { %6894 = vmatprep.subr.bf16.mxu1 %v7682_v10  ;;  %6185 = vmatprep.mubr.bf16.mxu0 %v9496_v43  ;;  %v7694_v43 = vld [vmem:[#allocation3 + $0x358] sm:$0xff]  }
0x5c5f   :  { %6916 = vmatprep.subr.bf16.mxu0 %v7683_v21 }
0x5c60   :  { %6895 = vmatpush3.bf16.msra.mxu1 %v7684_v54 }
0x5c61   :  { %6917 = vmatpush3.bf16.msra.mxu0 %v7685_v61  ;;  %6896 = vmatprep.subr.bf16.mxu1 %v7686_v23 }
0x5c62   :  { %6918 = vmatprep.subr.bf16.mxu0 %v7687_v63 }
0x5c64   :  { %6897 = vmatpush3.bf16.msra.mxu1 %v7688_v8 }
0x5c65   :  { %6919 = vmatpush3.bf16.msra.mxu0 %v7689_v50  ;;  %6898 = vmatprep.subr.bf16.mxu1 %v7690_v47 }
0x5c66   :  { %6920 = vmatprep.subr.bf16.mxu0 %v7691_v14 }
0x5c68   :  { %6899 = vmatpush3.bf16.msra.mxu1 %v7692_v57 }
0x5c69   :  { %6921 = vmatpush3.bf16.msra.mxu0 %v7693_v48  ;;  %6900 = vmatprep.subr.bf16.mxu1 %v7694_v43 }
0x5c6a   :  { %6922 = vmatprep.subr.bf16.mxu0 %v7695_v46 }
0x5c6c   :  { %6901 = vmatpush3.bf16.msra.mxu1 %v7696_v51 }
0x5c6d   :  { %6923 = vmatpush3.bf16.msra.mxu0 %v7697_v18  ;;  %6902 = vmatprep.subr.bf16.mxu1 %v7698_v40  ;;  %v6218_v44 = vpop.permute.xlu0 %6217 }
0x5c6e   :  { %6924 = vmatprep.subr.bf16.mxu0 %v7699_v15 }
0x5c70   :  { %6903 = vmatpush3.bf16.msra.mxu1 %v7700_v32 }
0x5c71   :  { %6925 = vmatpush3.bf16.msra.mxu0 %v7701_v24  ;;  %6904 = vmatprep.subr.bf16.mxu1 %v7702_v5 }
0x5c72   :  { %6926 = vmatprep.subr.bf16.mxu0 %v7703_v11 }
0x5c74   :  { %6905 = vmatpush3.bf16.msra.mxu1 %v7704_v39 }
0x5c75   :  { %6927 = vmatpush3.bf16.msra.mxu0 %v7705_v31  ;;  %6906 = vmatprep.subr.bf16.mxu1 %v7706_v26 }
0x5c76   :  { %6928 = vmatprep.subr.bf16.mxu0 %v7707_v28 }
0x5c78   :  { %6907 = vmatpush3.bf16.msra.mxu1 %v7708_v6 }
0x5c79   :  { %6929 = vmatpush3.bf16.msra.mxu0 %v7709_v13  ;;  %7000 = vmatprep.subr.bf16.mxu1 %v7771_v1 }
0x5c7a   :  { %7008 = vmatprep.subr.bf16.mxu0 %v7771_v1 }
0x5c7b   :  { %6146 = vmatmul.mubr.bf16.vlgmr.msra.gmra.mxu1 %v9440_v53  ;;  %v7712_v53 = vld [vmem:[%s9562_s10 + $0x28] sm:$0xff]  }
0x5c7c   :  { %6186 = vmatmul.mubr.bf16.vlgmr.msra.gmra.mxu0 %v9444_v22  ;;  %v7713_v22 = vld [vmem:[%s9562_s10 + $0x20] sm:$0xff]   ;;  %7001 = vmatpush3.bf16.msra.mxu1 %v7715_v12 }
0x5c7d   :  { %7009 = vmatpush3.bf16.msra.mxu0 %v7710_v17  ;;  %7002 = vmatprep.subr.bf16.mxu1 %v7771_v1 }
0x5c7e   :  { %7010 = vmatprep.subr.bf16.mxu0 %v7771_v1  ;;  %7004 = vmatprep.mubr.msk.bf16.mxu1 %vm7772_vm12, %v7771_v1 }
0x5c7f   :  { %7024 = vmatprep.mubr.msk.bf16.mxu0 %vm7772_vm12, %v7771_v1 }
0x5c80   :  { %7003 = vmatpush3.bf16.msra.mxu1 %v7717_v25 }
0x5c81   :  { %7011 = vmatpush3.bf16.msra.mxu0 %v7711_v19 }
0x5c82   :  { %7012 = vmatprep.subr.bf16.mxu0 %v7771_v1 }
0x5c83   :  { %7005 = vmatmul.mubr.msk.bf16.vlgmr.msra.gmra.mxu1 %vm1726_vm11, %v6218_v44 }
0x5c85   :  { %7013 = vmatpush3.bf16.msra.mxu0 %v7712_v53 }
0x5c86   :  { %7014 = vmatprep.subr.bf16.mxu0 %v7771_v1 }
0x5c89   :  { %7015 = vmatpush3.bf16.msra.mxu0 %v7713_v22  ;;  %v6732_v22 = vld [vmem:[%s9564_s12] ss:$0 sm:$0xff] }
0x5c8a   :  { %7016 = vmatprep.subr.bf16.mxu0 %v7771_v1 }
0x5c8d   :  { %7017 = vmatpush3.bf16.msra.mxu0 %v7714_v7 }
0x5c8e   :  { %7018 = vmatprep.subr.bf16.mxu0 %v7771_v1 }
0x5c91   :  { %7019 = vmatpush3.bf16.msra.mxu0 %v7716_v37 }
0x5c92   :  { %7020 = vmatprep.subr.bf16.mxu0 %v7771_v1 }
0x5c95   :  { %7021 = vmatpush3.bf16.msra.mxu0 %v7718_v20 }
0x5c96   :  { %7022 = vmatprep.subr.bf16.mxu0 %v7771_v1 }
0x5c99   :  { %7023 = vmatpush3.bf16.msra.mxu0 %v7719_v0 }
0x5cdb   :  { %v6776_v35 = vpop.f32.mrf.mxu1 }
0x5cdc   :  { %v6798_v27 = vpop.f32.mrf.mxu0 }
0x5cdd   :  { %v6777_v30 = vpop.f32.mrf.mxu1 }
0x5cde   :  { %v6778_v9 = vadd.f32 %v6777_v30, %v6776_v35  ;;  %v6799_v52 = vpop.f32.mrf.mxu0 }
0x5cdf   :  { %v6800_v38 = vadd.f32 %v6799_v52, %v6798_v27  ;;  %v6779_v55 = vpop.f32.mrf.mxu1 }
0x5ce0   :  { %v5908_v62 = vadd.f32 %v6778_v9, %v6592_v2  ;;  %v6801_v29 = vpop.f32.mrf.mxu0 }
0x5ce1   :  { %v6780_v45 = vpop.f32.mrf.mxu1 }
0x5ce2   :  { %v5948_v58 = vadd.f32 %v6800_v38, %v5908_v62  ;;  %v6802_v60 = vpop.f32.mrf.mxu0 }
0x5cfb   :  { %v6820_v59 = vpop.f32.mrf.mxu1 }
0x5cfc   :  { %v6842_v16 = vpop.f32.mrf.mxu0 }
0x5cfd   :  { %v6821_v36 = vpop.f32.mrf.mxu1 }
0x5cfe   :  { %v6843_v33 = vpop.f32.mrf.mxu0  ;;  %v6822_v63 = vadd.f32 %v6821_v36, %v6820_v59 }
0x5cff   :  { %v6823_v49 = vpop.f32.mrf.mxu1  ;;  %v6844_v50 = vadd.f32 %v6843_v33, %v6842_v16 }
0x5d00   :  { %v6845_v4 = vpop.f32.mrf.mxu0  ;;  %v5988_v8 = vadd.f32 %v6822_v63, %v5948_v58 }
0x5d01   :  { %v6824_v34 = vpop.f32.mrf.mxu1 }
0x5d02   :  { %v6846_v42 = vpop.f32.mrf.mxu0  ;;  %v6028_v14 = vadd.f32 %v6844_v50, %v5988_v8 }
0x5d1b   :  { %v6864_v41 = vpop.f32.mrf.mxu1 }
0x5d1c   :  { %v6886_v3 = vpop.f32.mrf.mxu0 }
0x5d1d   :  { %v6865_v56 = vpop.f32.mrf.mxu1 }
0x5d1e   :  { %v6887_v10 = vpop.f32.mrf.mxu0  ;;  %v6866_v47 = vadd.f32 %v6865_v56, %v6864_v41 }
0x5d1f   :  { %v6867_v21 = vpop.f32.mrf.mxu1  ;;  %v6888_v48 = vadd.f32 %v6887_v10, %v6886_v3 }
0x5d20   :  { %v6889_v54 = vpop.f32.mrf.mxu0  ;;  %v6068_v57 = vadd.f32 %v6866_v47, %v6028_v14 }
0x5d21   :  { %v6868_v61 = vpop.f32.mrf.mxu1 }
0x5d22   :  { %v6890_v23 = vpop.f32.mrf.mxu0  ;;  %v6108_v18 = vadd.f32 %v6888_v48, %v6068_v57 }
0x5d3b   :  { %v6908_v43 = vpop.f32.mrf.mxu1 }
0x5d3c   :  { %v6930_v46 = vpop.f32.mrf.mxu0 }
0x5d3d   :  { %v6909_v51 = vpop.f32.mrf.mxu1 }
0x5d3e   :  { %v6910_v40 = vadd.f32 %v6909_v51, %v6908_v43  ;;  %v6931_v15 = vpop.f32.mrf.mxu0 }
0x5d3f   :  { %v6911_v32 = vpop.f32.mrf.mxu1  ;;  %v6932_v5 = vadd.f32 %v6931_v15, %v6930_v46 }
0x5d40   :  { %v6148_v24 = vadd.f32 %v6910_v40, %v6108_v18  ;;  %v6933_v11 = vpop.f32.mrf.mxu0 }
0x5d41   :  { %v6912_v39 = vpop.f32.mrf.mxu1 }
0x5d42   :  { %v6188_v31 = vadd.f32 %v6932_v5, %v6148_v24  ;;  %v6934_v26 = vpop.f32.mrf.mxu0 }
0x5d43   :  { %v6268_v13 = vpop.f32.mrf.mxu1 }
0x5d44   :  { %v6193_v28 = vmax.f32 %v6188_v31, 0.0 }
0x5d45   :  { %v7006_v17 = vpop.f32.mrf.mxu1 }
0x5d46   :  { %v6194_v6 = vpack.c.bf16 %v6193_v28, %v6193_v28 }
0x5d47   :  { %v6271_v1 = vpop.f32.mrf.mxu1 }
0x5d48   :  { %7025 = vmatmul.mubr.bf16.vlgmr.msra.gmra.mxu0 %v6194_v6 }
0x5d49   :  { %v7007_v19 = vpop.f32.mrf.mxu1 }
0x5e08   :  { %v6356_v53 = vpop.f32.mrf.mxu0 }
0x5e09   :  { %v6357_v7 = vadd.f32 %v6356_v53, %v6268_v13 }
0x5e0a   :  { %v7026_v12 = vpop.f32.mrf.mxu0 }
0x5e0b   :  { %v6369_v37 = vadd.f32 %v6732_v22, %v6357_v7 }
0x5e0c   :  { %v6359_v25 = vpop.f32.mrf.mxu0 }
0x5e0d   :  { %6371 = vst.msk [vmem:[#allocation5] sm:$0x3] %vm6370_vm13, %v6369_v37 }
0x5e0e   :  { %v7027_v20 = vpop.f32.mrf.mxu0 }
0x5e0f   :  { %7751 = shalt.err (!%p7748_p9)
}
0x5e10   :  { %6381 = dma.vmem_to_hbm [thread:$0]  %s6379_s2, 32, %s9566_s14, [#allocation6]  }
0x5e11   :  { %7762 = dma.done.wait [#allocation6], 32  }
0x5e12   :  { %7763 = vsyncadd [#allocation6], 4294967264 }
0x5e13   :  { %6385 = vsyncpa [#allocation6], 1 }
0x5e14   :  { %6386 = vsyncmov [#allocation4] }
0x5e17   :  { %s6387_s12 = vpop.sfrf %6386 }
0x5e18   :  { %p6733_p10 = scmp.ne.s32.totalorder %s6387_s12, 0 }
0x5e1a   :  { %6391 = shalt.err (%p6733_p10)  }

</bundles_post_ra>
